<compile_context>
chip_gen: v6e
topology: v6e:2x2x1
jax: 0.10.0
libtpu: 0.0.40
codegen_flags: <defaults>
</compile_context>

<pallas_src>
import functools

import jax
import jax.numpy as jnp
from jax import lax
from jax.experimental import pallas as pl
from jax.experimental.pallas import tpu as pltpu

EPS = 1e-5  # InstanceNorm2d default eps


# --------------------------------------------------------------------------
# Shared epilogue: one-pass InstanceNorm (affine folded) + ReLU on (N, C)
# --------------------------------------------------------------------------
def _instance_norm_relu_2d(acc, gamma, beta, count):
    # acc: (N, Cout) f32 conv outputs, gamma/beta: (1, Cout)
    inv_n = 1.0 / float(count)
    mean = jnp.sum(acc, axis=0, keepdims=True) * inv_n
    var = jnp.sum(acc * acc, axis=0, keepdims=True) * inv_n - mean * mean
    var = jnp.maximum(var, 0.0)                       # guard tiny negative
    scale = gamma * lax.rsqrt(var + EPS)
    shift = beta - mean * scale
    return jnp.maximum(acc * scale + shift, 0.0)


# --------------------------------------------------------------------------
# Fused 3x3 conv (padding=1, no bias) + InstanceNorm(affine) + ReLU
# --------------------------------------------------------------------------
def _conv3x3_in_relu_kernel_big(H, W, Cin, Cout, x_ref, w_ref, g_ref, b_ref,
                                o_ref):
    # x_ref : (1, H+2, W+2, Cin) padded input, one batch element
    # w_ref : (3, 3, Cin, Cout)
    # g_ref, b_ref : (1, 1, Cout)
    # o_ref : (1, H, W, Cout)
    # 9 taps -> 9 full-image (H*W, Cin) x (Cin, Cout) MXU matmuls.
    acc = jnp.zeros((H * W, Cout), jnp.float32)
    for kh in range(3):
        for kw in range(3):
            xs = x_ref[0, pl.ds(kh, H), pl.ds(kw, W), :]       # (H, W, Cin)
            acc = acc + jnp.dot(xs.reshape(H * W, Cin), w_ref[kh, kw],
                                preferred_element_type=jnp.float32)
    y = _instance_norm_relu_2d(acc, g_ref[0], b_ref[0], H * W)  # (H*W, Cout)
    o_ref[0] = y.reshape(H, W, Cout)


def _conv3x3_in_relu_kernel_small(H, W, Cin, Cout, x_ref, w_ref, g_ref, b_ref,
                                  o_ref, acc_ref):
    # Tiny spatial levels (W not a multiple of 8; H, W <= 4): unrolled per-row
    # accumulation into a VMEM scratch.  Compute here is negligible.
    for h in range(H):                                  # static, unrolled
        r = jnp.zeros((W, Cout), jnp.float32)
        for kh in range(3):
            for kw in range(3):
                r = r + jnp.dot(x_ref[0, h + kh, pl.ds(kw, W), :],
                                w_ref[kh, kw],
                                preferred_element_type=jnp.float32)
        acc_ref[h] = r

    a = acc_ref[...]                                    # (H, W, Cout)
    inv_n = 1.0 / float(H * W)
    s = jnp.sum(jnp.sum(a, axis=1, keepdims=True), axis=0, keepdims=True)
    ss = jnp.sum(jnp.sum(a * a, axis=1, keepdims=True), axis=0, keepdims=True)
    mean = s * inv_n
    var = jnp.maximum(ss * inv_n - mean * mean, 0.0)
    scale = g_ref[...] * lax.rsqrt(var + EPS)           # (1, 1, Cout)
    shift = b_ref[...] - mean * scale
    o_ref[0] = jnp.maximum(a * scale + shift, 0.0)


def conv3x3_in_relu(x, w, gamma, beta):
    """x: (B,H,W,Cin) f32, w: (3,3,Cin,Cout), gamma/beta: (Cout,)."""
    B, H, W, Cin = x.shape
    Cout = w.shape[-1]
    xp = jnp.pad(x, ((0, 0), (1, 1), (1, 1), (0, 0)))   # cheap halo pad (XLA)

    if W % 8 == 0:
        kern = functools.partial(_conv3x3_in_relu_kernel_big, H, W, Cin, Cout)
        scratch = []
    else:
        kern = functools.partial(_conv3x3_in_relu_kernel_small, H, W, Cin,
                                 Cout)
        scratch = [pltpu.VMEM((H, W, Cout), jnp.float32)]

    return pl.pallas_call(
        kern,
        out_shape=jax.ShapeDtypeStruct((B, H, W, Cout), jnp.float32),
        grid=(B,),
        in_specs=[
            pl.BlockSpec((1, H + 2, W + 2, Cin), lambda n: (n, 0, 0, 0)),
            pl.BlockSpec((3, 3, Cin, Cout), lambda n: (0, 0, 0, 0)),
            pl.BlockSpec((1, 1, Cout), lambda n: (0, 0, 0)),
            pl.BlockSpec((1, 1, Cout), lambda n: (0, 0, 0)),
        ],
        out_specs=pl.BlockSpec((1, H, W, Cout), lambda n: (n, 0, 0, 0)),
        scratch_shapes=scratch,
        compiler_params=pltpu.CompilerParams(
            dimension_semantics=("parallel",)),   # v7x megacore; neutral else
    )(xp, w, gamma.reshape(1, 1, Cout), beta.reshape(1, 1, Cout))


# --------------------------------------------------------------------------
# Fused last up-block: 3x3 conv + IN + ReLU + 1x1 output conv + logsigmoids
# Outputs are lane-dense (1, 1, H*W) per batch element.
# --------------------------------------------------------------------------
def _conv3x3_in_relu_head_kernel(H, W, Cin, Cout, x_ref, w_ref, g_ref, b_ref,
                                 ow_ref, ob_ref, lp_ref, ln_ref):
    acc = jnp.zeros((H * W, Cout), jnp.float32)
    for kh in range(3):
        for kw in range(3):
            xs = x_ref[0, pl.ds(kh, H), pl.ds(kw, W), :]
            acc = acc + jnp.dot(xs.reshape(H * W, Cin), w_ref[kh, kw],
                                preferred_element_type=jnp.float32)
    y = _instance_norm_relu_2d(acc, g_ref[0], b_ref[0], H * W)  # (H*W, Cout)

    # 1x1 conv as an MXU "NT" matmul: (1, Cout) x (H*W, Cout)^T -> (1, H*W).
    # Keeps the result lane-major (no cross-lane reduce, lane-dense store).
    z = lax.dot_general(ow_ref[...], y, (((1,), (1,)), ((), ())),
                        preferred_element_type=jnp.float32) + ob_ref[...]

    # log sigmoid(+/-z).  softplus(-|z|) = log1p(exp(-|z|)); the log(1+x) form
    # is kept for Mosaic-lowering safety — x in (0, 1] so the accuracy loss is
    # <= ~1 ulp of the final (min(z,0) - soft) sum.
    soft = jnp.log(1.0 + jnp.exp(-jnp.abs(z)))
    lp_ref[0] = jnp.minimum(z, 0.0) - soft               # log sigmoid( z)
    ln_ref[0] = jnp.minimum(-z, 0.0) - soft              # log sigmoid(-z)


def conv3x3_in_relu_head(x, w, gamma, beta, out_w, out_b):
    """x: (B,H,W,Cin); w: (3,3,Cin,Cout); out_w: (Cout,); out_b: (1,)."""
    B, H, W, Cin = x.shape
    Cout = w.shape[-1]
    assert W % 8 == 0, "fused head expects the full-resolution level"
    xp = jnp.pad(x, ((0, 0), (1, 1), (1, 1), (0, 0)))
    kern = functools.partial(_conv3x3_in_relu_head_kernel, H, W, Cin, Cout)
    lp, ln = pl.pallas_call(
        kern,
        out_shape=(jax.ShapeDtypeStruct((B, 1, H * W), jnp.float32),
                   jax.ShapeDtypeStruct((B, 1, H * W), jnp.float32)),
        grid=(B,),
        in_specs=[
            pl.BlockSpec((1, H + 2, W + 2, Cin), lambda n: (n, 0, 0, 0)),
            pl.BlockSpec((3, 3, Cin, Cout), lambda n: (0, 0, 0, 0)),
            pl.BlockSpec((1, 1, Cout), lambda n: (0, 0, 0)),
            pl.BlockSpec((1, 1, Cout), lambda n: (0, 0, 0)),
            pl.BlockSpec((1, Cout), lambda n: (0, 0)),
            pl.BlockSpec((1, 1), lambda n: (0, 0)),
        ],
        out_specs=(pl.BlockSpec((1, 1, H * W), lambda n: (n, 0, 0)),
                   pl.BlockSpec((1, 1, H * W), lambda n: (n, 0, 0))),
        compiler_params=pltpu.CompilerParams(
            dimension_semantics=("parallel",)),
    )(xp, w, gamma.reshape(1, 1, Cout), beta.reshape(1, 1, Cout),
      out_w.reshape(1, Cout), out_b.reshape(1, 1))
    # (B, 1, H*W) -> (B, 1, H, W): free reshape, row-major matches h*W + w.
    return lp.reshape(B, 1, H, W), ln.reshape(B, 1, H, W)


# --------------------------------------------------------------------------
# Bottleneck MLP: Linear+ReLU x3 (single kernel, whole batch resident)
# --------------------------------------------------------------------------
def _mlp_kernel(x_ref, w1_ref, b1_ref, w2_ref, b2_ref, w3_ref, b3_ref, o_ref):
    h = jnp.dot(x_ref[...], w1_ref[...],
                preferred_element_type=jnp.float32) + b1_ref[...]
    h = jnp.maximum(h, 0.0)
    h = jnp.dot(h, w2_ref[...],
                preferred_element_type=jnp.float32) + b2_ref[...]
    h = jnp.maximum(h, 0.0)
    h = jnp.dot(h, w3_ref[...],
                preferred_element_type=jnp.float32) + b3_ref[...]
    o_ref[...] = jnp.maximum(h, 0.0)


def mlp_forward(x_flat, w1, b1, w2, b2, w3, b3):
    B, inc = x_flat.shape
    h1, h2, out = w1.shape[1], w2.shape[1], w3.shape[1]
    return pl.pallas_call(
        _mlp_kernel,
        out_shape=jax.ShapeDtypeStruct((B, out), jnp.float32),
        grid=(1,),
        in_specs=[
            pl.BlockSpec((B, inc), lambda i: (0, 0)),
            pl.BlockSpec((inc, h1), lambda i: (0, 0)),
            pl.BlockSpec((1, h1), lambda i: (0, 0)),
            pl.BlockSpec((h1, h2), lambda i: (0, 0)),
            pl.BlockSpec((1, h2), lambda i: (0, 0)),
            pl.BlockSpec((h2, out), lambda i: (0, 0)),
            pl.BlockSpec((1, out), lambda i: (0, 0)),
        ],
        out_specs=pl.BlockSpec((B, out), lambda i: (0, 0)),
    )(x_flat, w1, b1.reshape(1, -1), w2, b2.reshape(1, -1), w3,
      b3.reshape(1, -1))


# --------------------------------------------------------------------------
# JAX glue: nearest resize, pad+concat (pure data movement -> XLA)
# --------------------------------------------------------------------------
def downsample_nearest(x):   # NHWC, scale_factor=0.5 nearest
    return x[:, ::2, ::2, :]


def upsample_nearest(x):     # NHWC, scale_factor=2.0 nearest
    return jnp.repeat(jnp.repeat(x, 2, axis=1), 2, axis=2)


def comb(x, skip):           # pad x bottom/right to skip spatial, concat C
    if x.shape[1:3] != skip.shape[1:3]:
        ph = skip.shape[1] - x.shape[1]
        pw = skip.shape[2] - x.shape[2]
        x = jnp.pad(x, ((0, 0), (0, ph), (0, pw), (0, 0)))
    return jnp.concatenate([x, skip], axis=-1)


def attention_block_down(p, x):
    x = conv3x3_in_relu(x, p["w"], p["gamma"], p["beta"])
    skip = x
    if p["resize"]:
        x = downsample_nearest(skip)
    return x, skip


def attention_block_up(p, x, skip):
    x = comb(x, skip)
    x = conv3x3_in_relu(x, p["w"], p["gamma"], p["beta"])
    if p["resize"]:
        x = upsample_nearest(x)
    return x


def attention_forward(params, x_nchw, log_sk_nchw):
    x = jnp.concatenate([x_nchw, log_sk_nchw], axis=1)      # NCHW concat
    x = jnp.transpose(x, (0, 2, 3, 1))                      # -> NHWC
    skips = []
    for p in params["down"]:
        x, skip = attention_block_down(p, x)
        skips.append(skip)

    # bottleneck MLP: weights were pre-permuted to NHWC flatten order, so a
    # plain reshape suffices (no transposes around the bottleneck).
    B = x.shape[0]
    bshape = skips[-1].shape                                # NHWC bottleneck
    m = params["mlp"]
    flat = mlp_forward(x.reshape(B, -1), m["w1"], m["b1"], m["w2"], m["b2"],
                       m["w3"], m["b3"])
    x = flat.reshape(bshape)

    rskips = list(reversed(skips))
    for p, skip in zip(params["up"][:-1], rskips[:-1]):
        x = attention_block_up(p, x, skip)

    # last up block (resize=False) fused with the 1x1 output head
    p_last = params["up"][-1]
    assert not p_last["resize"]
    x = comb(x, skips[0])
    lp, ln = conv3x3_in_relu_head(x, p_last["w"], p_last["gamma"],
                                  p_last["beta"], params["out_w"],
                                  params["out_b"])
    return lp, ln                                           # (B,1,H,W) each


# --------------------------------------------------------------------------
# Deterministic synthetic parameter construction (mirrors __init__ shapes)
# --------------------------------------------------------------------------
def build_params(key, n_blocks, in_shape, ngf):
    c, h, w = in_shape

    down_specs = [(c + 1, ngf, True)]
    for i in range(1, n_blocks - 1):
        down_specs.append((ngf * 2 ** (i - 1), ngf * min(2 ** i, 8), True))
    last = ngf * min(2 ** (n_blocks - 1), 8)
    down_specs.append((last, last, False))

    up_specs = [(2 * ngf, ngf, False)]
    for i in range(1, n_blocks - 1):
        up_specs.append((2 * ngf * min(2 ** i, 8),
                         ngf * min(2 ** (i - 1), 8), True))
    up_specs.append((2 * ngf * min(2 ** (n_blocks - 1), 8),
                     ngf * min(2 ** (n_blocks - 1), 8), True))
    up_specs = list(reversed(up_specs))

    keys = iter(jax.random.split(key,
                                 8 * (len(down_specs) + len(up_specs)) + 16))

    def conv_block(cin, cout, resize):
        # NHWC conv weight (3,3,Cin,Cout) == PyTorch (Cout,Cin,3,3).transpose
        return {
            "w": 0.1 * jax.random.normal(next(keys), (3, 3, cin, cout),
                                         jnp.float32),
            "gamma": 1.0 + 0.1 * jax.random.normal(next(keys), (cout,),
                                                   jnp.float32),
            "beta": 0.1 * jax.random.normal(next(keys), (cout,), jnp.float32),
            "resize": resize,
        }

    down = [conv_block(*s) for s in down_specs]
    up = [conv_block(*s) for s in up_specs]

    hh, ww = h, w
    for (_, _, r) in down_specs:
        if r:
            hh, ww = hh // 2, ww // 2
    cb = down_specs[-1][1]
    inc = cb * hh * ww

    # MLP weights generated in PyTorch NCHW-flatten convention, then permuted
    # once at build time to NHWC-flatten order (removes runtime transposes).
    w1 = 0.1 * jax.random.normal(next(keys), (inc, 128), jnp.float32)
    b1 = 0.1 * jax.random.normal(next(keys), (128,), jnp.float32)
    w2 = 0.1 * jax.random.normal(next(keys), (128, 128), jnp.float32)
    b2 = 0.1 * jax.random.normal(next(keys), (128,), jnp.float32)
    w3 = 0.1 * jax.random.normal(next(keys), (128, inc), jnp.float32)
    b3 = 0.1 * jax.random.normal(next(keys), (inc,), jnp.float32)
    idx = jnp.arange(inc).reshape(cb, hh, ww).transpose(1, 2, 0).reshape(-1)
    mlp_p = {"w1": w1[idx, :], "b1": b1, "w2": w2, "b2": b2,
             "w3": w3[:, idx], "b3": b3[idx]}

    out_w = 0.1 * jax.random.normal(next(keys), (ngf,), jnp.float32)
    out_b = 0.1 * jax.random.normal(next(keys), (1,), jnp.float32)
    return {"down": down, "up": up, "mlp": mlp_p,
            "out_w": out_w, "out_b": out_b}


if __name__ == "__main__":
    n_blocks = 5          # module only constructs consistently for 5 or 6
    c, H, W = 3, 32, 32
    ngf = 8
    B = 2

    params = build_params(jax.random.PRNGKey(42), n_blocks, (c, H, W), ngf)

    key = jax.random.PRNGKey(0)
    k1, k2 = jax.random.split(key)
    x = jax.random.normal(k1, (B, c, H, W), jnp.float32)
    log_sk = jax.nn.log_sigmoid(
        jax.random.normal(k2, (B, 1, H, W), jnp.float32))

    log_a, log_1ma = attention_forward(params, x, log_sk)
    jax.block_until_ready((log_a, log_1ma))

    assert log_a.shape == (B, 1, H, W) and log_1ma.shape == (B, 1, H, W)
    assert jnp.all(jnp.isfinite(log_a)) and jnp.all(jnp.isfinite(log_1ma))
    print("KERNEL_OK")
</pallas_src>

<mosaic_0001>
module attributes {stable_mosaic.version = 11 : i64} {
  func.func @_conv3x3_in_relu_kernel_big(%arg0: i32, %arg1: memref<1x34x34x4xf32, #tpu.memory_space<vmem>>, %arg2: memref<3x3x4x8xf32, #tpu.memory_space<vmem>>, %arg3: memref<1x1x8xf32, #tpu.memory_space<vmem>>, %arg4: memref<1x1x8xf32, #tpu.memory_space<vmem>>, %arg5: memref<1x32x32x8xf32, #tpu.memory_space<vmem>>) attributes {dimension_semantics = [#tpu.dimension_semantics<parallel>], iteration_bounds = array<i64: 2>, scalar_prefetch = 0 : i64, scratch_operands = 0 : i64, tpu.core_type = #tpu.core_type<tc>, window_params = [{transform_indices = @transform_0, window_bounds = array<i64: 1, 34, 34, 4>}, {pipeline_mode = #tpu.pipeline_mode<synchronous>, transform_indices = @transform_1, window_bounds = array<i64: 3, 3, 4, 8>}, {pipeline_mode = #tpu.pipeline_mode<synchronous>, transform_indices = @transform_2, window_bounds = array<i64: 1, 1, 8>}, {pipeline_mode = #tpu.pipeline_mode<synchronous>, transform_indices = @transform_3, window_bounds = array<i64: 1, 1, 8>}, {transform_indices = @transform_4, window_bounds = array<i64: 1, 32, 32, 8>}]} {
    %cst = arith.constant 0.000000e+00 : f32
    %0 = vector.broadcast %cst : f32 to vector<1024x8xf32>
    %c0 = arith.constant 0 : index
    %c0_0 = arith.constant 0 : index
    %c0_1 = arith.constant 0 : index
    %c0_2 = arith.constant 0 : index
    %1 = vector.load %arg1[%c0, %c0_0, %c0_1, %c0_2] : memref<1x34x34x4xf32, #tpu.memory_space<vmem>>, vector<1x32x32x4xf32>
    %2 = vector.shape_cast %1 : vector<1x32x32x4xf32> to vector<32x32x4xf32>
    %3 = vector.shape_cast %2 : vector<32x32x4xf32> to vector<1024x4xf32>
    %c0_3 = arith.constant 0 : index
    %c0_4 = arith.constant 0 : index
    %c0_5 = arith.constant 0 : index
    %c0_6 = arith.constant 0 : index
    %4 = vector.load %arg2[%c0_3, %c0_4, %c0_5, %c0_6] : memref<3x3x4x8xf32, #tpu.memory_space<vmem>>, vector<1x1x4x8xf32>
    %5 = vector.shape_cast %4 : vector<1x1x4x8xf32> to vector<4x8xf32>
    %cst_7 = arith.constant dense<0.000000e+00> : vector<1024x8xf32>
    %6 = tpu.matmul %3, %5, %cst_7 {dimension_numbers = #tpu.dot_dimension_numbers<[1], [0], [0], [1], [0, 0, 1, 1], [], []>} : vector<1024x4xf32>, vector<4x8xf32>, vector<1024x8xf32> -> vector<1024x8xf32>
    %7 = arith.addf %0, %6 : vector<1024x8xf32>
    %c0_8 = arith.constant 0 : index
    %c0_9 = arith.constant 0 : index
    %c1 = arith.constant 1 : index
    %c0_10 = arith.constant 0 : index
    %8 = vector.load %arg1[%c0_8, %c0_9, %c1, %c0_10] : memref<1x34x34x4xf32, #tpu.memory_space<vmem>>, vector<1x32x32x4xf32>
    %9 = vector.shape_cast %8 : vector<1x32x32x4xf32> to vector<32x32x4xf32>
    %10 = vector.shape_cast %9 : vector<32x32x4xf32> to vector<1024x4xf32>
    %c0_11 = arith.constant 0 : index
    %c1_12 = arith.constant 1 : index
    %c0_13 = arith.constant 0 : index
    %c0_14 = arith.constant 0 : index
    %11 = vector.load %arg2[%c0_11, %c1_12, %c0_13, %c0_14] : memref<3x3x4x8xf32, #tpu.memory_space<vmem>>, vector<1x1x4x8xf32>
    %12 = vector.shape_cast %11 : vector<1x1x4x8xf32> to vector<4x8xf32>
    %cst_15 = arith.constant dense<0.000000e+00> : vector<1024x8xf32>
    %13 = tpu.matmul %10, %12, %cst_15 {dimension_numbers = #tpu.dot_dimension_numbers<[1], [0], [0], [1], [0, 0, 1, 1], [], []>} : vector<1024x4xf32>, vector<4x8xf32>, vector<1024x8xf32> -> vector<1024x8xf32>
    %14 = arith.addf %7, %13 : vector<1024x8xf32>
    %c0_16 = arith.constant 0 : index
    %c0_17 = arith.constant 0 : index
    %c2 = arith.constant 2 : index
    %c0_18 = arith.constant 0 : index
    %15 = vector.load %arg1[%c0_16, %c0_17, %c2, %c0_18] : memref<1x34x34x4xf32, #tpu.memory_space<vmem>>, vector<1x32x32x4xf32>
    %16 = vector.shape_cast %15 : vector<1x32x32x4xf32> to vector<32x32x4xf32>
    %17 = vector.shape_cast %16 : vector<32x32x4xf32> to vector<1024x4xf32>
    %c0_19 = arith.constant 0 : index
    %c2_20 = arith.constant 2 : index
    %c0_21 = arith.constant 0 : index
    %c0_22 = arith.constant 0 : index
    %18 = vector.load %arg2[%c0_19, %c2_20, %c0_21, %c0_22] : memref<3x3x4x8xf32, #tpu.memory_space<vmem>>, vector<1x1x4x8xf32>
    %19 = vector.shape_cast %18 : vector<1x1x4x8xf32> to vector<4x8xf32>
    %cst_23 = arith.constant dense<0.000000e+00> : vector<1024x8xf32>
    %20 = tpu.matmul %17, %19, %cst_23 {dimension_numbers = #tpu.dot_dimension_numbers<[1], [0], [0], [1], [0, 0, 1, 1], [], []>} : vector<1024x4xf32>, vector<4x8xf32>, vector<1024x8xf32> -> vector<1024x8xf32>
    %21 = arith.addf %14, %20 : vector<1024x8xf32>
    %c0_24 = arith.constant 0 : index
    %c1_25 = arith.constant 1 : index
    %c0_26 = arith.constant 0 : index
    %c0_27 = arith.constant 0 : index
    %22 = vector.load %arg1[%c0_24, %c1_25, %c0_26, %c0_27] : memref<1x34x34x4xf32, #tpu.memory_space<vmem>>, vector<1x32x32x4xf32>
    %23 = vector.shape_cast %22 : vector<1x32x32x4xf32> to vector<32x32x4xf32>
    %24 = vector.shape_cast %23 : vector<32x32x4xf32> to vector<1024x4xf32>
    %c1_28 = arith.constant 1 : index
    %c0_29 = arith.constant 0 : index
    %c0_30 = arith.constant 0 : index
    %c0_31 = arith.constant 0 : index
    %25 = vector.load %arg2[%c1_28, %c0_29, %c0_30, %c0_31] : memref<3x3x4x8xf32, #tpu.memory_space<vmem>>, vector<1x1x4x8xf32>
    %26 = vector.shape_cast %25 : vector<1x1x4x8xf32> to vector<4x8xf32>
    %cst_32 = arith.constant dense<0.000000e+00> : vector<1024x8xf32>
    %27 = tpu.matmul %24, %26, %cst_32 {dimension_numbers = #tpu.dot_dimension_numbers<[1], [0], [0], [1], [0, 0, 1, 1], [], []>} : vector<1024x4xf32>, vector<4x8xf32>, vector<1024x8xf32> -> vector<1024x8xf32>
    %28 = arith.addf %21, %27 : vector<1024x8xf32>
    %c0_33 = arith.constant 0 : index
    %c1_34 = arith.constant 1 : index
    %c1_35 = arith.constant 1 : index
    %c0_36 = arith.constant 0 : index
    %29 = vector.load %arg1[%c0_33, %c1_34, %c1_35, %c0_36] : memref<1x34x34x4xf32, #tpu.memory_space<vmem>>, vector<1x32x32x4xf32>
    %30 = vector.shape_cast %29 : vector<1x32x32x4xf32> to vector<32x32x4xf32>
    %31 = vector.shape_cast %30 : vector<32x32x4xf32> to vector<1024x4xf32>
    %c1_37 = arith.constant 1 : index
    %c1_38 = arith.constant 1 : index
    %c0_39 = arith.constant 0 : index
    %c0_40 = arith.constant 0 : index
    %32 = vector.load %arg2[%c1_37, %c1_38, %c0_39, %c0_40] : memref<3x3x4x8xf32, #tpu.memory_space<vmem>>, vector<1x1x4x8xf32>
    %33 = vector.shape_cast %32 : vector<1x1x4x8xf32> to vector<4x8xf32>
    %cst_41 = arith.constant dense<0.000000e+00> : vector<1024x8xf32>
    %34 = tpu.matmul %31, %33, %cst_41 {dimension_numbers = #tpu.dot_dimension_numbers<[1], [0], [0], [1], [0, 0, 1, 1], [], []>} : vector<1024x4xf32>, vector<4x8xf32>, vector<1024x8xf32> -> vector<1024x8xf32>
    %35 = arith.addf %28, %34 : vector<1024x8xf32>
    %c0_42 = arith.constant 0 : index
    %c1_43 = arith.constant 1 : index
    %c2_44 = arith.constant 2 : index
    %c0_45 = arith.constant 0 : index
    %36 = vector.load %arg1[%c0_42, %c1_43, %c2_44, %c0_45] : memref<1x34x34x4xf32, #tpu.memory_space<vmem>>, vector<1x32x32x4xf32>
    %37 = vector.shape_cast %36 : vector<1x32x32x4xf32> to vector<32x32x4xf32>
    %38 = vector.shape_cast %37 : vector<32x32x4xf32> to vector<1024x4xf32>
    %c1_46 = arith.constant 1 : index
    %c2_47 = arith.constant 2 : index
    %c0_48 = arith.constant 0 : index
    %c0_49 = arith.constant 0 : index
    %39 = vector.load %arg2[%c1_46, %c2_47, %c0_48, %c0_49] : memref<3x3x4x8xf32, #tpu.memory_space<vmem>>, vector<1x1x4x8xf32>
    %40 = vector.shape_cast %39 : vector<1x1x4x8xf32> to vector<4x8xf32>
    %cst_50 = arith.constant dense<0.000000e+00> : vector<1024x8xf32>
    %41 = tpu.matmul %38, %40, %cst_50 {dimension_numbers = #tpu.dot_dimension_numbers<[1], [0], [0], [1], [0, 0, 1, 1], [], []>} : vector<1024x4xf32>, vector<4x8xf32>, vector<1024x8xf32> -> vector<1024x8xf32>
    %42 = arith.addf %35, %41 : vector<1024x8xf32>
    %c0_51 = arith.constant 0 : index
    %c2_52 = arith.constant 2 : index
    %c0_53 = arith.constant 0 : index
    %c0_54 = arith.constant 0 : index
    %43 = vector.load %arg1[%c0_51, %c2_52, %c0_53, %c0_54] : memref<1x34x34x4xf32, #tpu.memory_space<vmem>>, vector<1x32x32x4xf32>
    %44 = vector.shape_cast %43 : vector<1x32x32x4xf32> to vector<32x32x4xf32>
    %45 = vector.shape_cast %44 : vector<32x32x4xf32> to vector<1024x4xf32>
    %c2_55 = arith.constant 2 : index
    %c0_56 = arith.constant 0 : index
    %c0_57 = arith.constant 0 : index
    %c0_58 = arith.constant 0 : index
    %46 = vector.load %arg2[%c2_55, %c0_56, %c0_57, %c0_58] : memref<3x3x4x8xf32, #tpu.memory_space<vmem>>, vector<1x1x4x8xf32>
    %47 = vector.shape_cast %46 : vector<1x1x4x8xf32> to vector<4x8xf32>
    %cst_59 = arith.constant dense<0.000000e+00> : vector<1024x8xf32>
    %48 = tpu.matmul %45, %47, %cst_59 {dimension_numbers = #tpu.dot_dimension_numbers<[1], [0], [0], [1], [0, 0, 1, 1], [], []>} : vector<1024x4xf32>, vector<4x8xf32>, vector<1024x8xf32> -> vector<1024x8xf32>
    %49 = arith.addf %42, %48 : vector<1024x8xf32>
    %c0_60 = arith.constant 0 : index
    %c2_61 = arith.constant 2 : index
    %c1_62 = arith.constant 1 : index
    %c0_63 = arith.constant 0 : index
    %50 = vector.load %arg1[%c0_60, %c2_61, %c1_62, %c0_63] : memref<1x34x34x4xf32, #tpu.memory_space<vmem>>, vector<1x32x32x4xf32>
    %51 = vector.shape_cast %50 : vector<1x32x32x4xf32> to vector<32x32x4xf32>
    %52 = vector.shape_cast %51 : vector<32x32x4xf32> to vector<1024x4xf32>
    %c2_64 = arith.constant 2 : index
    %c1_65 = arith.constant 1 : index
    %c0_66 = arith.constant 0 : index
    %c0_67 = arith.constant 0 : index
    %53 = vector.load %arg2[%c2_64, %c1_65, %c0_66, %c0_67] : memref<3x3x4x8xf32, #tpu.memory_space<vmem>>, vector<1x1x4x8xf32>
    %54 = vector.shape_cast %53 : vector<1x1x4x8xf32> to vector<4x8xf32>
    %cst_68 = arith.constant dense<0.000000e+00> : vector<1024x8xf32>
    %55 = tpu.matmul %52, %54, %cst_68 {dimension_numbers = #tpu.dot_dimension_numbers<[1], [0], [0], [1], [0, 0, 1, 1], [], []>} : vector<1024x4xf32>, vector<4x8xf32>, vector<1024x8xf32> -> vector<1024x8xf32>
    %56 = arith.addf %49, %55 : vector<1024x8xf32>
    %c0_69 = arith.constant 0 : index
    %c2_70 = arith.constant 2 : index
    %c2_71 = arith.constant 2 : index
    %c0_72 = arith.constant 0 : index
    %57 = vector.load %arg1[%c0_69, %c2_70, %c2_71, %c0_72] : memref<1x34x34x4xf32, #tpu.memory_space<vmem>>, vector<1x32x32x4xf32>
    %58 = vector.shape_cast %57 : vector<1x32x32x4xf32> to vector<32x32x4xf32>
    %59 = vector.shape_cast %58 : vector<32x32x4xf32> to vector<1024x4xf32>
    %c2_73 = arith.constant 2 : index
    %c2_74 = arith.constant 2 : index
    %c0_75 = arith.constant 0 : index
    %c0_76 = arith.constant 0 : index
    %60 = vector.load %arg2[%c2_73, %c2_74, %c0_75, %c0_76] : memref<3x3x4x8xf32, #tpu.memory_space<vmem>>, vector<1x1x4x8xf32>
    %61 = vector.shape_cast %60 : vector<1x1x4x8xf32> to vector<4x8xf32>
    %cst_77 = arith.constant dense<0.000000e+00> : vector<1024x8xf32>
    %62 = tpu.matmul %59, %61, %cst_77 {dimension_numbers = #tpu.dot_dimension_numbers<[1], [0], [0], [1], [0, 0, 1, 1], [], []>} : vector<1024x4xf32>, vector<4x8xf32>, vector<1024x8xf32> -> vector<1024x8xf32>
    %63 = arith.addf %56, %62 : vector<1024x8xf32>
    %c0_78 = arith.constant 0 : index
    %c0_79 = arith.constant 0 : index
    %c0_80 = arith.constant 0 : index
    %64 = vector.load %arg3[%c0_78, %c0_79, %c0_80] : memref<1x1x8xf32, #tpu.memory_space<vmem>>, vector<1x1x8xf32>
    %65 = vector.shape_cast %64 : vector<1x1x8xf32> to vector<1x8xf32>
    %c0_81 = arith.constant 0 : index
    %c0_82 = arith.constant 0 : index
    %c0_83 = arith.constant 0 : index
    %66 = vector.load %arg4[%c0_81, %c0_82, %c0_83] : memref<1x1x8xf32, #tpu.memory_space<vmem>>, vector<1x1x8xf32>
    %67 = vector.shape_cast %66 : vector<1x1x8xf32> to vector<1x8xf32>
    %cst_84 = arith.constant dense<0.000000e+00> : vector<8xf32>
    %68 = vector.multi_reduction <add>, %63, %cst_84 [0] : vector<1024x8xf32> to vector<8xf32>
    %69 = vector.shape_cast %68 : vector<8xf32> to vector<1x8xf32>
    %cst_85 = arith.constant 9.765625E-4 : f32
    %70 = vector.broadcast %cst_85 : f32 to vector<1x8xf32>
    %71 = arith.mulf %69, %70 : vector<1x8xf32>
    %72 = arith.mulf %63, %63 : vector<1024x8xf32>
    %cst_86 = arith.constant dense<0.000000e+00> : vector<8xf32>
    %73 = vector.multi_reduction <add>, %72, %cst_86 [0] : vector<1024x8xf32> to vector<8xf32>
    %74 = vector.shape_cast %73 : vector<8xf32> to vector<1x8xf32>
    %cst_87 = arith.constant 9.765625E-4 : f32
    %75 = vector.broadcast %cst_87 : f32 to vector<1x8xf32>
    %76 = arith.mulf %74, %75 : vector<1x8xf32>
    %77 = arith.mulf %71, %71 : vector<1x8xf32>
    %78 = arith.subf %76, %77 : vector<1x8xf32>
    %cst_88 = arith.constant 0.000000e+00 : f32
    %79 = vector.broadcast %cst_88 : f32 to vector<1x8xf32>
    %80 = arith.maximumf %78, %79 : vector<1x8xf32>
    %cst_89 = arith.constant 9.99999974E-6 : f32
    %81 = vector.broadcast %cst_89 : f32 to vector<1x8xf32>
    %82 = arith.addf %80, %81 : vector<1x8xf32>
    %83 = math.rsqrt %82 : vector<1x8xf32>
    %84 = arith.mulf %65, %83 : vector<1x8xf32>
    %85 = arith.mulf %71, %84 : vector<1x8xf32>
    %86 = arith.subf %67, %85 : vector<1x8xf32>
    %87 = vector.broadcast %84 : vector<1x8xf32> to vector<1024x8xf32>
    %88 = arith.mulf %63, %87 : vector<1024x8xf32>
    %89 = vector.broadcast %86 : vector<1x8xf32> to vector<1024x8xf32>
    %90 = arith.addf %88, %89 : vector<1024x8xf32>
    %cst_90 = arith.constant 0.000000e+00 : f32
    %91 = vector.broadcast %cst_90 : f32 to vector<1024x8xf32>
    %92 = arith.maximumf %90, %91 : vector<1024x8xf32>
    %93 = vector.shape_cast %92 : vector<1024x8xf32> to vector<32x32x8xf32>
    %c0_91 = arith.constant 0 : index
    %c0_92 = arith.constant 0 : index
    %c0_93 = arith.constant 0 : index
    %c0_94 = arith.constant 0 : index
    %94 = vector.load %arg5[%c0_91, %c0_92, %c0_93, %c0_94] : memref<1x32x32x8xf32, #tpu.memory_space<vmem>>, vector<1x32x32x8xf32>
    %95 = vector.shape_cast %94 : vector<1x32x32x8xf32> to vector<32x32x8xf32>
    %96 = vector.shape_cast %93 : vector<32x32x8xf32> to vector<1x32x32x8xf32>
    tpu.vector_store %arg5[%c0_91, %c0_92, %c0_93, %c0_94], %96 {strides = array<i32>} : memref<1x32x32x8xf32, #tpu.memory_space<vmem>>, vector<1x32x32x8xf32>,
    return
  }
  func.func @transform_0(%arg0: i32) -> (i32, i32, i32, i32) {
    %c0_i32 = arith.constant 0 : i32
    %c0_i32_0 = arith.constant 0 : i32
    %c0_i32_1 = arith.constant 0 : i32
    %c0_i32_2 = arith.constant 0 : i32
    return %arg0, %c0_i32, %c0_i32_0, %c0_i32_1 : i32, i32, i32, i32
  }
  func.func @transform_1(%arg0: i32) -> (i32, i32, i32, i32) {
    %c0_i32 = arith.constant 0 : i32
    %c0_i32_0 = arith.constant 0 : i32
    %c0_i32_1 = arith.constant 0 : i32
    %c0_i32_2 = arith.constant 0 : i32
    %c0_i32_3 = arith.constant 0 : i32
    return %c0_i32, %c0_i32_0, %c0_i32_1, %c0_i32_2 : i32, i32, i32, i32
  }
  func.func @transform_2(%arg0: i32) -> (i32, i32, i32) {
    %c0_i32 = arith.constant 0 : i32
    %c0_i32_0 = arith.constant 0 : i32
    %c0_i32_1 = arith.constant 0 : i32
    %c0_i32_2 = arith.constant 0 : i32
    return %c0_i32, %c0_i32_0, %c0_i32_1 : i32, i32, i32
  }
  func.func @transform_3(%arg0: i32) -> (i32, i32, i32) {
    %c0_i32 = arith.constant 0 : i32
    %c0_i32_0 = arith.constant 0 : i32
    %c0_i32_1 = arith.constant 0 : i32
    %c0_i32_2 = arith.constant 0 : i32
    return %c0_i32, %c0_i32_0, %c0_i32_1 : i32, i32, i32
  }
  func.func @transform_4(%arg0: i32) -> (i32, i32, i32, i32) {
    %c0_i32 = arith.constant 0 : i32
    %c0_i32_0 = arith.constant 0 : i32
    %c0_i32_1 = arith.constant 0 : i32
    %c0_i32_2 = arith.constant 0 : i32
    return %arg0, %c0_i32, %c0_i32_0, %c0_i32_1 : i32, i32, i32, i32
  }
}

</mosaic_0001>

<bundles_post_ra>
// kernel: tpu_custom_call.1
= control target key start
LH: loop header
LB: loop body
LE: loop exit
PB: predicated region body
PF: predicated region fallthrough
CT: control target
= control target key end

     0   :  { %s18239_s15 = smov 0   ;;  %s24504_s0 = inlined_call_operand.vmem [shape: f32[2,34,34,4], index: 0, kind: input, shape index: {}]   ;;  %s24505_s1 = inlined_call_operand.vmem [shape: f32[3,3,4,8], index: 1, kind: input, shape index: {}]   ;;  %s24506_s2 = inlined_call_operand.vmem [shape: f32[1,1,8], index: 2, kind: input, shape index: {}]   ;;  %s24507_s3 = inlined_call_operand.vmem [shape: f32[1,1,8], index: 3, kind: input, shape index: {}]   ;;  %s24508_s4 = inlined_call_operand.vmem [shape: f32[2,32,32,8], index: 4, kind: output, shape index: {}]  }
   0x1 LB: > { %s13337_s16 = sadd.s32 4294967295, %s18212_s15   ;;  %p13341_p0 = scmp.ge.s32.totalorder %s18212_s15, 1  ;;  %s18212_s15 = sphi %s18239_s15, %s14_s15  }
   0x2   : > { %p162_p1 = scmp.lt.s32.totalorder %s18212_s15, 3 }
   0x4   : > { %p163_p2 = pnand %p13341_p0, %p162_p1 }
   0x6   : > { %166 = sbr.rel (%p163_p2) target bundleno = 1580 (0x62c), region = 36 }
   0xb   : > { %v13345_v0 = vld [vmem:[%s24505_s1 + $0x4] sm:$0xf]  ;;  %vm842_vm0 = vcmask 1043456   ;;  %p188_p3 = scmp.lt.s32.totalorder %s13337_s16, 1  ;;  %v326_v1 = vld [vmem:[%s24505_s1] sm:$0xf] }
   0xc   : > { %18192 = vmatprep.subr.msk.mxu1 %vm842_vm0, %v13345_v0  ;;  %16446 = vmatprep.subr.msk.mxu0 %vm842_vm0, %v13345_v0  ;;  %v13604_v2 = vld [vmem:[%s24505_s1 + $0x8] sm:$0xf]  ;;  %vm457_vm1 = vcmask 31744   ;;  %v18283_v9 = vld [vmem:[%s24505_s1 + $0xc] sm:$0xf]  ;;  %vm12097_vm2 = vcmask 64512  }
   0xd   : > { %18193 = vmatpush3.msk.msra.mxu1 %vm842_vm0, %v13345_v0  ;;  %16447 = vmatpush3.msk.msra.mxu0 %vm842_vm0, %v13345_v0  ;;  %s25717_s16 = smov (!%p188_p3, %s13337_s16), 1  ;;  %v18378_v54 = vld [vmem:[%s24505_s1 + $0x10] sm:$0xf] }
   0xe   : > { %16640 = vmatprep.subr.msk.mxu1 %vm842_vm0, %v326_v1  ;;  %16834 = vmatprep.subr.msk.mxu0 %vm842_vm0, %v13604_v2  ;;  %s18194_s23 = smul.u32 1360, %s25717_s16  ;;  %s15284_s21 = sshll.u32 %s25717_s16, 10 }
  0x10   : > { %s18268_s26 = scalar_lea.vmem %s24504_s0, %s18194_s23  ;;  %s24099_s23 = scalar_lea.vmem %s24508_s4, %s15284_s21 }
  0x11   : > { %v327_v3 = vld [vmem:[%s18268_s26 + $0x1] sm:$0xff]  ;;  %v328_v5 = vld [vmem:[%s18268_s26 + $0x9] sm:$0xff]  ;;  %v329_v7 = vld [vmem:[%s18268_s26 + $0x11] sm:$0xff] }
  0x12   : > { %v391_v4 = vld [vmem:[%s18268_s26 + $0x281] sm:$0xff]  ;;  %16448 = vmatprep.mubr.msk.f32.mxu0 %vm457_vm1, %v327_v3  ;;  %v392_v6 = vld [vmem:[%s18268_s26 + $0x289] sm:$0xff]  ;;  %v393_v8 = vld [vmem:[%s18268_s26 + $0x291] sm:$0xff] }
  0x13   : > { %16544 = vmatprep.mubr.msk.f32.mxu1 %vm457_vm1, %v391_v4  ;;  %16449 = vmatmul.mubr.msk.f32.vlgmr.msra.gmra.mxu0 %vm457_vm1, %v328_v5  ;;  %v330_v10 = vld [vmem:[%s18268_s26 + $0x19] sm:$0xff]  ;;  %v331_v12 = vld [vmem:[%s18268_s26 + $0x29] sm:$0xff]  ;;  %v332_v14 = vld [vmem:[%s18268_s26 + $0x31] sm:$0xff] }
  0x14   : > { %16545 = vmatmul.mubr.msk.f32.vlgmr.msra.gmra.mxu1 %vm457_vm1, %v392_v6  ;;  %16835 = vmatpush3.msk.msra.mxu0 %vm842_vm0, %v13604_v2  ;;  %v394_v11 = vld [vmem:[%s18268_s26 + $0x299] sm:$0xff]  ;;  %v395_v13 = vld [vmem:[%s18268_s26 + $0x2a9] sm:$0xff]  ;;  %v396_v15 = vld [vmem:[%s18268_s26 + $0x2b1] sm:$0xff] }
  0x15   : > { %16641 = vmatpush3.msk.msra.mxu1 %vm842_vm0, %v326_v1  ;;  %16451 = vmatprep.mubr.msk.f32.mxu0 %vm457_vm1, %v329_v7  ;;  %v333_v16 = vld [vmem:[%s18268_s26 + $0x39] sm:$0xff]  ;;  %v334_v18 = vld [vmem:[%s18268_s26 + $0x41] sm:$0xff]  ;;  %v335_v20 = vld [vmem:[%s18268_s26 + $0x51] sm:$0xff] }
  0x16   : > { %16547 = vmatprep.mubr.msk.f32.mxu1 %vm457_vm1, %v393_v8  ;;  %17028 = vmatprep.subr.msk.mxu1 %vm842_vm0, %v18283_v9  ;;  %v397_v17 = vld [vmem:[%s18268_s26 + $0x2b9] sm:$0xff]  ;;  %v398_v19 = vld [vmem:[%s18268_s26 + $0x2c1] sm:$0xff]  ;;  %v399_v21 = vld [vmem:[%s18268_s26 + $0x2d1] sm:$0xff] }
  0x17   : > { %16452 = vmatmul.mubr.msk.f32.gmra.mxu0 %vm457_vm1, %v330_v10  ;;  %v336_v22 = vld [vmem:[%s18268_s26 + $0x59] sm:$0xff]  ;;  %v337_v24 = vld [vmem:[%s18268_s26 + $0x61] sm:$0xff]  ;;  %v338_v26 = vld [vmem:[%s18268_s26 + $0x69] sm:$0xff]  ;;  %17222 = vmatprep.subr.msk.mxu0 %vm842_vm0, %v18378_v54 }
  0x18   : > { %16548 = vmatmul.mubr.msk.f32.gmra.mxu1 %vm457_vm1, %v394_v11  ;;  %16454 = vmatprep.mubr.msk.f32.mxu0 %vm457_vm1, %v331_v12  ;;  %v400_v23 = vld [vmem:[%s18268_s26 + $0x2d9] sm:$0xff]  ;;  %v401_v25 = vld [vmem:[%s18268_s26 + $0x2e1] sm:$0xff]  ;;  %v402_v27 = vld [vmem:[%s18268_s26 + $0x2e9] sm:$0xff] }
  0x19   : > { %16550 = vmatprep.mubr.msk.f32.mxu1 %vm457_vm1, %v395_v13  ;;  %v339_v28 = vld [vmem:[%s18268_s26 + $0x79] sm:$0xff]  ;;  %v340_v30 = vld [vmem:[%s18268_s26 + $0x81] sm:$0xff]  ;;  %v341_v32 = vld [vmem:[%s18268_s26 + $0x89] sm:$0xff] }
  0x1a   : > { %v403_v29 = vld [vmem:[%s18268_s26 + $0x2f9] sm:$0xff]  ;;  %v404_v31 = vld [vmem:[%s18268_s26 + $0x301] sm:$0xff]  ;;  %v405_v33 = vld [vmem:[%s18268_s26 + $0x309] sm:$0xff] }
  0x1b   : > { %16455 = vmatmul.mubr.msk.f32.gmra.mxu0 %vm457_vm1, %v332_v14  ;;  %v342_v34 = vld [vmem:[%s18268_s26 + $0x91] sm:$0xff]  ;;  %v343_v36 = vld [vmem:[%s18268_s26 + $0xa1] sm:$0xff]  ;;  %v344_v38 = vld [vmem:[%s18268_s26 + $0xa9] sm:$0xff] }
  0x1c   : > { %16551 = vmatmul.mubr.msk.f32.gmra.mxu1 %vm457_vm1, %v396_v15  ;;  %16457 = vmatprep.mubr.msk.f32.mxu0 %vm457_vm1, %v333_v16  ;;  %v406_v35 = vld [vmem:[%s18268_s26 + $0x311] sm:$0xff]  ;;  %v407_v37 = vld [vmem:[%s18268_s26 + $0x321] sm:$0xff]  ;;  %v408_v39 = vld [vmem:[%s18268_s26 + $0x329] sm:$0xff] }
  0x1d   : > { %16553 = vmatprep.mubr.msk.f32.mxu1 %vm457_vm1, %v397_v17  ;;  %v345_v40 = vld [vmem:[%s18268_s26 + $0xb1] sm:$0xff]  ;;  %v346_v42 = vld [vmem:[%s18268_s26 + $0xb9] sm:$0xff]  ;;  %v347_v44 = vld [vmem:[%s18268_s26 + $0xc9] sm:$0xff] }
  0x1e   : > { %v409_v41 = vld [vmem:[%s18268_s26 + $0x331] sm:$0xff]  ;;  %v410_v43 = vld [vmem:[%s18268_s26 + $0x339] sm:$0xff]  ;;  %v411_v45 = vld [vmem:[%s18268_s26 + $0x349] sm:$0xff] }
  0x1f   : > { %16458 = vmatmul.mubr.msk.f32.gmra.mxu0 %vm457_vm1, %v334_v18  ;;  %v348_v46 = vld [vmem:[%s18268_s26 + $0xd1] sm:$0xff]  ;;  %v349_v48 = vld [vmem:[%s18268_s26 + $0xd9] sm:$0xff]  ;;  %v350_v50 = vld [vmem:[%s18268_s26 + $0xe1] sm:$0xff] }
  0x20   : > { %16554 = vmatmul.mubr.msk.f32.gmra.mxu1 %vm457_vm1, %v398_v19  ;;  %16460 = vmatprep.mubr.msk.f32.mxu0 %vm457_vm1, %v335_v20  ;;  %v412_v47 = vld [vmem:[%s18268_s26 + $0x351] sm:$0xff]  ;;  %v413_v49 = vld [vmem:[%s18268_s26 + $0x359] sm:$0xff]  ;;  %v414_v51 = vld [vmem:[%s18268_s26 + $0x361] sm:$0xff] }
  0x21   : > { %16556 = vmatprep.mubr.msk.f32.mxu1 %vm457_vm1, %v399_v21  ;;  %v351_v52 = vld [vmem:[%s18268_s26 + $0xf1] sm:$0xff]  ;;  %v352_v55 = vld [vmem:[%s18268_s26 + $0xf9] sm:$0xff]  ;;  %v353_v57 = vld [vmem:[%s18268_s26 + $0x101] sm:$0xff] }
  0x22   : > { %v415_v53 = vld [vmem:[%s18268_s26 + $0x371] sm:$0xff]  ;;  %v416_v56 = vld [vmem:[%s18268_s26 + $0x379] sm:$0xff]  ;;  %v417_v58 = vld [vmem:[%s18268_s26 + $0x381] sm:$0xff] }
  0x23   : > { %16461 = vmatmul.mubr.msk.f32.gmra.mxu0 %vm457_vm1, %v336_v22  ;;  %v354_v59 = vld [vmem:[%s18268_s26 + $0x109] sm:$0xff]  ;;  %v355_v61 = vld [vmem:[%s18268_s26 + $0x119] sm:$0xff]  ;;  %v356_v63 = vld [vmem:[%s18268_s26 + $0x121] sm:$0xff] }
  0x24   : > { %16557 = vmatmul.mubr.msk.f32.gmra.mxu1 %vm457_vm1, %v400_v23  ;;  %16463 = vmatprep.mubr.msk.f32.mxu0 %vm457_vm1, %v337_v24  ;;  %v418_v60 = vld [vmem:[%s18268_s26 + $0x389] sm:$0xff]  ;;  %v419_v62 = vld [vmem:[%s18268_s26 + $0x399] sm:$0xff]  ;;  %v420_v0 = vld [vmem:[%s18268_s26 + $0x3a1] sm:$0xff] }
  0x25   : > { %16559 = vmatprep.mubr.msk.f32.mxu1 %vm457_vm1, %v401_v25  ;;  %v357_v1 = vld [vmem:[%s18268_s26 + $0x129] sm:$0xff]  ;;  %v358_v3 = vld [vmem:[%s18268_s26 + $0x131] sm:$0xff]  ;;  %v359_v5 = vld [vmem:[%s18268_s26 + $0x141] sm:$0xff] }
  0x26   : > { %v421_v2 = vld [vmem:[%s18268_s26 + $0x3a9] sm:$0xff]  ;;  %v422_v4 = vld [vmem:[%s18268_s26 + $0x3b1] sm:$0xff]  ;;  %v423_v6 = vld [vmem:[%s18268_s26 + $0x3c1] sm:$0xff] }
  0x27   : > { %16464 = vmatmul.mubr.msk.f32.gmra.mxu0 %vm457_vm1, %v338_v26  ;;  %v360_v7 = vld [vmem:[%s18268_s26 + $0x149] sm:$0xff]  ;;  %v361_v10 = vld [vmem:[%s18268_s26 + $0x151] sm:$0xff]  ;;  %v362_v12 = vld [vmem:[%s18268_s26 + $0x159] sm:$0xff] }
  0x28   : > { %16560 = vmatmul.mubr.msk.f32.gmra.mxu1 %vm457_vm1, %v402_v27  ;;  %16466 = vmatprep.mubr.msk.f32.mxu0 %vm457_vm1, %v339_v28  ;;  %v424_v8 = vld [vmem:[%s18268_s26 + $0x3c9] sm:$0xff]  ;;  %v425_v11 = vld [vmem:[%s18268_s26 + $0x3d1] sm:$0xff]  ;;  %v426_v13 = vld [vmem:[%s18268_s26 + $0x3d9] sm:$0xff] }
  0x29   : > { %16562 = vmatprep.mubr.msk.f32.mxu1 %vm457_vm1, %v403_v29  ;;  %v363_v14 = vld [vmem:[%s18268_s26 + $0x169] sm:$0xff]  ;;  %v364_v16 = vld [vmem:[%s18268_s26 + $0x171] sm:$0xff]  ;;  %v365_v18 = vld [vmem:[%s18268_s26 + $0x179] sm:$0xff] }
  0x2a   : > { %v427_v15 = vld [vmem:[%s18268_s26 + $0x3e9] sm:$0xff]  ;;  %v428_v17 = vld [vmem:[%s18268_s26 + $0x3f1] sm:$0xff]  ;;  %v429_v19 = vld [vmem:[%s18268_s26 + $0x3f9] sm:$0xff] }
  0x2b   : > { %16467 = vmatmul.mubr.msk.f32.gmra.mxu0 %vm457_vm1, %v340_v30  ;;  %v366_v20 = vld [vmem:[%s18268_s26 + $0x181] sm:$0xff]  ;;  %v367_v22 = vld [vmem:[%s18268_s26 + $0x191] sm:$0xff]  ;;  %v368_v24 = vld [vmem:[%s18268_s26 + $0x199] sm:$0xff] }
  0x2c   : > { %16563 = vmatmul.mubr.msk.f32.gmra.mxu1 %vm457_vm1, %v404_v31  ;;  %16469 = vmatprep.mubr.msk.f32.mxu0 %vm457_vm1, %v341_v32  ;;  %v430_v21 = vld [vmem:[%s18268_s26 + $0x401] sm:$0xff]  ;;  %v431_v23 = vld [vmem:[%s18268_s26 + $0x411] sm:$0xff]  ;;  %v432_v25 = vld [vmem:[%s18268_s26 + $0x419] sm:$0xff] }
  0x2d   : > { %16565 = vmatprep.mubr.msk.f32.mxu1 %vm457_vm1, %v405_v33  ;;  %v369_v26 = vld [vmem:[%s18268_s26 + $0x1a1] sm:$0xff]  ;;  %v370_v28 = vld [vmem:[%s18268_s26 + $0x1a9] sm:$0xff]  ;;  %v371_v30 = vld [vmem:[%s18268_s26 + $0x1b9] sm:$0xff] }
  0x2e   : > { %v433_v27 = vld [vmem:[%s18268_s26 + $0x421] sm:$0xff]  ;;  %v434_v29 = vld [vmem:[%s18268_s26 + $0x429] sm:$0xff]  ;;  %v435_v31 = vld [vmem:[%s18268_s26 + $0x439] sm:$0xff] }
  0x2f   : > { %16470 = vmatmul.mubr.msk.f32.gmra.mxu0 %vm457_vm1, %v342_v34  ;;  %v372_v32 = vld [vmem:[%s18268_s26 + $0x1c1] sm:$0xff]  ;;  %v373_v34 = vld [vmem:[%s18268_s26 + $0x1c9] sm:$0xff] }
  0x30   : > { %16566 = vmatmul.mubr.msk.f32.gmra.mxu1 %vm457_vm1, %v406_v35  ;;  %16472 = vmatprep.mubr.msk.f32.mxu0 %vm457_vm1, %v343_v36  ;;  %v436_v33 = vld [vmem:[%s18268_s26 + $0x441] sm:$0xff]  ;;  %v437_v35 = vld [vmem:[%s18268_s26 + $0x449] sm:$0xff]  ;;  %v374_v36 = vld [vmem:[%s18268_s26 + $0x1d1] sm:$0xff] }
  0x31   : > { %16568 = vmatprep.mubr.msk.f32.mxu1 %vm457_vm1, %v407_v37  ;;  %v438_v37 = vld [vmem:[%s18268_s26 + $0x451] sm:$0xff] }
  0x33   : > { %16473 = vmatmul.mubr.msk.f32.gmra.mxu0 %vm457_vm1, %v344_v38  ;;  %v375_v38 = vld [vmem:[%s18268_s26 + $0x1e1] sm:$0xff] }
  0x34   : > { %16569 = vmatmul.mubr.msk.f32.gmra.mxu1 %vm457_vm1, %v408_v39  ;;  %16475 = vmatprep.mubr.msk.f32.mxu0 %vm457_vm1, %v345_v40  ;;  %v439_v39 = vld [vmem:[%s18268_s26 + $0x461] sm:$0xff]  ;;  %v376_v40 = vld [vmem:[%s18268_s26 + $0x1e9] sm:$0xff] }
  0x35   : > { %16571 = vmatprep.mubr.msk.f32.mxu1 %vm457_vm1, %v409_v41  ;;  %v440_v41 = vld [vmem:[%s18268_s26 + $0x469] sm:$0xff] }
  0x37   : > { %16476 = vmatmul.mubr.msk.f32.gmra.mxu0 %vm457_vm1, %v346_v42  ;;  %v377_v42 = vld [vmem:[%s18268_s26 + $0x1f1] sm:$0xff] }
  0x38   : > { %16572 = vmatmul.mubr.msk.f32.gmra.mxu1 %vm457_vm1, %v410_v43  ;;  %16478 = vmatprep.mubr.msk.f32.mxu0 %vm457_vm1, %v347_v44  ;;  %v441_v43 = vld [vmem:[%s18268_s26 + $0x471] sm:$0xff]  ;;  %v378_v44 = vld [vmem:[%s18268_s26 + $0x1f9] sm:$0xff] }
  0x39   : > { %16574 = vmatprep.mubr.msk.f32.mxu1 %vm457_vm1, %v411_v45  ;;  %v442_v45 = vld [vmem:[%s18268_s26 + $0x479] sm:$0xff] }
  0x3b   : > { %16479 = vmatmul.mubr.msk.f32.gmra.mxu0 %vm457_vm1, %v348_v46  ;;  %v379_v46 = vld [vmem:[%s18268_s26 + $0x209] sm:$0xff] }
  0x3c   : > { %16575 = vmatmul.mubr.msk.f32.gmra.mxu1 %vm457_vm1, %v412_v47  ;;  %16481 = vmatprep.mubr.msk.f32.mxu0 %vm457_vm1, %v349_v48  ;;  %v443_v47 = vld [vmem:[%s18268_s26 + $0x489] sm:$0xff]  ;;  %v380_v48 = vld [vmem:[%s18268_s26 + $0x211] sm:$0xff] }
  0x3d   : > { %16577 = vmatprep.mubr.msk.f32.mxu1 %vm457_vm1, %v413_v49  ;;  %v444_v49 = vld [vmem:[%s18268_s26 + $0x491] sm:$0xff] }
  0x3f   : > { %16482 = vmatmul.mubr.msk.f32.gmra.mxu0 %vm457_vm1, %v350_v50  ;;  %v381_v50 = vld [vmem:[%s18268_s26 + $0x219] sm:$0xff] }
  0x40   : > { %16578 = vmatmul.mubr.msk.f32.gmra.mxu1 %vm457_vm1, %v414_v51  ;;  %16484 = vmatprep.mubr.msk.f32.mxu0 %vm457_vm1, %v351_v52  ;;  %v445_v51 = vld [vmem:[%s18268_s26 + $0x499] sm:$0xff]  ;;  %v382_v52 = vld [vmem:[%s18268_s26 + $0x221] sm:$0xff] }
  0x41   : > { %16580 = vmatprep.mubr.msk.f32.mxu1 %vm457_vm1, %v415_v53  ;;  %v446_v53 = vld [vmem:[%s18268_s26 + $0x4a1] sm:$0xff] }
  0x43   : > { %16485 = vmatmul.mubr.msk.f32.gmra.mxu0 %vm457_vm1, %v352_v55  ;;  %v383_v55 = vld [vmem:[%s18268_s26 + $0x231] sm:$0xff] }
  0x44   : > { %16581 = vmatmul.mubr.msk.f32.gmra.mxu1 %vm457_vm1, %v416_v56  ;;  %16487 = vmatprep.mubr.msk.f32.mxu0 %vm457_vm1, %v353_v57  ;;  %v447_v56 = vld [vmem:[%s18268_s26 + $0x4b1] sm:$0xff]  ;;  %v384_v57 = vld [vmem:[%s18268_s26 + $0x239] sm:$0xff] }
  0x45   : > { %16583 = vmatprep.mubr.msk.f32.mxu1 %vm457_vm1, %v417_v58  ;;  %v448_v58 = vld [vmem:[%s18268_s26 + $0x4b9] sm:$0xff] }
  0x47   : > { %16488 = vmatmul.mubr.msk.f32.gmra.mxu0 %vm457_vm1, %v354_v59  ;;  %v385_v59 = vld [vmem:[%s18268_s26 + $0x241] sm:$0xff] }
  0x48   : > { %16584 = vmatmul.mubr.msk.f32.gmra.mxu1 %vm457_vm1, %v418_v60  ;;  %16490 = vmatprep.mubr.msk.f32.mxu0 %vm457_vm1, %v355_v61  ;;  %v449_v60 = vld [vmem:[%s18268_s26 + $0x4c1] sm:$0xff]  ;;  %v386_v61 = vld [vmem:[%s18268_s26 + $0x249] sm:$0xff] }
  0x49   : > { %16586 = vmatprep.mubr.msk.f32.mxu1 %vm457_vm1, %v419_v62  ;;  %v450_v62 = vld [vmem:[%s18268_s26 + $0x4c9] sm:$0xff] }
  0x4b   : > { %16491 = vmatmul.mubr.msk.f32.gmra.mxu0 %vm457_vm1, %v356_v63  ;;  %v387_v63 = vld [vmem:[%s18268_s26 + $0x259] sm:$0xff] }
  0x4c   : > { %16587 = vmatmul.mubr.msk.f32.gmra.mxu1 %vm457_vm1, %v420_v0  ;;  %16493 = vmatprep.mubr.msk.f32.mxu0 %vm457_vm1, %v357_v1  ;;  %v451_v0 = vld [vmem:[%s18268_s26 + $0x4d9] sm:$0xff]  ;;  %v388_v1 = vld [vmem:[%s18268_s26 + $0x261] sm:$0xff] }
  0x4d   : > { %16589 = vmatprep.mubr.msk.f32.mxu1 %vm457_vm1, %v421_v2  ;;  %v452_v2 = vld [vmem:[%s18268_s26 + $0x4e1] sm:$0xff] }
  0x4f   : > { %16494 = vmatmul.mubr.msk.f32.gmra.mxu0 %vm457_vm1, %v358_v3  ;;  %v389_v3 = vld [vmem:[%s18268_s26 + $0x269] sm:$0xff] }
  0x50   : > { %16590 = vmatmul.mubr.msk.f32.gmra.mxu1 %vm457_vm1, %v422_v4  ;;  %16496 = vmatprep.mubr.msk.f32.mxu0 %vm457_vm1, %v359_v5  ;;  %v453_v4 = vld [vmem:[%s18268_s26 + $0x4e9] sm:$0xff]  ;;  %v390_v5 = vld [vmem:[%s18268_s26 + $0x271] sm:$0xff] }
  0x51   : > { %16592 = vmatprep.mubr.msk.f32.mxu1 %vm457_vm1, %v423_v6  ;;  %v454_v6 = vld [vmem:[%s18268_s26 + $0x4f1] sm:$0xff] }
  0x53   : > { %16497 = vmatmul.mubr.msk.f32.gmra.mxu0 %vm457_vm1, %v360_v7  ;;  %v198_v7 = vld [vmem:[%s18268_s26] sm:$0xff] }
  0x54   : > { %16593 = vmatmul.mubr.msk.f32.gmra.mxu1 %vm457_vm1, %v424_v8  ;;  %16499 = vmatprep.mubr.msk.f32.mxu0 %vm457_vm1, %v361_v10  ;;  %v2643_v8 = vld [vmem:[%s18268_s26 + $0x2] sm:$0xff] }
  0x55   : > { %16595 = vmatprep.mubr.msk.f32.mxu1 %vm457_vm1, %v425_v11  ;;  %v199_v10 = vld [vmem:[%s18268_s26 + $0x8] sm:$0xff] }
  0x56   : > { %v2644_v11 = vld [vmem:[%s18268_s26 + $0xa] sm:$0xff] }
  0x57   : > { %16500 = vmatmul.mubr.msk.f32.gmra.mxu0 %vm457_vm1, %v362_v12  ;;  %v200_v12 = vld [vmem:[%s18268_s26 + $0x10] sm:$0xff] }
  0x58   : > { %16596 = vmatmul.mubr.msk.f32.gmra.mxu1 %vm457_vm1, %v426_v13  ;;  %16502 = vmatprep.mubr.msk.f32.mxu0 %vm457_vm1, %v363_v14  ;;  %v2645_v13 = vld [vmem:[%s18268_s26 + $0x12] sm:$0xff] }
  0x59   : > { %16598 = vmatprep.mubr.msk.f32.mxu1 %vm457_vm1, %v427_v15  ;;  %v201_v14 = vld [vmem:[%s18268_s26 + $0x18] sm:$0xff] }
  0x5a   : > { %v2646_v15 = vld [vmem:[%s18268_s26 + $0x1a] sm:$0xff] }
  0x5b   : > { %16503 = vmatmul.mubr.msk.f32.gmra.mxu0 %vm457_vm1, %v364_v16  ;;  %v202_v16 = vld [vmem:[%s18268_s26 + $0x28] sm:$0xff] }
  0x5c   : > { %16599 = vmatmul.mubr.msk.f32.gmra.mxu1 %vm457_vm1, %v428_v17  ;;  %16505 = vmatprep.mubr.msk.f32.mxu0 %vm457_vm1, %v365_v18  ;;  %v2647_v17 = vld [vmem:[%s18268_s26 + $0x2a] sm:$0xff]  ;;  %v204_v18 = vld [vmem:[%s18268_s26 + $0x38] sm:$0xff] }
  0x5d   : > { %16601 = vmatprep.mubr.msk.f32.mxu1 %vm457_vm1, %v429_v19  ;;  %v2649_v19 = vld [vmem:[%s18268_s26 + $0x3a] sm:$0xff] }
  0x5f   : > { %16506 = vmatmul.mubr.msk.f32.gmra.mxu0 %vm457_vm1, %v366_v20  ;;  %v205_v20 = vld [vmem:[%s18268_s26 + $0x40] sm:$0xff] }
  0x60   : > { %16602 = vmatmul.mubr.msk.f32.gmra.mxu1 %vm457_vm1, %v430_v21  ;;  %16508 = vmatprep.mubr.msk.f32.mxu0 %vm457_vm1, %v367_v22  ;;  %v2650_v21 = vld [vmem:[%s18268_s26 + $0x42] sm:$0xff]  ;;  %v206_v22 = vld [vmem:[%s18268_s26 + $0x50] sm:$0xff] }
  0x61   : > { %16604 = vmatprep.mubr.msk.f32.mxu1 %vm457_vm1, %v431_v23  ;;  %v2651_v23 = vld [vmem:[%s18268_s26 + $0x52] sm:$0xff] }
  0x63   : > { %16509 = vmatmul.mubr.msk.f32.gmra.mxu0 %vm457_vm1, %v368_v24  ;;  %v207_v24 = vld [vmem:[%s18268_s26 + $0x58] sm:$0xff] }
  0x64   : > { %16605 = vmatmul.mubr.msk.f32.gmra.mxu1 %vm457_vm1, %v432_v25  ;;  %16511 = vmatprep.mubr.msk.f32.mxu0 %vm457_vm1, %v369_v26  ;;  %v2652_v25 = vld [vmem:[%s18268_s26 + $0x5a] sm:$0xff] }
  0x65   : > { %16607 = vmatprep.mubr.msk.f32.mxu1 %vm457_vm1, %v433_v27  ;;  %v208_v26 = vld [vmem:[%s18268_s26 + $0x60] sm:$0xff] }
  0x66   : > { %v2653_v27 = vld [vmem:[%s18268_s26 + $0x62] sm:$0xff] }
  0x67   : > { %16512 = vmatmul.mubr.msk.f32.gmra.mxu0 %vm457_vm1, %v370_v28  ;;  %v209_v28 = vld [vmem:[%s18268_s26 + $0x68] sm:$0xff] }
  0x68   : > { %16608 = vmatmul.mubr.msk.f32.gmra.mxu1 %vm457_vm1, %v434_v29  ;;  %16514 = vmatprep.mubr.msk.f32.mxu0 %vm457_vm1, %v371_v30  ;;  %v2654_v29 = vld [vmem:[%s18268_s26 + $0x6a] sm:$0xff]  ;;  %v210_v30 = vld [vmem:[%s18268_s26 + $0x78] sm:$0xff] }
  0x69   : > { %16610 = vmatprep.mubr.msk.f32.mxu1 %vm457_vm1, %v435_v31  ;;  %v2655_v31 = vld [vmem:[%s18268_s26 + $0x7a] sm:$0xff] }
  0x6b   : > { %16515 = vmatmul.mubr.msk.f32.gmra.mxu0 %vm457_vm1, %v372_v32  ;;  %v211_v32 = vld [vmem:[%s18268_s26 + $0x80] sm:$0xff] }
  0x6c   : > { %16611 = vmatmul.mubr.msk.f32.gmra.mxu1 %vm457_vm1, %v436_v33  ;;  %16517 = vmatprep.mubr.msk.f32.mxu0 %vm457_vm1, %v373_v34  ;;  %v2656_v33 = vld [vmem:[%s18268_s26 + $0x82] sm:$0xff] }
  0x6d   : > { %16613 = vmatprep.mubr.msk.f32.mxu1 %vm457_vm1, %v437_v35  ;;  %v212_v34 = vld [vmem:[%s18268_s26 + $0x88] sm:$0xff] }
  0x6e   : > { %v2657_v35 = vld [vmem:[%s18268_s26 + $0x8a] sm:$0xff] }
  0x6f   : > { %16518 = vmatmul.mubr.msk.f32.gmra.mxu0 %vm457_vm1, %v374_v36  ;;  %v213_v36 = vld [vmem:[%s18268_s26 + $0x90] sm:$0xff] }
  0x70   : > { %16614 = vmatmul.mubr.msk.f32.gmra.mxu1 %vm457_vm1, %v438_v37  ;;  %16520 = vmatprep.mubr.msk.f32.mxu0 %vm457_vm1, %v375_v38  ;;  %v2658_v37 = vld [vmem:[%s18268_s26 + $0x92] sm:$0xff]  ;;  %v214_v38 = vld [vmem:[%s18268_s26 + $0xa0] sm:$0xff] }
  0x71   : > { %16616 = vmatprep.mubr.msk.f32.mxu1 %vm457_vm1, %v439_v39  ;;  %v2659_v39 = vld [vmem:[%s18268_s26 + $0xa2] sm:$0xff] }
  0x73   : > { %16521 = vmatmul.mubr.msk.f32.gmra.mxu0 %vm457_vm1, %v376_v40  ;;  %v215_v40 = vld [vmem:[%s18268_s26 + $0xa8] sm:$0xff] }
  0x74   : > { %16617 = vmatmul.mubr.msk.f32.gmra.mxu1 %vm457_vm1, %v440_v41  ;;  %16523 = vmatprep.mubr.msk.f32.mxu0 %vm457_vm1, %v377_v42  ;;  %v2660_v41 = vld [vmem:[%s18268_s26 + $0xaa] sm:$0xff] }
  0x75   : > { %16619 = vmatprep.mubr.msk.f32.mxu1 %vm457_vm1, %v441_v43  ;;  %v216_v42 = vld [vmem:[%s18268_s26 + $0xb0] sm:$0xff] }
  0x76   : > { %v2661_v43 = vld [vmem:[%s18268_s26 + $0xb2] sm:$0xff] }
  0x77   : > { %16524 = vmatmul.mubr.msk.f32.gmra.mxu0 %vm457_vm1, %v378_v44  ;;  %v217_v44 = vld [vmem:[%s18268_s26 + $0xb8] sm:$0xff] }
  0x78   : > { %16620 = vmatmul.mubr.msk.f32.gmra.mxu1 %vm457_vm1, %v442_v45  ;;  %16526 = vmatprep.mubr.msk.f32.mxu0 %vm457_vm1, %v379_v46  ;;  %v2662_v45 = vld [vmem:[%s18268_s26 + $0xba] sm:$0xff]  ;;  %v218_v46 = vld [vmem:[%s18268_s26 + $0xc8] sm:$0xff] }
  0x79   : > { %16622 = vmatprep.mubr.msk.f32.mxu1 %vm457_vm1, %v443_v47  ;;  %v2663_v47 = vld [vmem:[%s18268_s26 + $0xca] sm:$0xff] }
  0x7b   : > { %16527 = vmatmul.mubr.msk.f32.gmra.mxu0 %vm457_vm1, %v380_v48  ;;  %v219_v48 = vld [vmem:[%s18268_s26 + $0xd0] sm:$0xff] }
  0x7c   : > { %16623 = vmatmul.mubr.msk.f32.gmra.mxu1 %vm457_vm1, %v444_v49  ;;  %16529 = vmatprep.mubr.msk.f32.mxu0 %vm457_vm1, %v381_v50  ;;  %v2664_v49 = vld [vmem:[%s18268_s26 + $0xd2] sm:$0xff] }
  0x7d   : > { %16625 = vmatprep.mubr.msk.f32.mxu1 %vm457_vm1, %v445_v51  ;;  %v220_v50 = vld [vmem:[%s18268_s26 + $0xd8] sm:$0xff] }
  0x7e   : > { %v2665_v51 = vld [vmem:[%s18268_s26 + $0xda] sm:$0xff] }
  0x7f   : > { %16530 = vmatmul.mubr.msk.f32.gmra.mxu0 %vm457_vm1, %v382_v52  ;;  %v221_v52 = vld [vmem:[%s18268_s26 + $0xe0] sm:$0xff] }
  0x80   : > { %16626 = vmatmul.mubr.msk.f32.gmra.mxu1 %vm457_vm1, %v446_v53  ;;  %16532 = vmatprep.mubr.msk.f32.mxu0 %vm457_vm1, %v383_v55  ;;  %v2666_v53 = vld [vmem:[%s18268_s26 + $0xe2] sm:$0xff]  ;;  %v222_v55 = vld [vmem:[%s18268_s26 + $0xf0] sm:$0xff] }
  0x81   : > { %16628 = vmatprep.mubr.msk.f32.mxu1 %vm457_vm1, %v447_v56  ;;  %v2667_v56 = vld [vmem:[%s18268_s26 + $0xf2] sm:$0xff] }
  0x83   : > { %16533 = vmatmul.mubr.msk.f32.gmra.mxu0 %vm457_vm1, %v384_v57  ;;  %v223_v57 = vld [vmem:[%s18268_s26 + $0xf8] sm:$0xff] }
  0x84   : > { %16629 = vmatmul.mubr.msk.f32.gmra.mxu1 %vm457_vm1, %v448_v58  ;;  %16535 = vmatprep.mubr.msk.f32.mxu0 %vm457_vm1, %v385_v59  ;;  %v2668_v58 = vld [vmem:[%s18268_s26 + $0xfa] sm:$0xff] }
  0x85   : > { %16631 = vmatprep.mubr.msk.f32.mxu1 %vm457_vm1, %v449_v60  ;;  %v224_v59 = vld [vmem:[%s18268_s26 + $0x100] sm:$0xff] }
  0x86   : > { %v2669_v60 = vld [vmem:[%s18268_s26 + $0x102] sm:$0xff] }
  0x87   : > { %16536 = vmatmul.mubr.msk.f32.gmra.mxu0 %vm457_vm1, %v386_v61  ;;  %v225_v61 = vld [vmem:[%s18268_s26 + $0x108] sm:$0xff] }
  0x88   : > { %16632 = vmatmul.mubr.msk.f32.gmra.mxu1 %vm457_vm1, %v450_v62  ;;  %16538 = vmatprep.mubr.msk.f32.mxu0 %vm457_vm1, %v387_v63  ;;  %v2670_v62 = vld [vmem:[%s18268_s26 + $0x10a] sm:$0xff]  ;;  %v226_v63 = vld [vmem:[%s18268_s26 + $0x118] sm:$0xff] }
  0x89   : > { %16634 = vmatprep.mubr.msk.f32.mxu1 %vm457_vm1, %v451_v0  ;;  %v2671_v0 = vld [vmem:[%s18268_s26 + $0x11a] sm:$0xff] }
  0x8b   : > { %16539 = vmatmul.mubr.msk.f32.gmra.mxu0 %vm457_vm1, %v388_v1  ;;  %v227_v1 = vld [vmem:[%s18268_s26 + $0x120] sm:$0xff] }
  0x8c   : > { %16635 = vmatmul.mubr.msk.f32.gmra.mxu1 %vm457_vm1, %v452_v2  ;;  %16541 = vmatprep.mubr.msk.f32.mxu0 %vm457_vm1, %v389_v3  ;;  %v2672_v2 = vld [vmem:[%s18268_s26 + $0x122] sm:$0xff] }
  0x8d   : > { %16637 = vmatprep.mubr.msk.f32.mxu1 %vm457_vm1, %v453_v4  ;;  %v228_v3 = vld [vmem:[%s18268_s26 + $0x128] sm:$0xff] }
  0x8e   : > { %v2673_v4 = vld [vmem:[%s18268_s26 + $0x12a] sm:$0xff] }
  0x8f   : > { %16542 = vmatmul.mubr.msk.f32.gmra.mxu0 %vm457_vm1, %v390_v5  ;;  %v229_v5 = vld [vmem:[%s18268_s26 + $0x130] sm:$0xff] }
  0x90   : > { %16638 = vmatmul.mubr.msk.f32.gmra.mxu1 %vm457_vm1, %v454_v6  ;;  %16836 = vmatprep.mubr.msk.f32.mxu0 %vm457_vm1, %v2643_v8  ;;  %v2674_v6 = vld [vmem:[%s18268_s26 + $0x132] sm:$0xff]  ;;  %v2675_v8 = vld [vmem:[%s18268_s26 + $0x142] sm:$0xff] }
  0x91   : > { %16642 = vmatprep.mubr.msk.f32.mxu1 %vm457_vm1, %v198_v7  ;;  %v230_v7 = vld [vmem:[%s18268_s26 + $0x140] sm:$0xff] }
  0x93   : > { %16837 = vmatmul.mubr.msk.f32.vlgmr.msra.gmra.mxu0 %vm457_vm1, %v2644_v11  ;;  %v2676_v11 = vld [vmem:[%s18268_s26 + $0x14a] sm:$0xff] }
  0x94   : > { %16643 = vmatmul.mubr.msk.f32.vlgmr.msra.gmra.mxu1 %vm457_vm1, %v199_v10  ;;  %17223 = vmatpush3.msk.msra.mxu0 %vm842_vm0, %v18378_v54  ;;  %v2648_v54 = vld [vmem:[%s18268_s26 + $0x32] sm:$0xff]  ;;  %v231_v10 = vld [vmem:[%s18268_s26 + $0x148] sm:$0xff] }
  0x95   : > { %17029 = vmatpush3.msk.msra.mxu1 %vm842_vm0, %v18283_v9  ;;  %16645 = vmatprep.mubr.msk.f32.mxu1 %vm457_vm1, %v200_v12  ;;  %v203_v9 = vld [vmem:[%s18268_s26 + $0x30] sm:$0xff] }
  0x96   : > { %16839 = vmatprep.mubr.msk.f32.mxu0 %vm457_vm1, %v2645_v13  ;;  %v232_v12 = vld [vmem:[%s18268_s26 + $0x150] sm:$0xff] }
  0x97   : > { %16840 = vmatmul.mubr.msk.f32.gmra.mxu0 %vm457_vm1, %v2646_v15  ;;  %v2677_v13 = vld [vmem:[%s18268_s26 + $0x152] sm:$0xff] }
  0x98   : > { %16646 = vmatmul.mubr.msk.f32.gmra.mxu1 %vm457_vm1, %v201_v14  ;;  %16842 = vmatprep.mubr.msk.f32.mxu0 %vm457_vm1, %v2647_v17  ;;  %v2678_v17 = vld [vmem:[%s18268_s26 + $0x15a] sm:$0xff] }
  0x99   : > { %16648 = vmatprep.mubr.msk.f32.mxu1 %vm457_vm1, %v202_v16  ;;  %v233_v16 = vld [vmem:[%s18268_s26 + $0x158] sm:$0xff] }
  0x9b   : > { %16843 = vmatmul.mubr.msk.f32.gmra.mxu0 %vm457_vm1, %v2648_v54 }
  0x9c   : > { %16649 = vmatmul.mubr.msk.f32.gmra.mxu1 %vm457_vm1, %v203_v9  ;;  %16845 = vmatprep.mubr.msk.f32.mxu0 %vm457_vm1, %v2649_v19  ;;  %v2679_v19 = vld [vmem:[%s18268_s26 + $0x16a] sm:$0xff] }
  0x9d   : > { %16651 = vmatprep.mubr.msk.f32.mxu1 %vm457_vm1, %v204_v18  ;;  %v234_v18 = vld [vmem:[%s18268_s26 + $0x168] sm:$0xff] }
  0x9f   : > { %16846 = vmatmul.mubr.msk.f32.gmra.mxu0 %vm457_vm1, %v2650_v21 }
  0xa0   : > { %16652 = vmatmul.mubr.msk.f32.gmra.mxu1 %vm457_vm1, %v205_v20  ;;  %16848 = vmatprep.mubr.msk.f32.mxu0 %vm457_vm1, %v2651_v23  ;;  %v2680_v23 = vld [vmem:[%s18268_s26 + $0x172] sm:$0xff] }
  0xa1   : > { %16654 = vmatprep.mubr.msk.f32.mxu1 %vm457_vm1, %v206_v22  ;;  %v235_v22 = vld [vmem:[%s18268_s26 + $0x170] sm:$0xff] }
  0xa3   : > { %16849 = vmatmul.mubr.msk.f32.gmra.mxu0 %vm457_vm1, %v2652_v25 }
  0xa4   : > { %16655 = vmatmul.mubr.msk.f32.gmra.mxu1 %vm457_vm1, %v207_v24  ;;  %16851 = vmatprep.mubr.msk.f32.mxu0 %vm457_vm1, %v2653_v27  ;;  %v2681_v27 = vld [vmem:[%s18268_s26 + $0x17a] sm:$0xff] }
  0xa5   : > { %16657 = vmatprep.mubr.msk.f32.mxu1 %vm457_vm1, %v208_v26  ;;  %v236_v26 = vld [vmem:[%s18268_s26 + $0x178] sm:$0xff] }
  0xa7   : > { %16852 = vmatmul.mubr.msk.f32.gmra.mxu0 %vm457_vm1, %v2654_v29 }
  0xa8   : > { %16658 = vmatmul.mubr.msk.f32.gmra.mxu1 %vm457_vm1, %v209_v28  ;;  %16854 = vmatprep.mubr.msk.f32.mxu0 %vm457_vm1, %v2655_v31  ;;  %v2682_v31 = vld [vmem:[%s18268_s26 + $0x182] sm:$0xff] }
  0xa9   : > { %16660 = vmatprep.mubr.msk.f32.mxu1 %vm457_vm1, %v210_v30  ;;  %v237_v30 = vld [vmem:[%s18268_s26 + $0x180] sm:$0xff] }
  0xab   : > { %16855 = vmatmul.mubr.msk.f32.gmra.mxu0 %vm457_vm1, %v2656_v33 }
  0xac   : > { %16661 = vmatmul.mubr.msk.f32.gmra.mxu1 %vm457_vm1, %v211_v32  ;;  %16857 = vmatprep.mubr.msk.f32.mxu0 %vm457_vm1, %v2657_v35  ;;  %v2683_v35 = vld [vmem:[%s18268_s26 + $0x192] sm:$0xff] }
  0xad   : > { %16663 = vmatprep.mubr.msk.f32.mxu1 %vm457_vm1, %v212_v34  ;;  %v238_v34 = vld [vmem:[%s18268_s26 + $0x190] sm:$0xff] }
  0xaf   : > { %16858 = vmatmul.mubr.msk.f32.gmra.mxu0 %vm457_vm1, %v2658_v37 }
  0xb0   : > { %16664 = vmatmul.mubr.msk.f32.gmra.mxu1 %vm457_vm1, %v213_v36  ;;  %16860 = vmatprep.mubr.msk.f32.mxu0 %vm457_vm1, %v2659_v39  ;;  %v2684_v39 = vld [vmem:[%s18268_s26 + $0x19a] sm:$0xff] }
  0xb1   : > { %16666 = vmatprep.mubr.msk.f32.mxu1 %vm457_vm1, %v214_v38  ;;  %v239_v38 = vld [vmem:[%s18268_s26 + $0x198] sm:$0xff] }
  0xb3   : > { %16861 = vmatmul.mubr.msk.f32.gmra.mxu0 %vm457_vm1, %v2660_v41 }
  0xb4   : > { %16667 = vmatmul.mubr.msk.f32.gmra.mxu1 %vm457_vm1, %v215_v40  ;;  %16863 = vmatprep.mubr.msk.f32.mxu0 %vm457_vm1, %v2661_v43  ;;  %v2685_v43 = vld [vmem:[%s18268_s26 + $0x1a2] sm:$0xff] }
  0xb5   : > { %16669 = vmatprep.mubr.msk.f32.mxu1 %vm457_vm1, %v216_v42  ;;  %v240_v42 = vld [vmem:[%s18268_s26 + $0x1a0] sm:$0xff] }
  0xb7   : > { %16864 = vmatmul.mubr.msk.f32.gmra.mxu0 %vm457_vm1, %v2662_v45 }
  0xb8   : > { %16670 = vmatmul.mubr.msk.f32.gmra.mxu1 %vm457_vm1, %v217_v44  ;;  %16866 = vmatprep.mubr.msk.f32.mxu0 %vm457_vm1, %v2663_v47  ;;  %v2686_v47 = vld [vmem:[%s18268_s26 + $0x1aa] sm:$0xff] }
  0xb9   : > { %16672 = vmatprep.mubr.msk.f32.mxu1 %vm457_vm1, %v218_v46  ;;  %v241_v46 = vld [vmem:[%s18268_s26 + $0x1a8] sm:$0xff] }
  0xbb   : > { %16867 = vmatmul.mubr.msk.f32.gmra.mxu0 %vm457_vm1, %v2664_v49 }
  0xbc   : > { %16673 = vmatmul.mubr.msk.f32.gmra.mxu1 %vm457_vm1, %v219_v48  ;;  %16869 = vmatprep.mubr.msk.f32.mxu0 %vm457_vm1, %v2665_v51  ;;  %v2687_v51 = vld [vmem:[%s18268_s26 + $0x1ba] sm:$0xff] }
  0xbd   : > { %16675 = vmatprep.mubr.msk.f32.mxu1 %vm457_vm1, %v220_v50  ;;  %v242_v50 = vld [vmem:[%s18268_s26 + $0x1b8] sm:$0xff] }
  0xbf   : > { %16870 = vmatmul.mubr.msk.f32.gmra.mxu0 %vm457_vm1, %v2666_v53 }
  0xc0   : > { %16676 = vmatmul.mubr.msk.f32.gmra.mxu1 %vm457_vm1, %v221_v52  ;;  %16872 = vmatprep.mubr.msk.f32.mxu0 %vm457_vm1, %v2667_v56  ;;  %v2688_v56 = vld [vmem:[%s18268_s26 + $0x1c2] sm:$0xff] }
  0xc1   : > { %16678 = vmatprep.mubr.msk.f32.mxu1 %vm457_vm1, %v222_v55  ;;  %v243_v55 = vld [vmem:[%s18268_s26 + $0x1c0] sm:$0xff] }
  0xc3   : > { %16873 = vmatmul.mubr.msk.f32.gmra.mxu0 %vm457_vm1, %v2668_v58 }
  0xc4   : > { %16679 = vmatmul.mubr.msk.f32.gmra.mxu1 %vm457_vm1, %v223_v57  ;;  %16875 = vmatprep.mubr.msk.f32.mxu0 %vm457_vm1, %v2669_v60  ;;  %v2689_v60 = vld [vmem:[%s18268_s26 + $0x1ca] sm:$0xff] }
  0xc5   : > { %16681 = vmatprep.mubr.msk.f32.mxu1 %vm457_vm1, %v224_v59  ;;  %v244_v59 = vld [vmem:[%s18268_s26 + $0x1c8] sm:$0xff] }
  0xc7   : > { %16876 = vmatmul.mubr.msk.f32.gmra.mxu0 %vm457_vm1, %v2670_v62 }
  0xc8   : > { %16682 = vmatmul.mubr.msk.f32.gmra.mxu1 %vm457_vm1, %v225_v61  ;;  %16878 = vmatprep.mubr.msk.f32.mxu0 %vm457_vm1, %v2671_v0  ;;  %v2690_v0 = vld [vmem:[%s18268_s26 + $0x1d2] sm:$0xff] }
  0xc9   : > { %16684 = vmatprep.mubr.msk.f32.mxu1 %vm457_vm1, %v226_v63  ;;  %v245_v63 = vld [vmem:[%s18268_s26 + $0x1d0] sm:$0xff] }
  0xcb   : > { %16879 = vmatmul.mubr.msk.f32.gmra.mxu0 %vm457_vm1, %v2672_v2 }
  0xcc   : > { %16685 = vmatmul.mubr.msk.f32.gmra.mxu1 %vm457_vm1, %v227_v1  ;;  %16881 = vmatprep.mubr.msk.f32.mxu0 %vm457_vm1, %v2673_v4  ;;  %v2691_v4 = vld [vmem:[%s18268_s26 + $0x1e2] sm:$0xff] }
  0xcd   : > { %16687 = vmatprep.mubr.msk.f32.mxu1 %vm457_vm1, %v228_v3  ;;  %v246_v3 = vld [vmem:[%s18268_s26 + $0x1e0] sm:$0xff] }
  0xcf   : > { %16882 = vmatmul.mubr.msk.f32.gmra.mxu0 %vm457_vm1, %v2674_v6 }
  0xd0   : > { %16688 = vmatmul.mubr.msk.f32.gmra.mxu1 %vm457_vm1, %v229_v5  ;;  %16884 = vmatprep.mubr.msk.f32.mxu0 %vm457_vm1, %v2675_v8  ;;  %v2692_v8 = vld [vmem:[%s18268_s26 + $0x1ea] sm:$0xff] }
  0xd1   : > { %16690 = vmatprep.mubr.msk.f32.mxu1 %vm457_vm1, %v230_v7  ;;  %v247_v7 = vld [vmem:[%s18268_s26 + $0x1e8] sm:$0xff] }
  0xd3   : > { %v18682_v14 = vpop.f32.mrf.mxu0  ;;  %16885 = vmatmul.mubr.msk.f32.gmra.mxu0 %vm457_vm1, %v2676_v11 }
  0xd4   : > { %v18684_v15 = vpop.f32.mrf.mxu1  ;;  %16691 = vmatmul.mubr.msk.f32.gmra.mxu1 %vm457_vm1, %v231_v10  ;;  %16887 = vmatprep.mubr.msk.f32.mxu0 %vm457_vm1, %v2677_v13  ;;  %v2693_v13 = vld [vmem:[%s18268_s26 + $0x1f2] sm:$0xff] }
  0xd5   : > { %24598 = vst [vmem:[#allocation2_spill] sm:$0xff] %v18684_v15  ;;  %16693 = vmatprep.mubr.msk.f32.mxu1 %vm457_vm1, %v232_v12  ;;  %v18692_v9 = vpop.f32.mrf.mxu0  ;;  %v248_v12 = vld [vmem:[%s18268_s26 + $0x1f0] sm:$0xff] }
  0xd6   : > { %v18694_v54 = vpop.f32.mrf.mxu1 }
  0xd7   : > { %24599 = vst [vmem:[#allocation3_spill] sm:$0xff] %v18694_v54  ;;  %v18698_v20 = vpop.f32.mrf.mxu0  ;;  %16888 = vmatmul.mubr.msk.f32.gmra.mxu0 %vm457_vm1, %v2678_v17  ;;  %v284_v54 = vld [vmem:[%s18268_s26 + $0x358] sm:$0xff] }
  0xd8   : > { %v18700_v21 = vpop.f32.mrf.mxu1  ;;  %16694 = vmatmul.mubr.msk.f32.gmra.mxu1 %vm457_vm1, %v233_v16  ;;  %16890 = vmatprep.mubr.msk.f32.mxu0 %vm457_vm1, %v2679_v19  ;;  %v2694_v19 = vld [vmem:[%s18268_s26 + $0x1fa] sm:$0xff] }
  0xd9   : > { %24600 = vst [vmem:[#allocation4_spill] sm:$0xff] %v18700_v21  ;;  %16696 = vmatprep.mubr.msk.f32.mxu1 %vm457_vm1, %v234_v18  ;;  %v18708_v24 = vpop.f32.mrf.mxu0  ;;  %v249_v18 = vld [vmem:[%s18268_s26 + $0x1f8] sm:$0xff] }
  0xda   : > { %v18710_v25 = vpop.f32.mrf.mxu1 }
  0xdb   : > { %24601 = vst [vmem:[#allocation5_spill] sm:$0xff] %v18710_v25  ;;  %v18714_v28 = vpop.f32.mrf.mxu0  ;;  %16891 = vmatmul.mubr.msk.f32.gmra.mxu0 %vm457_vm1, %v2680_v23  ;;  %v282_v25 = vld [vmem:[%s18268_s26 + $0x348] sm:$0xff] }
  0xdc   : > { %v18716_v29 = vpop.f32.mrf.mxu1  ;;  %16697 = vmatmul.mubr.msk.f32.gmra.mxu1 %vm457_vm1, %v235_v22  ;;  %16893 = vmatprep.mubr.msk.f32.mxu0 %vm457_vm1, %v2681_v27  ;;  %v2695_v27 = vld [vmem:[%s18268_s26 + $0x20a] sm:$0xff] }
  0xdd   : > { %24602 = vst [vmem:[#allocation6_spill] sm:$0xff] %v18716_v29  ;;  %16699 = vmatprep.mubr.msk.f32.mxu1 %vm457_vm1, %v236_v26  ;;  %v18724_v32 = vpop.f32.mrf.mxu0  ;;  %v250_v26 = vld [vmem:[%s18268_s26 + $0x208] sm:$0xff] }
  0xde   : > { %v18726_v33 = vpop.f32.mrf.mxu1 }
  0xdf   : > { %24603 = vst [vmem:[#allocation7_spill] sm:$0xff] %v18726_v33  ;;  %v18730_v36 = vpop.f32.mrf.mxu0  ;;  %16894 = vmatmul.mubr.msk.f32.gmra.mxu0 %vm457_vm1, %v2682_v31  ;;  %v280_v33 = vld [vmem:[%s18268_s26 + $0x330] sm:$0xff] }
  0xe0   : > { %v18732_v37 = vpop.f32.mrf.mxu1  ;;  %16700 = vmatmul.mubr.msk.f32.gmra.mxu1 %vm457_vm1, %v237_v30  ;;  %16896 = vmatprep.mubr.msk.f32.mxu0 %vm457_vm1, %v2683_v35  ;;  %v2696_v35 = vld [vmem:[%s18268_s26 + $0x212] sm:$0xff] }
  0xe1   : > { %24604 = vst [vmem:[#allocation8_spill] sm:$0xff] %v18732_v37  ;;  %16702 = vmatprep.mubr.msk.f32.mxu1 %vm457_vm1, %v238_v34  ;;  %v18740_v40 = vpop.f32.mrf.mxu0  ;;  %v251_v34 = vld [vmem:[%s18268_s26 + $0x210] sm:$0xff] }
  0xe2   : > { %v18742_v41 = vpop.f32.mrf.mxu1 }
  0xe3   : > { %24605 = vst [vmem:[#allocation9_spill] sm:$0xff] %v18742_v41  ;;  %v18746_v44 = vpop.f32.mrf.mxu0  ;;  %16897 = vmatmul.mubr.msk.f32.gmra.mxu0 %vm457_vm1, %v2684_v39  ;;  %v278_v41 = vld [vmem:[%s18268_s26 + $0x320] sm:$0xff] }
  0xe4   : > { %v18748_v45 = vpop.f32.mrf.mxu1  ;;  %16703 = vmatmul.mubr.msk.f32.gmra.mxu1 %vm457_vm1, %v239_v38  ;;  %16899 = vmatprep.mubr.msk.f32.mxu0 %vm457_vm1, %v2685_v43  ;;  %v2697_v43 = vld [vmem:[%s18268_s26 + $0x21a] sm:$0xff] }
  0xe5   : > { %24606 = vst [vmem:[#allocation10_spill] sm:$0xff] %v18748_v45  ;;  %16705 = vmatprep.mubr.msk.f32.mxu1 %vm457_vm1, %v240_v42  ;;  %v18756_v48 = vpop.f32.mrf.mxu0  ;;  %v252_v42 = vld [vmem:[%s18268_s26 + $0x218] sm:$0xff] }
  0xe6   : > { %v18758_v49 = vpop.f32.mrf.mxu1 }
  0xe7   : > { %24607 = vst [vmem:[#allocation11_spill] sm:$0xff] %v18758_v49  ;;  %v18762_v52 = vpop.f32.mrf.mxu0  ;;  %16900 = vmatmul.mubr.msk.f32.gmra.mxu0 %vm457_vm1, %v2686_v47  ;;  %v276_v49 = vld [vmem:[%s18268_s26 + $0x308] sm:$0xff] }
  0xe8   : > { %v18764_v53 = vpop.f32.mrf.mxu1  ;;  %16706 = vmatmul.mubr.msk.f32.gmra.mxu1 %vm457_vm1, %v241_v46  ;;  %16902 = vmatprep.mubr.msk.f32.mxu0 %vm457_vm1, %v2687_v51  ;;  %v2698_v51 = vld [vmem:[%s18268_s26 + $0x222] sm:$0xff] }
  0xe9   : > { %24608 = vst [vmem:[#allocation12_spill] sm:$0xff] %v18764_v53  ;;  %16708 = vmatprep.mubr.msk.f32.mxu1 %vm457_vm1, %v242_v50  ;;  %v18772_v57 = vpop.f32.mrf.mxu0  ;;  %v253_v50 = vld [vmem:[%s18268_s26 + $0x220] sm:$0xff] }
  0xea   : > { %v18774_v58 = vpop.f32.mrf.mxu1 }
  0xeb   : > { %24609 = vst [vmem:[#allocation13_spill] sm:$0xff] %v18774_v58  ;;  %v18778_v61 = vpop.f32.mrf.mxu0  ;;  %16903 = vmatmul.mubr.msk.f32.gmra.mxu0 %vm457_vm1, %v2688_v56  ;;  %v274_v58 = vld [vmem:[%s18268_s26 + $0x2f8] sm:$0xff] }
  0xec   : > { %v18780_v62 = vpop.f32.mrf.mxu1  ;;  %16709 = vmatmul.mubr.msk.f32.gmra.mxu1 %vm457_vm1, %v243_v55  ;;  %16905 = vmatprep.mubr.msk.f32.mxu0 %vm457_vm1, %v2689_v60  ;;  %v2699_v60 = vld [vmem:[%s18268_s26 + $0x232] sm:$0xff] }
  0xed   : > { %24610 = vst [vmem:[#allocation14_spill] sm:$0xff] %v18780_v62  ;;  %16711 = vmatprep.mubr.msk.f32.mxu1 %vm457_vm1, %v244_v59  ;;  %v18788_v1 = vpop.f32.mrf.mxu0  ;;  %v254_v59 = vld [vmem:[%s18268_s26 + $0x230] sm:$0xff] }
  0xee   : > { %v18790_v2 = vpop.f32.mrf.mxu1 }
  0xef   : > { %24611 = vst [vmem:[#allocation15_spill] sm:$0xff] %v18790_v2  ;;  %v18794_v5 = vpop.f32.mrf.mxu0  ;;  %16906 = vmatmul.mubr.msk.f32.gmra.mxu0 %vm457_vm1, %v2690_v0  ;;  %v272_v2 = vld [vmem:[%s18268_s26 + $0x2e0] sm:$0xff] }
  0xf0   : > { %v18796_v6 = vpop.f32.mrf.mxu1  ;;  %16712 = vmatmul.mubr.msk.f32.gmra.mxu1 %vm457_vm1, %v245_v63  ;;  %16908 = vmatprep.mubr.msk.f32.mxu0 %vm457_vm1, %v2691_v4  ;;  %v2700_v4 = vld [vmem:[%s18268_s26 + $0x23a] sm:$0xff] }
  0xf1   : > { %24612 = vst [vmem:[#allocation16_spill] sm:$0xff] %v18796_v6  ;;  %16714 = vmatprep.mubr.msk.f32.mxu1 %vm457_vm1, %v246_v3  ;;  %v18804_v10 = vpop.f32.mrf.mxu0  ;;  %v255_v3 = vld [vmem:[%s18268_s26 + $0x238] sm:$0xff] }
  0xf2   : > { %v18806_v11 = vpop.f32.mrf.mxu1 }
  0xf3   : > { %24613 = vst [vmem:[#allocation17_spill] sm:$0xff] %v18806_v11  ;;  %v18810_v16 = vpop.f32.mrf.mxu0  ;;  %16909 = vmatmul.mubr.msk.f32.gmra.mxu0 %vm457_vm1, %v2692_v8  ;;  %v270_v11 = vld [vmem:[%s18268_s26 + $0x2d0] sm:$0xff] }
  0xf4   : > { %v18812_v17 = vpop.f32.mrf.mxu1  ;;  %16715 = vmatmul.mubr.msk.f32.gmra.mxu1 %vm457_vm1, %v247_v7  ;;  %16911 = vmatprep.mubr.msk.f32.mxu0 %vm457_vm1, %v2693_v13  ;;  %v2701_v13 = vld [vmem:[%s18268_s26 + $0x242] sm:$0xff] }
  0xf5   : > { %24614 = vst [vmem:[#allocation18_spill] sm:$0xff] %v18812_v17  ;;  %16717 = vmatprep.mubr.msk.f32.mxu1 %vm457_vm1, %v248_v12  ;;  %v18820_v22 = vpop.f32.mrf.mxu0  ;;  %v256_v12 = vld [vmem:[%s18268_s26 + $0x240] sm:$0xff] }
  0xf6   : > { %v18822_v23 = vpop.f32.mrf.mxu1 }
  0xf7   : > { %24615 = vst [vmem:[#allocation19_spill] sm:$0xff] %v18822_v23  ;;  %v18826_v30 = vpop.f32.mrf.mxu0  ;;  %16912 = vmatmul.mubr.msk.f32.gmra.mxu0 %vm457_vm1, %v2694_v19  ;;  %v268_v23 = vld [vmem:[%s18268_s26 + $0x2b8] sm:$0xff] }
  0xf8   : > { %v18828_v31 = vpop.f32.mrf.mxu1  ;;  %16718 = vmatmul.mubr.msk.f32.gmra.mxu1 %vm457_vm1, %v249_v18  ;;  %16914 = vmatprep.mubr.msk.f32.mxu0 %vm457_vm1, %v2695_v27  ;;  %v2702_v27 = vld [vmem:[%s18268_s26 + $0x24a] sm:$0xff] }
  0xf9   : > { %24616 = vst [vmem:[#allocation20_spill] sm:$0xff] %v18828_v31  ;;  %16720 = vmatprep.mubr.msk.f32.mxu1 %vm457_vm1, %v250_v26  ;;  %v18836_v38 = vpop.f32.mrf.mxu0  ;;  %v257_v26 = vld [vmem:[%s18268_s26 + $0x248] sm:$0xff] }
  0xfa   : > { %v18838_v39 = vpop.f32.mrf.mxu1 }
  0xfb   : > { %24617 = vst [vmem:[#allocation21_spill] sm:$0xff] %v18838_v39  ;;  %v18842_v46 = vpop.f32.mrf.mxu0  ;;  %16915 = vmatmul.mubr.msk.f32.gmra.mxu0 %vm457_vm1, %v2696_v35 }
  0xfc   : > { %v18844_v47 = vpop.f32.mrf.mxu1  ;;  %16721 = vmatmul.mubr.msk.f32.gmra.mxu1 %vm457_vm1, %v251_v34  ;;  %16917 = vmatprep.mubr.msk.f32.mxu0 %vm457_vm1, %v2697_v43  ;;  %v2703_v43 = vld [vmem:[%s18268_s26 + $0x25a] sm:$0xff] }
  0xfd   : > { %24618 = vst [vmem:[#allocation22_spill] sm:$0xff] %v18844_v47  ;;  %16723 = vmatprep.mubr.msk.f32.mxu1 %vm457_vm1, %v252_v42  ;;  %v18852_v55 = vpop.f32.mrf.mxu0  ;;  %v258_v42 = vld [vmem:[%s18268_s26 + $0x258] sm:$0xff] }
  0xfe   : > { %v18854_v56 = vpop.f32.mrf.mxu1  ;;  %v2712_v47 = vld [vmem:[%s18268_s26 + $0x2b2] sm:$0xff] }
  0xff   : > { %24619 = vst [vmem:[#allocation23_spill] sm:$0xff] %v18854_v56  ;;  %v18858_v63 = vpop.f32.mrf.mxu0  ;;  %16918 = vmatmul.mubr.msk.f32.gmra.mxu0 %vm457_vm1, %v2698_v51 }
 0x100   : > { %v18860_v0 = vpop.f32.mrf.mxu1  ;;  %16724 = vmatmul.mubr.msk.f32.gmra.mxu1 %vm457_vm1, %v253_v50  ;;  %16920 = vmatprep.mubr.msk.f32.mxu0 %vm457_vm1, %v2699_v60  ;;  %v2704_v60 = vld [vmem:[%s18268_s26 + $0x262] sm:$0xff] }
 0x101   : > { %24620 = vst [vmem:[#allocation24_spill] sm:$0xff] %v18860_v0  ;;  %16726 = vmatprep.mubr.msk.f32.mxu1 %vm457_vm1, %v254_v59  ;;  %v18868_v7 = vpop.f32.mrf.mxu0  ;;  %v259_v59 = vld [vmem:[%s18268_s26 + $0x260] sm:$0xff] }
 0x102   : > { %v18870_v8 = vpop.f32.mrf.mxu1 }
 0x103   : > { %24621 = vst [vmem:[#allocation25_spill] sm:$0xff] %v18870_v8  ;;  %v18874_v18 = vpop.f32.mrf.mxu0  ;;  %16921 = vmatmul.mubr.msk.f32.gmra.mxu0 %vm457_vm1, %v2700_v4  ;;  %v264_v8 = vld [vmem:[%s18268_s26 + $0x290] sm:$0xff] }
 0x104   : > { %v18876_v19 = vpop.f32.mrf.mxu1  ;;  %16727 = vmatmul.mubr.msk.f32.gmra.mxu1 %vm457_vm1, %v255_v3  ;;  %16923 = vmatprep.mubr.msk.f32.mxu0 %vm457_vm1, %v2701_v13  ;;  %v2705_v13 = vld [vmem:[%s18268_s26 + $0x26a] sm:$0xff] }
 0x105   : > { %24622 = vst [vmem:[#allocation26_spill] sm:$0xff] %v18876_v19  ;;  %16729 = vmatprep.mubr.msk.f32.mxu1 %vm457_vm1, %v256_v12  ;;  %v18884_v34 = vpop.f32.mrf.mxu0  ;;  %v260_v12 = vld [vmem:[%s18268_s26 + $0x268] sm:$0xff] }
 0x106   : > { %v18886_v35 = vpop.f32.mrf.mxu1 }
 0x107   : > { %24623 = vst [vmem:[#allocation27_spill] sm:$0xff] %v18886_v35  ;;  %v18890_v50 = vpop.f32.mrf.mxu0  ;;  %16924 = vmatmul.mubr.msk.f32.gmra.mxu0 %vm457_vm1, %v2702_v27  ;;  %v261_v27 = vld [vmem:[%s18268_s26 + $0x270] sm:$0xff]  ;;  %v262_v35 = vld [vmem:[%s18268_s26 + $0x280] sm:$0xff] }
 0x108   : > { %v18892_v51 = vpop.f32.mrf.mxu1  ;;  %16730 = vmatmul.mubr.msk.f32.gmra.mxu1 %vm457_vm1, %v257_v26  ;;  %16926 = vmatprep.mubr.msk.f32.mxu0 %vm457_vm1, %v2703_v43 }
 0x109   : > { %24624 = vst [vmem:[#allocation28_spill] sm:$0xff] %v18892_v51  ;;  %16732 = vmatprep.mubr.msk.f32.mxu1 %vm457_vm1, %v258_v42  ;;  %v18900_v3 = vpop.f32.mrf.mxu0  ;;  %v2706_v42 = vld [vmem:[%s18268_s26 + $0x272] sm:$0xff] }
 0x10a   : > { %v18902_v4 = vpop.f32.mrf.mxu1 }
 0x10b   : > { %24625 = vst [vmem:[#allocation29_spill] sm:$0xff] %v18902_v4  ;;  %v18906_v51 = vpop.f32.mrf.mxu0  ;;  %16927 = vmatmul.mubr.msk.f32.gmra.mxu0 %vm457_vm1, %v2704_v60  ;;  %v263_v60 = vld [vmem:[%s18268_s26 + $0x288] sm:$0xff] }
 0x10c   : > { %v18908_v26 = vpop.f32.mrf.mxu1  ;;  %16733 = vmatmul.mubr.msk.f32.gmra.mxu1 %vm457_vm1, %v259_v59  ;;  %16929 = vmatprep.mubr.msk.f32.mxu0 %vm457_vm1, %v2705_v13 }
 0x10d   : > { %24626 = vst [vmem:[#allocation30_spill] sm:$0xff] %v18908_v26  ;;  %16735 = vmatprep.mubr.msk.f32.mxu1 %vm457_vm1, %v260_v12  ;;  %v18916_v43 = vpop.f32.mrf.mxu0  ;;  %v2707_v26 = vld [vmem:[%s18268_s26 + $0x282] sm:$0xff]  ;;  %v2708_v12 = vld [vmem:[%s18268_s26 + $0x28a] sm:$0xff] }
 0x10e   : > { %v18918_v4 = vpop.f32.mrf.mxu1 }
 0x10f   : > { %24627 = vst [vmem:[#allocation31_spill] sm:$0xff] %v18918_v4  ;;  %v18922_v19 = vpop.f32.mrf.mxu0  ;;  %16930 = vmatmul.mubr.msk.f32.gmra.mxu0 %vm457_vm1, %v2706_v42  ;;  %v18951_v42 = vld [vmem:[%s24505_s1 + $0x14] sm:$0xf] }
 0x110   : > { %v18924_v59 = vpop.f32.mrf.mxu1  ;;  %16736 = vmatmul.mubr.msk.f32.gmra.mxu1 %vm457_vm1, %v261_v27  ;;  %16932 = vmatprep.mubr.msk.f32.mxu0 %vm457_vm1, %v2707_v26  ;;  %v2710_v26 = vld [vmem:[%s18268_s26 + $0x29a] sm:$0xff] }
 0x111   : > { %24628 = vst [vmem:[#allocation32_spill] sm:$0xff] %v18924_v59  ;;  %16738 = vmatprep.mubr.msk.f32.mxu1 %vm457_vm1, %v262_v35  ;;  %v18932_v13 = vpop.f32.mrf.mxu0  ;;  %v2709_v59 = vld [vmem:[%s18268_s26 + $0x292] sm:$0xff]  ;;  %17416 = vmatprep.subr.msk.mxu1 %vm842_vm0, %v18951_v42 }
 0x112   : > { %v18934_v4 = vpop.f32.mrf.mxu1  ;;  %v265_v35 = vld [vmem:[%s18268_s26 + $0x298] sm:$0xff] }
 0x113   : > { %24629 = vst [vmem:[#allocation33_spill] sm:$0xff] %v18934_v4  ;;  %v18938_v0 = vpop.f32.mrf.mxu0  ;;  %16933 = vmatmul.mubr.msk.f32.gmra.mxu0 %vm457_vm1, %v2708_v12  ;;  %v2711_v12 = vld [vmem:[%s18268_s26 + $0x2aa] sm:$0xff] }
 0x114   : > { %v18940_v27 = vpop.f32.mrf.mxu1  ;;  %16739 = vmatmul.mubr.msk.f32.gmra.mxu1 %vm457_vm1, %v263_v60  ;;  %16935 = vmatprep.mubr.msk.f32.mxu0 %vm457_vm1, %v2709_v59  ;;  %v266_v60 = vld [vmem:[%s18268_s26 + $0x2a8] sm:$0xff] }
 0x115   : > { %24630 = vst [vmem:[#allocation34_spill] sm:$0xff] %v18940_v27  ;;  %16741 = vmatprep.mubr.msk.f32.mxu1 %vm457_vm1, %v264_v8  ;;  %v18953_v4 = vpop.f32.mrf.mxu0  ;;  %v18964_v8 = vld [vmem:[%s24505_s1 + $0x18] sm:$0xf] }
 0x116   : > { %v18955_v27 = vpop.f32.mrf.mxu1  ;;  %17610 = vmatprep.subr.msk.mxu0 %vm842_vm0, %v18964_v8 }
 0x117   : > { %24631 = vst [vmem:[#allocation35_spill] sm:$0xff] %v18955_v27  ;;  %v18966_v59 = vpop.f32.mrf.mxu0  ;;  %16936 = vmatmul.mubr.msk.f32.gmra.mxu0 %vm457_vm1, %v2710_v26  ;;  %v267_v27 = vld [vmem:[%s18268_s26 + $0x2b0] sm:$0xff] }
 0x118   : > { %v18968_v56 = vpop.f32.mrf.mxu1  ;;  %16742 = vmatmul.mubr.msk.f32.gmra.mxu1 %vm457_vm1, %v265_v35  ;;  %16938 = vmatprep.mubr.msk.f32.mxu0 %vm457_vm1, %v2711_v12  ;;  %v2714_v12 = vld [vmem:[%s18268_s26 + $0x2c2] sm:$0xff] }
 0x119   : > { %24632 = vst [vmem:[#allocation36_spill] sm:$0xff] %v18968_v56  ;;  %16744 = vmatprep.mubr.msk.f32.mxu1 %vm457_vm1, %v266_v60  ;;  %v18976_v39 = vpop.f32.mrf.mxu0  ;;  %v2713_v56 = vld [vmem:[%s18268_s26 + $0x2ba] sm:$0xff] }
 0x11a   : > { %v18978_v31 = vpop.f32.mrf.mxu1  ;;  %v269_v60 = vld [vmem:[%s18268_s26 + $0x2c0] sm:$0xff] }
 0x11b   : > { %24633 = vst [vmem:[#allocation37_spill] sm:$0xff] %v18978_v31  ;;  %v18984_v35 = vpop.f32.mrf.mxu0  ;;  %16939 = vmatmul.mubr.msk.f32.gmra.mxu0 %vm457_vm1, %v2712_v47  ;;  %v2716_v47 = vld [vmem:[%s18268_s26 + $0x2da] sm:$0xff] }
 0x11c   : > { %v18986_v26 = vpop.f32.mrf.mxu1  ;;  %16745 = vmatmul.mubr.msk.f32.gmra.mxu1 %vm457_vm1, %v267_v27  ;;  %16941 = vmatprep.mubr.msk.f32.mxu0 %vm457_vm1, %v2713_v56 }
 0x11d   : > { %24634 = vst [vmem:[#allocation38_spill] sm:$0xff] %v18986_v26  ;;  %16747 = vmatprep.mubr.msk.f32.mxu1 %vm457_vm1, %v268_v23  ;;  %v18994_v31 = vpop.f32.mrf.mxu0  ;;  %v2715_v26 = vld [vmem:[%s18268_s26 + $0x2d2] sm:$0xff] }
 0x11e   : > { %v18996_v17 = vpop.f32.mrf.mxu1  ;;  %v271_v23 = vld [vmem:[%s18268_s26 + $0x2d8] sm:$0xff] }
 0x11f   : > { %24635 = vst [vmem:[#allocation39_spill] sm:$0xff] %v18996_v17  ;;  %v19000_v6 = vpop.f32.mrf.mxu0  ;;  %16942 = vmatmul.mubr.msk.f32.gmra.mxu0 %vm457_vm1, %v2714_v12 }
 0x120   : > { %v19002_v27 = vpop.f32.mrf.mxu1  ;;  %16748 = vmatmul.mubr.msk.f32.gmra.mxu1 %vm457_vm1, %v269_v60  ;;  %16944 = vmatprep.mubr.msk.f32.mxu0 %vm457_vm1, %v2715_v26  ;;  %v2718_v26 = vld [vmem:[%s18268_s26 + $0x2ea] sm:$0xff] }
 0x121   : > { %24636 = vst [vmem:[#allocation40_spill] sm:$0xff] %v19002_v27  ;;  %16750 = vmatprep.mubr.msk.f32.mxu1 %vm457_vm1, %v270_v11  ;;  %v19010_v56 = vpop.f32.mrf.mxu0  ;;  %v2717_v27 = vld [vmem:[%s18268_s26 + $0x2e2] sm:$0xff] }
 0x122   : > { %v19012_v17 = vpop.f32.mrf.mxu1  ;;  %v273_v11 = vld [vmem:[%s18268_s26 + $0x2e8] sm:$0xff] }
 0x123   : > { %24637 = vst [vmem:[#allocation41_spill] sm:$0xff] %v19012_v17  ;;  %v19016_v62 = vpop.f32.mrf.mxu0  ;;  %16945 = vmatmul.mubr.msk.f32.gmra.mxu0 %vm457_vm1, %v2716_v47 }
 0x124   : > { %v19018_v60 = vpop.f32.mrf.mxu1  ;;  %16751 = vmatmul.mubr.msk.f32.gmra.mxu1 %vm457_vm1, %v271_v23  ;;  %16947 = vmatprep.mubr.msk.f32.mxu0 %vm457_vm1, %v2717_v27  ;;  %v2720_v27 = vld [vmem:[%s18268_s26 + $0x302] sm:$0xff] }
 0x125   : > { %24638 = vst [vmem:[#allocation42_spill] sm:$0xff] %v19018_v60  ;;  %16753 = vmatprep.mubr.msk.f32.mxu1 %vm457_vm1, %v272_v2  ;;  %v19026_v12 = vpop.f32.mrf.mxu0  ;;  %v2719_v60 = vld [vmem:[%s18268_s26 + $0x2fa] sm:$0xff] }
 0x126   : > { %v19028_v17 = vpop.f32.mrf.mxu1  ;;  %v275_v2 = vld [vmem:[%s18268_s26 + $0x300] sm:$0xff] }
 0x127   : > { %24639 = vst [vmem:[#allocation43_spill] sm:$0xff] %v19028_v17  ;;  %v19032_v53 = vpop.f32.mrf.mxu0  ;;  %16948 = vmatmul.mubr.msk.f32.gmra.mxu0 %vm457_vm1, %v2718_v26 }
 0x128   : > { %v19034_v23 = vpop.f32.mrf.mxu1  ;;  %16754 = vmatmul.mubr.msk.f32.gmra.mxu1 %vm457_vm1, %v273_v11  ;;  %16950 = vmatprep.mubr.msk.f32.mxu0 %vm457_vm1, %v2719_v60  ;;  %v2722_v60 = vld [vmem:[%s18268_s26 + $0x312] sm:$0xff] }
 0x129   : > { %24640 = vst [vmem:[#allocation44_spill] sm:$0xff] %v19034_v23  ;;  %16756 = vmatprep.mubr.msk.f32.mxu1 %vm457_vm1, %v274_v58  ;;  %v19042_v47 = vpop.f32.mrf.mxu0  ;;  %v2721_v23 = vld [vmem:[%s18268_s26 + $0x30a] sm:$0xff] }
 0x12a   : > { %v19044_v17 = vpop.f32.mrf.mxu1  ;;  %v277_v58 = vld [vmem:[%s18268_s26 + $0x310] sm:$0xff] }
 0x12b   : > { %24641 = vst [vmem:[#allocation45_spill] sm:$0xff] %v19044_v17  ;;  %v19048_v45 = vpop.f32.mrf.mxu0  ;;  %16951 = vmatmul.mubr.msk.f32.gmra.mxu0 %vm457_vm1, %v2720_v27 }
 0x12c   : > { %v19050_v11 = vpop.f32.mrf.mxu1  ;;  %16757 = vmatmul.mubr.msk.f32.gmra.mxu1 %vm457_vm1, %v275_v2  ;;  %16953 = vmatprep.mubr.msk.f32.mxu0 %vm457_vm1, %v2721_v23  ;;  %v2724_v23 = vld [vmem:[%s18268_s26 + $0x32a] sm:$0xff] }
 0x12d   : > { %24642 = vst [vmem:[#allocation46_spill] sm:$0xff] %v19050_v11  ;;  %16759 = vmatprep.mubr.msk.f32.mxu1 %vm457_vm1, %v276_v49  ;;  %v19058_v26 = vpop.f32.mrf.mxu0  ;;  %v2723_v11 = vld [vmem:[%s18268_s26 + $0x322] sm:$0xff] }
 0x12e   : > { %v19060_v17 = vpop.f32.mrf.mxu1  ;;  %v279_v49 = vld [vmem:[%s18268_s26 + $0x328] sm:$0xff] }
 0x12f   : > { %24643 = vst [vmem:[#allocation47_spill] sm:$0xff] %v19060_v17  ;;  %v19064_v37 = vpop.f32.mrf.mxu0  ;;  %16954 = vmatmul.mubr.msk.f32.gmra.mxu0 %vm457_vm1, %v2722_v60 }
 0x130   : > { %v19066_v2 = vpop.f32.mrf.mxu1  ;;  %16760 = vmatmul.mubr.msk.f32.gmra.mxu1 %vm457_vm1, %v277_v58  ;;  %16956 = vmatprep.mubr.msk.f32.mxu0 %vm457_vm1, %v2723_v11  ;;  %v2726_v11 = vld [vmem:[%s18268_s26 + $0x33a] sm:$0xff] }
 0x131   : > { %24644 = vst [vmem:[#allocation48_spill] sm:$0xff] %v19066_v2  ;;  %16762 = vmatprep.mubr.msk.f32.mxu1 %vm457_vm1, %v278_v41  ;;  %v19074_v27 = vpop.f32.mrf.mxu0  ;;  %v2725_v2 = vld [vmem:[%s18268_s26 + $0x332] sm:$0xff] }
 0x132   : > { %v19076_v17 = vpop.f32.mrf.mxu1  ;;  %v281_v41 = vld [vmem:[%s18268_s26 + $0x338] sm:$0xff] }
 0x133   : > { %24645 = vst [vmem:[#allocation49_spill] sm:$0xff] %v19076_v17  ;;  %v19080_v29 = vpop.f32.mrf.mxu0  ;;  %16957 = vmatmul.mubr.msk.f32.gmra.mxu0 %vm457_vm1, %v2724_v23 }
 0x134   : > { %24646 = vst [vmem:[#allocation50_spill] sm:$0xff] %v19080_v29  ;;  %v19082_v58 = vpop.f32.mrf.mxu1  ;;  %16763 = vmatmul.mubr.msk.f32.gmra.mxu1 %vm457_vm1, %v279_v49  ;;  %16959 = vmatprep.mubr.msk.f32.mxu0 %vm457_vm1, %v2725_v2  ;;  %v2728_v2 = vld [vmem:[%s18268_s26 + $0x352] sm:$0xff] }
 0x135   : > { %24647 = vst [vmem:[#allocation51_spill] sm:$0xff] %v19082_v58  ;;  %16765 = vmatprep.mubr.msk.f32.mxu1 %vm457_vm1, %v280_v33  ;;  %v19090_v60 = vpop.f32.mrf.mxu0  ;;  %v2727_v58 = vld [vmem:[%s18268_s26 + $0x34a] sm:$0xff] }
 0x136   : > { %24648 = vst [vmem:[#allocation52_spill] sm:$0xff] %v19090_v60  ;;  %v19092_v17 = vpop.f32.mrf.mxu1  ;;  %v283_v33 = vld [vmem:[%s18268_s26 + $0x350] sm:$0xff] }
 0x137   : > { %24649 = vst [vmem:[#allocation53_spill] sm:$0xff] %v19092_v17  ;;  %v19096_v21 = vpop.f32.mrf.mxu0  ;;  %16960 = vmatmul.mubr.msk.f32.gmra.mxu0 %vm457_vm1, %v2726_v11  ;;  %v2743_v60 = vld [vmem:[%s18268_s26 + $0x3ea] sm:$0xff] }
 0x138   : > { %24650 = vst [vmem:[#allocation54_spill] sm:$0xff] %v19096_v21  ;;  %v19098_v49 = vpop.f32.mrf.mxu1  ;;  %16766 = vmatmul.mubr.msk.f32.gmra.mxu1 %vm457_vm1, %v281_v41  ;;  %16962 = vmatprep.mubr.msk.f32.mxu0 %vm457_vm1, %v2727_v58  ;;  %v2730_v58 = vld [vmem:[%s18268_s26 + $0x362] sm:$0xff] }
 0x139   : > { %24651 = vst [vmem:[#allocation55_spill] sm:$0xff] %v19098_v49  ;;  %16768 = vmatprep.mubr.msk.f32.mxu1 %vm457_vm1, %v282_v25  ;;  %v19106_v23 = vpop.f32.mrf.mxu0  ;;  %v2729_v49 = vld [vmem:[%s18268_s26 + $0x35a] sm:$0xff]  ;;  %v298_v21 = vld [vmem:[%s18268_s26 + $0x3e8] sm:$0xff] }
 0x13a   : > { %24652 = vst [vmem:[#allocation56_spill] sm:$0xff] %v19106_v23  ;;  %v19108_v17 = vpop.f32.mrf.mxu1  ;;  %v285_v25 = vld [vmem:[%s18268_s26 + $0x360] sm:$0xff] }
 0x13b   : > { %24653 = vst [vmem:[#allocation57_spill] sm:$0xff] %v19108_v17  ;;  %v19112_v15 = vpop.f32.mrf.mxu0  ;;  %16963 = vmatmul.mubr.msk.f32.gmra.mxu0 %vm457_vm1, %v2728_v2 }
 0x13c   : > { %24654 = vst [vmem:[#allocation58_spill] sm:$0xff] %v19112_v15  ;;  %v19114_v41 = vpop.f32.mrf.mxu1  ;;  %16769 = vmatmul.mubr.msk.f32.gmra.mxu1 %vm457_vm1, %v283_v33  ;;  %16965 = vmatprep.mubr.msk.f32.mxu0 %vm457_vm1, %v2729_v49  ;;  %v286_v15 = vld [vmem:[%s18268_s26 + $0x370] sm:$0xff]  ;;  %v2732_v49 = vld [vmem:[%s18268_s26 + $0x37a] sm:$0xff] }
 0x13d   : > { %24655 = vst [vmem:[#allocation59_spill] sm:$0xff] %v19114_v41  ;;  %16771 = vmatprep.mubr.msk.f32.mxu1 %vm457_vm1, %v284_v54  ;;  %v19122_v11 = vpop.f32.mrf.mxu0  ;;  %v2731_v41 = vld [vmem:[%s18268_s26 + $0x372] sm:$0xff] }
 0x13e   : > { %24656 = vst [vmem:[#allocation60_spill] sm:$0xff] %v19122_v11  ;;  %v19124_v17 = vpop.f32.mrf.mxu1  ;;  %v287_v54 = vld [vmem:[%s18268_s26 + $0x378] sm:$0xff] }
 0x13f   : > { %24657 = vst [vmem:[#allocation61_spill] sm:$0xff] %v19124_v17  ;;  %v19128_v23 = vpop.f32.mrf.mxu0  ;;  %16966 = vmatmul.mubr.msk.f32.gmra.mxu0 %vm457_vm1, %v2730_v58 }
 0x140   : > { %24658 = vst [vmem:[#allocation62_spill] sm:$0xff] %v19128_v23  ;;  %v19130_v33 = vpop.f32.mrf.mxu1  ;;  %16772 = vmatmul.mubr.msk.f32.gmra.mxu1 %vm457_vm1, %v285_v25  ;;  %16968 = vmatprep.mubr.msk.f32.mxu0 %vm457_vm1, %v2731_v41  ;;  %v288_v23 = vld [vmem:[%s18268_s26 + $0x380] sm:$0xff]  ;;  %v2734_v41 = vld [vmem:[%s18268_s26 + $0x38a] sm:$0xff] }
 0x141   : > { %24659 = vst [vmem:[#allocation63_spill] sm:$0xff] %v19130_v33  ;;  %16774 = vmatprep.mubr.msk.f32.mxu1 %vm457_vm1, %v286_v15  ;;  %v19138_v2 = vpop.f32.mrf.mxu0  ;;  %v2733_v33 = vld [vmem:[%s18268_s26 + $0x382] sm:$0xff] }
 0x142   : > { %24660 = vst [vmem:[#allocation64_spill] sm:$0xff] %v19138_v2  ;;  %v19140_v17 = vpop.f32.mrf.mxu1  ;;  %v289_v15 = vld [vmem:[%s18268_s26 + $0x388] sm:$0xff] }
 0x143   : > { %24661 = vst [vmem:[#allocation65_spill] sm:$0xff] %v19140_v17  ;;  %v19144_v11 = vpop.f32.mrf.mxu0  ;;  %16969 = vmatmul.mubr.msk.f32.gmra.mxu0 %vm457_vm1, %v2732_v49 }
 0x144   : > { %24662 = vst [vmem:[#allocation66_spill] sm:$0xff] %v19144_v11  ;;  %v19146_v25 = vpop.f32.mrf.mxu1  ;;  %16775 = vmatmul.mubr.msk.f32.gmra.mxu1 %vm457_vm1, %v287_v54  ;;  %16971 = vmatprep.mubr.msk.f32.mxu0 %vm457_vm1, %v2733_v33  ;;  %v290_v11 = vld [vmem:[%s18268_s26 + $0x398] sm:$0xff]  ;;  %v2736_v33 = vld [vmem:[%s18268_s26 + $0x3a2] sm:$0xff] }
 0x145   : > { %24663 = vst [vmem:[#allocation67_spill] sm:$0xff] %v19146_v25  ;;  %16777 = vmatprep.mubr.msk.f32.mxu1 %vm457_vm1, %v288_v23  ;;  %v19154_v58 = vpop.f32.mrf.mxu0  ;;  %v2735_v25 = vld [vmem:[%s18268_s26 + $0x39a] sm:$0xff] }
 0x146   : > { %24664 = vst [vmem:[#allocation68_spill] sm:$0xff] %v19154_v58  ;;  %v19156_v17 = vpop.f32.mrf.mxu1  ;;  %v291_v23 = vld [vmem:[%s18268_s26 + $0x3a0] sm:$0xff] }
 0x147   : > { %24665 = vst [vmem:[#allocation69_spill] sm:$0xff] %v19156_v17  ;;  %v19160_v2 = vpop.f32.mrf.mxu0  ;;  %16972 = vmatmul.mubr.msk.f32.gmra.mxu0 %vm457_vm1, %v2734_v41 }
 0x148   : > { %24666 = vst [vmem:[#allocation70_spill] sm:$0xff] %v19160_v2  ;;  %v19162_v54 = vpop.f32.mrf.mxu1  ;;  %16778 = vmatmul.mubr.msk.f32.gmra.mxu1 %vm457_vm1, %v289_v15  ;;  %16974 = vmatprep.mubr.msk.f32.mxu0 %vm457_vm1, %v2735_v25  ;;  %v292_v2 = vld [vmem:[%s18268_s26 + $0x3a8] sm:$0xff]  ;;  %v2738_v25 = vld [vmem:[%s18268_s26 + $0x3b2] sm:$0xff] }
 0x149   : > { %24667 = vst [vmem:[#allocation71_spill] sm:$0xff] %v19162_v54  ;;  %16780 = vmatprep.mubr.msk.f32.mxu1 %vm457_vm1, %v290_v11  ;;  %v19170_v49 = vpop.f32.mrf.mxu0  ;;  %v2737_v54 = vld [vmem:[%s18268_s26 + $0x3aa] sm:$0xff] }
 0x14a   : > { %24668 = vst [vmem:[#allocation72_spill] sm:$0xff] %v19170_v49  ;;  %v19172_v17 = vpop.f32.mrf.mxu1  ;;  %v293_v11 = vld [vmem:[%s18268_s26 + $0x3b0] sm:$0xff] }
 0x14b   : > { %24669 = vst [vmem:[#allocation73_spill] sm:$0xff] %v19172_v17  ;;  %v19176_v58 = vpop.f32.mrf.mxu0  ;;  %16975 = vmatmul.mubr.msk.f32.gmra.mxu0 %vm457_vm1, %v2736_v33 }
 0x14c   : > { %24670 = vst [vmem:[#allocation74_spill] sm:$0xff] %v19176_v58  ;;  %v19178_v15 = vpop.f32.mrf.mxu1  ;;  %16781 = vmatmul.mubr.msk.f32.gmra.mxu1 %vm457_vm1, %v291_v23  ;;  %16977 = vmatprep.mubr.msk.f32.mxu0 %vm457_vm1, %v2737_v54  ;;  %v294_v58 = vld [vmem:[%s18268_s26 + $0x3c0] sm:$0xff]  ;;  %v2740_v54 = vld [vmem:[%s18268_s26 + $0x3ca] sm:$0xff] }
 0x14d   : > { %24671 = vst [vmem:[#allocation75_spill] sm:$0xff] %v19178_v15  ;;  %16783 = vmatprep.mubr.msk.f32.mxu1 %vm457_vm1, %v292_v2  ;;  %v19186_v41 = vpop.f32.mrf.mxu0  ;;  %v2739_v15 = vld [vmem:[%s18268_s26 + $0x3c2] sm:$0xff] }
 0x14e   : > { %24672 = vst [vmem:[#allocation76_spill] sm:$0xff] %v19186_v41  ;;  %v19188_v17 = vpop.f32.mrf.mxu1  ;;  %v295_v2 = vld [vmem:[%s18268_s26 + $0x3c8] sm:$0xff] }
 0x14f   : > { %24673 = vst [vmem:[#allocation77_spill] sm:$0xff] %v19188_v17  ;;  %v19192_v49 = vpop.f32.mrf.mxu0  ;;  %16978 = vmatmul.mubr.msk.f32.gmra.mxu0 %vm457_vm1, %v2738_v25  ;;  %v2742_v25 = vld [vmem:[%s18268_s26 + $0x3da] sm:$0xff] }
 0x150   : > { %24674 = vst [vmem:[#allocation78_spill] sm:$0xff] %v19192_v49  ;;  %v19194_v23 = vpop.f32.mrf.mxu1  ;;  %16784 = vmatmul.mubr.msk.f32.gmra.mxu1 %vm457_vm1, %v293_v11  ;;  %16980 = vmatprep.mubr.msk.f32.mxu0 %vm457_vm1, %v2739_v15  ;;  %v296_v49 = vld [vmem:[%s18268_s26 + $0x3d0] sm:$0xff]  ;;  %v297_v15 = vld [vmem:[%s18268_s26 + $0x3d8] sm:$0xff] }
 0x151   : > { %24675 = vst [vmem:[#allocation79_spill] sm:$0xff] %v19194_v23  ;;  %16786 = vmatprep.mubr.msk.f32.mxu1 %vm457_vm1, %v294_v58  ;;  %v19202_v33 = vpop.f32.mrf.mxu0  ;;  %v2741_v23 = vld [vmem:[%s18268_s26 + $0x3d2] sm:$0xff] }
 0x152   : > { %24676 = vst [vmem:[#allocation80_spill] sm:$0xff] %v19202_v33  ;;  %v19204_v17 = vpop.f32.mrf.mxu1 }
 0x153   : > { %24677 = vst [vmem:[#allocation81_spill] sm:$0xff] %v19204_v17  ;;  %v16838_v11 = vpop.f32.mrf.mxu0  ;;  %16981 = vmatmul.mubr.msk.f32.gmra.mxu0 %vm457_vm1, %v2740_v54 }
 0x154   : > { %v16644_v41 = vpop.f32.mrf.mxu1  ;;  %16787 = vmatmul.mubr.msk.f32.gmra.mxu1 %vm457_vm1, %v295_v2  ;;  %16983 = vmatprep.mubr.msk.f32.mxu0 %vm457_vm1, %v2741_v23  ;;  %v299_v23 = vld [vmem:[%s18268_s26 + $0x3f0] sm:$0xff] }
 0x155   : > { %v2010_v58 = vadd.f32 %v16644_v41, %v18682_v14  ;;  %16789 = vmatprep.mubr.msk.f32.mxu1 %vm457_vm1, %v296_v49  ;;  %v3226_v17 = vpop.f32.mrf.mxu0 }
 0x156   : > { %v2004_v33 = vpop.f32.mrf.mxu1 }
 0x157   : > { %v19217_v2 = vadd.f32 %v16838_v11, %v2010_v58  ;;  %v2005_v54 = vadd.f32 %v2004_v33, %v18692_v9  ;;  %v16841_v14 = vpop.f32.mrf.mxu0  ;;  %16984 = vmatmul.mubr.msk.f32.gmra.mxu0 %vm457_vm1, %v2742_v25  ;;  %v2744_v11 = vld [vmem:[%s18268_s26 + $0x3f2] sm:$0xff] }
 0x158   : > { %v16647_v29 = vpop.f32.mrf.mxu1  ;;  %16790 = vmatmul.mubr.msk.f32.gmra.mxu1 %vm457_vm1, %v297_v15  ;;  %16986 = vmatprep.mubr.msk.f32.mxu0 %vm457_vm1, %v2743_v60  ;;  %v300_v33 = vld [vmem:[%s18268_s26 + $0x3f8] sm:$0xff]  ;;  %v301_v60 = vld [vmem:[%s18268_s26 + $0x400] sm:$0xff] }
 0x159   : > { %24678 = vst [vmem:[#allocation82_spill] sm:$0xff] %v19217_v2  ;;  %v19222_v49 = vadd.f32 %v3226_v17, %v2005_v54  ;;  %v2020_v41 = vadd.f32 %v16647_v29, %v18698_v20  ;;  %16792 = vmatprep.mubr.msk.f32.mxu1 %vm457_vm1, %v298_v21  ;;  %v3236_v9 = vpop.f32.mrf.mxu0  ;;  %v2745_v15 = vld [vmem:[%s18268_s26 + $0x3fa] sm:$0xff]  ;;  %v2746_v54 = vld [vmem:[%s18268_s26 + $0x402] sm:$0xff] }
 0x15a   : > { %v2014_v58 = vpop.f32.mrf.mxu1 }
 0x15b   : > { %v19231_v2 = vadd.f32 %v16841_v14, %v2020_v41  ;;  %v2015_v17 = vadd.f32 %v2014_v58, %v18708_v24  ;;  %v16844_v20 = vpop.f32.mrf.mxu0  ;;  %16987 = vmatmul.mubr.msk.f32.gmra.mxu0 %vm457_vm1, %v2744_v11  ;;  %v302_v41 = vld [vmem:[%s18268_s26 + $0x410] sm:$0xff] }
 0x15c   : > { %v16650_v25 = vpop.f32.mrf.mxu1  ;;  %16793 = vmatmul.mubr.msk.f32.gmra.mxu1 %vm457_vm1, %v299_v23  ;;  %16989 = vmatprep.mubr.msk.f32.mxu0 %vm457_vm1, %v2745_v15  ;;  %v2747_v23 = vld [vmem:[%s18268_s26 + $0x412] sm:$0xff] }
 0x15d   : > { %v19236_v21 = vadd.f32 %v3236_v9, %v2015_v17  ;;  %v2030_v29 = vadd.f32 %v16650_v25, %v18714_v28  ;;  %16795 = vmatprep.mubr.msk.f32.mxu1 %vm457_vm1, %v300_v33  ;;  %v3246_v24 = vpop.f32.mrf.mxu0  ;;  %v303_v17 = vld [vmem:[%s18268_s26 + $0x418] sm:$0xff] }
 0x15e   : > { %v2024_v14 = vpop.f32.mrf.mxu1  ;;  %v2748_v25 = vld [vmem:[%s18268_s26 + $0x41a] sm:$0xff] }
 0x15f   : > { %v19245_v58 = vadd.f32 %v16844_v20, %v2030_v29  ;;  %v2025_v11 = vadd.f32 %v2024_v14, %v18724_v32  ;;  %v16847_v28 = vpop.f32.mrf.mxu0  ;;  %16990 = vmatmul.mubr.msk.f32.gmra.mxu0 %vm457_vm1, %v2746_v54  ;;  %v304_v29 = vld [vmem:[%s18268_s26 + $0x420] sm:$0xff] }
 0x160   : > { %v16653_v9 = vpop.f32.mrf.mxu1  ;;  %16796 = vmatmul.mubr.msk.f32.gmra.mxu1 %vm457_vm1, %v301_v60  ;;  %16992 = vmatprep.mubr.msk.f32.mxu0 %vm457_vm1, %v2747_v23  ;;  %v2749_v60 = vld [vmem:[%s18268_s26 + $0x422] sm:$0xff] }
 0x161   : > { %v19250_v33 = vadd.f32 %v3246_v24, %v2025_v11  ;;  %v2040_v15 = vadd.f32 %v16653_v9, %v18730_v36  ;;  %16798 = vmatprep.mubr.msk.f32.mxu1 %vm457_vm1, %v302_v41  ;;  %v3256_v32 = vpop.f32.mrf.mxu0  ;;  %v305_v11 = vld [vmem:[%s18268_s26 + $0x428] sm:$0xff] }
 0x162   : > { %v2034_v20 = vpop.f32.mrf.mxu1  ;;  %v2750_v9 = vld [vmem:[%s18268_s26 + $0x42a] sm:$0xff] }
 0x163   : > { %v19259_v14 = vadd.f32 %v16847_v28, %v2040_v15  ;;  %v2035_v54 = vadd.f32 %v2034_v20, %v18740_v40  ;;  %v16850_v36 = vpop.f32.mrf.mxu0  ;;  %16993 = vmatmul.mubr.msk.f32.gmra.mxu0 %vm457_vm1, %v2748_v25  ;;  %v306_v15 = vld [vmem:[%s18268_s26 + $0x438] sm:$0xff] }
 0x164   : > { %v16656_v24 = vpop.f32.mrf.mxu1  ;;  %16799 = vmatmul.mubr.msk.f32.gmra.mxu1 %vm457_vm1, %v303_v17  ;;  %16995 = vmatprep.mubr.msk.f32.mxu0 %vm457_vm1, %v2749_v60  ;;  %v2751_v17 = vld [vmem:[%s18268_s26 + $0x43a] sm:$0xff] }
 0x165   : > { %v19264_v41 = vadd.f32 %v3256_v32, %v2035_v54  ;;  %v2050_v23 = vadd.f32 %v16656_v24, %v18746_v44  ;;  %16801 = vmatprep.mubr.msk.f32.mxu1 %vm457_vm1, %v304_v29  ;;  %v3266_v40 = vpop.f32.mrf.mxu0  ;;  %v307_v54 = vld [vmem:[%s18268_s26 + $0x440] sm:$0xff] }
 0x166   : > { %v2044_v28 = vpop.f32.mrf.mxu1  ;;  %v2752_v24 = vld [vmem:[%s18268_s26 + $0x442] sm:$0xff] }
 0x167   : > { %v19273_v20 = vadd.f32 %v16850_v36, %v2050_v23  ;;  %v2045_v25 = vadd.f32 %v2044_v28, %v18756_v48  ;;  %v16853_v44 = vpop.f32.mrf.mxu0  ;;  %16996 = vmatmul.mubr.msk.f32.gmra.mxu0 %vm457_vm1, %v2750_v9  ;;  %v308_v23 = vld [vmem:[%s18268_s26 + $0x448] sm:$0xff] }
 0x168   : > { %v16659_v32 = vpop.f32.mrf.mxu1  ;;  %16802 = vmatmul.mubr.msk.f32.gmra.mxu1 %vm457_vm1, %v305_v11  ;;  %16998 = vmatprep.mubr.msk.f32.mxu0 %vm457_vm1, %v2751_v17  ;;  %v2753_v11 = vld [vmem:[%s18268_s26 + $0x44a] sm:$0xff] }
 0x169   : > { %v19278_v29 = vadd.f32 %v3266_v40, %v2045_v25  ;;  %v2060_v60 = vadd.f32 %v16659_v32, %v18762_v52  ;;  %16804 = vmatprep.mubr.msk.f32.mxu1 %vm457_vm1, %v306_v15  ;;  %v3276_v48 = vpop.f32.mrf.mxu0  ;;  %v309_v25 = vld [vmem:[%s18268_s26 + $0x450] sm:$0xff] }
 0x16a   : > { %v2054_v36 = vpop.f32.mrf.mxu1  ;;  %v2754_v32 = vld [vmem:[%s18268_s26 + $0x452] sm:$0xff] }
 0x16b   : > { %v19287_v28 = vadd.f32 %v16853_v44, %v2060_v60  ;;  %v2055_v9 = vadd.f32 %v2054_v36, %v18772_v57  ;;  %v16856_v52 = vpop.f32.mrf.mxu0  ;;  %16999 = vmatmul.mubr.msk.f32.gmra.mxu0 %vm457_vm1, %v2752_v24  ;;  %v310_v60 = vld [vmem:[%s18268_s26 + $0x460] sm:$0xff] }
 0x16c   : > { %v16662_v40 = vpop.f32.mrf.mxu1  ;;  %16805 = vmatmul.mubr.msk.f32.gmra.mxu1 %vm457_vm1, %v307_v54  ;;  %17001 = vmatprep.mubr.msk.f32.mxu0 %vm457_vm1, %v2753_v11  ;;  %v2755_v54 = vld [vmem:[%s18268_s26 + $0x462] sm:$0xff] }
 0x16d   : > { %v19292_v15 = vadd.f32 %v3276_v48, %v2055_v9  ;;  %v2070_v17 = vadd.f32 %v16662_v40, %v18778_v61  ;;  %16807 = vmatprep.mubr.msk.f32.mxu1 %vm457_vm1, %v308_v23  ;;  %v3286_v57 = vpop.f32.mrf.mxu0  ;;  %v311_v9 = vld [vmem:[%s18268_s26 + $0x468] sm:$0xff] }
 0x16e   : > { %v2064_v44 = vpop.f32.mrf.mxu1  ;;  %v2756_v40 = vld [vmem:[%s18268_s26 + $0x46a] sm:$0xff] }
 0x16f   : > { %v19301_v36 = vadd.f32 %v16856_v52, %v2070_v17  ;;  %v2065_v24 = vadd.f32 %v2064_v44, %v18788_v1  ;;  %v16859_v61 = vpop.f32.mrf.mxu0  ;;  %17002 = vmatmul.mubr.msk.f32.gmra.mxu0 %vm457_vm1, %v2754_v32  ;;  %v312_v17 = vld [vmem:[%s18268_s26 + $0x470] sm:$0xff] }
 0x170   : > { %v16665_v48 = vpop.f32.mrf.mxu1  ;;  %16808 = vmatmul.mubr.msk.f32.gmra.mxu1 %vm457_vm1, %v309_v25  ;;  %17004 = vmatprep.mubr.msk.f32.mxu0 %vm457_vm1, %v2755_v54  ;;  %v2757_v25 = vld [vmem:[%s18268_s26 + $0x472] sm:$0xff] }
 0x171   : > { %v19306_v23 = vadd.f32 %v3286_v57, %v2065_v24  ;;  %v2080_v11 = vadd.f32 %v16665_v48, %v18794_v5  ;;  %16810 = vmatprep.mubr.msk.f32.mxu1 %vm457_vm1, %v310_v60  ;;  %v3296_v1 = vpop.f32.mrf.mxu0  ;;  %v313_v24 = vld [vmem:[%s18268_s26 + $0x478] sm:$0xff] }
 0x172   : > { %v2074_v52 = vpop.f32.mrf.mxu1  ;;  %v2758_v48 = vld [vmem:[%s18268_s26 + $0x47a] sm:$0xff] }
 0x173   : > { %v19315_v44 = vadd.f32 %v16859_v61, %v2080_v11  ;;  %v2075_v32 = vadd.f32 %v2074_v52, %v18804_v10  ;;  %v16862_v5 = vpop.f32.mrf.mxu0  ;;  %17005 = vmatmul.mubr.msk.f32.gmra.mxu0 %vm457_vm1, %v2756_v40  ;;  %v314_v11 = vld [vmem:[%s18268_s26 + $0x488] sm:$0xff] }
 0x174   : > { %v16668_v57 = vpop.f32.mrf.mxu1  ;;  %16811 = vmatmul.mubr.msk.f32.gmra.mxu1 %vm457_vm1, %v311_v9  ;;  %17007 = vmatprep.mubr.msk.f32.mxu0 %vm457_vm1, %v2757_v25  ;;  %v2759_v9 = vld [vmem:[%s18268_s26 + $0x48a] sm:$0xff] }
 0x175   : > { %v19320_v60 = vadd.f32 %v3296_v1, %v2075_v32  ;;  %v2090_v54 = vadd.f32 %v16668_v57, %v18810_v16  ;;  %16813 = vmatprep.mubr.msk.f32.mxu1 %vm457_vm1, %v312_v17  ;;  %v3306_v10 = vpop.f32.mrf.mxu0  ;;  %v315_v32 = vld [vmem:[%s18268_s26 + $0x490] sm:$0xff] }
 0x176   : > { %v2084_v61 = vpop.f32.mrf.mxu1  ;;  %v2760_v57 = vld [vmem:[%s18268_s26 + $0x492] sm:$0xff] }
 0x177   : > { %v19329_v52 = vadd.f32 %v16862_v5, %v2090_v54  ;;  %v2085_v40 = vadd.f32 %v2084_v61, %v18820_v22  ;;  %v16865_v16 = vpop.f32.mrf.mxu0  ;;  %17008 = vmatmul.mubr.msk.f32.gmra.mxu0 %vm457_vm1, %v2758_v48  ;;  %v316_v54 = vld [vmem:[%s18268_s26 + $0x498] sm:$0xff] }
 0x178   : > { %v16671_v1 = vpop.f32.mrf.mxu1  ;;  %16814 = vmatmul.mubr.msk.f32.gmra.mxu1 %vm457_vm1, %v313_v24  ;;  %17010 = vmatprep.mubr.msk.f32.mxu0 %vm457_vm1, %v2759_v9  ;;  %v2761_v24 = vld [vmem:[%s18268_s26 + $0x49a] sm:$0xff] }
 0x179   : > { %v19334_v17 = vadd.f32 %v3306_v10, %v2085_v40  ;;  %v2100_v25 = vadd.f32 %v16671_v1, %v18826_v30  ;;  %16816 = vmatprep.mubr.msk.f32.mxu1 %vm457_vm1, %v314_v11  ;;  %v3316_v22 = vpop.f32.mrf.mxu0  ;;  %v317_v40 = vld [vmem:[%s18268_s26 + $0x4a0] sm:$0xff] }
 0x17a   : > { %v2094_v5 = vpop.f32.mrf.mxu1  ;;  %v2762_v1 = vld [vmem:[%s18268_s26 + $0x4a2] sm:$0xff] }
 0x17b   : > { %v19343_v61 = vadd.f32 %v16865_v16, %v2100_v25  ;;  %v2095_v48 = vadd.f32 %v2094_v5, %v18836_v38  ;;  %v16868_v30 = vpop.f32.mrf.mxu0  ;;  %17011 = vmatmul.mubr.msk.f32.gmra.mxu0 %vm457_vm1, %v2760_v57  ;;  %v318_v25 = vld [vmem:[%s18268_s26 + $0x4b0] sm:$0xff] }
 0x17c   : > { %v16674_v10 = vpop.f32.mrf.mxu1  ;;  %16817 = vmatmul.mubr.msk.f32.gmra.mxu1 %vm457_vm1, %v315_v32  ;;  %17013 = vmatprep.mubr.msk.f32.mxu0 %vm457_vm1, %v2761_v24  ;;  %v2763_v32 = vld [vmem:[%s18268_s26 + $0x4b2] sm:$0xff] }
 0x17d   : > { %v19348_v11 = vadd.f32 %v3316_v22, %v2095_v48  ;;  %v2110_v9 = vadd.f32 %v16674_v10, %v18842_v46  ;;  %16819 = vmatprep.mubr.msk.f32.mxu1 %vm457_vm1, %v316_v54  ;;  %v3326_v38 = vpop.f32.mrf.mxu0  ;;  %v319_v48 = vld [vmem:[%s18268_s26 + $0x4b8] sm:$0xff] }
 0x17e   : > { %v2104_v16 = vpop.f32.mrf.mxu1  ;;  %v2764_v10 = vld [vmem:[%s18268_s26 + $0x4ba] sm:$0xff] }
 0x17f   : > { %v19357_v5 = vadd.f32 %v16868_v30, %v2110_v9  ;;  %v2105_v57 = vadd.f32 %v2104_v16, %v18852_v55  ;;  %v16871_v46 = vpop.f32.mrf.mxu0  ;;  %17014 = vmatmul.mubr.msk.f32.gmra.mxu0 %vm457_vm1, %v2762_v1  ;;  %v320_v9 = vld [vmem:[%s18268_s26 + $0x4c0] sm:$0xff] }
 0x180   : > { %v16677_v22 = vpop.f32.mrf.mxu1  ;;  %16820 = vmatmul.mubr.msk.f32.gmra.mxu1 %vm457_vm1, %v317_v40  ;;  %17016 = vmatprep.mubr.msk.f32.mxu0 %vm457_vm1, %v2763_v32  ;;  %v2765_v40 = vld [vmem:[%s18268_s26 + $0x4c2] sm:$0xff] }
 0x181   : > { %v19362_v54 = vadd.f32 %v3326_v38, %v2105_v57  ;;  %v2120_v24 = vadd.f32 %v16677_v22, %v18858_v63  ;;  %16822 = vmatprep.mubr.msk.f32.mxu1 %vm457_vm1, %v318_v25  ;;  %v3336_v55 = vpop.f32.mrf.mxu0  ;;  %v321_v57 = vld [vmem:[%s18268_s26 + $0x4c8] sm:$0xff] }
 0x182   : > { %v2114_v30 = vpop.f32.mrf.mxu1  ;;  %v2766_v22 = vld [vmem:[%s18268_s26 + $0x4ca] sm:$0xff] }
 0x183   : > { %v19371_v16 = vadd.f32 %v16871_v46, %v2120_v24  ;;  %v2115_v1 = vadd.f32 %v2114_v30, %v18868_v7  ;;  %v16874_v63 = vpop.f32.mrf.mxu0  ;;  %17017 = vmatmul.mubr.msk.f32.gmra.mxu0 %vm457_vm1, %v2764_v10  ;;  %v322_v24 = vld [vmem:[%s18268_s26 + $0x4d8] sm:$0xff] }
 0x184   : > { %v16680_v38 = vpop.f32.mrf.mxu1  ;;  %16823 = vmatmul.mubr.msk.f32.gmra.mxu1 %vm457_vm1, %v319_v48  ;;  %17019 = vmatprep.mubr.msk.f32.mxu0 %vm457_vm1, %v2765_v40  ;;  %v2767_v48 = vld [vmem:[%s18268_s26 + $0x4da] sm:$0xff] }
 0x185   : > { %v19376_v25 = vadd.f32 %v3336_v55, %v2115_v1  ;;  %v2130_v32 = vadd.f32 %v16680_v38, %v18874_v18  ;;  %16825 = vmatprep.mubr.msk.f32.mxu1 %vm457_vm1, %v320_v9  ;;  %v3346_v7 = vpop.f32.mrf.mxu0  ;;  %v323_v1 = vld [vmem:[%s18268_s26 + $0x4e0] sm:$0xff] }
 0x186   : > { %v2124_v46 = vpop.f32.mrf.mxu1  ;;  %v2768_v38 = vld [vmem:[%s18268_s26 + $0x4e2] sm:$0xff] }
 0x187   : > { %v19385_v30 = vadd.f32 %v16874_v63, %v2130_v32  ;;  %v2125_v10 = vadd.f32 %v2124_v46, %v18884_v34  ;;  %v16877_v18 = vpop.f32.mrf.mxu0  ;;  %17020 = vmatmul.mubr.msk.f32.gmra.mxu0 %vm457_vm1, %v2766_v22  ;;  %v324_v32 = vld [vmem:[%s18268_s26 + $0x4e8] sm:$0xff] }
 0x188   : > { %v16683_v55 = vpop.f32.mrf.mxu1  ;;  %16826 = vmatmul.mubr.msk.f32.gmra.mxu1 %vm457_vm1, %v321_v57  ;;  %17022 = vmatprep.mubr.msk.f32.mxu0 %vm457_vm1, %v2767_v48  ;;  %v2769_v57 = vld [vmem:[%s18268_s26 + $0x4ea] sm:$0xff] }
 0x189   : > { %v19390_v9 = vadd.f32 %v3346_v7, %v2125_v10  ;;  %v2140_v40 = vadd.f32 %v16683_v55, %v18890_v50  ;;  %16828 = vmatprep.mubr.msk.f32.mxu1 %vm457_vm1, %v322_v24  ;;  %v3356_v34 = vpop.f32.mrf.mxu0  ;;  %v325_v10 = vld [vmem:[%s18268_s26 + $0x4f0] sm:$0xff] }
 0x18a   : > { %v2134_v63 = vpop.f32.mrf.mxu1  ;;  %v2770_v55 = vld [vmem:[%s18268_s26 + $0x4f2] sm:$0xff] }
 0x18b   : > { %v19399_v46 = vadd.f32 %v16877_v18, %v2140_v40  ;;  %v2135_v22 = vadd.f32 %v2134_v63, %v18900_v3  ;;  %v16880_v50 = vpop.f32.mrf.mxu0  ;;  %17023 = vmatmul.mubr.msk.f32.gmra.mxu0 %vm457_vm1, %v2768_v38  ;;  %v13734_v40 = vld [vmem:[%s18268_s26 + $0x28] sm:$0xff] }
 0x18c   : > { %v16686_v7 = vpop.f32.mrf.mxu1  ;;  %16829 = vmatmul.mubr.msk.f32.gmra.mxu1 %vm457_vm1, %v323_v1  ;;  %17025 = vmatprep.mubr.msk.f32.mxu0 %vm457_vm1, %v2769_v57  ;;  %v13992_v63 = vld [vmem:[%s18268_s26 + $0x29] sm:$0xff] }
 0x18d   : > { %v19404_v24 = vadd.f32 %v3356_v34, %v2135_v22  ;;  %v2150_v48 = vadd.f32 %v16686_v7, %v18906_v51  ;;  %16831 = vmatprep.mubr.msk.f32.mxu1 %vm457_vm1, %v324_v32  ;;  %v3366_v3 = vpop.f32.mrf.mxu0  ;;  %v13735_v22 = vld [vmem:[%s18268_s26 + $0x30] sm:$0xff] }
 0x18e   : > { %v2144_v18 = vpop.f32.mrf.mxu1  ;;  %v13993_v7 = vld [vmem:[%s18268_s26 + $0x31] sm:$0xff] }
 0x18f   : > { %v19413_v1 = vadd.f32 %v16880_v50, %v2150_v48  ;;  %v2145_v38 = vadd.f32 %v2144_v18, %v18916_v43  ;;  %v16883_v51 = vpop.f32.mrf.mxu0  ;;  %17026 = vmatmul.mubr.msk.f32.gmra.mxu0 %vm457_vm1, %v2770_v55  ;;  %v13736_v18 = vld [vmem:[%s18268_s26 + $0x38] sm:$0xff] }
 0x190   : > { %v16689_v34 = vpop.f32.mrf.mxu1  ;;  %16832 = vmatmul.mubr.msk.f32.gmra.mxu1 %vm457_vm1, %v325_v10  ;;  %17224 = vmatprep.mubr.msk.f32.mxu0 %vm457_vm1, %v13992_v63  ;;  %v13994_v55 = vld [vmem:[%s18268_s26 + $0x39] sm:$0xff] }
 0x191   : > { %v19418_v32 = vadd.f32 %v3366_v3, %v2145_v38  ;;  %v2160_v57 = vadd.f32 %v16689_v34, %v18922_v19  ;;  %17030 = vmatprep.mubr.msk.f32.mxu1 %vm457_vm1, %v13734_v40  ;;  %v3376_v50 = vpop.f32.mrf.mxu0  ;;  %v13995_v38 = vld [vmem:[%s18268_s26 + $0x41] sm:$0xff] }
 0x192   : > { %v2154_v43 = vpop.f32.mrf.mxu1 }
 0x193   : > { %v19425_v48 = vadd.f32 %v16883_v51, %v2160_v57  ;;  %v2155_v10 = vadd.f32 %v2154_v43, %v18932_v13  ;;  %v16886_v19 = vpop.f32.mrf.mxu0  ;;  %17225 = vmatmul.mubr.msk.f32.vlgmr.msra.gmra.mxu0 %vm457_vm1, %v13993_v7  ;;  %v13737_v13 = vld [vmem:[%s18268_s26 + $0x40] sm:$0xff]  ;;  %v13738_v57 = vld [vmem:[%s18268_s26 + $0x50] sm:$0xff] }
 0x194   : > { %v16692_v3 = vpop.f32.mrf.mxu1  ;;  %17031 = vmatmul.mubr.msk.f32.vlgmr.msra.gmra.mxu1 %vm457_vm1, %v13735_v22  ;;  %17611 = vmatpush3.msk.msra.mxu0 %vm842_vm0, %v18964_v8  ;;  %v13996_v22 = vld [vmem:[%s18268_s26 + $0x51] sm:$0xff] }
 0x195   : > { %v19432_v40 = vadd.f32 %v3376_v50, %v2155_v10  ;;  %v2170_v63 = vadd.f32 %v16692_v3, %v18938_v0  ;;  %17417 = vmatpush3.msk.msra.mxu1 %vm842_vm0, %v18951_v42  ;;  %v3386_v51 = vpop.f32.mrf.mxu0  ;;  %17033 = vmatprep.mubr.msk.f32.mxu1 %vm457_vm1, %v13736_v18  ;;  %v13739_v10 = vld [vmem:[%s18268_s26 + $0x58] sm:$0xff]  ;;  %v13740_v3 = vld [vmem:[%s18268_s26 + $0x60] sm:$0xff] }
 0x196   : > { %v2164_v34 = vpop.f32.mrf.mxu1  ;;  %17227 = vmatprep.mubr.msk.f32.mxu0 %vm457_vm1, %v13994_v55  ;;  %v13997_v18 = vld [vmem:[%s18268_s26 + $0x59] sm:$0xff] }
 0x197   : > { %v19445_v0 = vadd.f32 %v16886_v19, %v2170_v63  ;;  %v2165_v42 = vadd.f32 %v2164_v34, %v18953_v4  ;;  %v16889_v8 = vpop.f32.mrf.mxu0  ;;  %17228 = vmatmul.mubr.msk.f32.gmra.mxu0 %vm457_vm1, %v13995_v38  ;;  %v13998_v19 = vld [vmem:[%s18268_s26 + $0x61] sm:$0xff] }
 0x198   : > { %v16695_v7 = vpop.f32.mrf.mxu1  ;;  %17034 = vmatmul.mubr.msk.f32.gmra.mxu1 %vm457_vm1, %v13737_v13  ;;  %17230 = vmatprep.mubr.msk.f32.mxu0 %vm457_vm1, %v13996_v22  ;;  %v13999_v22 = vld [vmem:[%s18268_s26 + $0x69] sm:$0xff] }
 0x199   : > { %v19450_v43 = vadd.f32 %v3386_v51, %v2165_v42  ;;  %v2180_v50 = vadd.f32 %v16695_v7, %v18966_v59  ;;  %17036 = vmatprep.mubr.msk.f32.mxu1 %vm457_vm1, %v13738_v57  ;;  %v3396_v4 = vpop.f32.mrf.mxu0  ;;  %v13741_v57 = vld [vmem:[%s18268_s26 + $0x68] sm:$0xff]  ;;  %v13742_v7 = vld [vmem:[%s18268_s26 + $0x78] sm:$0xff] }
 0x19a   : > { %v2174_v55 = vpop.f32.mrf.mxu1 }
 0x19b   : > { %v19459_v63 = vadd.f32 %v16889_v8, %v2180_v50  ;;  %v2175_v13 = vadd.f32 %v2174_v55, %v18976_v39  ;;  %v16892_v59 = vpop.f32.mrf.mxu0  ;;  %17231 = vmatmul.mubr.msk.f32.gmra.mxu0 %vm457_vm1, %v13997_v18  ;;  %v14000_v8 = vld [vmem:[%s18268_s26 + $0x79] sm:$0xff] }
 0x19c   : > { %v16698_v38 = vpop.f32.mrf.mxu1  ;;  %17037 = vmatmul.mubr.msk.f32.gmra.mxu1 %vm457_vm1, %v13739_v10  ;;  %17233 = vmatprep.mubr.msk.f32.mxu0 %vm457_vm1, %v13998_v19  ;;  %v14001_v19 = vld [vmem:[%s18268_s26 + $0x81] sm:$0xff] }
 0x19d   : > { %v19464_v34 = vadd.f32 %v3396_v4, %v2175_v13  ;;  %v2190_v51 = vadd.f32 %v16698_v38, %v18984_v35  ;;  %17039 = vmatprep.mubr.msk.f32.mxu1 %vm457_vm1, %v13740_v3  ;;  %v3406_v39 = vpop.f32.mrf.mxu0  ;;  %v13743_v3 = vld [vmem:[%s18268_s26 + $0x80] sm:$0xff]  ;;  %v13744_v38 = vld [vmem:[%s18268_s26 + $0x88] sm:$0xff] }
 0x19e   : > { %v2184_v42 = vpop.f32.mrf.mxu1 }
 0x19f   : > { %v19473_v50 = vadd.f32 %v16892_v59, %v2190_v51  ;;  %v2185_v10 = vadd.f32 %v2184_v42, %v18994_v31  ;;  %v16895_v35 = vpop.f32.mrf.mxu0  ;;  %17234 = vmatmul.mubr.msk.f32.gmra.mxu0 %vm457_vm1, %v13999_v22  ;;  %v14002_v59 = vld [vmem:[%s18268_s26 + $0x89] sm:$0xff] }
 0x1a0   : > { %v16701_v18 = vpop.f32.mrf.mxu1  ;;  %17040 = vmatmul.mubr.msk.f32.gmra.mxu1 %vm457_vm1, %v13741_v57  ;;  %17236 = vmatprep.mubr.msk.f32.mxu0 %vm457_vm1, %v14000_v8  ;;  %v14003_v8 = vld [vmem:[%s18268_s26 + $0x91] sm:$0xff] }
 0x1a1   : > { %v19478_v55 = vadd.f32 %v3406_v39, %v2185_v10  ;;  %v2200_v4 = vadd.f32 %v16701_v18, %v19000_v6  ;;  %17042 = vmatprep.mubr.msk.f32.mxu1 %vm457_vm1, %v13742_v7  ;;  %v3416_v31 = vpop.f32.mrf.mxu0  ;;  %v13745_v7 = vld [vmem:[%s18268_s26 + $0x90] sm:$0xff]  ;;  %v13746_v18 = vld [vmem:[%s18268_s26 + $0xa0] sm:$0xff] }
 0x1a2   : > { %v2194_v13 = vpop.f32.mrf.mxu1 }
 0x1a3   : > { %v19487_v51 = vadd.f32 %v16895_v35, %v2200_v4  ;;  %v2195_v57 = vadd.f32 %v2194_v13, %v19010_v56  ;;  %v16898_v6 = vpop.f32.mrf.mxu0  ;;  %17237 = vmatmul.mubr.msk.f32.gmra.mxu0 %vm457_vm1, %v14001_v19  ;;  %v14004_v35 = vld [vmem:[%s18268_s26 + $0xa1] sm:$0xff] }
 0x1a4   : > { %v16704_v22 = vpop.f32.mrf.mxu1  ;;  %17043 = vmatmul.mubr.msk.f32.gmra.mxu1 %vm457_vm1, %v13743_v3  ;;  %17239 = vmatprep.mubr.msk.f32.mxu0 %vm457_vm1, %v14002_v59  ;;  %v14005_v59 = vld [vmem:[%s18268_s26 + $0xa9] sm:$0xff] }
 0x1a5   : > { %v19492_v42 = vadd.f32 %v3416_v31, %v2195_v57  ;;  %v2210_v39 = vadd.f32 %v16704_v22, %v19016_v62  ;;  %17045 = vmatprep.mubr.msk.f32.mxu1 %vm457_vm1, %v13744_v38  ;;  %v3426_v56 = vpop.f32.mrf.mxu0  ;;  %v13747_v38 = vld [vmem:[%s18268_s26 + $0xa8] sm:$0xff]  ;;  %v13748_v22 = vld [vmem:[%s18268_s26 + $0xb0] sm:$0xff] }
 0x1a6   : > { %v2204_v10 = vpop.f32.mrf.mxu1 }
 0x1a7   : > { %v19501_v4 = vadd.f32 %v16898_v6, %v2210_v39  ;;  %v2205_v3 = vadd.f32 %v2204_v10, %v19026_v12  ;;  %v16901_v62 = vpop.f32.mrf.mxu0  ;;  %17240 = vmatmul.mubr.msk.f32.gmra.mxu0 %vm457_vm1, %v14003_v8  ;;  %v14006_v6 = vld [vmem:[%s18268_s26 + $0xb1] sm:$0xff] }
 0x1a8   : > { %v16707_v19 = vpop.f32.mrf.mxu1  ;;  %17046 = vmatmul.mubr.msk.f32.gmra.mxu1 %vm457_vm1, %v13745_v7  ;;  %17242 = vmatprep.mubr.msk.f32.mxu0 %vm457_vm1, %v14004_v35  ;;  %v14007_v35 = vld [vmem:[%s18268_s26 + $0xb9] sm:$0xff] }
 0x1a9   : > { %v19506_v13 = vadd.f32 %v3426_v56, %v2205_v3  ;;  %v2220_v31 = vadd.f32 %v16707_v19, %v19032_v53  ;;  %17048 = vmatprep.mubr.msk.f32.mxu1 %vm457_vm1, %v13746_v18  ;;  %v3436_v12 = vpop.f32.mrf.mxu0  ;;  %v13749_v18 = vld [vmem:[%s18268_s26 + $0xb8] sm:$0xff]  ;;  %v13750_v19 = vld [vmem:[%s18268_s26 + $0xc8] sm:$0xff] }
 0x1aa   : > { %v2214_v57 = vpop.f32.mrf.mxu1 }
 0x1ab   : > { %v19515_v39 = vadd.f32 %v16901_v62, %v2220_v31  ;;  %v2215_v7 = vadd.f32 %v2214_v57, %v19042_v47  ;;  %v16904_v53 = vpop.f32.mrf.mxu0  ;;  %17243 = vmatmul.mubr.msk.f32.gmra.mxu0 %vm457_vm1, %v14005_v59  ;;  %v14008_v62 = vld [vmem:[%s18268_s26 + $0xc9] sm:$0xff] }
 0x1ac   : > { %v16710_v8 = vpop.f32.mrf.mxu1  ;;  %17049 = vmatmul.mubr.msk.f32.gmra.mxu1 %vm457_vm1, %v13747_v38  ;;  %17245 = vmatprep.mubr.msk.f32.mxu0 %vm457_vm1, %v14006_v6  ;;  %v14009_v6 = vld [vmem:[%s18268_s26 + $0xd1] sm:$0xff] }
 0x1ad   : > { %v19520_v10 = vadd.f32 %v3436_v12, %v2215_v7  ;;  %v2230_v56 = vadd.f32 %v16710_v8, %v19048_v45  ;;  %17051 = vmatprep.mubr.msk.f32.mxu1 %vm457_vm1, %v13748_v22  ;;  %v3446_v47 = vpop.f32.mrf.mxu0  ;;  %v13751_v22 = vld [vmem:[%s18268_s26 + $0xd0] sm:$0xff]  ;;  %v13752_v8 = vld [vmem:[%s18268_s26 + $0xd8] sm:$0xff] }
 0x1ae   : > { %v2224_v3 = vpop.f32.mrf.mxu1 }
 0x1af   : > { %v19529_v31 = vadd.f32 %v16904_v53, %v2230_v56  ;;  %v2225_v38 = vadd.f32 %v2224_v3, %v19058_v26  ;;  %v16907_v45 = vpop.f32.mrf.mxu0  ;;  %17246 = vmatmul.mubr.msk.f32.gmra.mxu0 %vm457_vm1, %v14007_v35  ;;  %v14010_v53 = vld [vmem:[%s18268_s26 + $0xd9] sm:$0xff] }
 0x1b0   : > { %v16713_v59 = vpop.f32.mrf.mxu1  ;;  %17052 = vmatmul.mubr.msk.f32.gmra.mxu1 %vm457_vm1, %v13749_v18  ;;  %17248 = vmatprep.mubr.msk.f32.mxu0 %vm457_vm1, %v14008_v62  ;;  %v13753_v62 = vld [vmem:[%s18268_s26 + $0xe0] sm:$0xff] }
 0x1b1   : > { %v19534_v57 = vadd.f32 %v3446_v47, %v2225_v38  ;;  %v2240_v12 = vadd.f32 %v16713_v59, %v19064_v37  ;;  %17054 = vmatprep.mubr.msk.f32.mxu1 %vm457_vm1, %v13750_v19  ;;  %v3456_v26 = vpop.f32.mrf.mxu0  ;;  %v24680_v47 = vld [vmem:[#allocation50_spill] sm:$0xff] }
 0x1b2   : > { %v2234_v7 = vpop.f32.mrf.mxu1  ;;  %v14011_v38 = vld [vmem:[%s18268_s26 + $0xe1] sm:$0xff] }
 0x1b3   : > { %v19543_v56 = vadd.f32 %v16907_v45, %v2240_v12  ;;  %v2235_v18 = vadd.f32 %v2234_v7, %v19074_v27  ;;  %v16910_v37 = vpop.f32.mrf.mxu0  ;;  %17249 = vmatmul.mubr.msk.f32.gmra.mxu0 %vm457_vm1, %v14009_v6  ;;  %v13754_v45 = vld [vmem:[%s18268_s26 + $0xf0] sm:$0xff] }
 0x1b4   : > { %v16716_v35 = vpop.f32.mrf.mxu1  ;;  %17055 = vmatmul.mubr.msk.f32.gmra.mxu1 %vm457_vm1, %v13751_v22  ;;  %17251 = vmatprep.mubr.msk.f32.mxu0 %vm457_vm1, %v14010_v53  ;;  %v14012_v12 = vld [vmem:[%s18268_s26 + $0xf1] sm:$0xff]  ;;  %v24684_v53 = vld [vmem:[#allocation54_spill] sm:$0xff] }
 0x1b5   : > { %v19548_v3 = vadd.f32 %v3456_v26, %v2235_v18  ;;  %v2250_v19 = vadd.f32 %v16716_v35, %v24680_v47  ;;  %17057 = vmatprep.mubr.msk.f32.mxu1 %vm457_vm1, %v13752_v8  ;;  %v3466_v27 = vpop.f32.mrf.mxu0  ;;  %v24682_v6 = vld [vmem:[#allocation52_spill] sm:$0xff]  ;;  %v13755_v47 = vld [vmem:[%s18268_s26 + $0xf8] sm:$0xff] }
 0x1b6   : > { %v2244_v59 = vpop.f32.mrf.mxu1 }
 0x1b7   : > { %24679 = vst [vmem:[#allocation83_spill] sm:$0xff] %v19548_v3  ;;  %v19557_v22 = vadd.f32 %v16910_v37, %v2250_v19  ;;  %v2245_v7 = vadd.f32 %v2244_v59, %v24682_v6  ;;  %v16913_v18 = vpop.f32.mrf.mxu0  ;;  %17252 = vmatmul.mubr.msk.f32.gmra.mxu0 %vm457_vm1, %v14011_v38  ;;  %v14013_v37 = vld [vmem:[%s18268_s26 + $0xf9] sm:$0xff]  ;;  %v24686_v38 = vld [vmem:[#allocation56_spill] sm:$0xff]  ;;  %v14062_v3 = vld [vmem:[%s18268_s26 + $0x2e1] sm:$0xff] }
 0x1b8   : > { %v16719_v26 = vpop.f32.mrf.mxu1  ;;  %17058 = vmatmul.mubr.msk.f32.gmra.mxu1 %vm457_vm1, %v13753_v62  ;;  %17254 = vmatprep.mubr.msk.f32.mxu0 %vm457_vm1, %v14012_v12  ;;  %v13756_v6 = vld [vmem:[%s18268_s26 + $0x100] sm:$0xff] }
 0x1b9   : > { %24681 = vst [vmem:[#allocation50_spill] sm:$0xff] %v19557_v22  ;;  %v19562_v8 = vadd.f32 %v3466_v27, %v2245_v7  ;;  %v2260_v35 = vadd.f32 %v16719_v26, %v24684_v53  ;;  %17060 = vmatprep.mubr.msk.f32.mxu1 %vm457_vm1, %v13754_v45  ;;  %v3476_v59 = vpop.f32.mrf.mxu0  ;;  %v14014_v22 = vld [vmem:[%s18268_s26 + $0x101] sm:$0xff] }
 0x1ba   : > { %v2254_v19 = vpop.f32.mrf.mxu1  ;;  %v24688_v12 = vld [vmem:[#allocation58_spill] sm:$0xff] }
 0x1bb   : > { %24683 = vst [vmem:[#allocation52_spill] sm:$0xff] %v19562_v8  ;;  %v19571_v62 = vadd.f32 %v16913_v18, %v2260_v35  ;;  %v2255_v27 = vadd.f32 %v2254_v19, %v24686_v38  ;;  %v16916_v26 = vpop.f32.mrf.mxu0  ;;  %17255 = vmatmul.mubr.msk.f32.gmra.mxu0 %vm457_vm1, %v14013_v37  ;;  %v13757_v8 = vld [vmem:[%s18268_s26 + $0x108] sm:$0xff]  ;;  %v13758_v38 = vld [vmem:[%s18268_s26 + $0x118] sm:$0xff]  ;;  %v24690_v37 = vld [vmem:[#allocation60_spill] sm:$0xff] }
 0x1bc   : > { %v16722_v7 = vpop.f32.mrf.mxu1  ;;  %17061 = vmatmul.mubr.msk.f32.gmra.mxu1 %vm457_vm1, %v13755_v47  ;;  %17257 = vmatprep.mubr.msk.f32.mxu0 %vm457_vm1, %v14014_v22  ;;  %v14015_v18 = vld [vmem:[%s18268_s26 + $0x109] sm:$0xff] }
 0x1bd   : > { %24685 = vst [vmem:[#allocation54_spill] sm:$0xff] %v19571_v62  ;;  %v19576_v45 = vadd.f32 %v3476_v59, %v2255_v27  ;;  %v2270_v53 = vadd.f32 %v16722_v7, %v24688_v12  ;;  %17063 = vmatprep.mubr.msk.f32.mxu1 %vm457_vm1, %v13756_v6  ;;  %v3486_v19 = vpop.f32.mrf.mxu0  ;;  %v14016_v62 = vld [vmem:[%s18268_s26 + $0x119] sm:$0xff] }
 0x1be   : > { %v2264_v35 = vpop.f32.mrf.mxu1  ;;  %v24692_v6 = vld [vmem:[#allocation62_spill] sm:$0xff] }
 0x1bf   : > { %24687 = vst [vmem:[#allocation56_spill] sm:$0xff] %v19576_v45  ;;  %v19585_v47 = vadd.f32 %v16916_v26, %v2270_v53  ;;  %v2265_v59 = vadd.f32 %v2264_v35, %v24690_v37  ;;  %v16919_v7 = vpop.f32.mrf.mxu0  ;;  %17258 = vmatmul.mubr.msk.f32.gmra.mxu0 %vm457_vm1, %v14015_v18  ;;  %v13759_v45 = vld [vmem:[%s18268_s26 + $0x120] sm:$0xff]  ;;  %v13760_v37 = vld [vmem:[%s18268_s26 + $0x128] sm:$0xff]  ;;  %v24694_v18 = vld [vmem:[#allocation64_spill] sm:$0xff] }
 0x1c0   : > { %v16725_v27 = vpop.f32.mrf.mxu1  ;;  %17064 = vmatmul.mubr.msk.f32.gmra.mxu1 %vm457_vm1, %v13757_v8  ;;  %17260 = vmatprep.mubr.msk.f32.mxu0 %vm457_vm1, %v14016_v62  ;;  %v14017_v26 = vld [vmem:[%s18268_s26 + $0x121] sm:$0xff] }
 0x1c1   : > { %24689 = vst [vmem:[#allocation58_spill] sm:$0xff] %v19585_v47  ;;  %v19590_v22 = vadd.f32 %v3486_v19, %v2265_v59  ;;  %v2280_v12 = vadd.f32 %v16725_v27, %v24692_v6  ;;  %17066 = vmatprep.mubr.msk.f32.mxu1 %vm457_vm1, %v13758_v38  ;;  %v3496_v35 = vpop.f32.mrf.mxu0  ;;  %v14018_v47 = vld [vmem:[%s18268_s26 + $0x129] sm:$0xff]  ;;  %v24696_v38 = vld [vmem:[#allocation66_spill] sm:$0xff] }
 0x1c2   : > { %v2274_v53 = vpop.f32.mrf.mxu1 }
 0x1c3   : > { %24691 = vst [vmem:[#allocation60_spill] sm:$0xff] %v19590_v22  ;;  %v19599_v8 = vadd.f32 %v16919_v7, %v2280_v12  ;;  %v2275_v19 = vadd.f32 %v2274_v53, %v24694_v18  ;;  %v16922_v27 = vpop.f32.mrf.mxu0  ;;  %17261 = vmatmul.mubr.msk.f32.gmra.mxu0 %vm457_vm1, %v14017_v26  ;;  %v13761_v22 = vld [vmem:[%s18268_s26 + $0x130] sm:$0xff]  ;;  %v13762_v18 = vld [vmem:[%s18268_s26 + $0x140] sm:$0xff] }
 0x1c4   : > { %v16728_v59 = vpop.f32.mrf.mxu1  ;;  %17067 = vmatmul.mubr.msk.f32.gmra.mxu1 %vm457_vm1, %v13759_v45  ;;  %17263 = vmatprep.mubr.msk.f32.mxu0 %vm457_vm1, %v14018_v47  ;;  %v14019_v7 = vld [vmem:[%s18268_s26 + $0x131] sm:$0xff] }
 0x1c5   : > { %24693 = vst [vmem:[#allocation62_spill] sm:$0xff] %v19599_v8  ;;  %v19604_v62 = vadd.f32 %v3496_v35, %v2275_v19  ;;  %v2290_v6 = vadd.f32 %v16728_v59, %v24696_v38  ;;  %17069 = vmatprep.mubr.msk.f32.mxu1 %vm457_vm1, %v13760_v37  ;;  %v3506_v53 = vpop.f32.mrf.mxu0  ;;  %v14020_v8 = vld [vmem:[%s18268_s26 + $0x141] sm:$0xff]  ;;  %v24698_v26 = vld [vmem:[#allocation68_spill] sm:$0xff] }
 0x1c6   : > { %v2284_v12 = vpop.f32.mrf.mxu1  ;;  %v24700_v37 = vld [vmem:[#allocation70_spill] sm:$0xff] }
 0x1c7   : > { %24695 = vst [vmem:[#allocation64_spill] sm:$0xff] %v19604_v62  ;;  %v19613_v45 = vadd.f32 %v16922_v27, %v2290_v6  ;;  %v2285_v35 = vadd.f32 %v2284_v12, %v24698_v26  ;;  %v16925_v59 = vpop.f32.mrf.mxu0  ;;  %17264 = vmatmul.mubr.msk.f32.gmra.mxu0 %vm457_vm1, %v14019_v7  ;;  %v13763_v62 = vld [vmem:[%s18268_s26 + $0x148] sm:$0xff]  ;;  %v13764_v26 = vld [vmem:[%s18268_s26 + $0x150] sm:$0xff] }
 0x1c8   : > { %v16731_v19 = vpop.f32.mrf.mxu1  ;;  %17070 = vmatmul.mubr.msk.f32.gmra.mxu1 %vm457_vm1, %v13761_v22  ;;  %17266 = vmatprep.mubr.msk.f32.mxu0 %vm457_vm1, %v14020_v8  ;;  %v14021_v27 = vld [vmem:[%s18268_s26 + $0x149] sm:$0xff] }
 0x1c9   : > { %24697 = vst [vmem:[#allocation66_spill] sm:$0xff] %v19613_v45  ;;  %v19618_v47 = vadd.f32 %v3506_v53, %v2285_v35  ;;  %v2300_v38 = vadd.f32 %v16731_v19, %v24700_v37  ;;  %17072 = vmatprep.mubr.msk.f32.mxu1 %vm457_vm1, %v13762_v18  ;;  %v3516_v12 = vpop.f32.mrf.mxu0  ;;  %v14022_v45 = vld [vmem:[%s18268_s26 + $0x151] sm:$0xff]  ;;  %v24704_v18 = vld [vmem:[#allocation74_spill] sm:$0xff] }
 0x1ca   : > { %v2294_v6 = vpop.f32.mrf.mxu1  ;;  %v24702_v7 = vld [vmem:[#allocation72_spill] sm:$0xff] }
 0x1cb   : > { %24699 = vst [vmem:[#allocation68_spill] sm:$0xff] %v19618_v47  ;;  %v19627_v22 = vadd.f32 %v16925_v59, %v2300_v38  ;;  %v2295_v53 = vadd.f32 %v2294_v6, %v24702_v7  ;;  %v16928_v19 = vpop.f32.mrf.mxu0  ;;  %17267 = vmatmul.mubr.msk.f32.gmra.mxu0 %vm457_vm1, %v14021_v27  ;;  %v13765_v47 = vld [vmem:[%s18268_s26 + $0x158] sm:$0xff]  ;;  %v13766_v7 = vld [vmem:[%s18268_s26 + $0x168] sm:$0xff]  ;;  %v24706_v27 = vld [vmem:[#allocation76_spill] sm:$0xff] }
 0x1cc   : > { %v16734_v35 = vpop.f32.mrf.mxu1  ;;  %17073 = vmatmul.mubr.msk.f32.gmra.mxu1 %vm457_vm1, %v13763_v62  ;;  %17269 = vmatprep.mubr.msk.f32.mxu0 %vm457_vm1, %v14022_v45  ;;  %v14023_v59 = vld [vmem:[%s18268_s26 + $0x159] sm:$0xff] }
 0x1cd   : > { %24701 = vst [vmem:[#allocation70_spill] sm:$0xff] %v19627_v22  ;;  %v19632_v8 = vadd.f32 %v3516_v12, %v2295_v53  ;;  %v2310_v37 = vadd.f32 %v16734_v35, %v24704_v18  ;;  %17075 = vmatprep.mubr.msk.f32.mxu1 %vm457_vm1, %v13764_v26  ;;  %v3526_v6 = vpop.f32.mrf.mxu0  ;;  %v14024_v22 = vld [vmem:[%s18268_s26 + $0x169] sm:$0xff]  ;;  %v24708_v26 = vld [vmem:[#allocation78_spill] sm:$0xff] }
 0x1ce   : > { %v2304_v38 = vpop.f32.mrf.mxu1 }
 0x1cf   : > { %24703 = vst [vmem:[#allocation72_spill] sm:$0xff] %v19632_v8  ;;  %v19641_v62 = vadd.f32 %v16928_v19, %v2310_v37  ;;  %v2305_v12 = vadd.f32 %v2304_v38, %v24706_v27  ;;  %v16931_v35 = vpop.f32.mrf.mxu0  ;;  %17270 = vmatmul.mubr.msk.f32.gmra.mxu0 %vm457_vm1, %v14023_v59  ;;  %v13767_v8 = vld [vmem:[%s18268_s26 + $0x170] sm:$0xff]  ;;  %v13768_v27 = vld [vmem:[%s18268_s26 + $0x178] sm:$0xff] }
 0x1d0   : > { %v16737_v53 = vpop.f32.mrf.mxu1  ;;  %17076 = vmatmul.mubr.msk.f32.gmra.mxu1 %vm457_vm1, %v13765_v47  ;;  %17272 = vmatprep.mubr.msk.f32.mxu0 %vm457_vm1, %v14024_v22  ;;  %v14025_v19 = vld [vmem:[%s18268_s26 + $0x171] sm:$0xff] }
 0x1d1   : > { %24705 = vst [vmem:[#allocation74_spill] sm:$0xff] %v19641_v62  ;;  %v19646_v45 = vadd.f32 %v3526_v6, %v2305_v12  ;;  %v2320_v18 = vadd.f32 %v16737_v53, %v24708_v26  ;;  %17078 = vmatprep.mubr.msk.f32.mxu1 %vm457_vm1, %v13766_v7  ;;  %v3536_v38 = vpop.f32.mrf.mxu0  ;;  %v14026_v62 = vld [vmem:[%s18268_s26 + $0x179] sm:$0xff]  ;;  %v24710_v59 = vld [vmem:[#allocation80_spill] sm:$0xff] }
 0x1d2   : > { %v2314_v37 = vpop.f32.mrf.mxu1  ;;  %v24712_v7 = vld [vmem:[#allocation2_spill] sm:$0xff] }
 0x1d3   : > { %24707 = vst [vmem:[#allocation76_spill] sm:$0xff] %v19646_v45  ;;  %v19655_v47 = vadd.f32 %v16931_v35, %v2320_v18  ;;  %v2315_v6 = vadd.f32 %v2314_v37, %v24710_v59  ;;  %v16934_v53 = vpop.f32.mrf.mxu0  ;;  %17273 = vmatmul.mubr.msk.f32.gmra.mxu0 %vm457_vm1, %v14025_v19  ;;  %v13769_v45 = vld [vmem:[%s18268_s26 + $0x180] sm:$0xff]  ;;  %v13770_v59 = vld [vmem:[%s18268_s26 + $0x190] sm:$0xff]  ;;  %v24714_v19 = vld [vmem:[#allocation3_spill] sm:$0xff] }
 0x1d4   : > { %v16740_v12 = vpop.f32.mrf.mxu1  ;;  %17079 = vmatmul.mubr.msk.f32.gmra.mxu1 %vm457_vm1, %v13767_v8  ;;  %17275 = vmatprep.mubr.msk.f32.mxu0 %vm457_vm1, %v14026_v62  ;;  %v14027_v35 = vld [vmem:[%s18268_s26 + $0x181] sm:$0xff] }
 0x1d5   : > { %24709 = vst [vmem:[#allocation78_spill] sm:$0xff] %v19655_v47  ;;  %v19660_v22 = vadd.f32 %v3536_v38, %v2315_v6  ;;  %v2330_v26 = vadd.f32 %v16740_v12, %v24712_v7  ;;  %17081 = vmatprep.mubr.msk.f32.mxu1 %vm457_vm1, %v13768_v27  ;;  %v3546_v37 = vpop.f32.mrf.mxu0  ;;  %v14028_v47 = vld [vmem:[%s18268_s26 + $0x191] sm:$0xff] }
 0x1d6   : > { %v2324_v18 = vpop.f32.mrf.mxu1  ;;  %v24716_v27 = vld [vmem:[#allocation4_spill] sm:$0xff] }
 0x1d7   : > { %24711 = vst [vmem:[#allocation80_spill] sm:$0xff] %v19660_v22  ;;  %v19669_v8 = vadd.f32 %v16934_v53, %v2330_v26  ;;  %v2325_v38 = vadd.f32 %v2324_v18, %v24714_v19  ;;  %v16937_v12 = vpop.f32.mrf.mxu0  ;;  %17276 = vmatmul.mubr.msk.f32.gmra.mxu0 %vm457_vm1, %v14027_v35  ;;  %v13771_v22 = vld [vmem:[%s18268_s26 + $0x198] sm:$0xff]  ;;  %v13772_v19 = vld [vmem:[%s18268_s26 + $0x1a0] sm:$0xff] }
 0x1d8   : > { %v16743_v6 = vpop.f32.mrf.mxu1  ;;  %17082 = vmatmul.mubr.msk.f32.gmra.mxu1 %vm457_vm1, %v13769_v45  ;;  %17278 = vmatprep.mubr.msk.f32.mxu0 %vm457_vm1, %v14028_v47  ;;  %v14029_v53 = vld [vmem:[%s18268_s26 + $0x199] sm:$0xff] }
 0x1d9   : > { %24713 = vst [vmem:[#allocation2_spill] sm:$0xff] %v19669_v8  ;;  %v19674_v62 = vadd.f32 %v3546_v37, %v2325_v38  ;;  %v2340_v7 = vadd.f32 %v16743_v6, %v24716_v27  ;;  %17084 = vmatprep.mubr.msk.f32.mxu1 %vm457_vm1, %v13770_v59  ;;  %v3556_v18 = vpop.f32.mrf.mxu0  ;;  %v14030_v8 = vld [vmem:[%s18268_s26 + $0x1a1] sm:$0xff]  ;;  %v24718_v35 = vld [vmem:[#allocation5_spill] sm:$0xff] }
 0x1da   : > { %v2334_v26 = vpop.f32.mrf.mxu1  ;;  %v24720_v59 = vld [vmem:[#allocation6_spill] sm:$0xff] }
 0x1db   : > { %24715 = vst [vmem:[#allocation3_spill] sm:$0xff] %v19674_v62  ;;  %v19683_v45 = vadd.f32 %v16937_v12, %v2340_v7  ;;  %v2335_v37 = vadd.f32 %v2334_v26, %v24718_v35  ;;  %v16940_v6 = vpop.f32.mrf.mxu0  ;;  %17279 = vmatmul.mubr.msk.f32.gmra.mxu0 %vm457_vm1, %v14029_v53  ;;  %v13773_v62 = vld [vmem:[%s18268_s26 + $0x1a8] sm:$0xff]  ;;  %v13774_v35 = vld [vmem:[%s18268_s26 + $0x1b8] sm:$0xff] }
 0x1dc   : > { %v16746_v38 = vpop.f32.mrf.mxu1  ;;  %17085 = vmatmul.mubr.msk.f32.gmra.mxu1 %vm457_vm1, %v13771_v22  ;;  %17281 = vmatprep.mubr.msk.f32.mxu0 %vm457_vm1, %v14030_v8  ;;  %v14031_v12 = vld [vmem:[%s18268_s26 + $0x1a9] sm:$0xff] }
 0x1dd   : > { %24717 = vst [vmem:[#allocation4_spill] sm:$0xff] %v19683_v45  ;;  %v19688_v47 = vadd.f32 %v3556_v18, %v2335_v37  ;;  %v2350_v27 = vadd.f32 %v16746_v38, %v24720_v59  ;;  %17087 = vmatprep.mubr.msk.f32.mxu1 %vm457_vm1, %v13772_v19  ;;  %v3566_v26 = vpop.f32.mrf.mxu0  ;;  %v14032_v45 = vld [vmem:[%s18268_s26 + $0x1b9] sm:$0xff]  ;;  %v24722_v53 = vld [vmem:[#allocation7_spill] sm:$0xff]  ;;  %v24724_v19 = vld [vmem:[#allocation8_spill] sm:$0xff] }
 0x1de   : > { %v2344_v7 = vpop.f32.mrf.mxu1 }
 0x1df   : > { %24719 = vst [vmem:[#allocation5_spill] sm:$0xff] %v19688_v47  ;;  %v19697_v22 = vadd.f32 %v16940_v6, %v2350_v27  ;;  %v2345_v18 = vadd.f32 %v2344_v7, %v24722_v53  ;;  %v16943_v38 = vpop.f32.mrf.mxu0  ;;  %17282 = vmatmul.mubr.msk.f32.gmra.mxu0 %vm457_vm1, %v14031_v12  ;;  %v13775_v47 = vld [vmem:[%s18268_s26 + $0x1c0] sm:$0xff]  ;;  %v13776_v53 = vld [vmem:[%s18268_s26 + $0x1c8] sm:$0xff]  ;;  %v24726_v12 = vld [vmem:[#allocation9_spill] sm:$0xff] }
 0x1e0   : > { %v16749_v37 = vpop.f32.mrf.mxu1  ;;  %17088 = vmatmul.mubr.msk.f32.gmra.mxu1 %vm457_vm1, %v13773_v62  ;;  %17284 = vmatprep.mubr.msk.f32.mxu0 %vm457_vm1, %v14032_v45  ;;  %v14033_v6 = vld [vmem:[%s18268_s26 + $0x1c1] sm:$0xff] }
 0x1e1   : > { %24721 = vst [vmem:[#allocation6_spill] sm:$0xff] %v19697_v22  ;;  %v19702_v8 = vadd.f32 %v3566_v26, %v2345_v18  ;;  %v2360_v59 = vadd.f32 %v16749_v37, %v24724_v19  ;;  %17090 = vmatprep.mubr.msk.f32.mxu1 %vm457_vm1, %v13774_v35  ;;  %v3576_v7 = vpop.f32.mrf.mxu0  ;;  %v14034_v22 = vld [vmem:[%s18268_s26 + $0x1c9] sm:$0xff]  ;;  %v24728_v35 = vld [vmem:[#allocation10_spill] sm:$0xff] }
 0x1e2   : > { %v2354_v27 = vpop.f32.mrf.mxu1 }
 0x1e3   : > { %24723 = vst [vmem:[#allocation7_spill] sm:$0xff] %v19702_v8  ;;  %v19711_v62 = vadd.f32 %v16943_v38, %v2360_v59  ;;  %v2355_v26 = vadd.f32 %v2354_v27, %v24726_v12  ;;  %v16946_v37 = vpop.f32.mrf.mxu0  ;;  %17285 = vmatmul.mubr.msk.f32.gmra.mxu0 %vm457_vm1, %v14033_v6  ;;  %v13777_v8 = vld [vmem:[%s18268_s26 + $0x1d0] sm:$0xff]  ;;  %v13778_v12 = vld [vmem:[%s18268_s26 + $0x1e0] sm:$0xff]  ;;  %v24730_v6 = vld [vmem:[#allocation11_spill] sm:$0xff] }
 0x1e4   : > { %v16752_v18 = vpop.f32.mrf.mxu1  ;;  %17091 = vmatmul.mubr.msk.f32.gmra.mxu1 %vm457_vm1, %v13775_v47  ;;  %17287 = vmatprep.mubr.msk.f32.mxu0 %vm457_vm1, %v14034_v22  ;;  %v14035_v38 = vld [vmem:[%s18268_s26 + $0x1d1] sm:$0xff] }
 0x1e5   : > { %24725 = vst [vmem:[#allocation8_spill] sm:$0xff] %v19711_v62  ;;  %v19716_v45 = vadd.f32 %v3576_v7, %v2355_v26  ;;  %v2370_v19 = vadd.f32 %v16752_v18, %v24728_v35  ;;  %17093 = vmatprep.mubr.msk.f32.mxu1 %vm457_vm1, %v13776_v53  ;;  %v3586_v27 = vpop.f32.mrf.mxu0  ;;  %v14036_v62 = vld [vmem:[%s18268_s26 + $0x1e1] sm:$0xff]  ;;  %v24732_v53 = vld [vmem:[#allocation12_spill] sm:$0xff] }
 0x1e6   : > { %v2364_v59 = vpop.f32.mrf.mxu1 }
 0x1e7   : > { %24727 = vst [vmem:[#allocation9_spill] sm:$0xff] %v19716_v45  ;;  %v19725_v47 = vadd.f32 %v16946_v37, %v2370_v19  ;;  %v2365_v7 = vadd.f32 %v2364_v59, %v24730_v6  ;;  %v16949_v18 = vpop.f32.mrf.mxu0  ;;  %17288 = vmatmul.mubr.msk.f32.gmra.mxu0 %vm457_vm1, %v14035_v38  ;;  %v13779_v45 = vld [vmem:[%s18268_s26 + $0x1e8] sm:$0xff]  ;;  %v13780_v6 = vld [vmem:[%s18268_s26 + $0x1f0] sm:$0xff]  ;;  %v24734_v38 = vld [vmem:[#allocation13_spill] sm:$0xff] }
 0x1e8   : > { %v16755_v26 = vpop.f32.mrf.mxu1  ;;  %17094 = vmatmul.mubr.msk.f32.gmra.mxu1 %vm457_vm1, %v13777_v8  ;;  %17290 = vmatprep.mubr.msk.f32.mxu0 %vm457_vm1, %v14036_v62  ;;  %v14037_v37 = vld [vmem:[%s18268_s26 + $0x1e9] sm:$0xff] }
 0x1e9   : > { %24729 = vst [vmem:[#allocation10_spill] sm:$0xff] %v19725_v47  ;;  %v19730_v22 = vadd.f32 %v3586_v27, %v2365_v7  ;;  %v2380_v35 = vadd.f32 %v16755_v26, %v24732_v53  ;;  %17096 = vmatprep.mubr.msk.f32.mxu1 %vm457_vm1, %v13778_v12  ;;  %v3596_v59 = vpop.f32.mrf.mxu0  ;;  %v14038_v47 = vld [vmem:[%s18268_s26 + $0x1f1] sm:$0xff]  ;;  %v24736_v12 = vld [vmem:[#allocation14_spill] sm:$0xff] }
 0x1ea   : > { %v2374_v19 = vpop.f32.mrf.mxu1 }
 0x1eb   : > { %24731 = vst [vmem:[#allocation11_spill] sm:$0xff] %v19730_v22  ;;  %v19739_v8 = vadd.f32 %v16949_v18, %v2380_v35  ;;  %v2375_v27 = vadd.f32 %v2374_v19, %v24734_v38  ;;  %v16952_v26 = vpop.f32.mrf.mxu0  ;;  %17291 = vmatmul.mubr.msk.f32.gmra.mxu0 %vm457_vm1, %v14037_v37  ;;  %v13781_v22 = vld [vmem:[%s18268_s26 + $0x1f8] sm:$0xff]  ;;  %v13782_v38 = vld [vmem:[%s18268_s26 + $0x208] sm:$0xff] }
 0x1ec   : > { %v16758_v7 = vpop.f32.mrf.mxu1  ;;  %17097 = vmatmul.mubr.msk.f32.gmra.mxu1 %vm457_vm1, %v13779_v45  ;;  %17293 = vmatprep.mubr.msk.f32.mxu0 %vm457_vm1, %v14038_v47  ;;  %v14039_v18 = vld [vmem:[%s18268_s26 + $0x1f9] sm:$0xff]  ;;  %v24738_v37 = vld [vmem:[#allocation15_spill] sm:$0xff] }
 0x1ed   : > { %24733 = vst [vmem:[#allocation12_spill] sm:$0xff] %v19739_v8  ;;  %v19744_v62 = vadd.f32 %v3596_v59, %v2375_v27  ;;  %v2390_v53 = vadd.f32 %v16758_v7, %v24736_v12  ;;  %17099 = vmatprep.mubr.msk.f32.mxu1 %vm457_vm1, %v13780_v6  ;;  %v3606_v19 = vpop.f32.mrf.mxu0  ;;  %v14040_v8 = vld [vmem:[%s18268_s26 + $0x209] sm:$0xff] }
 0x1ee   : > { %v2384_v35 = vpop.f32.mrf.mxu1  ;;  %v24740_v6 = vld [vmem:[#allocation16_spill] sm:$0xff] }
 0x1ef   : > { %24735 = vst [vmem:[#allocation13_spill] sm:$0xff] %v19744_v62  ;;  %v19753_v45 = vadd.f32 %v16952_v26, %v2390_v53  ;;  %v2385_v59 = vadd.f32 %v2384_v35, %v24738_v37  ;;  %v16955_v7 = vpop.f32.mrf.mxu0  ;;  %17294 = vmatmul.mubr.msk.f32.gmra.mxu0 %vm457_vm1, %v14039_v18  ;;  %v13783_v62 = vld [vmem:[%s18268_s26 + $0x210] sm:$0xff]  ;;  %v13784_v37 = vld [vmem:[%s18268_s26 + $0x218] sm:$0xff] }
 0x1f0   : > { %v16761_v27 = vpop.f32.mrf.mxu1  ;;  %17100 = vmatmul.mubr.msk.f32.gmra.mxu1 %vm457_vm1, %v13781_v22  ;;  %17296 = vmatprep.mubr.msk.f32.mxu0 %vm457_vm1, %v14040_v8  ;;  %v14041_v26 = vld [vmem:[%s18268_s26 + $0x211] sm:$0xff] }
 0x1f1   : > { %24737 = vst [vmem:[#allocation14_spill] sm:$0xff] %v19753_v45  ;;  %v19758_v47 = vadd.f32 %v3606_v19, %v2385_v59  ;;  %v2400_v12 = vadd.f32 %v16761_v27, %v24740_v6  ;;  %17102 = vmatprep.mubr.msk.f32.mxu1 %vm457_vm1, %v13782_v38  ;;  %v3616_v35 = vpop.f32.mrf.mxu0  ;;  %v14042_v45 = vld [vmem:[%s18268_s26 + $0x219] sm:$0xff] }
 0x1f2   : > { %v2394_v53 = vpop.f32.mrf.mxu1  ;;  %v24742_v18 = vld [vmem:[#allocation17_spill] sm:$0xff]  ;;  %v24744_v38 = vld [vmem:[#allocation18_spill] sm:$0xff] }
 0x1f3   : > { %24739 = vst [vmem:[#allocation15_spill] sm:$0xff] %v19758_v47  ;;  %v19767_v22 = vadd.f32 %v16955_v7, %v2400_v12  ;;  %v2395_v19 = vadd.f32 %v2394_v53, %v24742_v18  ;;  %v16958_v27 = vpop.f32.mrf.mxu0  ;;  %17297 = vmatmul.mubr.msk.f32.gmra.mxu0 %vm457_vm1, %v14041_v26  ;;  %v13785_v47 = vld [vmem:[%s18268_s26 + $0x220] sm:$0xff]  ;;  %v13786_v18 = vld [vmem:[%s18268_s26 + $0x230] sm:$0xff]  ;;  %v24746_v26 = vld [vmem:[#allocation19_spill] sm:$0xff] }
 0x1f4   : > { %v16764_v59 = vpop.f32.mrf.mxu1  ;;  %17103 = vmatmul.mubr.msk.f32.gmra.mxu1 %vm457_vm1, %v13783_v62  ;;  %17299 = vmatprep.mubr.msk.f32.mxu0 %vm457_vm1, %v14042_v45  ;;  %v14043_v7 = vld [vmem:[%s18268_s26 + $0x221] sm:$0xff] }
 0x1f5   : > { %24741 = vst [vmem:[#allocation16_spill] sm:$0xff] %v19767_v22  ;;  %v19772_v8 = vadd.f32 %v3616_v35, %v2395_v19  ;;  %v2410_v6 = vadd.f32 %v16764_v59, %v24744_v38  ;;  %17105 = vmatprep.mubr.msk.f32.mxu1 %vm457_vm1, %v13784_v37  ;;  %v3626_v53 = vpop.f32.mrf.mxu0  ;;  %v14044_v22 = vld [vmem:[%s18268_s26 + $0x231] sm:$0xff] }
 0x1f6   : > { %v2404_v12 = vpop.f32.mrf.mxu1  ;;  %v24748_v37 = vld [vmem:[#allocation20_spill] sm:$0xff] }
 0x1f7   : > { %24743 = vst [vmem:[#allocation17_spill] sm:$0xff] %v19772_v8  ;;  %v19781_v62 = vadd.f32 %v16958_v27, %v2410_v6  ;;  %v2405_v35 = vadd.f32 %v2404_v12, %v24746_v26  ;;  %v16961_v59 = vpop.f32.mrf.mxu0  ;;  %17300 = vmatmul.mubr.msk.f32.gmra.mxu0 %vm457_vm1, %v14043_v7  ;;  %v13787_v8 = vld [vmem:[%s18268_s26 + $0x238] sm:$0xff]  ;;  %v13788_v26 = vld [vmem:[%s18268_s26 + $0x240] sm:$0xff] }
 0x1f8   : > { %v16767_v19 = vpop.f32.mrf.mxu1  ;;  %17106 = vmatmul.mubr.msk.f32.gmra.mxu1 %vm457_vm1, %v13785_v47  ;;  %17302 = vmatprep.mubr.msk.f32.mxu0 %vm457_vm1, %v14044_v22  ;;  %v14045_v27 = vld [vmem:[%s18268_s26 + $0x239] sm:$0xff] }
 0x1f9   : > { %24745 = vst [vmem:[#allocation18_spill] sm:$0xff] %v19781_v62  ;;  %v19786_v45 = vadd.f32 %v3626_v53, %v2405_v35  ;;  %v2420_v38 = vadd.f32 %v16767_v19, %v24748_v37  ;;  %17108 = vmatprep.mubr.msk.f32.mxu1 %vm457_vm1, %v13786_v18  ;;  %v3636_v12 = vpop.f32.mrf.mxu0  ;;  %v14046_v62 = vld [vmem:[%s18268_s26 + $0x241] sm:$0xff]  ;;  %v24750_v7 = vld [vmem:[#allocation21_spill] sm:$0xff] }
 0x1fa   : > { %v2414_v6 = vpop.f32.mrf.mxu1  ;;  %v24752_v18 = vld [vmem:[#allocation22_spill] sm:$0xff] }
 0x1fb   : > { %24747 = vst [vmem:[#allocation19_spill] sm:$0xff] %v19786_v45  ;;  %v19795_v47 = vadd.f32 %v16961_v59, %v2420_v38  ;;  %v2415_v53 = vadd.f32 %v2414_v6, %v24750_v7  ;;  %v16964_v19 = vpop.f32.mrf.mxu0  ;;  %17303 = vmatmul.mubr.msk.f32.gmra.mxu0 %vm457_vm1, %v14045_v27  ;;  %v13789_v45 = vld [vmem:[%s18268_s26 + $0x248] sm:$0xff]  ;;  %v13790_v7 = vld [vmem:[%s18268_s26 + $0x258] sm:$0xff] }
 0x1fc   : > { %v16770_v35 = vpop.f32.mrf.mxu1  ;;  %17109 = vmatmul.mubr.msk.f32.gmra.mxu1 %vm457_vm1, %v13787_v8  ;;  %17305 = vmatprep.mubr.msk.f32.mxu0 %vm457_vm1, %v14046_v62  ;;  %v14047_v59 = vld [vmem:[%s18268_s26 + $0x249] sm:$0xff] }
 0x1fd   : > { %24749 = vst [vmem:[#allocation20_spill] sm:$0xff] %v19795_v47  ;;  %v19800_v22 = vadd.f32 %v3636_v12, %v2415_v53  ;;  %v2430_v37 = vadd.f32 %v16770_v35, %v24752_v18  ;;  %17111 = vmatprep.mubr.msk.f32.mxu1 %vm457_vm1, %v13788_v26  ;;  %v3646_v6 = vpop.f32.mrf.mxu0  ;;  %v14048_v47 = vld [vmem:[%s18268_s26 + $0x259] sm:$0xff]  ;;  %v24754_v27 = vld [vmem:[#allocation23_spill] sm:$0xff]  ;;  %v24756_v26 = vld [vmem:[#allocation24_spill] sm:$0xff] }
 0x1fe   : > { %v2424_v38 = vpop.f32.mrf.mxu1 }
 0x1ff   : > { %24751 = vst [vmem:[#allocation21_spill] sm:$0xff] %v19800_v22  ;;  %v19809_v8 = vadd.f32 %v16964_v19, %v2430_v37  ;;  %v2425_v12 = vadd.f32 %v2424_v38, %v24754_v27  ;;  %v16967_v35 = vpop.f32.mrf.mxu0  ;;  %17306 = vmatmul.mubr.msk.f32.gmra.mxu0 %vm457_vm1, %v14047_v59  ;;  %v13791_v22 = vld [vmem:[%s18268_s26 + $0x260] sm:$0xff]  ;;  %v13792_v27 = vld [vmem:[%s18268_s26 + $0x268] sm:$0xff]  ;;  %v24758_v59 = vld [vmem:[#allocation25_spill] sm:$0xff] }
 0x200   : > { %v16773_v53 = vpop.f32.mrf.mxu1  ;;  %17112 = vmatmul.mubr.msk.f32.gmra.mxu1 %vm457_vm1, %v13789_v45  ;;  %17308 = vmatprep.mubr.msk.f32.mxu0 %vm457_vm1, %v14048_v47  ;;  %v14049_v19 = vld [vmem:[%s18268_s26 + $0x261] sm:$0xff] }
 0x201   : > { %24753 = vst [vmem:[#allocation22_spill] sm:$0xff] %v19809_v8  ;;  %v19814_v62 = vadd.f32 %v3646_v6, %v2425_v12  ;;  %v2440_v18 = vadd.f32 %v16773_v53, %v24756_v26  ;;  %17114 = vmatprep.mubr.msk.f32.mxu1 %vm457_vm1, %v13790_v7  ;;  %v3656_v38 = vpop.f32.mrf.mxu0  ;;  %v14050_v8 = vld [vmem:[%s18268_s26 + $0x269] sm:$0xff]  ;;  %v24760_v7 = vld [vmem:[#allocation26_spill] sm:$0xff] }
 0x202   : > { %v2434_v37 = vpop.f32.mrf.mxu1 }
 0x203   : > { %24755 = vst [vmem:[#allocation23_spill] sm:$0xff] %v19814_v62  ;;  %v19823_v45 = vadd.f32 %v16967_v35, %v2440_v18  ;;  %v2435_v6 = vadd.f32 %v2434_v37, %v24758_v59  ;;  %v16970_v53 = vpop.f32.mrf.mxu0  ;;  %17309 = vmatmul.mubr.msk.f32.gmra.mxu0 %vm457_vm1, %v14049_v19  ;;  %v13793_v62 = vld [vmem:[%s18268_s26 + $0x270] sm:$0xff]  ;;  %v13794_v59 = vld [vmem:[%s18268_s26 + $0x280] sm:$0xff]  ;;  %v24762_v19 = vld [vmem:[#allocation27_spill] sm:$0xff] }
 0x204   : > { %v16776_v12 = vpop.f32.mrf.mxu1  ;;  %17115 = vmatmul.mubr.msk.f32.gmra.mxu1 %vm457_vm1, %v13791_v22  ;;  %17311 = vmatprep.mubr.msk.f32.mxu0 %vm457_vm1, %v14050_v8  ;;  %v14051_v35 = vld [vmem:[%s18268_s26 + $0x271] sm:$0xff] }
 0x205   : > { %24757 = vst [vmem:[#allocation24_spill] sm:$0xff] %v19823_v45  ;;  %v19828_v47 = vadd.f32 %v3656_v38, %v2435_v6  ;;  %v2450_v26 = vadd.f32 %v16776_v12, %v24760_v7  ;;  %17117 = vmatprep.mubr.msk.f32.mxu1 %vm457_vm1, %v13792_v27  ;;  %v3666_v37 = vpop.f32.mrf.mxu0  ;;  %v14052_v45 = vld [vmem:[%s18268_s26 + $0x281] sm:$0xff]  ;;  %v24764_v27 = vld [vmem:[#allocation28_spill] sm:$0xff] }
 0x206   : > { %v2444_v18 = vpop.f32.mrf.mxu1 }
 0x207   : > { %24759 = vst [vmem:[#allocation25_spill] sm:$0xff] %v19828_v47  ;;  %v19837_v22 = vadd.f32 %v16970_v53, %v2450_v26  ;;  %v2445_v38 = vadd.f32 %v2444_v18, %v24762_v19  ;;  %v16973_v12 = vpop.f32.mrf.mxu0  ;;  %17312 = vmatmul.mubr.msk.f32.gmra.mxu0 %vm457_vm1, %v14051_v35  ;;  %v13795_v47 = vld [vmem:[%s18268_s26 + $0x288] sm:$0xff]  ;;  %v13796_v19 = vld [vmem:[%s18268_s26 + $0x290] sm:$0xff]  ;;  %v24766_v35 = vld [vmem:[#allocation29_spill] sm:$0xff] }
 0x208   : > { %v16779_v6 = vpop.f32.mrf.mxu1  ;;  %17118 = vmatmul.mubr.msk.f32.gmra.mxu1 %vm457_vm1, %v13793_v62  ;;  %17314 = vmatprep.mubr.msk.f32.mxu0 %vm457_vm1, %v14052_v45  ;;  %v14053_v53 = vld [vmem:[%s18268_s26 + $0x289] sm:$0xff] }
 0x209   : > { %24761 = vst [vmem:[#allocation26_spill] sm:$0xff] %v19837_v22  ;;  %v19842_v8 = vadd.f32 %v3666_v37, %v2445_v38  ;;  %v2460_v7 = vadd.f32 %v16779_v6, %v24764_v27  ;;  %17120 = vmatprep.mubr.msk.f32.mxu1 %vm457_vm1, %v13794_v59  ;;  %v3676_v18 = vpop.f32.mrf.mxu0  ;;  %v14054_v22 = vld [vmem:[%s18268_s26 + $0x291] sm:$0xff]  ;;  %v24768_v59 = vld [vmem:[#allocation30_spill] sm:$0xff] }
 0x20a   : > { %v2454_v26 = vpop.f32.mrf.mxu1 }
 0x20b   : > { %24763 = vst [vmem:[#allocation27_spill] sm:$0xff] %v19842_v8  ;;  %v19851_v62 = vadd.f32 %v16973_v12, %v2460_v7  ;;  %v2455_v37 = vadd.f32 %v2454_v26, %v24766_v35  ;;  %v16976_v6 = vpop.f32.mrf.mxu0  ;;  %17315 = vmatmul.mubr.msk.f32.gmra.mxu0 %vm457_vm1, %v14053_v53  ;;  %v13797_v8 = vld [vmem:[%s18268_s26 + $0x298] sm:$0xff]  ;;  %v13798_v35 = vld [vmem:[%s18268_s26 + $0x2a8] sm:$0xff] }
 0x20c   : > { %v16782_v38 = vpop.f32.mrf.mxu1  ;;  %17121 = vmatmul.mubr.msk.f32.gmra.mxu1 %vm457_vm1, %v13795_v47  ;;  %17317 = vmatprep.mubr.msk.f32.mxu0 %vm457_vm1, %v14054_v22  ;;  %v14055_v12 = vld [vmem:[%s18268_s26 + $0x299] sm:$0xff]  ;;  %v24770_v53 = vld [vmem:[#allocation31_spill] sm:$0xff] }
 0x20d   : > { %24765 = vst [vmem:[#allocation28_spill] sm:$0xff] %v19851_v62  ;;  %v19856_v45 = vadd.f32 %v3676_v18, %v2455_v37  ;;  %v2470_v27 = vadd.f32 %v16782_v38, %v24768_v59  ;;  %17123 = vmatprep.mubr.msk.f32.mxu1 %vm457_vm1, %v13796_v19  ;;  %v3686_v26 = vpop.f32.mrf.mxu0  ;;  %v14056_v62 = vld [vmem:[%s18268_s26 + $0x2a9] sm:$0xff] }
 0x20e   : > { %v2464_v7 = vpop.f32.mrf.mxu1  ;;  %v24772_v19 = vld [vmem:[#allocation32_spill] sm:$0xff] }
 0x20f   : > { %24767 = vst [vmem:[#allocation29_spill] sm:$0xff] %v19856_v45  ;;  %v19865_v47 = vadd.f32 %v16976_v6, %v2470_v27  ;;  %v2465_v18 = vadd.f32 %v2464_v7, %v24770_v53  ;;  %v16979_v38 = vpop.f32.mrf.mxu0  ;;  %17318 = vmatmul.mubr.msk.f32.gmra.mxu0 %vm457_vm1, %v14055_v12  ;;  %v13799_v45 = vld [vmem:[%s18268_s26 + $0x2b0] sm:$0xff]  ;;  %v13800_v53 = vld [vmem:[%s18268_s26 + $0x2b8] sm:$0xff] }
 0x210   : > { %v16785_v37 = vpop.f32.mrf.mxu1  ;;  %17124 = vmatmul.mubr.msk.f32.gmra.mxu1 %vm457_vm1, %v13797_v8  ;;  %17320 = vmatprep.mubr.msk.f32.mxu0 %vm457_vm1, %v14056_v62  ;;  %v14057_v6 = vld [vmem:[%s18268_s26 + $0x2b1] sm:$0xff] }
 0x211   : > { %24769 = vst [vmem:[#allocation30_spill] sm:$0xff] %v19865_v47  ;;  %v19870_v22 = vadd.f32 %v3686_v26, %v2465_v18  ;;  %v2480_v59 = vadd.f32 %v16785_v37, %v24772_v19  ;;  %17126 = vmatprep.mubr.msk.f32.mxu1 %vm457_vm1, %v13798_v35  ;;  %v3696_v7 = vpop.f32.mrf.mxu0  ;;  %v14058_v47 = vld [vmem:[%s18268_s26 + $0x2b9] sm:$0xff] }
 0x212   : > { %v2474_v27 = vpop.f32.mrf.mxu1  ;;  %v24774_v12 = vld [vmem:[#allocation33_spill] sm:$0xff]  ;;  %v24776_v35 = vld [vmem:[#allocation34_spill] sm:$0xff] }
 0x213   : > { %24771 = vst [vmem:[#allocation31_spill] sm:$0xff] %v19870_v22  ;;  %v19879_v8 = vadd.f32 %v16979_v38, %v2480_v59  ;;  %v2475_v26 = vadd.f32 %v2474_v27, %v24774_v12  ;;  %v16982_v37 = vpop.f32.mrf.mxu0  ;;  %17321 = vmatmul.mubr.msk.f32.gmra.mxu0 %vm457_vm1, %v14057_v6  ;;  %v13801_v22 = vld [vmem:[%s18268_s26 + $0x2c0] sm:$0xff]  ;;  %v14894_v59 = vld [vmem:[%s24505_s1 + $0x1c] sm:$0xf]  ;;  %v14060_v6 = vld [vmem:[%s18268_s26 + $0x2d1] sm:$0xff] }
 0x214   : > { %v16788_v18 = vpop.f32.mrf.mxu1  ;;  %17127 = vmatmul.mubr.msk.f32.gmra.mxu1 %vm457_vm1, %v13799_v45  ;;  %17323 = vmatprep.mubr.msk.f32.mxu0 %vm457_vm1, %v14058_v47  ;;  %v14059_v38 = vld [vmem:[%s18268_s26 + $0x2c1] sm:$0xff]  ;;  %v13802_v45 = vld [vmem:[%s18268_s26 + $0x2d0] sm:$0xff] }
 0x215   : > { %24773 = vst [vmem:[#allocation32_spill] sm:$0xff] %v19879_v8  ;;  %v19884_v62 = vadd.f32 %v3696_v7, %v2475_v26  ;;  %v2490_v19 = vadd.f32 %v16788_v18, %v24776_v35  ;;  %17129 = vmatprep.mubr.msk.f32.mxu1 %vm457_vm1, %v13800_v53  ;;  %v3706_v12 = vpop.f32.mrf.mxu0  ;;  %17804 = vmatprep.subr.msk.mxu1 %vm842_vm0, %v14894_v59  ;;  %v24778_v53 = vld [vmem:[#allocation35_spill] sm:$0xff]  ;;  %v19903_v26 = vld [vmem:[%s24505_s1 + $0x20] sm:$0xf]  ;;  %v24780_v59 = vld [vmem:[#allocation36_spill] sm:$0xff] }
 0x216   : > { %v2484_v27 = vpop.f32.mrf.mxu1  ;;  %17998 = vmatprep.subr.msk.mxu0 %vm842_vm0, %v19903_v26 }
 0x217   : > { %24775 = vst [vmem:[#allocation33_spill] sm:$0xff] %v19884_v62  ;;  %v19897_v7 = vadd.f32 %v16982_v37, %v2490_v19  ;;  %v2485_v47 = vadd.f32 %v2484_v27, %v24778_v53  ;;  %v16985_v35 = vpop.f32.mrf.mxu0  ;;  %17324 = vmatmul.mubr.msk.f32.gmra.mxu0 %vm457_vm1, %v14059_v38  ;;  %v13803_v37 = vld [vmem:[%s18268_s26 + $0x2d8] sm:$0xff] }
 0x218   : > { %v16791_v18 = vpop.f32.mrf.mxu1  ;;  %17130 = vmatmul.mubr.msk.f32.gmra.mxu1 %vm457_vm1, %v13801_v22  ;;  %17326 = vmatprep.mubr.msk.f32.mxu0 %vm457_vm1, %v14060_v6  ;;  %v14061_v19 = vld [vmem:[%s18268_s26 + $0x2d9] sm:$0xff] }
 0x219   : > { %24777 = vst [vmem:[#allocation34_spill] sm:$0xff] %v19897_v7  ;;  %v19907_v62 = vadd.f32 %v3706_v12, %v2485_v47  ;;  %v2500_v8 = vadd.f32 %v16791_v18, %v24780_v59  ;;  %17132 = vmatprep.mubr.msk.f32.mxu1 %vm457_vm1, %v13802_v45  ;;  %v3716_v53 = vpop.f32.mrf.mxu0  ;;  %v13804_v7 = vld [vmem:[%s18268_s26 + $0x2e0] sm:$0xff]  ;;  %v24782_v38 = vld [vmem:[#allocation37_spill] sm:$0xff] }
 0x21a   : > { %v2494_v27 = vpop.f32.mrf.mxu1  ;;  %v24784_v18 = vld [vmem:[#allocation38_spill] sm:$0xff] }
 0x21b   : > { %24779 = vst [vmem:[#allocation35_spill] sm:$0xff] %v19907_v62  ;;  %v19918_v22 = vadd.f32 %v16985_v35, %v2500_v8  ;;  %v2495_v12 = vadd.f32 %v2494_v27, %v24782_v38  ;;  %v16988_v47 = vpop.f32.mrf.mxu0  ;;  %17327 = vmatmul.mubr.msk.f32.gmra.mxu0 %vm457_vm1, %v14061_v19  ;;  %v13805_v62 = vld [vmem:[%s18268_s26 + $0x2e8] sm:$0xff]  ;;  %v13806_v38 = vld [vmem:[%s18268_s26 + $0x2f8] sm:$0xff] }
 0x21c   : > { %v16794_v45 = vpop.f32.mrf.mxu1  ;;  %17133 = vmatmul.mubr.msk.f32.gmra.mxu1 %vm457_vm1, %v13803_v37  ;;  %17329 = vmatprep.mubr.msk.f32.mxu0 %vm457_vm1, %v14062_v3  ;;  %v14063_v8 = vld [vmem:[%s18268_s26 + $0x2e9] sm:$0xff] }
 0x21d   : > { %24781 = vst [vmem:[#allocation36_spill] sm:$0xff] %v19918_v22  ;;  %v19923_v6 = vadd.f32 %v3716_v53, %v2495_v12  ;;  %v2510_v59 = vadd.f32 %v16794_v45, %v24784_v18  ;;  %17135 = vmatprep.mubr.msk.f32.mxu1 %vm457_vm1, %v13804_v7  ;;  %v3726_v27 = vpop.f32.mrf.mxu0  ;;  %v14064_v22 = vld [vmem:[%s18268_s26 + $0x2f9] sm:$0xff]  ;;  %v24786_v19 = vld [vmem:[#allocation39_spill] sm:$0xff]  ;;  %v24788_v7 = vld [vmem:[#allocation40_spill] sm:$0xff] }
 0x21e   : > { %v2504_v35 = vpop.f32.mrf.mxu1 }
 0x21f   : > { %24783 = vst [vmem:[#allocation37_spill] sm:$0xff] %v19923_v6  ;;  %v19932_v37 = vadd.f32 %v16988_v47, %v2510_v59  ;;  %v2505_v53 = vadd.f32 %v2504_v35, %v24786_v19  ;;  %v16991_v45 = vpop.f32.mrf.mxu0  ;;  %17330 = vmatmul.mubr.msk.f32.gmra.mxu0 %vm457_vm1, %v14063_v8  ;;  %v13807_v6 = vld [vmem:[%s18268_s26 + $0x300] sm:$0xff]  ;;  %v13808_v19 = vld [vmem:[%s18268_s26 + $0x308] sm:$0xff]  ;;  %v24790_v8 = vld [vmem:[#allocation41_spill] sm:$0xff] }
 0x220   : > { %v16797_v12 = vpop.f32.mrf.mxu1  ;;  %17136 = vmatmul.mubr.msk.f32.gmra.mxu1 %vm457_vm1, %v13805_v62  ;;  %17332 = vmatprep.mubr.msk.f32.mxu0 %vm457_vm1, %v14064_v22  ;;  %v14065_v47 = vld [vmem:[%s18268_s26 + $0x301] sm:$0xff] }
 0x221   : > { %24785 = vst [vmem:[#allocation38_spill] sm:$0xff] %v19932_v37  ;;  %v19937_v3 = vadd.f32 %v3726_v27, %v2505_v53  ;;  %v2520_v18 = vadd.f32 %v16797_v12, %v24788_v7  ;;  %17138 = vmatprep.mubr.msk.f32.mxu1 %vm457_vm1, %v13806_v38  ;;  %v3736_v35 = vpop.f32.mrf.mxu0  ;;  %v14066_v37 = vld [vmem:[%s18268_s26 + $0x309] sm:$0xff]  ;;  %v24792_v38 = vld [vmem:[#allocation42_spill] sm:$0xff] }
 0x222   : > { %v2514_v59 = vpop.f32.mrf.mxu1 }
 0x223   : > { %24787 = vst [vmem:[#allocation39_spill] sm:$0xff] %v19937_v3  ;;  %v19946_v62 = vadd.f32 %v16991_v45, %v2520_v18  ;;  %v2515_v27 = vadd.f32 %v2514_v59, %v24790_v8  ;;  %v16994_v12 = vpop.f32.mrf.mxu0  ;;  %17333 = vmatmul.mubr.msk.f32.gmra.mxu0 %vm457_vm1, %v14065_v47  ;;  %v13809_v3 = vld [vmem:[%s18268_s26 + $0x310] sm:$0xff]  ;;  %v13810_v8 = vld [vmem:[%s18268_s26 + $0x320] sm:$0xff]  ;;  %v24794_v47 = vld [vmem:[#allocation43_spill] sm:$0xff] }
 0x224   : > { %v16800_v53 = vpop.f32.mrf.mxu1  ;;  %17139 = vmatmul.mubr.msk.f32.gmra.mxu1 %vm457_vm1, %v13807_v6  ;;  %17335 = vmatprep.mubr.msk.f32.mxu0 %vm457_vm1, %v14066_v37  ;;  %v14067_v45 = vld [vmem:[%s18268_s26 + $0x311] sm:$0xff] }
 0x225   : > { %24789 = vst [vmem:[#allocation40_spill] sm:$0xff] %v19946_v62  ;;  %v19951_v22 = vadd.f32 %v3736_v35, %v2515_v27  ;;  %v2530_v7 = vadd.f32 %v16800_v53, %v24792_v38  ;;  %17141 = vmatprep.mubr.msk.f32.mxu1 %vm457_vm1, %v13808_v19  ;;  %v3746_v59 = vpop.f32.mrf.mxu0  ;;  %v14068_v62 = vld [vmem:[%s18268_s26 + $0x321] sm:$0xff]  ;;  %v24796_v19 = vld [vmem:[#allocation44_spill] sm:$0xff] }
 0x226   : > { %v2524_v18 = vpop.f32.mrf.mxu1 }
 0x227   : > { %24791 = vst [vmem:[#allocation41_spill] sm:$0xff] %v19951_v22  ;;  %v19960_v6 = vadd.f32 %v16994_v12, %v2530_v7  ;;  %v2525_v35 = vadd.f32 %v2524_v18, %v24794_v47  ;;  %v16997_v53 = vpop.f32.mrf.mxu0  ;;  %17336 = vmatmul.mubr.msk.f32.gmra.mxu0 %vm457_vm1, %v14067_v45  ;;  %v13811_v22 = vld [vmem:[%s18268_s26 + $0x328] sm:$0xff]  ;;  %v13812_v47 = vld [vmem:[%s18268_s26 + $0x330] sm:$0xff]  ;;  %v24798_v45 = vld [vmem:[#allocation45_spill] sm:$0xff] }
 0x228   : > { %v16803_v27 = vpop.f32.mrf.mxu1  ;;  %17142 = vmatmul.mubr.msk.f32.gmra.mxu1 %vm457_vm1, %v13809_v3  ;;  %17338 = vmatprep.mubr.msk.f32.mxu0 %vm457_vm1, %v14068_v62  ;;  %v14069_v12 = vld [vmem:[%s18268_s26 + $0x329] sm:$0xff] }
 0x229   : > { %24793 = vst [vmem:[#allocation42_spill] sm:$0xff] %v19960_v6  ;;  %v19965_v37 = vadd.f32 %v3746_v59, %v2525_v35  ;;  %v2540_v38 = vadd.f32 %v16803_v27, %v24796_v19  ;;  %17144 = vmatprep.mubr.msk.f32.mxu1 %vm457_vm1, %v13810_v8  ;;  %v3756_v18 = vpop.f32.mrf.mxu0  ;;  %v14070_v6 = vld [vmem:[%s18268_s26 + $0x331] sm:$0xff]  ;;  %v24800_v8 = vld [vmem:[#allocation46_spill] sm:$0xff] }
 0x22a   : > { %v2534_v7 = vpop.f32.mrf.mxu1 }
 0x22b   : > { %24795 = vst [vmem:[#allocation43_spill] sm:$0xff] %v19965_v37  ;;  %v19974_v3 = vadd.f32 %v16997_v53, %v2540_v38  ;;  %v2535_v59 = vadd.f32 %v2534_v7, %v24798_v45  ;;  %v17000_v27 = vpop.f32.mrf.mxu0  ;;  %17339 = vmatmul.mubr.msk.f32.gmra.mxu0 %vm457_vm1, %v14069_v12  ;;  %v13813_v37 = vld [vmem:[%s18268_s26 + $0x338] sm:$0xff]  ;;  %v13814_v45 = vld [vmem:[%s18268_s26 + $0x348] sm:$0xff] }
 0x22c   : > { %v16806_v35 = vpop.f32.mrf.mxu1  ;;  %17145 = vmatmul.mubr.msk.f32.gmra.mxu1 %vm457_vm1, %v13811_v22  ;;  %17341 = vmatprep.mubr.msk.f32.mxu0 %vm457_vm1, %v14070_v6  ;;  %v14071_v53 = vld [vmem:[%s18268_s26 + $0x339] sm:$0xff]  ;;  %v24802_v12 = vld [vmem:[#allocation47_spill] sm:$0xff] }
 0x22d   : > { %24797 = vst [vmem:[#allocation44_spill] sm:$0xff] %v19974_v3  ;;  %v19979_v62 = vadd.f32 %v3756_v18, %v2535_v59  ;;  %v2550_v19 = vadd.f32 %v16806_v35, %v24800_v8  ;;  %17147 = vmatprep.mubr.msk.f32.mxu1 %vm457_vm1, %v13812_v47  ;;  %v3766_v7 = vpop.f32.mrf.mxu0  ;;  %v14072_v3 = vld [vmem:[%s18268_s26 + $0x349] sm:$0xff] }
 0x22e   : > { %v2544_v38 = vpop.f32.mrf.mxu1  ;;  %v24804_v47 = vld [vmem:[#allocation48_spill] sm:$0xff] }
 0x22f   : > { %24799 = vst [vmem:[#allocation45_spill] sm:$0xff] %v19979_v62  ;;  %v19988_v22 = vadd.f32 %v17000_v27, %v2550_v19  ;;  %v2545_v18 = vadd.f32 %v2544_v38, %v24802_v12  ;;  %v17003_v35 = vpop.f32.mrf.mxu0  ;;  %17342 = vmatmul.mubr.msk.f32.gmra.mxu0 %vm457_vm1, %v14071_v53  ;;  %v13815_v62 = vld [vmem:[%s18268_s26 + $0x350] sm:$0xff]  ;;  %v13816_v12 = vld [vmem:[%s18268_s26 + $0x358] sm:$0xff] }
 0x230   : > { %v16809_v59 = vpop.f32.mrf.mxu1  ;;  %17148 = vmatmul.mubr.msk.f32.gmra.mxu1 %vm457_vm1, %v13813_v37  ;;  %17344 = vmatprep.mubr.msk.f32.mxu0 %vm457_vm1, %v14072_v3  ;;  %v14073_v27 = vld [vmem:[%s18268_s26 + $0x351] sm:$0xff] }
 0x231   : > { %24801 = vst [vmem:[#allocation46_spill] sm:$0xff] %v19988_v22  ;;  %v19993_v6 = vadd.f32 %v3766_v7, %v2545_v18  ;;  %v2560_v8 = vadd.f32 %v16809_v59, %v24804_v47  ;;  %17150 = vmatprep.mubr.msk.f32.mxu1 %vm457_vm1, %v13814_v45  ;;  %v3776_v38 = vpop.f32.mrf.mxu0  ;;  %v14074_v22 = vld [vmem:[%s18268_s26 + $0x359] sm:$0xff]  ;;  %v24808_v45 = vld [vmem:[#allocation51_spill] sm:$0xff] }
 0x232   : > { %v2554_v19 = vpop.f32.mrf.mxu1  ;;  %v24806_v53 = vld [vmem:[#allocation49_spill] sm:$0xff] }
 0x233   : > { %24803 = vst [vmem:[#allocation47_spill] sm:$0xff] %v19993_v6  ;;  %v20002_v37 = vadd.f32 %v17003_v35, %v2560_v8  ;;  %v2555_v7 = vadd.f32 %v2554_v19, %v24806_v53  ;;  %v17006_v59 = vpop.f32.mrf.mxu0  ;;  %17345 = vmatmul.mubr.msk.f32.gmra.mxu0 %vm457_vm1, %v14073_v27  ;;  %v13817_v6 = vld [vmem:[%s18268_s26 + $0x360] sm:$0xff]  ;;  %v13818_v53 = vld [vmem:[%s18268_s26 + $0x370] sm:$0xff]  ;;  %v24810_v27 = vld [vmem:[#allocation53_spill] sm:$0xff] }
 0x234   : > { %v16812_v18 = vpop.f32.mrf.mxu1  ;;  %17151 = vmatmul.mubr.msk.f32.gmra.mxu1 %vm457_vm1, %v13815_v62  ;;  %17347 = vmatprep.mubr.msk.f32.mxu0 %vm457_vm1, %v14074_v22  ;;  %v14075_v35 = vld [vmem:[%s18268_s26 + $0x361] sm:$0xff] }
 0x235   : > { %24805 = vst [vmem:[#allocation48_spill] sm:$0xff] %v20002_v37  ;;  %v20007_v3 = vadd.f32 %v3776_v38, %v2555_v7  ;;  %v2570_v47 = vadd.f32 %v16812_v18, %v24808_v45  ;;  %17153 = vmatprep.mubr.msk.f32.mxu1 %vm457_vm1, %v13816_v12  ;;  %v3786_v19 = vpop.f32.mrf.mxu0  ;;  %v14076_v37 = vld [vmem:[%s18268_s26 + $0x371] sm:$0xff]  ;;  %v24812_v12 = vld [vmem:[#allocation55_spill] sm:$0xff] }
 0x236   : > { %v2564_v8 = vpop.f32.mrf.mxu1 }
 0x237   : > { %24807 = vst [vmem:[#allocation49_spill] sm:$0xff] %v20007_v3  ;;  %v20016_v62 = vadd.f32 %v17006_v59, %v2570_v47  ;;  %v2565_v38 = vadd.f32 %v2564_v8, %v24810_v27  ;;  %v17009_v18 = vpop.f32.mrf.mxu0  ;;  %17348 = vmatmul.mubr.msk.f32.gmra.mxu0 %vm457_vm1, %v14075_v35  ;;  %v13819_v3 = vld [vmem:[%s18268_s26 + $0x378] sm:$0xff]  ;;  %v13820_v27 = vld [vmem:[%s18268_s26 + $0x380] sm:$0xff] }
 0x238   : > { %v16815_v7 = vpop.f32.mrf.mxu1  ;;  %17154 = vmatmul.mubr.msk.f32.gmra.mxu1 %vm457_vm1, %v13817_v6  ;;  %17350 = vmatprep.mubr.msk.f32.mxu0 %vm457_vm1, %v14076_v37  ;;  %v14077_v59 = vld [vmem:[%s18268_s26 + $0x379] sm:$0xff] }
 0x239   : > { %24809 = vst [vmem:[#allocation51_spill] sm:$0xff] %v20016_v62  ;;  %v20021_v22 = vadd.f32 %v3786_v19, %v2565_v38  ;;  %v2580_v45 = vadd.f32 %v16815_v7, %v24812_v12  ;;  %17156 = vmatprep.mubr.msk.f32.mxu1 %vm457_vm1, %v13818_v53  ;;  %v3796_v8 = vpop.f32.mrf.mxu0  ;;  %v14078_v62 = vld [vmem:[%s18268_s26 + $0x381] sm:$0xff]  ;;  %v24814_v35 = vld [vmem:[#allocation57_spill] sm:$0xff] }
 0x23a   : > { %v2574_v47 = vpop.f32.mrf.mxu1  ;;  %v24816_v53 = vld [vmem:[#allocation59_spill] sm:$0xff] }
 0x23b   : > { %24811 = vst [vmem:[#allocation53_spill] sm:$0xff] %v20021_v22  ;;  %v20030_v6 = vadd.f32 %v17009_v18, %v2580_v45  ;;  %v2575_v19 = vadd.f32 %v2574_v47, %v24814_v35  ;;  %v17012_v7 = vpop.f32.mrf.mxu0  ;;  %17351 = vmatmul.mubr.msk.f32.gmra.mxu0 %vm457_vm1, %v14077_v59  ;;  %v13821_v22 = vld [vmem:[%s18268_s26 + $0x388] sm:$0xff]  ;;  %v13822_v35 = vld [vmem:[%s18268_s26 + $0x398] sm:$0xff] }
 0x23c   : > { %v16818_v38 = vpop.f32.mrf.mxu1  ;;  %17157 = vmatmul.mubr.msk.f32.gmra.mxu1 %vm457_vm1, %v13819_v3  ;;  %17353 = vmatprep.mubr.msk.f32.mxu0 %vm457_vm1, %v14078_v62  ;;  %v14079_v18 = vld [vmem:[%s18268_s26 + $0x389] sm:$0xff]  ;;  %v24818_v59 = vld [vmem:[#allocation61_spill] sm:$0xff] }
 0x23d   : > { %24813 = vst [vmem:[#allocation55_spill] sm:$0xff] %v20030_v6  ;;  %v20035_v37 = vadd.f32 %v3796_v8, %v2575_v19  ;;  %v2590_v12 = vadd.f32 %v16818_v38, %v24816_v53  ;;  %17159 = vmatprep.mubr.msk.f32.mxu1 %vm457_vm1, %v13820_v27  ;;  %v3806_v47 = vpop.f32.mrf.mxu0  ;;  %v14080_v6 = vld [vmem:[%s18268_s26 + $0x399] sm:$0xff]  ;;  %v24820_v27 = vld [vmem:[#allocation63_spill] sm:$0xff] }
 0x23e   : > { %v2584_v45 = vpop.f32.mrf.mxu1 }
 0x23f   : > { %24815 = vst [vmem:[#allocation57_spill] sm:$0xff] %v20035_v37  ;;  %v20044_v3 = vadd.f32 %v17012_v7, %v2590_v12  ;;  %v2585_v8 = vadd.f32 %v2584_v45, %v24818_v59  ;;  %v17015_v38 = vpop.f32.mrf.mxu0  ;;  %17354 = vmatmul.mubr.msk.f32.gmra.mxu0 %vm457_vm1, %v14079_v18  ;;  %v13823_v37 = vld [vmem:[%s18268_s26 + $0x3a0] sm:$0xff]  ;;  %v13824_v59 = vld [vmem:[%s18268_s26 + $0x3a8] sm:$0xff]  ;;  %v24822_v18 = vld [vmem:[#allocation65_spill] sm:$0xff] }
 0x240   : > { %v16821_v19 = vpop.f32.mrf.mxu1  ;;  %17160 = vmatmul.mubr.msk.f32.gmra.mxu1 %vm457_vm1, %v13821_v22  ;;  %17356 = vmatprep.mubr.msk.f32.mxu0 %vm457_vm1, %v14080_v6  ;;  %v14081_v7 = vld [vmem:[%s18268_s26 + $0x3a1] sm:$0xff] }
 0x241   : > { %24817 = vst [vmem:[#allocation59_spill] sm:$0xff] %v20044_v3  ;;  %v20049_v62 = vadd.f32 %v3806_v47, %v2585_v8  ;;  %v2600_v53 = vadd.f32 %v16821_v19, %v24820_v27  ;;  %17162 = vmatprep.mubr.msk.f32.mxu1 %vm457_vm1, %v13822_v35  ;;  %v3816_v45 = vpop.f32.mrf.mxu0  ;;  %v14082_v3 = vld [vmem:[%s18268_s26 + $0x3a9] sm:$0xff] }
 0x242   : > { %v2594_v12 = vpop.f32.mrf.mxu1  ;;  %v24824_v35 = vld [vmem:[#allocation67_spill] sm:$0xff] }
 0x243   : > { %24819 = vst [vmem:[#allocation61_spill] sm:$0xff] %v20049_v62  ;;  %v20058_v22 = vadd.f32 %v17015_v38, %v2600_v53  ;;  %v2595_v47 = vadd.f32 %v2594_v12, %v24822_v18  ;;  %v17018_v19 = vpop.f32.mrf.mxu0  ;;  %17357 = vmatmul.mubr.msk.f32.gmra.mxu0 %vm457_vm1, %v14081_v7  ;;  %v13825_v62 = vld [vmem:[%s18268_s26 + $0x3b0] sm:$0xff]  ;;  %v13826_v18 = vld [vmem:[%s18268_s26 + $0x3c0] sm:$0xff]  ;;  %v24826_v7 = vld [vmem:[#allocation69_spill] sm:$0xff] }
 0x244   : > { %v16824_v8 = vpop.f32.mrf.mxu1  ;;  %17163 = vmatmul.mubr.msk.f32.gmra.mxu1 %vm457_vm1, %v13823_v37  ;;  %17359 = vmatprep.mubr.msk.f32.mxu0 %vm457_vm1, %v14082_v3  ;;  %v14083_v38 = vld [vmem:[%s18268_s26 + $0x3b1] sm:$0xff] }
 0x245   : > { %24821 = vst [vmem:[#allocation63_spill] sm:$0xff] %v20058_v22  ;;  %v20063_v6 = vadd.f32 %v3816_v45, %v2595_v47  ;;  %v2610_v27 = vadd.f32 %v16824_v8, %v24824_v35  ;;  %17165 = vmatprep.mubr.msk.f32.mxu1 %vm457_vm1, %v13824_v59  ;;  %v3826_v12 = vpop.f32.mrf.mxu0  ;;  %v14084_v22 = vld [vmem:[%s18268_s26 + $0x3c1] sm:$0xff] }
 0x246   : > { %v2604_v53 = vpop.f32.mrf.mxu1  ;;  %v24828_v59 = vld [vmem:[#allocation71_spill] sm:$0xff] }
 0x247   : > { %24823 = vst [vmem:[#allocation65_spill] sm:$0xff] %v20063_v6  ;;  %v20072_v37 = vadd.f32 %v17018_v19, %v2610_v27  ;;  %v2605_v45 = vadd.f32 %v2604_v53, %v24826_v7  ;;  %v17021_v8 = vpop.f32.mrf.mxu0  ;;  %17360 = vmatmul.mubr.msk.f32.gmra.mxu0 %vm457_vm1, %v14083_v38  ;;  %v13827_v6 = vld [vmem:[%s18268_s26 + $0x3c8] sm:$0xff]  ;;  %v13828_v7 = vld [vmem:[%s18268_s26 + $0x3d0] sm:$0xff]  ;;  %v24830_v38 = vld [vmem:[#allocation73_spill] sm:$0xff] }
 0x248   : > { %v16827_v47 = vpop.f32.mrf.mxu1  ;;  %17166 = vmatmul.mubr.msk.f32.gmra.mxu1 %vm457_vm1, %v13825_v62  ;;  %17362 = vmatprep.mubr.msk.f32.mxu0 %vm457_vm1, %v14084_v22  ;;  %v14085_v19 = vld [vmem:[%s18268_s26 + $0x3c9] sm:$0xff] }
 0x249   : > { %24825 = vst [vmem:[#allocation67_spill] sm:$0xff] %v20072_v37  ;;  %v20077_v3 = vadd.f32 %v3826_v12, %v2605_v45  ;;  %v2620_v35 = vadd.f32 %v16827_v47, %v24828_v59  ;;  %17168 = vmatprep.mubr.msk.f32.mxu1 %vm457_vm1, %v13826_v18  ;;  %v3836_v53 = vpop.f32.mrf.mxu0  ;;  %v14086_v37 = vld [vmem:[%s18268_s26 + $0x3d1] sm:$0xff]  ;;  %v24832_v18 = vld [vmem:[#allocation75_spill] sm:$0xff] }
 0x24a   : > { %v2614_v27 = vpop.f32.mrf.mxu1 }
 0x24b   : > { %24827 = vst [vmem:[#allocation69_spill] sm:$0xff] %v20077_v3  ;;  %v20086_v62 = vadd.f32 %v17021_v8, %v2620_v35  ;;  %v2615_v12 = vadd.f32 %v2614_v27, %v24830_v38  ;;  %v17024_v47 = vpop.f32.mrf.mxu0  ;;  %17363 = vmatmul.mubr.msk.f32.gmra.mxu0 %vm457_vm1, %v14085_v19  ;;  %v13829_v3 = vld [vmem:[%s18268_s26 + $0x3d8] sm:$0xff]  ;;  %v13830_v38 = vld [vmem:[%s18268_s26 + $0x3e8] sm:$0xff] }
 0x24c   : > { %v16830_v45 = vpop.f32.mrf.mxu1  ;;  %17169 = vmatmul.mubr.msk.f32.gmra.mxu1 %vm457_vm1, %v13827_v6  ;;  %17365 = vmatprep.mubr.msk.f32.mxu0 %vm457_vm1, %v14086_v37  ;;  %v14087_v8 = vld [vmem:[%s18268_s26 + $0x3d9] sm:$0xff] }
 0x24d   : > { %24829 = vst [vmem:[#allocation71_spill] sm:$0xff] %v20086_v62  ;;  %v20091_v22 = vadd.f32 %v3836_v53, %v2615_v12  ;;  %v2630_v59 = vadd.f32 %v16830_v45, %v24832_v18  ;;  %17171 = vmatprep.mubr.msk.f32.mxu1 %vm457_vm1, %v13828_v7  ;;  %v3846_v27 = vpop.f32.mrf.mxu0  ;;  %v14088_v62 = vld [vmem:[%s18268_s26 + $0x3e9] sm:$0xff]  ;;  %v24834_v19 = vld [vmem:[#allocation77_spill] sm:$0xff] }
 0x24e   : > { %v2624_v35 = vpop.f32.mrf.mxu1  ;;  %v24836_v7 = vld [vmem:[#allocation79_spill] sm:$0xff] }
 0x24f   : > { %24831 = vst [vmem:[#allocation73_spill] sm:$0xff] %v20091_v22  ;;  %v20100_v6 = vadd.f32 %v17024_v47, %v2630_v59  ;;  %v2625_v53 = vadd.f32 %v2624_v35, %v24834_v19  ;;  %v17027_v45 = vpop.f32.mrf.mxu0  ;;  %17366 = vmatmul.mubr.msk.f32.gmra.mxu0 %vm457_vm1, %v14087_v8  ;;  %v13831_v22 = vld [vmem:[%s18268_s26 + $0x3f0] sm:$0xff]  ;;  %v13832_v19 = vld [vmem:[%s18268_s26 + $0x3f8] sm:$0xff] }
 0x250   : > { %v16833_v12 = vpop.f32.mrf.mxu1  ;;  %17172 = vmatmul.mubr.msk.f32.gmra.mxu1 %vm457_vm1, %v13829_v3  ;;  %17368 = vmatprep.mubr.msk.f32.mxu0 %vm457_vm1, %v14088_v62  ;;  %v14089_v47 = vld [vmem:[%s18268_s26 + $0x3f1] sm:$0xff] }
 0x251   : > { %24833 = vst [vmem:[#allocation75_spill] sm:$0xff] %v20100_v6  ;;  %v20105_v37 = vadd.f32 %v3846_v27, %v2625_v53  ;;  %v2640_v18 = vadd.f32 %v16833_v12, %v24836_v7  ;;  %17174 = vmatprep.mubr.msk.f32.mxu1 %vm457_vm1, %v13830_v38  ;;  %v3856_v35 = vpop.f32.mrf.mxu0  ;;  %v14090_v6 = vld [vmem:[%s18268_s26 + $0x3f9] sm:$0xff] }
 0x252   : > { %v2634_v59 = vpop.f32.mrf.mxu1  ;;  %v24838_v8 = vld [vmem:[#allocation81_spill] sm:$0xff]  ;;  %v24839_v12 = vld [vmem:[#allocation82_spill] sm:$0xff] }
 0x253   : > { %24835 = vst [vmem:[#allocation77_spill] sm:$0xff] %v20105_v37  ;;  %v20114_v3 = vadd.f32 %v17027_v45, %v2640_v18  ;;  %v2635_v27 = vadd.f32 %v2634_v59, %v24838_v8  ;;  %v17226_v38 = vpop.f32.mrf.mxu0  ;;  %17369 = vmatmul.mubr.msk.f32.gmra.mxu0 %vm457_vm1, %v14089_v47  ;;  %v13833_v37 = vld [vmem:[%s18268_s26 + $0x400] sm:$0xff]  ;;  %v13834_v8 = vld [vmem:[%s18268_s26 + $0x410] sm:$0xff] }
 0x254   : > { %v17032_v53 = vpop.f32.mrf.mxu1  ;;  %17175 = vmatmul.mubr.msk.f32.gmra.mxu1 %vm457_vm1, %v13831_v22  ;;  %17371 = vmatprep.mubr.msk.f32.mxu0 %vm457_vm1, %v14090_v6  ;;  %v14091_v45 = vld [vmem:[%s18268_s26 + $0x401] sm:$0xff]  ;;  %v14092_v22 = vld [vmem:[%s18268_s26 + $0x411] sm:$0xff] }
 0x255   : > { %24837 = vst [vmem:[#allocation79_spill] sm:$0xff] %v20114_v3  ;;  %v20119_v62 = vadd.f32 %v3856_v35, %v2635_v27  ;;  %v5217_v7 = vadd.f32 %v17032_v53, %v24839_v12  ;;  %17177 = vmatprep.mubr.msk.f32.mxu1 %vm457_vm1, %v13832_v19  ;;  %v5927_v59 = vpop.f32.mrf.mxu0  ;;  %v13835_v53 = vld [vmem:[%s18268_s26 + $0x418] sm:$0xff] }
 0x256   : > { %v4577_v18 = vpop.f32.mrf.mxu1 }
 0x257   : > { %v20128_v3 = vadd.f32 %v17226_v38, %v5217_v7  ;;  %v5216_v47 = vadd.f32 %v4577_v18, %v19222_v49  ;;  %v17229_v19 = vpop.f32.mrf.mxu0  ;;  %17372 = vmatmul.mubr.msk.f32.gmra.mxu0 %vm457_vm1, %v14091_v45  ;;  %v14093_v38 = vld [vmem:[%s18268_s26 + $0x419] sm:$0xff] }
 0x258   : > { %v17035_v35 = vpop.f32.mrf.mxu1  ;;  %17178 = vmatmul.mubr.msk.f32.gmra.mxu1 %vm457_vm1, %v13833_v37  ;;  %17374 = vmatprep.mubr.msk.f32.mxu0 %vm457_vm1, %v14092_v22  ;;  %v13836_v7 = vld [vmem:[%s18268_s26 + $0x420] sm:$0xff] }
 0x259   : > { %v20133_v6 = vadd.f32 %v5927_v59, %v5216_v47  ;;  %v5219_v27 = vadd.f32 %v17035_v35, %v19231_v2  ;;  %17180 = vmatprep.mubr.msk.f32.mxu1 %vm457_vm1, %v13834_v8  ;;  %v5937_v49 = vpop.f32.mrf.mxu0  ;;  %v14094_v37 = vld [vmem:[%s18268_s26 + $0x421] sm:$0xff]  ;;  %v14095_v35 = vld [vmem:[%s18268_s26 + $0x429] sm:$0xff] }
 0x25a   : > { %v4587_v12 = vpop.f32.mrf.mxu1  ;;  %v13837_v47 = vld [vmem:[%s18268_s26 + $0x428] sm:$0xff] }
 0x25b   : > { %v20142_v18 = vadd.f32 %v17229_v19, %v5219_v27  ;;  %v5218_v45 = vadd.f32 %v4587_v12, %v19236_v21  ;;  %v17232_v2 = vpop.f32.mrf.mxu0  ;;  %17375 = vmatmul.mubr.msk.f32.gmra.mxu0 %vm457_vm1, %v14093_v38  ;;  %v13838_v27 = vld [vmem:[%s18268_s26 + $0x438] sm:$0xff] }
 0x25c   : > { %v17038_v59 = vpop.f32.mrf.mxu1  ;;  %17181 = vmatmul.mubr.msk.f32.gmra.mxu1 %vm457_vm1, %v13835_v53  ;;  %17377 = vmatprep.mubr.msk.f32.mxu0 %vm457_vm1, %v14094_v37  ;;  %v14096_v53 = vld [vmem:[%s18268_s26 + $0x439] sm:$0xff] }
 0x25d   : > { %v20147_v8 = vadd.f32 %v5937_v49, %v5218_v45  ;;  %v5221_v22 = vadd.f32 %v17038_v59, %v19245_v58  ;;  %17183 = vmatprep.mubr.msk.f32.mxu1 %vm457_vm1, %v13836_v7  ;;  %v5947_v21 = vpop.f32.mrf.mxu0  ;;  %v13839_v45 = vld [vmem:[%s18268_s26 + $0x440] sm:$0xff] }
 0x25e   : > { %v4597_v19 = vpop.f32.mrf.mxu1  ;;  %v14097_v59 = vld [vmem:[%s18268_s26 + $0x441] sm:$0xff] }
 0x25f   : > { %v20156_v12 = vadd.f32 %v17232_v2, %v5221_v22  ;;  %v5220_v38 = vadd.f32 %v4597_v19, %v19250_v33  ;;  %v17235_v58 = vpop.f32.mrf.mxu0  ;;  %17378 = vmatmul.mubr.msk.f32.gmra.mxu0 %vm457_vm1, %v14095_v35  ;;  %v13840_v22 = vld [vmem:[%s18268_s26 + $0x448] sm:$0xff] }
 0x260   : > { %v17041_v49 = vpop.f32.mrf.mxu1  ;;  %17184 = vmatmul.mubr.msk.f32.gmra.mxu1 %vm457_vm1, %v13837_v47  ;;  %17380 = vmatprep.mubr.msk.f32.mxu0 %vm457_vm1, %v14096_v53  ;;  %v14098_v47 = vld [vmem:[%s18268_s26 + $0x449] sm:$0xff] }
 0x261   : > { %v20161_v7 = vadd.f32 %v5947_v21, %v5220_v38  ;;  %v5223_v37 = vadd.f32 %v17041_v49, %v19259_v14  ;;  %17186 = vmatprep.mubr.msk.f32.mxu1 %vm457_vm1, %v13838_v27  ;;  %v5957_v33 = vpop.f32.mrf.mxu0  ;;  %v13841_v38 = vld [vmem:[%s18268_s26 + $0x450] sm:$0xff] }
 0x262   : > { %v4607_v2 = vpop.f32.mrf.mxu1  ;;  %v14099_v49 = vld [vmem:[%s18268_s26 + $0x451] sm:$0xff] }
 0x263   : > { %v20170_v19 = vadd.f32 %v17235_v58, %v5223_v37  ;;  %v5222_v35 = vadd.f32 %v4607_v2, %v19264_v41  ;;  %v17238_v14 = vpop.f32.mrf.mxu0  ;;  %17381 = vmatmul.mubr.msk.f32.gmra.mxu0 %vm457_vm1, %v14097_v59  ;;  %v13842_v37 = vld [vmem:[%s18268_s26 + $0x460] sm:$0xff] }
 0x264   : > { %v17044_v21 = vpop.f32.mrf.mxu1  ;;  %17187 = vmatmul.mubr.msk.f32.gmra.mxu1 %vm457_vm1, %v13839_v45  ;;  %17383 = vmatprep.mubr.msk.f32.mxu0 %vm457_vm1, %v14098_v47  ;;  %v14100_v45 = vld [vmem:[%s18268_s26 + $0x461] sm:$0xff] }
 0x265   : > { %v20175_v27 = vadd.f32 %v5957_v33, %v5222_v35  ;;  %v5225_v53 = vadd.f32 %v17044_v21, %v19273_v20  ;;  %17189 = vmatprep.mubr.msk.f32.mxu1 %vm457_vm1, %v13840_v22  ;;  %v5967_v41 = vpop.f32.mrf.mxu0  ;;  %v13843_v35 = vld [vmem:[%s18268_s26 + $0x468] sm:$0xff] }
 0x266   : > { %v4617_v58 = vpop.f32.mrf.mxu1  ;;  %v14101_v21 = vld [vmem:[%s18268_s26 + $0x469] sm:$0xff] }
 0x267   : > { %v20184_v2 = vadd.f32 %v17238_v14, %v5225_v53  ;;  %v5224_v59 = vadd.f32 %v4617_v58, %v19278_v29  ;;  %v17241_v20 = vpop.f32.mrf.mxu0  ;;  %17384 = vmatmul.mubr.msk.f32.gmra.mxu0 %vm457_vm1, %v14099_v49  ;;  %v13844_v53 = vld [vmem:[%s18268_s26 + $0x470] sm:$0xff] }
 0x268   : > { %v17047_v33 = vpop.f32.mrf.mxu1  ;;  %17190 = vmatmul.mubr.msk.f32.gmra.mxu1 %vm457_vm1, %v13841_v38  ;;  %17386 = vmatprep.mubr.msk.f32.mxu0 %vm457_vm1, %v14100_v45  ;;  %v14102_v38 = vld [vmem:[%s18268_s26 + $0x471] sm:$0xff] }
 0x269   : > { %v20189_v22 = vadd.f32 %v5967_v41, %v5224_v59  ;;  %v5227_v47 = vadd.f32 %v17047_v33, %v19287_v28  ;;  %17192 = vmatprep.mubr.msk.f32.mxu1 %vm457_vm1, %v13842_v37  ;;  %v5977_v29 = vpop.f32.mrf.mxu0  ;;  %v13845_v59 = vld [vmem:[%s18268_s26 + $0x478] sm:$0xff] }
 0x26a   : > { %v4627_v14 = vpop.f32.mrf.mxu1  ;;  %v14103_v33 = vld [vmem:[%s18268_s26 + $0x479] sm:$0xff] }
 0x26b   : > { %v20198_v58 = vadd.f32 %v17241_v20, %v5227_v47  ;;  %v5226_v49 = vadd.f32 %v4627_v14, %v19292_v15  ;;  %v17244_v28 = vpop.f32.mrf.mxu0  ;;  %17387 = vmatmul.mubr.msk.f32.gmra.mxu0 %vm457_vm1, %v14101_v21  ;;  %v13846_v47 = vld [vmem:[%s18268_s26 + $0x488] sm:$0xff] }
 0x26c   : > { %v17050_v41 = vpop.f32.mrf.mxu1  ;;  %17193 = vmatmul.mubr.msk.f32.gmra.mxu1 %vm457_vm1, %v13843_v35  ;;  %17389 = vmatprep.mubr.msk.f32.mxu0 %vm457_vm1, %v14102_v38  ;;  %v14104_v35 = vld [vmem:[%s18268_s26 + $0x489] sm:$0xff] }
 0x26d   : > { %v20203_v37 = vadd.f32 %v5977_v29, %v5226_v49  ;;  %v5229_v45 = vadd.f32 %v17050_v41, %v19301_v36  ;;  %17195 = vmatprep.mubr.msk.f32.mxu1 %vm457_vm1, %v13844_v53  ;;  %v5987_v15 = vpop.f32.mrf.mxu0  ;;  %v13847_v49 = vld [vmem:[%s18268_s26 + $0x490] sm:$0xff] }
 0x26e   : > { %v4637_v20 = vpop.f32.mrf.mxu1  ;;  %v14105_v41 = vld [vmem:[%s18268_s26 + $0x491] sm:$0xff] }
 0x26f   : > { %v20212_v14 = vadd.f32 %v17244_v28, %v5229_v45  ;;  %v5228_v21 = vadd.f32 %v4637_v20, %v19306_v23  ;;  %v17247_v36 = vpop.f32.mrf.mxu0  ;;  %17390 = vmatmul.mubr.msk.f32.gmra.mxu0 %vm457_vm1, %v14103_v33  ;;  %v13848_v45 = vld [vmem:[%s18268_s26 + $0x498] sm:$0xff] }
 0x270   : > { %v17053_v29 = vpop.f32.mrf.mxu1  ;;  %17196 = vmatmul.mubr.msk.f32.gmra.mxu1 %vm457_vm1, %v13845_v59  ;;  %17392 = vmatprep.mubr.msk.f32.mxu0 %vm457_vm1, %v14104_v35  ;;  %v14106_v59 = vld [vmem:[%s18268_s26 + $0x499] sm:$0xff] }
 0x271   : > { %v20217_v53 = vadd.f32 %v5987_v15, %v5228_v21  ;;  %v5231_v38 = vadd.f32 %v17053_v29, %v19315_v44  ;;  %17198 = vmatprep.mubr.msk.f32.mxu1 %vm457_vm1, %v13846_v47  ;;  %v5997_v23 = vpop.f32.mrf.mxu0  ;;  %v13849_v21 = vld [vmem:[%s18268_s26 + $0x4a0] sm:$0xff] }
 0x272   : > { %v4647_v28 = vpop.f32.mrf.mxu1  ;;  %v14107_v29 = vld [vmem:[%s18268_s26 + $0x4a1] sm:$0xff] }
 0x273   : > { %v20226_v20 = vadd.f32 %v17247_v36, %v5231_v38  ;;  %v5230_v33 = vadd.f32 %v4647_v28, %v19320_v60  ;;  %v17250_v44 = vpop.f32.mrf.mxu0  ;;  %17393 = vmatmul.mubr.msk.f32.gmra.mxu0 %vm457_vm1, %v14105_v41  ;;  %v13850_v38 = vld [vmem:[%s18268_s26 + $0x4b0] sm:$0xff] }
 0x274   : > { %v17056_v15 = vpop.f32.mrf.mxu1  ;;  %17199 = vmatmul.mubr.msk.f32.gmra.mxu1 %vm457_vm1, %v13847_v49  ;;  %17395 = vmatprep.mubr.msk.f32.mxu0 %vm457_vm1, %v14106_v59  ;;  %v14108_v49 = vld [vmem:[%s18268_s26 + $0x4b1] sm:$0xff] }
 0x275   : > { %v20231_v47 = vadd.f32 %v5997_v23, %v5230_v33  ;;  %v5233_v35 = vadd.f32 %v17056_v15, %v19329_v52  ;;  %17201 = vmatprep.mubr.msk.f32.mxu1 %vm457_vm1, %v13848_v45  ;;  %v6007_v60 = vpop.f32.mrf.mxu0  ;;  %v13851_v33 = vld [vmem:[%s18268_s26 + $0x4b8] sm:$0xff] }
 0x276   : > { %v4657_v36 = vpop.f32.mrf.mxu1  ;;  %v14109_v15 = vld [vmem:[%s18268_s26 + $0x4b9] sm:$0xff] }
 0x277   : > { %v20240_v28 = vadd.f32 %v17250_v44, %v5233_v35  ;;  %v5232_v41 = vadd.f32 %v4657_v36, %v19334_v17  ;;  %v17253_v52 = vpop.f32.mrf.mxu0  ;;  %17396 = vmatmul.mubr.msk.f32.gmra.mxu0 %vm457_vm1, %v14107_v29  ;;  %v13852_v35 = vld [vmem:[%s18268_s26 + $0x4c0] sm:$0xff] }
 0x278   : > { %v17059_v23 = vpop.f32.mrf.mxu1  ;;  %17202 = vmatmul.mubr.msk.f32.gmra.mxu1 %vm457_vm1, %v13849_v21  ;;  %17398 = vmatprep.mubr.msk.f32.mxu0 %vm457_vm1, %v14108_v49  ;;  %v14110_v21 = vld [vmem:[%s18268_s26 + $0x4c1] sm:$0xff] }
 0x279   : > { %v20245_v45 = vadd.f32 %v6007_v60, %v5232_v41  ;;  %v5235_v59 = vadd.f32 %v17059_v23, %v19343_v61  ;;  %17204 = vmatprep.mubr.msk.f32.mxu1 %vm457_vm1, %v13850_v38  ;;  %v6017_v17 = vpop.f32.mrf.mxu0  ;;  %v13853_v41 = vld [vmem:[%s18268_s26 + $0x4c8] sm:$0xff] }
 0x27a   : > { %v4667_v44 = vpop.f32.mrf.mxu1  ;;  %v14111_v23 = vld [vmem:[%s18268_s26 + $0x4c9] sm:$0xff] }
 0x27b   : > { %v20254_v36 = vadd.f32 %v17253_v52, %v5235_v59  ;;  %v5234_v29 = vadd.f32 %v4667_v44, %v19348_v11  ;;  %v17256_v61 = vpop.f32.mrf.mxu0  ;;  %17399 = vmatmul.mubr.msk.f32.gmra.mxu0 %vm457_vm1, %v14109_v15  ;;  %v13854_v59 = vld [vmem:[%s18268_s26 + $0x4d8] sm:$0xff] }
 0x27c   : > { %v17062_v60 = vpop.f32.mrf.mxu1  ;;  %17205 = vmatmul.mubr.msk.f32.gmra.mxu1 %vm457_vm1, %v13851_v33  ;;  %17401 = vmatprep.mubr.msk.f32.mxu0 %vm457_vm1, %v14110_v21  ;;  %v14112_v33 = vld [vmem:[%s18268_s26 + $0x4d9] sm:$0xff] }
 0x27d   : > { %v20259_v38 = vadd.f32 %v6017_v17, %v5234_v29  ;;  %v5237_v49 = vadd.f32 %v17062_v60, %v19357_v5  ;;  %17207 = vmatprep.mubr.msk.f32.mxu1 %vm457_vm1, %v13852_v35  ;;  %v6027_v11 = vpop.f32.mrf.mxu0  ;;  %v13855_v29 = vld [vmem:[%s18268_s26 + $0x4e0] sm:$0xff] }
 0x27e   : > { %v4677_v52 = vpop.f32.mrf.mxu1  ;;  %v14113_v60 = vld [vmem:[%s18268_s26 + $0x4e1] sm:$0xff] }
 0x27f   : > { %v20268_v44 = vadd.f32 %v17256_v61, %v5237_v49  ;;  %v5236_v15 = vadd.f32 %v4677_v52, %v19362_v54  ;;  %v17259_v5 = vpop.f32.mrf.mxu0  ;;  %17402 = vmatmul.mubr.msk.f32.gmra.mxu0 %vm457_vm1, %v14111_v23  ;;  %v13856_v49 = vld [vmem:[%s18268_s26 + $0x4e8] sm:$0xff] }
 0x280   : > { %v17065_v17 = vpop.f32.mrf.mxu1  ;;  %17208 = vmatmul.mubr.msk.f32.gmra.mxu1 %vm457_vm1, %v13853_v41  ;;  %17404 = vmatprep.mubr.msk.f32.mxu0 %vm457_vm1, %v14112_v33  ;;  %v14114_v41 = vld [vmem:[%s18268_s26 + $0x4e9] sm:$0xff] }
 0x281   : > { %v20273_v35 = vadd.f32 %v6027_v11, %v5236_v15  ;;  %v5239_v21 = vadd.f32 %v17065_v17, %v19371_v16  ;;  %17210 = vmatprep.mubr.msk.f32.mxu1 %vm457_vm1, %v13854_v59  ;;  %v6037_v54 = vpop.f32.mrf.mxu0  ;;  %v13857_v15 = vld [vmem:[%s18268_s26 + $0x4f0] sm:$0xff] }
 0x282   : > { %v4687_v61 = vpop.f32.mrf.mxu1  ;;  %v14115_v17 = vld [vmem:[%s18268_s26 + $0x4f1] sm:$0xff] }
 0x283   : > { %v20282_v52 = vadd.f32 %v17259_v5, %v5239_v21  ;;  %v5238_v23 = vadd.f32 %v4687_v61, %v19376_v25  ;;  %v17262_v16 = vpop.f32.mrf.mxu0  ;;  %17405 = vmatmul.mubr.msk.f32.gmra.mxu0 %vm457_vm1, %v14113_v60  ;;  %v13858_v21 = vld [vmem:[%s18268_s26 + $0x500] sm:$0xff] }
 0x284   : > { %v17068_v11 = vpop.f32.mrf.mxu1  ;;  %17211 = vmatmul.mubr.msk.f32.gmra.mxu1 %vm457_vm1, %v13855_v29  ;;  %17407 = vmatprep.mubr.msk.f32.mxu0 %vm457_vm1, %v14114_v41  ;;  %v14116_v29 = vld [vmem:[%s18268_s26 + $0x501] sm:$0xff] }
 0x285   : > { %v20287_v59 = vadd.f32 %v6037_v54, %v5238_v23  ;;  %v5241_v33 = vadd.f32 %v17068_v11, %v19385_v30  ;;  %17213 = vmatprep.mubr.msk.f32.mxu1 %vm457_vm1, %v13856_v49  ;;  %v6047_v25 = vpop.f32.mrf.mxu0  ;;  %v13859_v23 = vld [vmem:[%s18268_s26 + $0x508] sm:$0xff] }
 0x286   : > { %v4697_v5 = vpop.f32.mrf.mxu1  ;;  %v14117_v11 = vld [vmem:[%s18268_s26 + $0x509] sm:$0xff] }
 0x287   : > { %v20296_v61 = vadd.f32 %v17262_v16, %v5241_v33  ;;  %v5240_v60 = vadd.f32 %v4697_v5, %v19390_v9  ;;  %v17265_v30 = vpop.f32.mrf.mxu0  ;;  %17408 = vmatmul.mubr.msk.f32.gmra.mxu0 %vm457_vm1, %v14115_v17  ;;  %v13860_v33 = vld [vmem:[%s18268_s26 + $0x510] sm:$0xff] }
 0x288   : > { %v17071_v54 = vpop.f32.mrf.mxu1  ;;  %17214 = vmatmul.mubr.msk.f32.gmra.mxu1 %vm457_vm1, %v13857_v15  ;;  %17410 = vmatprep.mubr.msk.f32.mxu0 %vm457_vm1, %v14116_v29  ;;  %v14118_v15 = vld [vmem:[%s18268_s26 + $0x511] sm:$0xff] }
 0x289   : > { %v20301_v49 = vadd.f32 %v6047_v25, %v5240_v60  ;;  %v5243_v41 = vadd.f32 %v17071_v54, %v19399_v46  ;;  %17216 = vmatprep.mubr.msk.f32.mxu1 %vm457_vm1, %v13858_v21  ;;  %v6057_v9 = vpop.f32.mrf.mxu0  ;;  %v13861_v60 = vld [vmem:[%s18268_s26 + $0x518] sm:$0xff] }
 0x28a   : > { %v4707_v16 = vpop.f32.mrf.mxu1  ;;  %v14119_v54 = vld [vmem:[%s18268_s26 + $0x519] sm:$0xff] }
 0x28b   : > { %v20310_v5 = vadd.f32 %v17265_v30, %v5243_v41  ;;  %v5242_v17 = vadd.f32 %v4707_v16, %v19404_v24  ;;  %v17268_v46 = vpop.f32.mrf.mxu0  ;;  %17411 = vmatmul.mubr.msk.f32.gmra.mxu0 %vm457_vm1, %v14117_v11  ;;  %v14250_v41 = vld [vmem:[%s18268_s26 + $0x2a] sm:$0xff] }
 0x28c   : > { %v17074_v25 = vpop.f32.mrf.mxu1  ;;  %17217 = vmatmul.mubr.msk.f32.gmra.mxu1 %vm457_vm1, %v13859_v23  ;;  %17413 = vmatprep.mubr.msk.f32.mxu0 %vm457_vm1, %v14118_v15  ;;  %v14508_v16 = vld [vmem:[%s18268_s26 + $0x50] sm:$0xff] }
 0x28d   : > { %v20315_v21 = vadd.f32 %v6057_v9, %v5242_v17  ;;  %v5245_v29 = vadd.f32 %v17074_v25, %v19413_v1  ;;  %17219 = vmatprep.mubr.msk.f32.mxu1 %vm457_vm1, %v13860_v33  ;;  %v6067_v24 = vpop.f32.mrf.mxu0  ;;  %v14251_v17 = vld [vmem:[%s18268_s26 + $0x32] sm:$0xff] }
 0x28e   : > { %v4717_v30 = vpop.f32.mrf.mxu1  ;;  %v14509_v25 = vld [vmem:[%s18268_s26 + $0x58] sm:$0xff] }
 0x28f   : > { %v20324_v23 = vadd.f32 %v17268_v46, %v5245_v29  ;;  %v5244_v11 = vadd.f32 %v4717_v30, %v19418_v32  ;;  %v17271_v1 = vpop.f32.mrf.mxu0  ;;  %17414 = vmatmul.mubr.msk.f32.gmra.mxu0 %vm457_vm1, %v14119_v54  ;;  %v14252_v30 = vld [vmem:[%s18268_s26 + $0x3a] sm:$0xff] }
 0x290   : > { %v17077_v9 = vpop.f32.mrf.mxu1  ;;  %17220 = vmatmul.mubr.msk.f32.gmra.mxu1 %vm457_vm1, %v13861_v60  ;;  %17612 = vmatprep.mubr.msk.f32.mxu0 %vm457_vm1, %v14508_v16  ;;  %v14510_v54 = vld [vmem:[%s18268_s26 + $0x60] sm:$0xff] }
 0x291   : > { %v20329_v33 = vadd.f32 %v6067_v24, %v5244_v11  ;;  %v5247_v15 = vadd.f32 %v17077_v9, %v19425_v48  ;;  %17418 = vmatprep.mubr.msk.f32.mxu1 %vm457_vm1, %v14250_v41  ;;  %v6077_v32 = vpop.f32.mrf.mxu0  ;;  %v18205_v11 = vld [vmem:[%s24505_s1 + $0x1c] sm:$0xf]  ;;  %v14511_v9 = vld [vmem:[%s18268_s26 + $0x68] sm:$0xff] }
 0x292   : > { %v4727_v46 = vpop.f32.mrf.mxu1 }
 0x293   : > { %v20336_v29 = vadd.f32 %v17271_v1, %v5247_v15  ;;  %v5246_v60 = vadd.f32 %v4727_v46, %v19432_v40  ;;  %v17274_v48 = vpop.f32.mrf.mxu0  ;;  %17613 = vmatmul.mubr.msk.f32.vlgmr.msra.gmra.mxu0 %vm457_vm1, %v14509_v25  ;;  %v14253_v40 = vld [vmem:[%s18268_s26 + $0x42] sm:$0xff] }
 0x294   : > { %v17080_v24 = vpop.f32.mrf.mxu1  ;;  %17419 = vmatmul.mubr.msk.f32.vlgmr.msra.gmra.mxu1 %vm457_vm1, %v14251_v17  ;;  %17999 = vmatpush3.msk.msra.mxu0 %vm842_vm0, %v19903_v26  ;;  %v14512_v17 = vld [vmem:[%s18268_s26 + $0x78] sm:$0xff] }
 0x295   : > { %v20343_v41 = vadd.f32 %v6077_v32, %v5246_v60  ;;  %v5249_v16 = vadd.f32 %v17080_v24, %v19445_v0  ;;  %17805 = vmatpush3.msk.msra.mxu1 %vm842_vm0, %v18205_v11  ;;  %v6087_v15 = vpop.f32.mrf.mxu0  ;;  %17421 = vmatprep.mubr.msk.f32.mxu1 %vm457_vm1, %v14252_v30  ;;  %v14254_v0 = vld [vmem:[%s18268_s26 + $0x52] sm:$0xff]  ;;  %v14513_v24 = vld [vmem:[%s18268_s26 + $0x80] sm:$0xff]  ;;  %v14514_v11 = vld [vmem:[%s18268_s26 + $0x88] sm:$0xff] }
 0x296   : > { %v4737_v1 = vpop.f32.mrf.mxu1  ;;  %17615 = vmatprep.mubr.msk.f32.mxu0 %vm457_vm1, %v14510_v54  ;;  %v14255_v54 = vld [vmem:[%s18268_s26 + $0x5a] sm:$0xff] }
 0x297   : > { %v20358_v25 = vadd.f32 %v17274_v48, %v5249_v16  ;;  %v5248_v46 = vadd.f32 %v4737_v1, %v19450_v43  ;;  %v17277_v26 = vpop.f32.mrf.mxu0  ;;  %17616 = vmatmul.mubr.msk.f32.gmra.mxu0 %vm457_vm1, %v14511_v9  ;;  %v14256_v16 = vld [vmem:[%s18268_s26 + $0x62] sm:$0xff] }
 0x298   : > { %v17083_v32 = vpop.f32.mrf.mxu1  ;;  %17422 = vmatmul.mubr.msk.f32.gmra.mxu1 %vm457_vm1, %v14253_v40  ;;  %17618 = vmatprep.mubr.msk.f32.mxu0 %vm457_vm1, %v14512_v17  ;;  %v14257_v17 = vld [vmem:[%s18268_s26 + $0x6a] sm:$0xff] }
 0x299   : > { %v20363_v60 = vadd.f32 %v6087_v15, %v5248_v46  ;;  %v5251_v30 = vadd.f32 %v17083_v32, %v19459_v63  ;;  %17424 = vmatprep.mubr.msk.f32.mxu1 %vm457_vm1, %v14254_v0  ;;  %v6097_v43 = vpop.f32.mrf.mxu0  ;;  %v14515_v46 = vld [vmem:[%s18268_s26 + $0x90] sm:$0xff] }
 0x29a   : > { %v4747_v48 = vpop.f32.mrf.mxu1 }
 0x29b   : > { %v20372_v40 = vadd.f32 %v17277_v26, %v5251_v30  ;;  %v5250_v9 = vadd.f32 %v4747_v48, %v19464_v34  ;;  %v17280_v63 = vpop.f32.mrf.mxu0  ;;  %17619 = vmatmul.mubr.msk.f32.gmra.mxu0 %vm457_vm1, %v14513_v24  ;;  %v14258_v26 = vld [vmem:[%s18268_s26 + $0x7a] sm:$0xff] }
 0x29c   : > { %v17086_v1 = vpop.f32.mrf.mxu1  ;;  %17425 = vmatmul.mubr.msk.f32.gmra.mxu1 %vm457_vm1, %v14255_v54  ;;  %17621 = vmatprep.mubr.msk.f32.mxu0 %vm457_vm1, %v14514_v11  ;;  %v14516_v30 = vld [vmem:[%s18268_s26 + $0xa0] sm:$0xff] }
 0x29d   : > { %v20377_v15 = vadd.f32 %v6097_v43, %v5250_v9  ;;  %v5253_v0 = vadd.f32 %v17086_v1, %v19473_v50  ;;  %17427 = vmatprep.mubr.msk.f32.mxu1 %vm457_vm1, %v14256_v16  ;;  %v6107_v34 = vpop.f32.mrf.mxu0  ;;  %v14259_v11 = vld [vmem:[%s18268_s26 + $0x82] sm:$0xff] }
 0x29e   : > { %v4757_v32 = vpop.f32.mrf.mxu1  ;;  %v14517_v9 = vld [vmem:[%s18268_s26 + $0xa8] sm:$0xff] }
 0x29f   : > { %v20386_v54 = vadd.f32 %v17280_v63, %v5253_v0  ;;  %v5252_v24 = vadd.f32 %v4757_v32, %v19478_v55  ;;  %v17283_v50 = vpop.f32.mrf.mxu0  ;;  %17622 = vmatmul.mubr.msk.f32.gmra.mxu0 %vm457_vm1, %v14515_v46  ;;  %v14260_v63 = vld [vmem:[%s18268_s26 + $0x8a] sm:$0xff] }
 0x2a0   : > { %v17089_v48 = vpop.f32.mrf.mxu1  ;;  %17428 = vmatmul.mubr.msk.f32.gmra.mxu1 %vm457_vm1, %v14257_v17  ;;  %17624 = vmatprep.mubr.msk.f32.mxu0 %vm457_vm1, %v14516_v30  ;;  %v14518_v0 = vld [vmem:[%s18268_s26 + $0xb0] sm:$0xff] }
 0x2a1   : > { %v20391_v43 = vadd.f32 %v6107_v34, %v5252_v24  ;;  %v5255_v16 = vadd.f32 %v17089_v48, %v19487_v51  ;;  %17430 = vmatprep.mubr.msk.f32.mxu1 %vm457_vm1, %v14258_v26  ;;  %v6117_v55 = vpop.f32.mrf.mxu0  ;;  %v14261_v30 = vld [vmem:[%s18268_s26 + $0x92] sm:$0xff] }
 0x2a2   : > { %v4767_v1 = vpop.f32.mrf.mxu1  ;;  %v14519_v24 = vld [vmem:[%s18268_s26 + $0xb8] sm:$0xff] }
 0x2a3   : > { %v20400_v17 = vadd.f32 %v17283_v50, %v5255_v16  ;;  %v5254_v46 = vadd.f32 %v4767_v1, %v19492_v42  ;;  %v17286_v51 = vpop.f32.mrf.mxu0  ;;  %17625 = vmatmul.mubr.msk.f32.gmra.mxu0 %vm457_vm1, %v14517_v9  ;;  %v14262_v50 = vld [vmem:[%s18268_s26 + $0xa2] sm:$0xff] }
 0x2a4   : > { %v17092_v32 = vpop.f32.mrf.mxu1  ;;  %17431 = vmatmul.mubr.msk.f32.gmra.mxu1 %vm457_vm1, %v14259_v11  ;;  %17627 = vmatprep.mubr.msk.f32.mxu0 %vm457_vm1, %v14518_v0  ;;  %v14520_v16 = vld [vmem:[%s18268_s26 + $0xc8] sm:$0xff] }
 0x2a5   : > { %v20405_v34 = vadd.f32 %v6117_v55, %v5254_v46  ;;  %v5257_v26 = vadd.f32 %v17092_v32, %v19501_v4  ;;  %17433 = vmatprep.mubr.msk.f32.mxu1 %vm457_vm1, %v14260_v63  ;;  %v6127_v42 = vpop.f32.mrf.mxu0  ;;  %v14263_v0 = vld [vmem:[%s18268_s26 + $0xaa] sm:$0xff] }
 0x2a6   : > { %v4777_v48 = vpop.f32.mrf.mxu1  ;;  %v14521_v46 = vld [vmem:[%s18268_s26 + $0xd0] sm:$0xff] }
 0x2a7   : > { %v20414_v11 = vadd.f32 %v17286_v51, %v5257_v26  ;;  %v5256_v9 = vadd.f32 %v4777_v48, %v19506_v13  ;;  %v17289_v4 = vpop.f32.mrf.mxu0  ;;  %17628 = vmatmul.mubr.msk.f32.gmra.mxu0 %vm457_vm1, %v14519_v24  ;;  %v14264_v51 = vld [vmem:[%s18268_s26 + $0xb2] sm:$0xff] }
 0x2a8   : > { %v17095_v1 = vpop.f32.mrf.mxu1  ;;  %17434 = vmatmul.mubr.msk.f32.gmra.mxu1 %vm457_vm1, %v14261_v30  ;;  %17630 = vmatprep.mubr.msk.f32.mxu0 %vm457_vm1, %v14520_v16  ;;  %v14522_v26 = vld [vmem:[%s18268_s26 + $0xd8] sm:$0xff] }
 0x2a9   : > { %v20419_v55 = vadd.f32 %v6127_v42, %v5256_v9  ;;  %v5259_v63 = vadd.f32 %v17095_v1, %v19515_v39  ;;  %17436 = vmatprep.mubr.msk.f32.mxu1 %vm457_vm1, %v14262_v50  ;;  %v6137_v13 = vpop.f32.mrf.mxu0  ;;  %v14265_v16 = vld [vmem:[%s18268_s26 + $0xba] sm:$0xff] }
 0x2aa   : > { %v4787_v32 = vpop.f32.mrf.mxu1  ;;  %v14523_v9 = vld [vmem:[%s18268_s26 + $0xe0] sm:$0xff] }
 0x2ab   : > { %v20428_v30 = vadd.f32 %v17289_v4, %v5259_v63  ;;  %v5258_v24 = vadd.f32 %v4787_v32, %v19520_v10  ;;  %v17292_v39 = vpop.f32.mrf.mxu0  ;;  %17631 = vmatmul.mubr.msk.f32.gmra.mxu0 %vm457_vm1, %v14521_v46  ;;  %v14266_v4 = vld [vmem:[%s18268_s26 + $0xca] sm:$0xff] }
 0x2ac   : > { %v17098_v48 = vpop.f32.mrf.mxu1  ;;  %17437 = vmatmul.mubr.msk.f32.gmra.mxu1 %vm457_vm1, %v14263_v0  ;;  %17633 = vmatprep.mubr.msk.f32.mxu0 %vm457_vm1, %v14522_v26  ;;  %v14524_v63 = vld [vmem:[%s18268_s26 + $0xf0] sm:$0xff] }
 0x2ad   : > { %v20433_v42 = vadd.f32 %v6137_v13, %v5258_v24  ;;  %v5261_v50 = vadd.f32 %v17098_v48, %v19529_v31  ;;  %17439 = vmatprep.mubr.msk.f32.mxu1 %vm457_vm1, %v14264_v51  ;;  %v6147_v10 = vpop.f32.mrf.mxu0  ;;  %v14267_v26 = vld [vmem:[%s18268_s26 + $0xd2] sm:$0xff] }
 0x2ae   : > { %v4797_v1 = vpop.f32.mrf.mxu1  ;;  %v14525_v24 = vld [vmem:[%s18268_s26 + $0xf8] sm:$0xff] }
 0x2af   : > { %v20442_v0 = vadd.f32 %v17292_v39, %v5261_v50  ;;  %v5260_v46 = vadd.f32 %v4797_v1, %v19534_v57  ;;  %v17295_v31 = vpop.f32.mrf.mxu0  ;;  %17634 = vmatmul.mubr.msk.f32.gmra.mxu0 %vm457_vm1, %v14523_v9  ;;  %v14268_v39 = vld [vmem:[%s18268_s26 + $0xda] sm:$0xff]  ;;  %v24841_v9 = vld [vmem:[#allocation83_spill] sm:$0xff] }
 0x2b0   : > { %v17101_v32 = vpop.f32.mrf.mxu1  ;;  %17440 = vmatmul.mubr.msk.f32.gmra.mxu1 %vm457_vm1, %v14265_v16  ;;  %17636 = vmatprep.mubr.msk.f32.mxu0 %vm457_vm1, %v14524_v63  ;;  %v14526_v50 = vld [vmem:[%s18268_s26 + $0x100] sm:$0xff] }
 0x2b1   : > { %v20447_v13 = vadd.f32 %v6147_v10, %v5260_v46  ;;  %v5263_v51 = vadd.f32 %v17101_v32, %v19543_v56  ;;  %17442 = vmatprep.mubr.msk.f32.mxu1 %vm457_vm1, %v14266_v4  ;;  %v6157_v57 = vpop.f32.mrf.mxu0  ;;  %v24843_v63 = vld [vmem:[#allocation50_spill] sm:$0xff] }
 0x2b2   : > { %v4807_v48 = vpop.f32.mrf.mxu1  ;;  %v14269_v32 = vld [vmem:[%s18268_s26 + $0xe2] sm:$0xff] }
 0x2b3   : > { %v20456_v16 = vadd.f32 %v17295_v31, %v5263_v51  ;;  %v5262_v1 = vadd.f32 %v4807_v48, %v24841_v9  ;;  %v17298_v56 = vpop.f32.mrf.mxu0  ;;  %17637 = vmatmul.mubr.msk.f32.gmra.mxu0 %vm457_vm1, %v14525_v24  ;;  %v14527_v31 = vld [vmem:[%s18268_s26 + $0x108] sm:$0xff]  ;;  %v14270_v9 = vld [vmem:[%s18268_s26 + $0xf2] sm:$0xff] }
 0x2b4   : > { %v17104_v10 = vpop.f32.mrf.mxu1  ;;  %17443 = vmatmul.mubr.msk.f32.gmra.mxu1 %vm457_vm1, %v14267_v26  ;;  %17639 = vmatprep.mubr.msk.f32.mxu0 %vm457_vm1, %v14526_v50  ;;  %v24845_v24 = vld [vmem:[#allocation52_spill] sm:$0xff]  ;;  %v24847_v50 = vld [vmem:[#allocation54_spill] sm:$0xff] }
 0x2b5   : > { %24840 = vst [vmem:[#allocation81_spill] sm:$0xff] %v20456_v16  ;;  %v20461_v4 = vadd.f32 %v6157_v57, %v5262_v1  ;;  %v5265_v46 = vadd.f32 %v17104_v10, %v24843_v63  ;;  %17445 = vmatprep.mubr.msk.f32.mxu1 %vm457_vm1, %v14268_v39  ;;  %v6167_v48 = vpop.f32.mrf.mxu0  ;;  %v14528_v16 = vld [vmem:[%s18268_s26 + $0x118] sm:$0xff] }
 0x2b6   : > { %v4817_v51 = vpop.f32.mrf.mxu1 }
 0x2b7   : > { %24842 = vst [vmem:[#allocation82_spill] sm:$0xff] %v20461_v4  ;;  %v20470_v26 = vadd.f32 %v17298_v56, %v5265_v46  ;;  %v5264_v57 = vadd.f32 %v4817_v51, %v24845_v24  ;;  %v17301_v10 = vpop.f32.mrf.mxu0  ;;  %17640 = vmatmul.mubr.msk.f32.gmra.mxu0 %vm457_vm1, %v14527_v31  ;;  %v14271_v4 = vld [vmem:[%s18268_s26 + $0xfa] sm:$0xff]  ;;  %v14272_v24 = vld [vmem:[%s18268_s26 + $0x102] sm:$0xff]  ;;  %v24849_v31 = vld [vmem:[#allocation56_spill] sm:$0xff] }
 0x2b8   : > { %v17107_v1 = vpop.f32.mrf.mxu1  ;;  %17446 = vmatmul.mubr.msk.f32.gmra.mxu1 %vm457_vm1, %v14269_v32  ;;  %17642 = vmatprep.mubr.msk.f32.mxu0 %vm457_vm1, %v14528_v16  ;;  %v14529_v56 = vld [vmem:[%s18268_s26 + $0x120] sm:$0xff] }
 0x2b9   : > { %24844 = vst [vmem:[#allocation83_spill] sm:$0xff] %v20470_v26  ;;  %v20475_v39 = vadd.f32 %v6167_v48, %v5264_v57  ;;  %v5267_v63 = vadd.f32 %v17107_v1, %v24847_v50  ;;  %17448 = vmatprep.mubr.msk.f32.mxu1 %vm457_vm1, %v14270_v9  ;;  %v6177_v51 = vpop.f32.mrf.mxu0  ;;  %v14530_v26 = vld [vmem:[%s18268_s26 + $0x128] sm:$0xff]  ;;  %v24851_v9 = vld [vmem:[#allocation58_spill] sm:$0xff] }
 0x2ba   : > { %v4827_v46 = vpop.f32.mrf.mxu1 }
 0x2bb   : > { %24846 = vst [vmem:[#allocation50_spill] sm:$0xff] %v20475_v39  ;;  %v20484_v32 = vadd.f32 %v17301_v10, %v5267_v63  ;;  %v5266_v48 = vadd.f32 %v4827_v46, %v24849_v31  ;;  %v17304_v1 = vpop.f32.mrf.mxu0  ;;  %17643 = vmatmul.mubr.msk.f32.gmra.mxu0 %vm457_vm1, %v14529_v56  ;;  %v14273_v39 = vld [vmem:[%s18268_s26 + $0x10a] sm:$0xff]  ;;  %v14274_v31 = vld [vmem:[%s18268_s26 + $0x11a] sm:$0xff] }
 0x2bc   : > { %v17110_v57 = vpop.f32.mrf.mxu1  ;;  %17449 = vmatmul.mubr.msk.f32.gmra.mxu1 %vm457_vm1, %v14271_v4  ;;  %17645 = vmatprep.mubr.msk.f32.mxu0 %vm457_vm1, %v14530_v26  ;;  %v14531_v10 = vld [vmem:[%s18268_s26 + $0x130] sm:$0xff] }
 0x2bd   : > { %24848 = vst [vmem:[#allocation52_spill] sm:$0xff] %v20484_v32  ;;  %v20489_v16 = vadd.f32 %v6177_v51, %v5266_v48  ;;  %v5269_v50 = vadd.f32 %v17110_v57, %v24851_v9  ;;  %17451 = vmatprep.mubr.msk.f32.mxu1 %vm457_vm1, %v14272_v24  ;;  %v6187_v46 = vpop.f32.mrf.mxu0  ;;  %v14532_v32 = vld [vmem:[%s18268_s26 + $0x140] sm:$0xff]  ;;  %v24853_v56 = vld [vmem:[#allocation60_spill] sm:$0xff] }
 0x2be   : > { %v4837_v63 = vpop.f32.mrf.mxu1  ;;  %v24855_v24 = vld [vmem:[#allocation62_spill] sm:$0xff] }
 0x2bf   : > { %24850 = vst [vmem:[#allocation54_spill] sm:$0xff] %v20489_v16  ;;  %v20498_v4 = vadd.f32 %v17304_v1, %v5269_v50  ;;  %v5268_v51 = vadd.f32 %v4837_v63, %v24853_v56  ;;  %v17307_v57 = vpop.f32.mrf.mxu0  ;;  %17646 = vmatmul.mubr.msk.f32.gmra.mxu0 %vm457_vm1, %v14531_v10  ;;  %v14275_v16 = vld [vmem:[%s18268_s26 + $0x122] sm:$0xff]  ;;  %v14276_v56 = vld [vmem:[%s18268_s26 + $0x12a] sm:$0xff] }
 0x2c0   : > { %v17113_v48 = vpop.f32.mrf.mxu1  ;;  %17452 = vmatmul.mubr.msk.f32.gmra.mxu1 %vm457_vm1, %v14273_v39  ;;  %17648 = vmatprep.mubr.msk.f32.mxu0 %vm457_vm1, %v14532_v32  ;;  %v14533_v1 = vld [vmem:[%s18268_s26 + $0x148] sm:$0xff]  ;;  %v24857_v10 = vld [vmem:[#allocation64_spill] sm:$0xff] }
 0x2c1   : > { %24852 = vst [vmem:[#allocation56_spill] sm:$0xff] %v20498_v4  ;;  %v20503_v26 = vadd.f32 %v6187_v46, %v5268_v51  ;;  %v5271_v9 = vadd.f32 %v17113_v48, %v24855_v24  ;;  %17454 = vmatprep.mubr.msk.f32.mxu1 %vm457_vm1, %v14274_v31  ;;  %v6197_v63 = vpop.f32.mrf.mxu0  ;;  %v14534_v4 = vld [vmem:[%s18268_s26 + $0x150] sm:$0xff]  ;;  %v24859_v31 = vld [vmem:[#allocation66_spill] sm:$0xff] }
 0x2c2   : > { %v4847_v50 = vpop.f32.mrf.mxu1 }
 0x2c3   : > { %24854 = vst [vmem:[#allocation58_spill] sm:$0xff] %v20503_v26  ;;  %v20512_v39 = vadd.f32 %v17307_v57, %v5271_v9  ;;  %v5270_v46 = vadd.f32 %v4847_v50, %v24857_v10  ;;  %v17310_v48 = vpop.f32.mrf.mxu0  ;;  %17649 = vmatmul.mubr.msk.f32.gmra.mxu0 %vm457_vm1, %v14533_v1  ;;  %v14277_v26 = vld [vmem:[%s18268_s26 + $0x132] sm:$0xff]  ;;  %v14278_v10 = vld [vmem:[%s18268_s26 + $0x142] sm:$0xff] }
 0x2c4   : > { %v17116_v51 = vpop.f32.mrf.mxu1  ;;  %17455 = vmatmul.mubr.msk.f32.gmra.mxu1 %vm457_vm1, %v14275_v16  ;;  %17651 = vmatprep.mubr.msk.f32.mxu0 %vm457_vm1, %v14534_v4  ;;  %v14535_v57 = vld [vmem:[%s18268_s26 + $0x158] sm:$0xff]  ;;  %v24861_v1 = vld [vmem:[#allocation68_spill] sm:$0xff] }
 0x2c5   : > { %24856 = vst [vmem:[#allocation60_spill] sm:$0xff] %v20512_v39  ;;  %v20517_v32 = vadd.f32 %v6197_v63, %v5270_v46  ;;  %v5273_v24 = vadd.f32 %v17116_v51, %v24859_v31  ;;  %17457 = vmatprep.mubr.msk.f32.mxu1 %vm457_vm1, %v14276_v56  ;;  %v6207_v50 = vpop.f32.mrf.mxu0  ;;  %v14536_v39 = vld [vmem:[%s18268_s26 + $0x168] sm:$0xff]  ;;  %v24863_v56 = vld [vmem:[#allocation70_spill] sm:$0xff] }
 0x2c6   : > { %v4857_v9 = vpop.f32.mrf.mxu1 }
 0x2c7   : > { %24858 = vst [vmem:[#allocation62_spill] sm:$0xff] %v20517_v32  ;;  %v20526_v16 = vadd.f32 %v17310_v48, %v5273_v24  ;;  %v5272_v63 = vadd.f32 %v4857_v9, %v24861_v1  ;;  %v17313_v51 = vpop.f32.mrf.mxu0  ;;  %17652 = vmatmul.mubr.msk.f32.gmra.mxu0 %vm457_vm1, %v14535_v57  ;;  %v14279_v32 = vld [vmem:[%s18268_s26 + $0x14a] sm:$0xff]  ;;  %v14280_v1 = vld [vmem:[%s18268_s26 + $0x152] sm:$0xff] }
 0x2c8   : > { %v17119_v46 = vpop.f32.mrf.mxu1  ;;  %17458 = vmatmul.mubr.msk.f32.gmra.mxu1 %vm457_vm1, %v14277_v26  ;;  %17654 = vmatprep.mubr.msk.f32.mxu0 %vm457_vm1, %v14536_v39  ;;  %v14537_v48 = vld [vmem:[%s18268_s26 + $0x170] sm:$0xff] }
 0x2c9   : > { %24860 = vst [vmem:[#allocation64_spill] sm:$0xff] %v20526_v16  ;;  %v20531_v4 = vadd.f32 %v6207_v50, %v5272_v63  ;;  %v5275_v31 = vadd.f32 %v17119_v46, %v24863_v56  ;;  %17460 = vmatprep.mubr.msk.f32.mxu1 %vm457_vm1, %v14278_v10  ;;  %v6217_v9 = vpop.f32.mrf.mxu0  ;;  %v14538_v16 = vld [vmem:[%s18268_s26 + $0x178] sm:$0xff]  ;;  %v24865_v57 = vld [vmem:[#allocation72_spill] sm:$0xff]  ;;  %v24867_v10 = vld [vmem:[#allocation74_spill] sm:$0xff] }
 0x2ca   : > { %v4867_v24 = vpop.f32.mrf.mxu1 }
 0x2cb   : > { %24862 = vst [vmem:[#allocation66_spill] sm:$0xff] %v20531_v4  ;;  %v20540_v26 = vadd.f32 %v17313_v51, %v5275_v31  ;;  %v5274_v50 = vadd.f32 %v4867_v24, %v24865_v57  ;;  %v17316_v46 = vpop.f32.mrf.mxu0  ;;  %17655 = vmatmul.mubr.msk.f32.gmra.mxu0 %vm457_vm1, %v14537_v48  ;;  %v14281_v4 = vld [vmem:[%s18268_s26 + $0x15a] sm:$0xff]  ;;  %v14282_v57 = vld [vmem:[%s18268_s26 + $0x16a] sm:$0xff] }
 0x2cc   : > { %v17122_v63 = vpop.f32.mrf.mxu1  ;;  %17461 = vmatmul.mubr.msk.f32.gmra.mxu1 %vm457_vm1, %v14279_v32  ;;  %17657 = vmatprep.mubr.msk.f32.mxu0 %vm457_vm1, %v14538_v16  ;;  %v14539_v51 = vld [vmem:[%s18268_s26 + $0x180] sm:$0xff]  ;;  %v24869_v48 = vld [vmem:[#allocation76_spill] sm:$0xff] }
 0x2cd   : > { %24864 = vst [vmem:[#allocation68_spill] sm:$0xff] %v20540_v26  ;;  %v20545_v39 = vadd.f32 %v6217_v9, %v5274_v50  ;;  %v5277_v56 = vadd.f32 %v17122_v63, %v24867_v10  ;;  %17463 = vmatprep.mubr.msk.f32.mxu1 %vm457_vm1, %v14280_v1  ;;  %v6227_v24 = vpop.f32.mrf.mxu0  ;;  %v14540_v26 = vld [vmem:[%s18268_s26 + $0x190] sm:$0xff]  ;;  %v24871_v1 = vld [vmem:[#allocation78_spill] sm:$0xff] }
 0x2ce   : > { %v4877_v31 = vpop.f32.mrf.mxu1 }
 0x2cf   : > { %24866 = vst [vmem:[#allocation70_spill] sm:$0xff] %v20545_v39  ;;  %v20554_v32 = vadd.f32 %v17316_v46, %v5277_v56  ;;  %v5276_v9 = vadd.f32 %v4877_v31, %v24869_v48  ;;  %v17319_v63 = vpop.f32.mrf.mxu0  ;;  %17658 = vmatmul.mubr.msk.f32.gmra.mxu0 %vm457_vm1, %v14539_v51  ;;  %v14283_v39 = vld [vmem:[%s18268_s26 + $0x172] sm:$0xff]  ;;  %v14284_v48 = vld [vmem:[%s18268_s26 + $0x17a] sm:$0xff] }
 0x2d0   : > { %v17125_v50 = vpop.f32.mrf.mxu1  ;;  %17464 = vmatmul.mubr.msk.f32.gmra.mxu1 %vm457_vm1, %v14281_v4  ;;  %17660 = vmatprep.mubr.msk.f32.mxu0 %vm457_vm1, %v14540_v26  ;;  %v14541_v46 = vld [vmem:[%s18268_s26 + $0x198] sm:$0xff]  ;;  %v24873_v51 = vld [vmem:[#allocation80_spill] sm:$0xff] }
 0x2d1   : > { %24868 = vst [vmem:[#allocation72_spill] sm:$0xff] %v20554_v32  ;;  %v20559_v16 = vadd.f32 %v6227_v24, %v5276_v9  ;;  %v5279_v10 = vadd.f32 %v17125_v50, %v24871_v1  ;;  %17466 = vmatprep.mubr.msk.f32.mxu1 %vm457_vm1, %v14282_v57  ;;  %v6237_v31 = vpop.f32.mrf.mxu0  ;;  %v14542_v32 = vld [vmem:[%s18268_s26 + $0x1a0] sm:$0xff] }
 0x2d2   : > { %v4887_v56 = vpop.f32.mrf.mxu1  ;;  %v24875_v57 = vld [vmem:[#allocation2_spill] sm:$0xff] }
 0x2d3   : > { %24870 = vst [vmem:[#allocation74_spill] sm:$0xff] %v20559_v16  ;;  %v20568_v4 = vadd.f32 %v17319_v63, %v5279_v10  ;;  %v5278_v24 = vadd.f32 %v4887_v56, %v24873_v51  ;;  %v17322_v50 = vpop.f32.mrf.mxu0  ;;  %17661 = vmatmul.mubr.msk.f32.gmra.mxu0 %vm457_vm1, %v14541_v46  ;;  %v14285_v16 = vld [vmem:[%s18268_s26 + $0x182] sm:$0xff]  ;;  %v14286_v51 = vld [vmem:[%s18268_s26 + $0x192] sm:$0xff] }
 0x2d4   : > { %v17128_v9 = vpop.f32.mrf.mxu1  ;;  %17467 = vmatmul.mubr.msk.f32.gmra.mxu1 %vm457_vm1, %v14283_v39  ;;  %17663 = vmatprep.mubr.msk.f32.mxu0 %vm457_vm1, %v14542_v32  ;;  %v14543_v63 = vld [vmem:[%s18268_s26 + $0x1a8] sm:$0xff] }
 0x2d5   : > { %24872 = vst [vmem:[#allocation76_spill] sm:$0xff] %v20568_v4  ;;  %v20573_v26 = vadd.f32 %v6237_v31, %v5278_v24  ;;  %v5281_v1 = vadd.f32 %v17128_v9, %v24875_v57  ;;  %17469 = vmatprep.mubr.msk.f32.mxu1 %vm457_vm1, %v14284_v48  ;;  %v6247_v56 = vpop.f32.mrf.mxu0  ;;  %v14544_v4 = vld [vmem:[%s18268_s26 + $0x1b8] sm:$0xff]  ;;  %v24877_v46 = vld [vmem:[#allocation3_spill] sm:$0xff]  ;;  %v24879_v48 = vld [vmem:[#allocation4_spill] sm:$0xff] }
 0x2d6   : > { %v4897_v10 = vpop.f32.mrf.mxu1 }
 0x2d7   : > { %24874 = vst [vmem:[#allocation78_spill] sm:$0xff] %v20573_v26  ;;  %v20582_v39 = vadd.f32 %v17322_v50, %v5281_v1  ;;  %v5280_v31 = vadd.f32 %v4897_v10, %v24877_v46  ;;  %v17325_v9 = vpop.f32.mrf.mxu0  ;;  %17664 = vmatmul.mubr.msk.f32.gmra.mxu0 %vm457_vm1, %v14543_v63  ;;  %v14287_v26 = vld [vmem:[%s18268_s26 + $0x19a] sm:$0xff]  ;;  %v14288_v46 = vld [vmem:[%s18268_s26 + $0x1a2] sm:$0xff] }
 0x2d8   : > { %v17131_v24 = vpop.f32.mrf.mxu1  ;;  %17470 = vmatmul.mubr.msk.f32.gmra.mxu1 %vm457_vm1, %v14285_v16  ;;  %17666 = vmatprep.mubr.msk.f32.mxu0 %vm457_vm1, %v14544_v4  ;;  %v14545_v50 = vld [vmem:[%s18268_s26 + $0x1c0] sm:$0xff]  ;;  %v24881_v63 = vld [vmem:[#allocation5_spill] sm:$0xff] }
 0x2d9   : > { %24876 = vst [vmem:[#allocation80_spill] sm:$0xff] %v20582_v39  ;;  %v20587_v32 = vadd.f32 %v6247_v56, %v5280_v31  ;;  %v5283_v57 = vadd.f32 %v17131_v24, %v24879_v48  ;;  %17472 = vmatprep.mubr.msk.f32.mxu1 %vm457_vm1, %v14286_v51  ;;  %v6257_v10 = vpop.f32.mrf.mxu0  ;;  %v14546_v39 = vld [vmem:[%s18268_s26 + $0x1c8] sm:$0xff]  ;;  %v24883_v51 = vld [vmem:[#allocation6_spill] sm:$0xff] }
 0x2da   : > { %v4907_v1 = vpop.f32.mrf.mxu1 }
 0x2db   : > { %24878 = vst [vmem:[#allocation2_spill] sm:$0xff] %v20587_v32  ;;  %v20596_v16 = vadd.f32 %v17325_v9, %v5283_v57  ;;  %v5282_v56 = vadd.f32 %v4907_v1, %v24881_v63  ;;  %v17328_v24 = vpop.f32.mrf.mxu0  ;;  %17667 = vmatmul.mubr.msk.f32.gmra.mxu0 %vm457_vm1, %v14545_v50  ;;  %v14289_v32 = vld [vmem:[%s18268_s26 + $0x1aa] sm:$0xff]  ;;  %v14290_v63 = vld [vmem:[%s18268_s26 + $0x1ba] sm:$0xff] }
 0x2dc   : > { %v17134_v31 = vpop.f32.mrf.mxu1  ;;  %17473 = vmatmul.mubr.msk.f32.gmra.mxu1 %vm457_vm1, %v14287_v26  ;;  %17669 = vmatprep.mubr.msk.f32.mxu0 %vm457_vm1, %v14546_v39  ;;  %v14547_v9 = vld [vmem:[%s18268_s26 + $0x1d0] sm:$0xff]  ;;  %v24885_v50 = vld [vmem:[#allocation7_spill] sm:$0xff] }
 0x2dd   : > { %24880 = vst [vmem:[#allocation3_spill] sm:$0xff] %v20596_v16  ;;  %v20601_v4 = vadd.f32 %v6257_v10, %v5282_v56  ;;  %v5285_v48 = vadd.f32 %v17134_v31, %v24883_v51  ;;  %17475 = vmatprep.mubr.msk.f32.mxu1 %vm457_vm1, %v14288_v46  ;;  %v6267_v1 = vpop.f32.mrf.mxu0  ;;  %v14548_v16 = vld [vmem:[%s18268_s26 + $0x1e0] sm:$0xff]  ;;  %v24887_v46 = vld [vmem:[#allocation8_spill] sm:$0xff] }
 0x2de   : > { %v4917_v57 = vpop.f32.mrf.mxu1 }
 0x2df   : > { %24882 = vst [vmem:[#allocation4_spill] sm:$0xff] %v20601_v4  ;;  %v20610_v26 = vadd.f32 %v17328_v24, %v5285_v48  ;;  %v5284_v10 = vadd.f32 %v4917_v57, %v24885_v50  ;;  %v17331_v31 = vpop.f32.mrf.mxu0  ;;  %17670 = vmatmul.mubr.msk.f32.gmra.mxu0 %vm457_vm1, %v14547_v9  ;;  %v14291_v4 = vld [vmem:[%s18268_s26 + $0x1c2] sm:$0xff]  ;;  %v14292_v50 = vld [vmem:[%s18268_s26 + $0x1ca] sm:$0xff]  ;;  %v24889_v9 = vld [vmem:[#allocation9_spill] sm:$0xff] }
 0x2e0   : > { %v17137_v56 = vpop.f32.mrf.mxu1  ;;  %17476 = vmatmul.mubr.msk.f32.gmra.mxu1 %vm457_vm1, %v14289_v32  ;;  %17672 = vmatprep.mubr.msk.f32.mxu0 %vm457_vm1, %v14548_v16  ;;  %v14549_v24 = vld [vmem:[%s18268_s26 + $0x1e8] sm:$0xff] }
 0x2e1   : > { %24884 = vst [vmem:[#allocation5_spill] sm:$0xff] %v20610_v26  ;;  %v20615_v39 = vadd.f32 %v6267_v1, %v5284_v10  ;;  %v5287_v51 = vadd.f32 %v17137_v56, %v24887_v46  ;;  %17478 = vmatprep.mubr.msk.f32.mxu1 %vm457_vm1, %v14290_v63  ;;  %v6277_v57 = vpop.f32.mrf.mxu0  ;;  %v14550_v26 = vld [vmem:[%s18268_s26 + $0x1f0] sm:$0xff]  ;;  %v24891_v63 = vld [vmem:[#allocation10_spill] sm:$0xff] }
 0x2e2   : > { %v4927_v48 = vpop.f32.mrf.mxu1 }
 0x2e3   : > { %24886 = vst [vmem:[#allocation6_spill] sm:$0xff] %v20615_v39  ;;  %v20624_v32 = vadd.f32 %v17331_v31, %v5287_v51  ;;  %v5286_v1 = vadd.f32 %v4927_v48, %v24889_v9  ;;  %v17334_v56 = vpop.f32.mrf.mxu0  ;;  %17673 = vmatmul.mubr.msk.f32.gmra.mxu0 %vm457_vm1, %v14549_v24  ;;  %v14293_v39 = vld [vmem:[%s18268_s26 + $0x1d2] sm:$0xff]  ;;  %v14294_v9 = vld [vmem:[%s18268_s26 + $0x1e2] sm:$0xff] }
 0x2e4   : > { %v17140_v10 = vpop.f32.mrf.mxu1  ;;  %17479 = vmatmul.mubr.msk.f32.gmra.mxu1 %vm457_vm1, %v14291_v4  ;;  %17675 = vmatprep.mubr.msk.f32.mxu0 %vm457_vm1, %v14550_v26  ;;  %v14551_v31 = vld [vmem:[%s18268_s26 + $0x1f8] sm:$0xff]  ;;  %v24893_v24 = vld [vmem:[#allocation11_spill] sm:$0xff] }
 0x2e5   : > { %24888 = vst [vmem:[#allocation7_spill] sm:$0xff] %v20624_v32  ;;  %v20629_v16 = vadd.f32 %v6277_v57, %v5286_v1  ;;  %v5289_v46 = vadd.f32 %v17140_v10, %v24891_v63  ;;  %17481 = vmatprep.mubr.msk.f32.mxu1 %vm457_vm1, %v14292_v50  ;;  %v6287_v48 = vpop.f32.mrf.mxu0  ;;  %v14552_v32 = vld [vmem:[%s18268_s26 + $0x208] sm:$0xff]  ;;  %v24895_v50 = vld [vmem:[#allocation12_spill] sm:$0xff] }
 0x2e6   : > { %v4937_v51 = vpop.f32.mrf.mxu1 }
 0x2e7   : > { %24890 = vst [vmem:[#allocation8_spill] sm:$0xff] %v20629_v16  ;;  %v20638_v4 = vadd.f32 %v17334_v56, %v5289_v46  ;;  %v5288_v57 = vadd.f32 %v4937_v51, %v24893_v24  ;;  %v17337_v10 = vpop.f32.mrf.mxu0  ;;  %17676 = vmatmul.mubr.msk.f32.gmra.mxu0 %vm457_vm1, %v14551_v31  ;;  %v14295_v16 = vld [vmem:[%s18268_s26 + $0x1ea] sm:$0xff]  ;;  %v14296_v24 = vld [vmem:[%s18268_s26 + $0x1f2] sm:$0xff] }
 0x2e8   : > { %v17143_v1 = vpop.f32.mrf.mxu1  ;;  %17482 = vmatmul.mubr.msk.f32.gmra.mxu1 %vm457_vm1, %v14293_v39  ;;  %17678 = vmatprep.mubr.msk.f32.mxu0 %vm457_vm1, %v14552_v32  ;;  %v14553_v56 = vld [vmem:[%s18268_s26 + $0x210] sm:$0xff]  ;;  %v24897_v31 = vld [vmem:[#allocation13_spill] sm:$0xff] }
 0x2e9   : > { %24892 = vst [vmem:[#allocation9_spill] sm:$0xff] %v20638_v4  ;;  %v20643_v26 = vadd.f32 %v6287_v48, %v5288_v57  ;;  %v5291_v63 = vadd.f32 %v17143_v1, %v24895_v50  ;;  %17484 = vmatprep.mubr.msk.f32.mxu1 %vm457_vm1, %v14294_v9  ;;  %v6297_v51 = vpop.f32.mrf.mxu0  ;;  %v14554_v4 = vld [vmem:[%s18268_s26 + $0x218] sm:$0xff]  ;;  %v24899_v9 = vld [vmem:[#allocation14_spill] sm:$0xff] }
 0x2ea   : > { %v4947_v46 = vpop.f32.mrf.mxu1 }
 0x2eb   : > { %24894 = vst [vmem:[#allocation10_spill] sm:$0xff] %v20643_v26  ;;  %v20652_v39 = vadd.f32 %v17337_v10, %v5291_v63  ;;  %v5290_v48 = vadd.f32 %v4947_v46, %v24897_v31  ;;  %v17340_v1 = vpop.f32.mrf.mxu0  ;;  %17679 = vmatmul.mubr.msk.f32.gmra.mxu0 %vm457_vm1, %v14553_v56  ;;  %v14297_v26 = vld [vmem:[%s18268_s26 + $0x1fa] sm:$0xff]  ;;  %v14298_v31 = vld [vmem:[%s18268_s26 + $0x20a] sm:$0xff] }
 0x2ec   : > { %v17146_v57 = vpop.f32.mrf.mxu1  ;;  %17485 = vmatmul.mubr.msk.f32.gmra.mxu1 %vm457_vm1, %v14295_v16  ;;  %17681 = vmatprep.mubr.msk.f32.mxu0 %vm457_vm1, %v14554_v4  ;;  %v14555_v10 = vld [vmem:[%s18268_s26 + $0x220] sm:$0xff]  ;;  %v24901_v56 = vld [vmem:[#allocation15_spill] sm:$0xff] }
 0x2ed   : > { %24896 = vst [vmem:[#allocation11_spill] sm:$0xff] %v20652_v39  ;;  %v20657_v32 = vadd.f32 %v6297_v51, %v5290_v48  ;;  %v5293_v50 = vadd.f32 %v17146_v57, %v24899_v9  ;;  %17487 = vmatprep.mubr.msk.f32.mxu1 %vm457_vm1, %v14296_v24  ;;  %v6307_v46 = vpop.f32.mrf.mxu0  ;;  %v14556_v39 = vld [vmem:[%s18268_s26 + $0x230] sm:$0xff] }
 0x2ee   : > { %v4957_v63 = vpop.f32.mrf.mxu1  ;;  %v24903_v24 = vld [vmem:[#allocation16_spill] sm:$0xff] }
 0x2ef   : > { %24898 = vst [vmem:[#allocation12_spill] sm:$0xff] %v20657_v32  ;;  %v20666_v16 = vadd.f32 %v17340_v1, %v5293_v50  ;;  %v5292_v51 = vadd.f32 %v4957_v63, %v24901_v56  ;;  %v17343_v57 = vpop.f32.mrf.mxu0  ;;  %17682 = vmatmul.mubr.msk.f32.gmra.mxu0 %vm457_vm1, %v14555_v10  ;;  %v14299_v32 = vld [vmem:[%s18268_s26 + $0x212] sm:$0xff]  ;;  %v14300_v56 = vld [vmem:[%s18268_s26 + $0x21a] sm:$0xff] }
 0x2f0   : > { %v17149_v48 = vpop.f32.mrf.mxu1  ;;  %17488 = vmatmul.mubr.msk.f32.gmra.mxu1 %vm457_vm1, %v14297_v26  ;;  %17684 = vmatprep.mubr.msk.f32.mxu0 %vm457_vm1, %v14556_v39  ;;  %v14557_v1 = vld [vmem:[%s18268_s26 + $0x238] sm:$0xff] }
 0x2f1   : > { %24900 = vst [vmem:[#allocation13_spill] sm:$0xff] %v20666_v16  ;;  %v20671_v4 = vadd.f32 %v6307_v46, %v5292_v51  ;;  %v5295_v9 = vadd.f32 %v17149_v48, %v24903_v24  ;;  %17490 = vmatprep.mubr.msk.f32.mxu1 %vm457_vm1, %v14298_v31  ;;  %v6317_v63 = vpop.f32.mrf.mxu0  ;;  %v14558_v16 = vld [vmem:[%s18268_s26 + $0x240] sm:$0xff]  ;;  %v24905_v10 = vld [vmem:[#allocation17_spill] sm:$0xff] }
 0x2f2   : > { %v4967_v50 = vpop.f32.mrf.mxu1  ;;  %v24907_v31 = vld [vmem:[#allocation18_spill] sm:$0xff] }
 0x2f3   : > { %24902 = vst [vmem:[#allocation14_spill] sm:$0xff] %v20671_v4  ;;  %v20680_v26 = vadd.f32 %v17343_v57, %v5295_v9  ;;  %v5294_v46 = vadd.f32 %v4967_v50, %v24905_v10  ;;  %v17346_v48 = vpop.f32.mrf.mxu0  ;;  %17685 = vmatmul.mubr.msk.f32.gmra.mxu0 %vm457_vm1, %v14557_v1  ;;  %v14301_v4 = vld [vmem:[%s18268_s26 + $0x222] sm:$0xff]  ;;  %v14302_v10 = vld [vmem:[%s18268_s26 + $0x232] sm:$0xff] }
 0x2f4   : > { %v17152_v51 = vpop.f32.mrf.mxu1  ;;  %17491 = vmatmul.mubr.msk.f32.gmra.mxu1 %vm457_vm1, %v14299_v32  ;;  %17687 = vmatprep.mubr.msk.f32.mxu0 %vm457_vm1, %v14558_v16  ;;  %v14559_v57 = vld [vmem:[%s18268_s26 + $0x248] sm:$0xff] }
 0x2f5   : > { %24904 = vst [vmem:[#allocation15_spill] sm:$0xff] %v20680_v26  ;;  %v20685_v39 = vadd.f32 %v6317_v63, %v5294_v46  ;;  %v5297_v24 = vadd.f32 %v17152_v51, %v24907_v31  ;;  %17493 = vmatprep.mubr.msk.f32.mxu1 %vm457_vm1, %v14300_v56  ;;  %v6327_v50 = vpop.f32.mrf.mxu0  ;;  %v14560_v26 = vld [vmem:[%s18268_s26 + $0x258] sm:$0xff]  ;;  %v24909_v1 = vld [vmem:[#allocation19_spill] sm:$0xff]  ;;  %v24911_v56 = vld [vmem:[#allocation20_spill] sm:$0xff] }
 0x2f6   : > { %v4977_v9 = vpop.f32.mrf.mxu1 }
 0x2f7   : > { %24906 = vst [vmem:[#allocation16_spill] sm:$0xff] %v20685_v39  ;;  %v20694_v32 = vadd.f32 %v17346_v48, %v5297_v24  ;;  %v5296_v63 = vadd.f32 %v4977_v9, %v24909_v1  ;;  %v17349_v51 = vpop.f32.mrf.mxu0  ;;  %17688 = vmatmul.mubr.msk.f32.gmra.mxu0 %vm457_vm1, %v14559_v57  ;;  %v14303_v39 = vld [vmem:[%s18268_s26 + $0x23a] sm:$0xff]  ;;  %v14304_v1 = vld [vmem:[%s18268_s26 + $0x242] sm:$0xff] }
 0x2f8   : > { %v17155_v46 = vpop.f32.mrf.mxu1  ;;  %17494 = vmatmul.mubr.msk.f32.gmra.mxu1 %vm457_vm1, %v14301_v4  ;;  %17690 = vmatprep.mubr.msk.f32.mxu0 %vm457_vm1, %v14560_v26  ;;  %v14561_v48 = vld [vmem:[%s18268_s26 + $0x260] sm:$0xff]  ;;  %v24913_v57 = vld [vmem:[#allocation21_spill] sm:$0xff] }
 0x2f9   : > { %24908 = vst [vmem:[#allocation17_spill] sm:$0xff] %v20694_v32  ;;  %v20699_v16 = vadd.f32 %v6327_v50, %v5296_v63  ;;  %v5299_v31 = vadd.f32 %v17155_v46, %v24911_v56  ;;  %17496 = vmatprep.mubr.msk.f32.mxu1 %vm457_vm1, %v14302_v10  ;;  %v6337_v9 = vpop.f32.mrf.mxu0  ;;  %v14562_v32 = vld [vmem:[%s18268_s26 + $0x268] sm:$0xff]  ;;  %v24915_v10 = vld [vmem:[#allocation22_spill] sm:$0xff] }
 0x2fa   : > { %v4987_v24 = vpop.f32.mrf.mxu1 }
 0x2fb   : > { %24910 = vst [vmem:[#allocation18_spill] sm:$0xff] %v20699_v16  ;;  %v20708_v4 = vadd.f32 %v17349_v51, %v5299_v31  ;;  %v5298_v50 = vadd.f32 %v4987_v24, %v24913_v57  ;;  %v17352_v46 = vpop.f32.mrf.mxu0  ;;  %17691 = vmatmul.mubr.msk.f32.gmra.mxu0 %vm457_vm1, %v14561_v48  ;;  %v14305_v16 = vld [vmem:[%s18268_s26 + $0x24a] sm:$0xff]  ;;  %v14306_v57 = vld [vmem:[%s18268_s26 + $0x25a] sm:$0xff] }
 0x2fc   : > { %v17158_v63 = vpop.f32.mrf.mxu1  ;;  %17497 = vmatmul.mubr.msk.f32.gmra.mxu1 %vm457_vm1, %v14303_v39  ;;  %17693 = vmatprep.mubr.msk.f32.mxu0 %vm457_vm1, %v14562_v32  ;;  %v14563_v51 = vld [vmem:[%s18268_s26 + $0x270] sm:$0xff]  ;;  %v24917_v48 = vld [vmem:[#allocation23_spill] sm:$0xff] }
 0x2fd   : > { %24912 = vst [vmem:[#allocation19_spill] sm:$0xff] %v20708_v4  ;;  %v20713_v26 = vadd.f32 %v6337_v9, %v5298_v50  ;;  %v5301_v56 = vadd.f32 %v17158_v63, %v24915_v10  ;;  %17499 = vmatprep.mubr.msk.f32.mxu1 %vm457_vm1, %v14304_v1  ;;  %v6347_v24 = vpop.f32.mrf.mxu0  ;;  %v14564_v4 = vld [vmem:[%s18268_s26 + $0x280] sm:$0xff]  ;;  %v24919_v1 = vld [vmem:[#allocation24_spill] sm:$0xff] }
 0x2fe   : > { %v4997_v31 = vpop.f32.mrf.mxu1 }
 0x2ff   : > { %24914 = vst [vmem:[#allocation20_spill] sm:$0xff] %v20713_v26  ;;  %v20722_v39 = vadd.f32 %v17352_v46, %v5301_v56  ;;  %v5300_v9 = vadd.f32 %v4997_v31, %v24917_v48  ;;  %v17355_v63 = vpop.f32.mrf.mxu0  ;;  %17694 = vmatmul.mubr.msk.f32.gmra.mxu0 %vm457_vm1, %v14563_v51  ;;  %v14307_v26 = vld [vmem:[%s18268_s26 + $0x262] sm:$0xff]  ;;  %v14308_v48 = vld [vmem:[%s18268_s26 + $0x26a] sm:$0xff]  ;;  %v24921_v51 = vld [vmem:[#allocation25_spill] sm:$0xff] }
 0x300   : > { %v17161_v50 = vpop.f32.mrf.mxu1  ;;  %17500 = vmatmul.mubr.msk.f32.gmra.mxu1 %vm457_vm1, %v14305_v16  ;;  %17696 = vmatprep.mubr.msk.f32.mxu0 %vm457_vm1, %v14564_v4  ;;  %v14565_v46 = vld [vmem:[%s18268_s26 + $0x288] sm:$0xff] }
 0x301   : > { %24916 = vst [vmem:[#allocation21_spill] sm:$0xff] %v20722_v39  ;;  %v20727_v32 = vadd.f32 %v6347_v24, %v5300_v9  ;;  %v5303_v10 = vadd.f32 %v17161_v50, %v24919_v1  ;;  %17502 = vmatprep.mubr.msk.f32.mxu1 %vm457_vm1, %v14306_v57  ;;  %v6357_v31 = vpop.f32.mrf.mxu0  ;;  %v14566_v39 = vld [vmem:[%s18268_s26 + $0x290] sm:$0xff]  ;;  %v24923_v57 = vld [vmem:[#allocation26_spill] sm:$0xff] }
 0x302   : > { %v5007_v56 = vpop.f32.mrf.mxu1 }
 0x303   : > { %24918 = vst [vmem:[#allocation22_spill] sm:$0xff] %v20727_v32  ;;  %v20736_v16 = vadd.f32 %v17355_v63, %v5303_v10  ;;  %v5302_v24 = vadd.f32 %v5007_v56, %v24921_v51  ;;  %v17358_v50 = vpop.f32.mrf.mxu0  ;;  %17697 = vmatmul.mubr.msk.f32.gmra.mxu0 %vm457_vm1, %v14565_v46  ;;  %v14309_v32 = vld [vmem:[%s18268_s26 + $0x272] sm:$0xff]  ;;  %v14310_v51 = vld [vmem:[%s18268_s26 + $0x282] sm:$0xff] }
 0x304   : > { %v17164_v9 = vpop.f32.mrf.mxu1  ;;  %17503 = vmatmul.mubr.msk.f32.gmra.mxu1 %vm457_vm1, %v14307_v26  ;;  %17699 = vmatprep.mubr.msk.f32.mxu0 %vm457_vm1, %v14566_v39  ;;  %v14567_v63 = vld [vmem:[%s18268_s26 + $0x298] sm:$0xff]  ;;  %v24925_v46 = vld [vmem:[#allocation27_spill] sm:$0xff] }
 0x305   : > { %24920 = vst [vmem:[#allocation23_spill] sm:$0xff] %v20736_v16  ;;  %v20741_v4 = vadd.f32 %v6357_v31, %v5302_v24  ;;  %v5305_v1 = vadd.f32 %v17164_v9, %v24923_v57  ;;  %17505 = vmatprep.mubr.msk.f32.mxu1 %vm457_vm1, %v14308_v48  ;;  %v6367_v56 = vpop.f32.mrf.mxu0  ;;  %v14568_v16 = vld [vmem:[%s18268_s26 + $0x2a8] sm:$0xff]  ;;  %v24927_v48 = vld [vmem:[#allocation28_spill] sm:$0xff] }
 0x306   : > { %v5017_v10 = vpop.f32.mrf.mxu1 }
 0x307   : > { %24922 = vst [vmem:[#allocation24_spill] sm:$0xff] %v20741_v4  ;;  %v20750_v26 = vadd.f32 %v17358_v50, %v5305_v1  ;;  %v5304_v31 = vadd.f32 %v5017_v10, %v24925_v46  ;;  %v17361_v9 = vpop.f32.mrf.mxu0  ;;  %17700 = vmatmul.mubr.msk.f32.gmra.mxu0 %vm457_vm1, %v14567_v63  ;;  %v14311_v4 = vld [vmem:[%s18268_s26 + $0x28a] sm:$0xff]  ;;  %v14312_v46 = vld [vmem:[%s18268_s26 + $0x292] sm:$0xff] }
 0x308   : > { %v17167_v24 = vpop.f32.mrf.mxu1  ;;  %17506 = vmatmul.mubr.msk.f32.gmra.mxu1 %vm457_vm1, %v14309_v32  ;;  %17702 = vmatprep.mubr.msk.f32.mxu0 %vm457_vm1, %v14568_v16  ;;  %v14569_v50 = vld [vmem:[%s18268_s26 + $0x2b0] sm:$0xff]  ;;  %v24929_v63 = vld [vmem:[#allocation29_spill] sm:$0xff] }
 0x309   : > { %24924 = vst [vmem:[#allocation25_spill] sm:$0xff] %v20750_v26  ;;  %v20755_v39 = vadd.f32 %v6367_v56, %v5304_v31  ;;  %v5307_v57 = vadd.f32 %v17167_v24, %v24927_v48  ;;  %17508 = vmatprep.mubr.msk.f32.mxu1 %vm457_vm1, %v14310_v51  ;;  %v6377_v10 = vpop.f32.mrf.mxu0  ;;  %v14570_v26 = vld [vmem:[%s18268_s26 + $0x2b8] sm:$0xff]  ;;  %v24931_v51 = vld [vmem:[#allocation30_spill] sm:$0xff] }
 0x30a   : > { %v5027_v1 = vpop.f32.mrf.mxu1 }
 0x30b   : > { %24926 = vst [vmem:[#allocation26_spill] sm:$0xff] %v20755_v39  ;;  %v20764_v32 = vadd.f32 %v17361_v9, %v5307_v57  ;;  %v5306_v56 = vadd.f32 %v5027_v1, %v24929_v63  ;;  %v17364_v24 = vpop.f32.mrf.mxu0  ;;  %17703 = vmatmul.mubr.msk.f32.gmra.mxu0 %vm457_vm1, %v14569_v50  ;;  %v14313_v39 = vld [vmem:[%s18268_s26 + $0x29a] sm:$0xff]  ;;  %v14314_v63 = vld [vmem:[%s18268_s26 + $0x2aa] sm:$0xff] }
 0x30c   : > { %v17170_v31 = vpop.f32.mrf.mxu1  ;;  %17509 = vmatmul.mubr.msk.f32.gmra.mxu1 %vm457_vm1, %v14311_v4  ;;  %17705 = vmatprep.mubr.msk.f32.mxu0 %vm457_vm1, %v14570_v26  ;;  %v14571_v9 = vld [vmem:[%s18268_s26 + $0x2c0] sm:$0xff]  ;;  %v24933_v50 = vld [vmem:[#allocation31_spill] sm:$0xff] }
 0x30d   : > { %24928 = vst [vmem:[#allocation27_spill] sm:$0xff] %v20764_v32  ;;  %v20769_v16 = vadd.f32 %v6377_v10, %v5306_v56  ;;  %v5309_v48 = vadd.f32 %v17170_v31, %v24931_v51  ;;  %17511 = vmatprep.mubr.msk.f32.mxu1 %vm457_vm1, %v14312_v46  ;;  %v6387_v1 = vpop.f32.mrf.mxu0  ;;  %v14572_v32 = vld [vmem:[%s18268_s26 + $0x2d0] sm:$0xff] }
 0x30e   : > { %v5037_v57 = vpop.f32.mrf.mxu1  ;;  %v24935_v46 = vld [vmem:[#allocation32_spill] sm:$0xff] }
 0x30f   : > { %24930 = vst [vmem:[#allocation28_spill] sm:$0xff] %v20769_v16  ;;  %v20778_v4 = vadd.f32 %v17364_v24, %v5309_v48  ;;  %v5308_v10 = vadd.f32 %v5037_v57, %v24933_v50  ;;  %v17367_v31 = vpop.f32.mrf.mxu0  ;;  %17706 = vmatmul.mubr.msk.f32.gmra.mxu0 %vm457_vm1, %v14571_v9  ;;  %v14315_v16 = vld [vmem:[%s18268_s26 + $0x2b2] sm:$0xff]  ;;  %v14316_v50 = vld [vmem:[%s18268_s26 + $0x2ba] sm:$0xff] }
 0x310   : > { %v17173_v56 = vpop.f32.mrf.mxu1  ;;  %17512 = vmatmul.mubr.msk.f32.gmra.mxu1 %vm457_vm1, %v14313_v39  ;;  %17708 = vmatprep.mubr.msk.f32.mxu0 %vm457_vm1, %v14572_v32  ;;  %v14573_v24 = vld [vmem:[%s18268_s26 + $0x2d8] sm:$0xff] }
 0x311   : > { %24932 = vst [vmem:[#allocation29_spill] sm:$0xff] %v20778_v4  ;;  %v20783_v26 = vadd.f32 %v6387_v1, %v5308_v10  ;;  %v5311_v51 = vadd.f32 %v17173_v56, %v24935_v46  ;;  %17514 = vmatprep.mubr.msk.f32.mxu1 %vm457_vm1, %v14314_v63  ;;  %v6397_v57 = vpop.f32.mrf.mxu0  ;;  %v14574_v4 = vld [vmem:[%s18268_s26 + $0x2e0] sm:$0xff]  ;;  %v24937_v9 = vld [vmem:[#allocation33_spill] sm:$0xff] }
 0x312   : > { %v5047_v48 = vpop.f32.mrf.mxu1  ;;  %v24939_v63 = vld [vmem:[#allocation34_spill] sm:$0xff] }
 0x313   : > { %24934 = vst [vmem:[#allocation30_spill] sm:$0xff] %v20783_v26  ;;  %v20792_v39 = vadd.f32 %v17367_v31, %v5311_v51  ;;  %v5310_v1 = vadd.f32 %v5047_v48, %v24937_v9  ;;  %v17370_v56 = vpop.f32.mrf.mxu0  ;;  %17709 = vmatmul.mubr.msk.f32.gmra.mxu0 %vm457_vm1, %v14573_v24  ;;  %v14317_v26 = vld [vmem:[%s18268_s26 + $0x2c2] sm:$0xff]  ;;  %v14318_v9 = vld [vmem:[%s18268_s26 + $0x2d2] sm:$0xff] }
 0x314   : > { %v17176_v10 = vpop.f32.mrf.mxu1  ;;  %17515 = vmatmul.mubr.msk.f32.gmra.mxu1 %vm457_vm1, %v14315_v16  ;;  %17711 = vmatprep.mubr.msk.f32.mxu0 %vm457_vm1, %v14574_v4  ;;  %v14575_v31 = vld [vmem:[%s18268_s26 + $0x2e8] sm:$0xff] }
 0x315   : > { %24936 = vst [vmem:[#allocation31_spill] sm:$0xff] %v20792_v39  ;;  %v20797_v32 = vadd.f32 %v6397_v57, %v5310_v1  ;;  %v5313_v46 = vadd.f32 %v17176_v10, %v24939_v63  ;;  %17517 = vmatprep.mubr.msk.f32.mxu1 %vm457_vm1, %v14316_v50  ;;  %v6407_v48 = vpop.f32.mrf.mxu0  ;;  %v14576_v39 = vld [vmem:[%s18268_s26 + $0x2f8] sm:$0xff]  ;;  %v24941_v24 = vld [vmem:[#allocation35_spill] sm:$0xff]  ;;  %v24943_v50 = vld [vmem:[#allocation36_spill] sm:$0xff] }
 0x316   : > { %v5057_v51 = vpop.f32.mrf.mxu1 }
 0x317   : > { %24938 = vst [vmem:[#allocation32_spill] sm:$0xff] %v20797_v32  ;;  %v20806_v16 = vadd.f32 %v17370_v56, %v5313_v46  ;;  %v5312_v57 = vadd.f32 %v5057_v51, %v24941_v24  ;;  %v17373_v10 = vpop.f32.mrf.mxu0  ;;  %17712 = vmatmul.mubr.msk.f32.gmra.mxu0 %vm457_vm1, %v14575_v31  ;;  %v14319_v32 = vld [vmem:[%s18268_s26 + $0x2da] sm:$0xff]  ;;  %v14320_v24 = vld [vmem:[%s18268_s26 + $0x2e2] sm:$0xff] }
 0x318   : > { %v17179_v1 = vpop.f32.mrf.mxu1  ;;  %17518 = vmatmul.mubr.msk.f32.gmra.mxu1 %vm457_vm1, %v14317_v26  ;;  %17714 = vmatprep.mubr.msk.f32.mxu0 %vm457_vm1, %v14576_v39  ;;  %v14577_v56 = vld [vmem:[%s18268_s26 + $0x300] sm:$0xff]  ;;  %v24945_v31 = vld [vmem:[#allocation37_spill] sm:$0xff] }
 0x319   : > { %24940 = vst [vmem:[#allocation33_spill] sm:$0xff] %v20806_v16  ;;  %v20811_v4 = vadd.f32 %v6407_v48, %v5312_v57  ;;  %v5315_v63 = vadd.f32 %v17179_v1, %v24943_v50  ;;  %17520 = vmatprep.mubr.msk.f32.mxu1 %vm457_vm1, %v14318_v9  ;;  %v6417_v51 = vpop.f32.mrf.mxu0  ;;  %v14578_v16 = vld [vmem:[%s18268_s26 + $0x308] sm:$0xff]  ;;  %v24947_v9 = vld [vmem:[#allocation38_spill] sm:$0xff] }
 0x31a   : > { %v5067_v46 = vpop.f32.mrf.mxu1 }
 0x31b   : > { %24942 = vst [vmem:[#allocation34_spill] sm:$0xff] %v20811_v4  ;;  %v20820_v26 = vadd.f32 %v17373_v10, %v5315_v63  ;;  %v5314_v48 = vadd.f32 %v5067_v46, %v24945_v31  ;;  %v17376_v1 = vpop.f32.mrf.mxu0  ;;  %17715 = vmatmul.mubr.msk.f32.gmra.mxu0 %vm457_vm1, %v14577_v56  ;;  %v14321_v4 = vld [vmem:[%s18268_s26 + $0x2ea] sm:$0xff]  ;;  %v14322_v31 = vld [vmem:[%s18268_s26 + $0x2fa] sm:$0xff] }
 0x31c   : > { %v17182_v57 = vpop.f32.mrf.mxu1  ;;  %17521 = vmatmul.mubr.msk.f32.gmra.mxu1 %vm457_vm1, %v14319_v32  ;;  %17717 = vmatprep.mubr.msk.f32.mxu0 %vm457_vm1, %v14578_v16  ;;  %v14579_v10 = vld [vmem:[%s18268_s26 + $0x310] sm:$0xff]  ;;  %v24949_v56 = vld [vmem:[#allocation39_spill] sm:$0xff] }
 0x31d   : > { %24944 = vst [vmem:[#allocation35_spill] sm:$0xff] %v20820_v26  ;;  %v20825_v39 = vadd.f32 %v6417_v51, %v5314_v48  ;;  %v5317_v50 = vadd.f32 %v17182_v57, %v24947_v9  ;;  %17523 = vmatprep.mubr.msk.f32.mxu1 %vm457_vm1, %v14320_v24  ;;  %v6427_v46 = vpop.f32.mrf.mxu0  ;;  %v14580_v26 = vld [vmem:[%s18268_s26 + $0x320] sm:$0xff]  ;;  %v24951_v24 = vld [vmem:[#allocation40_spill] sm:$0xff] }
 0x31e   : > { %v5077_v63 = vpop.f32.mrf.mxu1 }
 0x31f   : > { %24946 = vst [vmem:[#allocation36_spill] sm:$0xff] %v20825_v39  ;;  %v20834_v32 = vadd.f32 %v17376_v1, %v5317_v50  ;;  %v5316_v51 = vadd.f32 %v5077_v63, %v24949_v56  ;;  %v17379_v57 = vpop.f32.mrf.mxu0  ;;  %17718 = vmatmul.mubr.msk.f32.gmra.mxu0 %vm457_vm1, %v14579_v10  ;;  %v14323_v39 = vld [vmem:[%s18268_s26 + $0x302] sm:$0xff]  ;;  %v14324_v56 = vld [vmem:[%s18268_s26 + $0x30a] sm:$0xff]  ;;  %v24953_v10 = vld [vmem:[#allocation41_spill] sm:$0xff] }
 0x320   : > { %v17185_v48 = vpop.f32.mrf.mxu1  ;;  %17524 = vmatmul.mubr.msk.f32.gmra.mxu1 %vm457_vm1, %v14321_v4  ;;  %17720 = vmatprep.mubr.msk.f32.mxu0 %vm457_vm1, %v14580_v26  ;;  %v14581_v1 = vld [vmem:[%s18268_s26 + $0x328] sm:$0xff] }
 0x321   : > { %24948 = vst [vmem:[#allocation37_spill] sm:$0xff] %v20834_v32  ;;  %v20839_v16 = vadd.f32 %v6427_v46, %v5316_v51  ;;  %v5319_v9 = vadd.f32 %v17185_v48, %v24951_v24  ;;  %17526 = vmatprep.mubr.msk.f32.mxu1 %vm457_vm1, %v14322_v31  ;;  %v6437_v63 = vpop.f32.mrf.mxu0  ;;  %v14582_v32 = vld [vmem:[%s18268_s26 + $0x330] sm:$0xff]  ;;  %v24955_v31 = vld [vmem:[#allocation42_spill] sm:$0xff] }
 0x322   : > { %v5087_v50 = vpop.f32.mrf.mxu1 }
 0x323   : > { %24950 = vst [vmem:[#allocation38_spill] sm:$0xff] %v20839_v16  ;;  %v20848_v4 = vadd.f32 %v17379_v57, %v5319_v9  ;;  %v5318_v46 = vadd.f32 %v5087_v50, %v24953_v10  ;;  %v17382_v48 = vpop.f32.mrf.mxu0  ;;  %17721 = vmatmul.mubr.msk.f32.gmra.mxu0 %vm457_vm1, %v14581_v1  ;;  %v14325_v16 = vld [vmem:[%s18268_s26 + $0x312] sm:$0xff]  ;;  %v14326_v10 = vld [vmem:[%s18268_s26 + $0x322] sm:$0xff] }
 0x324   : > { %v17188_v51 = vpop.f32.mrf.mxu1  ;;  %17527 = vmatmul.mubr.msk.f32.gmra.mxu1 %vm457_vm1, %v14323_v39  ;;  %17723 = vmatprep.mubr.msk.f32.mxu0 %vm457_vm1, %v14582_v32  ;;  %v14583_v57 = vld [vmem:[%s18268_s26 + $0x338] sm:$0xff]  ;;  %v24957_v1 = vld [vmem:[#allocation43_spill] sm:$0xff] }
 0x325   : > { %24952 = vst [vmem:[#allocation39_spill] sm:$0xff] %v20848_v4  ;;  %v20853_v26 = vadd.f32 %v6437_v63, %v5318_v46  ;;  %v5321_v24 = vadd.f32 %v17188_v51, %v24955_v31  ;;  %17529 = vmatprep.mubr.msk.f32.mxu1 %vm457_vm1, %v14324_v56  ;;  %v6447_v50 = vpop.f32.mrf.mxu0  ;;  %v14584_v4 = vld [vmem:[%s18268_s26 + $0x348] sm:$0xff]  ;;  %v24959_v56 = vld [vmem:[#allocation44_spill] sm:$0xff] }
 0x326   : > { %v5097_v9 = vpop.f32.mrf.mxu1 }
 0x327   : > { %24954 = vst [vmem:[#allocation40_spill] sm:$0xff] %v20853_v26  ;;  %v20862_v39 = vadd.f32 %v17382_v48, %v5321_v24  ;;  %v5320_v63 = vadd.f32 %v5097_v9, %v24957_v1  ;;  %v17385_v51 = vpop.f32.mrf.mxu0  ;;  %17724 = vmatmul.mubr.msk.f32.gmra.mxu0 %vm457_vm1, %v14583_v57  ;;  %v14327_v26 = vld [vmem:[%s18268_s26 + $0x32a] sm:$0xff]  ;;  %v14328_v1 = vld [vmem:[%s18268_s26 + $0x332] sm:$0xff] }
 0x328   : > { %v17191_v46 = vpop.f32.mrf.mxu1  ;;  %17530 = vmatmul.mubr.msk.f32.gmra.mxu1 %vm457_vm1, %v14325_v16  ;;  %17726 = vmatprep.mubr.msk.f32.mxu0 %vm457_vm1, %v14584_v4  ;;  %v14585_v48 = vld [vmem:[%s18268_s26 + $0x350] sm:$0xff]  ;;  %v24961_v57 = vld [vmem:[#allocation45_spill] sm:$0xff] }
 0x329   : > { %24956 = vst [vmem:[#allocation41_spill] sm:$0xff] %v20862_v39  ;;  %v20867_v32 = vadd.f32 %v6447_v50, %v5320_v63  ;;  %v5323_v31 = vadd.f32 %v17191_v46, %v24959_v56  ;;  %17532 = vmatprep.mubr.msk.f32.mxu1 %vm457_vm1, %v14326_v10  ;;  %v6457_v9 = vpop.f32.mrf.mxu0  ;;  %v14586_v39 = vld [vmem:[%s18268_s26 + $0x358] sm:$0xff]  ;;  %v24963_v10 = vld [vmem:[#allocation46_spill] sm:$0xff] }
 0x32a   : > { %v5107_v24 = vpop.f32.mrf.mxu1 }
 0x32b   : > { %24958 = vst [vmem:[#allocation42_spill] sm:$0xff] %v20867_v32  ;;  %v20876_v16 = vadd.f32 %v17385_v51, %v5323_v31  ;;  %v5322_v50 = vadd.f32 %v5107_v24, %v24961_v57  ;;  %v17388_v46 = vpop.f32.mrf.mxu0  ;;  %17727 = vmatmul.mubr.msk.f32.gmra.mxu0 %vm457_vm1, %v14585_v48  ;;  %v14329_v32 = vld [vmem:[%s18268_s26 + $0x33a] sm:$0xff]  ;;  %v14330_v57 = vld [vmem:[%s18268_s26 + $0x34a] sm:$0xff] }
 0x32c   : > { %v17194_v63 = vpop.f32.mrf.mxu1  ;;  %17533 = vmatmul.mubr.msk.f32.gmra.mxu1 %vm457_vm1, %v14327_v26  ;;  %17729 = vmatprep.mubr.msk.f32.mxu0 %vm457_vm1, %v14586_v39  ;;  %v14587_v51 = vld [vmem:[%s18268_s26 + $0x360] sm:$0xff]  ;;  %v24965_v48 = vld [vmem:[#allocation47_spill] sm:$0xff] }
 0x32d   : > { %24960 = vst [vmem:[#allocation43_spill] sm:$0xff] %v20876_v16  ;;  %v20881_v4 = vadd.f32 %v6457_v9, %v5322_v50  ;;  %v5325_v56 = vadd.f32 %v17194_v63, %v24963_v10  ;;  %17535 = vmatprep.mubr.msk.f32.mxu1 %vm457_vm1, %v14328_v1  ;;  %v6467_v24 = vpop.f32.mrf.mxu0  ;;  %v14588_v16 = vld [vmem:[%s18268_s26 + $0x370] sm:$0xff] }
 0x32e   : > { %v5117_v31 = vpop.f32.mrf.mxu1  ;;  %v24967_v1 = vld [vmem:[#allocation48_spill] sm:$0xff] }
 0x32f   : > { %24962 = vst [vmem:[#allocation44_spill] sm:$0xff] %v20881_v4  ;;  %v20890_v26 = vadd.f32 %v17388_v46, %v5325_v56  ;;  %v5324_v9 = vadd.f32 %v5117_v31, %v24965_v48  ;;  %v17391_v63 = vpop.f32.mrf.mxu0  ;;  %17730 = vmatmul.mubr.msk.f32.gmra.mxu0 %vm457_vm1, %v14587_v51  ;;  %v14331_v4 = vld [vmem:[%s18268_s26 + $0x352] sm:$0xff]  ;;  %v14332_v48 = vld [vmem:[%s18268_s26 + $0x35a] sm:$0xff] }
 0x330   : > { %v17197_v50 = vpop.f32.mrf.mxu1  ;;  %17536 = vmatmul.mubr.msk.f32.gmra.mxu1 %vm457_vm1, %v14329_v32  ;;  %17732 = vmatprep.mubr.msk.f32.mxu0 %vm457_vm1, %v14588_v16  ;;  %v14589_v46 = vld [vmem:[%s18268_s26 + $0x378] sm:$0xff] }
 0x331   : > { %24964 = vst [vmem:[#allocation45_spill] sm:$0xff] %v20890_v26  ;;  %v20895_v39 = vadd.f32 %v6467_v24, %v5324_v9  ;;  %v5327_v10 = vadd.f32 %v17197_v50, %v24967_v1  ;;  %17538 = vmatprep.mubr.msk.f32.mxu1 %vm457_vm1, %v14330_v57  ;;  %v6477_v31 = vpop.f32.mrf.mxu0  ;;  %v14590_v26 = vld [vmem:[%s18268_s26 + $0x380] sm:$0xff]  ;;  %v24969_v51 = vld [vmem:[#allocation49_spill] sm:$0xff]  ;;  %v24971_v57 = vld [vmem:[#allocation51_spill] sm:$0xff] }
 0x332   : > { %v5127_v56 = vpop.f32.mrf.mxu1 }
 0x333   : > { %24966 = vst [vmem:[#allocation46_spill] sm:$0xff] %v20895_v39  ;;  %v20904_v32 = vadd.f32 %v17391_v63, %v5327_v10  ;;  %v5326_v24 = vadd.f32 %v5127_v56, %v24969_v51  ;;  %v17394_v50 = vpop.f32.mrf.mxu0  ;;  %17733 = vmatmul.mubr.msk.f32.gmra.mxu0 %vm457_vm1, %v14589_v46  ;;  %v14333_v39 = vld [vmem:[%s18268_s26 + $0x362] sm:$0xff]  ;;  %v14334_v51 = vld [vmem:[%s18268_s26 + $0x372] sm:$0xff] }
 0x334   : > { %v17200_v9 = vpop.f32.mrf.mxu1  ;;  %17539 = vmatmul.mubr.msk.f32.gmra.mxu1 %vm457_vm1, %v14331_v4  ;;  %17735 = vmatprep.mubr.msk.f32.mxu0 %vm457_vm1, %v14590_v26  ;;  %v14591_v63 = vld [vmem:[%s18268_s26 + $0x388] sm:$0xff]  ;;  %v24973_v46 = vld [vmem:[#allocation53_spill] sm:$0xff] }
 0x335   : > { %24968 = vst [vmem:[#allocation47_spill] sm:$0xff] %v20904_v32  ;;  %v20909_v16 = vadd.f32 %v6477_v31, %v5326_v24  ;;  %v5329_v1 = vadd.f32 %v17200_v9, %v24971_v57  ;;  %17541 = vmatprep.mubr.msk.f32.mxu1 %vm457_vm1, %v14332_v48  ;;  %v6487_v56 = vpop.f32.mrf.mxu0  ;;  %v14592_v32 = vld [vmem:[%s18268_s26 + $0x398] sm:$0xff]  ;;  %v24975_v48 = vld [vmem:[#allocation55_spill] sm:$0xff] }
 0x336   : > { %v5137_v10 = vpop.f32.mrf.mxu1 }
 0x337   : > { %24970 = vst [vmem:[#allocation48_spill] sm:$0xff] %v20909_v16  ;;  %v20918_v4 = vadd.f32 %v17394_v50, %v5329_v1  ;;  %v5328_v31 = vadd.f32 %v5137_v10, %v24973_v46  ;;  %v17397_v9 = vpop.f32.mrf.mxu0  ;;  %17736 = vmatmul.mubr.msk.f32.gmra.mxu0 %vm457_vm1, %v14591_v63  ;;  %v14335_v16 = vld [vmem:[%s18268_s26 + $0x37a] sm:$0xff]  ;;  %v14336_v46 = vld [vmem:[%s18268_s26 + $0x382] sm:$0xff] }
 0x338   : > { %v17203_v24 = vpop.f32.mrf.mxu1  ;;  %17542 = vmatmul.mubr.msk.f32.gmra.mxu1 %vm457_vm1, %v14333_v39  ;;  %17738 = vmatprep.mubr.msk.f32.mxu0 %vm457_vm1, %v14592_v32  ;;  %v14593_v50 = vld [vmem:[%s18268_s26 + $0x3a0] sm:$0xff]  ;;  %v24977_v63 = vld [vmem:[#allocation57_spill] sm:$0xff] }
 0x339   : > { %24972 = vst [vmem:[#allocation49_spill] sm:$0xff] %v20918_v4  ;;  %v20923_v26 = vadd.f32 %v6487_v56, %v5328_v31  ;;  %v5331_v57 = vadd.f32 %v17203_v24, %v24975_v48  ;;  %17544 = vmatprep.mubr.msk.f32.mxu1 %vm457_vm1, %v14334_v51  ;;  %v6497_v10 = vpop.f32.mrf.mxu0  ;;  %v14594_v4 = vld [vmem:[%s18268_s26 + $0x3a8] sm:$0xff] }
 0x33a   : > { %v5147_v1 = vpop.f32.mrf.mxu1  ;;  %v24979_v51 = vld [vmem:[#allocation59_spill] sm:$0xff] }
 0x33b   : > { %24974 = vst [vmem:[#allocation51_spill] sm:$0xff] %v20923_v26  ;;  %v20932_v39 = vadd.f32 %v17397_v9, %v5331_v57  ;;  %v5330_v56 = vadd.f32 %v5147_v1, %v24977_v63  ;;  %v17400_v24 = vpop.f32.mrf.mxu0  ;;  %17739 = vmatmul.mubr.msk.f32.gmra.mxu0 %vm457_vm1, %v14593_v50  ;;  %v14337_v26 = vld [vmem:[%s18268_s26 + $0x38a] sm:$0xff]  ;;  %v14338_v63 = vld [vmem:[%s18268_s26 + $0x39a] sm:$0xff] }
 0x33c   : > { %v17206_v31 = vpop.f32.mrf.mxu1  ;;  %17545 = vmatmul.mubr.msk.f32.gmra.mxu1 %vm457_vm1, %v14335_v16  ;;  %17741 = vmatprep.mubr.msk.f32.mxu0 %vm457_vm1, %v14594_v4  ;;  %v14595_v9 = vld [vmem:[%s18268_s26 + $0x3b0] sm:$0xff]  ;;  %v24981_v50 = vld [vmem:[#allocation61_spill] sm:$0xff] }
 0x33d   : > { %24976 = vst [vmem:[#allocation53_spill] sm:$0xff] %v20932_v39  ;;  %v20937_v32 = vadd.f32 %v6497_v10, %v5330_v56  ;;  %v5333_v48 = vadd.f32 %v17206_v31, %v24979_v51  ;;  %17547 = vmatprep.mubr.msk.f32.mxu1 %vm457_vm1, %v14336_v46  ;;  %v6507_v1 = vpop.f32.mrf.mxu0  ;;  %v14596_v39 = vld [vmem:[%s18268_s26 + $0x3c0] sm:$0xff]  ;;  %v24983_v46 = vld [vmem:[#allocation63_spill] sm:$0xff] }
 0x33e   : > { %v5157_v57 = vpop.f32.mrf.mxu1 }
 0x33f   : > { %24978 = vst [vmem:[#allocation55_spill] sm:$0xff] %v20937_v32  ;;  %v20946_v16 = vadd.f32 %v17400_v24, %v5333_v48  ;;  %v5332_v10 = vadd.f32 %v5157_v57, %v24981_v50  ;;  %v17403_v31 = vpop.f32.mrf.mxu0  ;;  %17742 = vmatmul.mubr.msk.f32.gmra.mxu0 %vm457_vm1, %v14595_v9  ;;  %v14339_v32 = vld [vmem:[%s18268_s26 + $0x3a2] sm:$0xff]  ;;  %v14340_v50 = vld [vmem:[%s18268_s26 + $0x3aa] sm:$0xff]  ;;  %v24985_v9 = vld [vmem:[#allocation65_spill] sm:$0xff] }
 0x340   : > { %v17209_v56 = vpop.f32.mrf.mxu1  ;;  %17548 = vmatmul.mubr.msk.f32.gmra.mxu1 %vm457_vm1, %v14337_v26  ;;  %17744 = vmatprep.mubr.msk.f32.mxu0 %vm457_vm1, %v14596_v39  ;;  %v14597_v24 = vld [vmem:[%s18268_s26 + $0x3c8] sm:$0xff] }
 0x341   : > { %24980 = vst [vmem:[#allocation57_spill] sm:$0xff] %v20946_v16  ;;  %v20951_v4 = vadd.f32 %v6507_v1, %v5332_v10  ;;  %v5335_v51 = vadd.f32 %v17209_v56, %v24983_v46  ;;  %17550 = vmatprep.mubr.msk.f32.mxu1 %vm457_vm1, %v14338_v63  ;;  %v6517_v57 = vpop.f32.mrf.mxu0  ;;  %v14598_v16 = vld [vmem:[%s18268_s26 + $0x3d0] sm:$0xff]  ;;  %v24987_v63 = vld [vmem:[#allocation67_spill] sm:$0xff] }
 0x342   : > { %v5167_v48 = vpop.f32.mrf.mxu1 }
 0x343   : > { %24982 = vst [vmem:[#allocation59_spill] sm:$0xff] %v20951_v4  ;;  %v20960_v26 = vadd.f32 %v17403_v31, %v5335_v51  ;;  %v5334_v1 = vadd.f32 %v5167_v48, %v24985_v9  ;;  %v17406_v56 = vpop.f32.mrf.mxu0  ;;  %17745 = vmatmul.mubr.msk.f32.gmra.mxu0 %vm457_vm1, %v14597_v24  ;;  %v14341_v4 = vld [vmem:[%s18268_s26 + $0x3b2] sm:$0xff]  ;;  %v14342_v9 = vld [vmem:[%s18268_s26 + $0x3c2] sm:$0xff] }
 0x344   : > { %v17212_v10 = vpop.f32.mrf.mxu1  ;;  %17551 = vmatmul.mubr.msk.f32.gmra.mxu1 %vm457_vm1, %v14339_v32  ;;  %17747 = vmatprep.mubr.msk.f32.mxu0 %vm457_vm1, %v14598_v16  ;;  %v14599_v31 = vld [vmem:[%s18268_s26 + $0x3d8] sm:$0xff] }
 0x345   : > { %24984 = vst [vmem:[#allocation61_spill] sm:$0xff] %v20960_v26  ;;  %v20965_v39 = vadd.f32 %v6517_v57, %v5334_v1  ;;  %v5337_v46 = vadd.f32 %v17212_v10, %v24987_v63  ;;  %17553 = vmatprep.mubr.msk.f32.mxu1 %vm457_vm1, %v14340_v50  ;;  %v6527_v48 = vpop.f32.mrf.mxu0  ;;  %v14600_v26 = vld [vmem:[%s18268_s26 + $0x3e8] sm:$0xff]  ;;  %v24989_v24 = vld [vmem:[#allocation69_spill] sm:$0xff] }
 0x346   : > { %v5177_v51 = vpop.f32.mrf.mxu1  ;;  %v24991_v50 = vld [vmem:[#allocation71_spill] sm:$0xff] }
 0x347   : > { %24986 = vst [vmem:[#allocation63_spill] sm:$0xff] %v20965_v39  ;;  %v20974_v32 = vadd.f32 %v17406_v56, %v5337_v46  ;;  %v5336_v57 = vadd.f32 %v5177_v51, %v24989_v24  ;;  %v17409_v10 = vpop.f32.mrf.mxu0  ;;  %17748 = vmatmul.mubr.msk.f32.gmra.mxu0 %vm457_vm1, %v14599_v31  ;;  %v14343_v39 = vld [vmem:[%s18268_s26 + $0x3ca] sm:$0xff]  ;;  %v14344_v24 = vld [vmem:[%s18268_s26 + $0x3d2] sm:$0xff] }
 0x348   : > { %v17215_v1 = vpop.f32.mrf.mxu1  ;;  %17554 = vmatmul.mubr.msk.f32.gmra.mxu1 %vm457_vm1, %v14341_v4  ;;  %17750 = vmatprep.mubr.msk.f32.mxu0 %vm457_vm1, %v14600_v26  ;;  %v14601_v56 = vld [vmem:[%s18268_s26 + $0x3f0] sm:$0xff]  ;;  %v24993_v31 = vld [vmem:[#allocation73_spill] sm:$0xff] }
 0x349   : > { %24988 = vst [vmem:[#allocation65_spill] sm:$0xff] %v20974_v32  ;;  %v20979_v16 = vadd.f32 %v6527_v48, %v5336_v57  ;;  %v5339_v63 = vadd.f32 %v17215_v1, %v24991_v50  ;;  %17556 = vmatprep.mubr.msk.f32.mxu1 %vm457_vm1, %v14342_v9  ;;  %v6537_v51 = vpop.f32.mrf.mxu0  ;;  %v14602_v32 = vld [vmem:[%s18268_s26 + $0x3f8] sm:$0xff]  ;;  %v24995_v9 = vld [vmem:[#allocation75_spill] sm:$0xff] }
 0x34a   : > { %v5187_v46 = vpop.f32.mrf.mxu1 }
 0x34b   : > { %24990 = vst [vmem:[#allocation67_spill] sm:$0xff] %v20979_v16  ;;  %v20988_v4 = vadd.f32 %v17409_v10, %v5339_v63  ;;  %v5338_v48 = vadd.f32 %v5187_v46, %v24993_v31  ;;  %v17412_v1 = vpop.f32.mrf.mxu0  ;;  %17751 = vmatmul.mubr.msk.f32.gmra.mxu0 %vm457_vm1, %v14601_v56  ;;  %v14345_v16 = vld [vmem:[%s18268_s26 + $0x3da] sm:$0xff]  ;;  %v14346_v31 = vld [vmem:[%s18268_s26 + $0x3ea] sm:$0xff] }
 0x34c   : > { %v17218_v57 = vpop.f32.mrf.mxu1  ;;  %17557 = vmatmul.mubr.msk.f32.gmra.mxu1 %vm457_vm1, %v14343_v39  ;;  %17753 = vmatprep.mubr.msk.f32.mxu0 %vm457_vm1, %v14602_v32  ;;  %v14603_v10 = vld [vmem:[%s18268_s26 + $0x400] sm:$0xff]  ;;  %v24997_v56 = vld [vmem:[#allocation77_spill] sm:$0xff] }
 0x34d   : > { %24992 = vst [vmem:[#allocation69_spill] sm:$0xff] %v20988_v4  ;;  %v20993_v26 = vadd.f32 %v6537_v51, %v5338_v48  ;;  %v5341_v50 = vadd.f32 %v17218_v57, %v24995_v9  ;;  %17559 = vmatprep.mubr.msk.f32.mxu1 %vm457_vm1, %v14344_v24  ;;  %v6547_v46 = vpop.f32.mrf.mxu0  ;;  %v14604_v4 = vld [vmem:[%s18268_s26 + $0x410] sm:$0xff]  ;;  %v24998_v24 = vld [vmem:[#allocation79_spill] sm:$0xff] }
 0x34e   : > { %v5197_v63 = vpop.f32.mrf.mxu1 }
 0x34f   : > { %24994 = vst [vmem:[#allocation71_spill] sm:$0xff] %v20993_v26  ;;  %v21002_v39 = vadd.f32 %v17412_v1, %v5341_v50  ;;  %v5340_v51 = vadd.f32 %v5197_v63, %v24997_v56  ;;  %v17415_v57 = vpop.f32.mrf.mxu0  ;;  %17754 = vmatmul.mubr.msk.f32.gmra.mxu0 %vm457_vm1, %v14603_v10  ;;  %v14347_v26 = vld [vmem:[%s18268_s26 + $0x3f2] sm:$0xff]  ;;  %v14348_v56 = vld [vmem:[%s18268_s26 + $0x3fa] sm:$0xff] }
 0x350   : > { %v17221_v48 = vpop.f32.mrf.mxu1  ;;  %17560 = vmatmul.mubr.msk.f32.gmra.mxu1 %vm457_vm1, %v14345_v16  ;;  %17756 = vmatprep.mubr.msk.f32.mxu0 %vm457_vm1, %v14604_v4  ;;  %v14605_v1 = vld [vmem:[%s18268_s26 + $0x418] sm:$0xff] }
 0x351   : > { %24996 = vst [vmem:[#allocation73_spill] sm:$0xff] %v21002_v39  ;;  %v21007_v32 = vadd.f32 %v6547_v46, %v5340_v51  ;;  %v5343_v9 = vadd.f32 %v17221_v48, %v24998_v24  ;;  %17562 = vmatprep.mubr.msk.f32.mxu1 %vm457_vm1, %v14346_v31  ;;  %v6557_v63 = vpop.f32.mrf.mxu0  ;;  %v14606_v39 = vld [vmem:[%s18268_s26 + $0x420] sm:$0xff] }
 0x352   : > { %v5207_v50 = vpop.f32.mrf.mxu1  ;;  %v14349_v48 = vld [vmem:[%s18268_s26 + $0x402] sm:$0xff] }
 0x353   : > { %v21016_v16 = vadd.f32 %v17415_v57, %v5343_v9  ;;  %v5342_v10 = vadd.f32 %v5207_v50, %v20119_v62  ;;  %v17614_v31 = vpop.f32.mrf.mxu0  ;;  %17757 = vmatmul.mubr.msk.f32.gmra.mxu0 %vm457_vm1, %v14605_v1  ;;  %v14607_v57 = vld [vmem:[%s18268_s26 + $0x428] sm:$0xff]  ;;  %v14350_v9 = vld [vmem:[%s18268_s26 + $0x412] sm:$0xff] }
 0x354   : > { %v17420_v46 = vpop.f32.mrf.mxu1  ;;  %17563 = vmatmul.mubr.msk.f32.gmra.mxu1 %vm457_vm1, %v14347_v26  ;;  %17759 = vmatprep.mubr.msk.f32.mxu0 %vm457_vm1, %v14606_v39  ;;  %v14608_v26 = vld [vmem:[%s18268_s26 + $0x438] sm:$0xff] }
 0x355   : > { %v21021_v4 = vadd.f32 %v6557_v63, %v5342_v10  ;;  %v7917_v51 = vadd.f32 %v17420_v46, %v20128_v3  ;;  %17565 = vmatprep.mubr.msk.f32.mxu1 %vm457_vm1, %v14348_v56  ;;  %v8628_v62 = vpop.f32.mrf.mxu0  ;;  %v14351_v10 = vld [vmem:[%s18268_s26 + $0x41a] sm:$0xff] }
 0x356   : > { %v7277_v24 = vpop.f32.mrf.mxu1  ;;  %v14609_v46 = vld [vmem:[%s18268_s26 + $0x440] sm:$0xff] }
 0x357   : > { %v21030_v50 = vadd.f32 %v17614_v31, %v7917_v51  ;;  %v7916_v1 = vadd.f32 %v7277_v24, %v20133_v6  ;;  %v17617_v3 = vpop.f32.mrf.mxu0  ;;  %17760 = vmatmul.mubr.msk.f32.gmra.mxu0 %vm457_vm1, %v14607_v57  ;;  %v14352_v51 = vld [vmem:[%s18268_s26 + $0x422] sm:$0xff] }
 0x358   : > { %v17423_v63 = vpop.f32.mrf.mxu1  ;;  %17566 = vmatmul.mubr.msk.f32.gmra.mxu1 %vm457_vm1, %v14349_v48  ;;  %17762 = vmatprep.mubr.msk.f32.mxu0 %vm457_vm1, %v14608_v26  ;;  %v14610_v48 = vld [vmem:[%s18268_s26 + $0x448] sm:$0xff] }
 0x359   : > { %v21035_v39 = vadd.f32 %v8628_v62, %v7916_v1  ;;  %v7919_v56 = vadd.f32 %v17423_v63, %v20142_v18  ;;  %17568 = vmatprep.mubr.msk.f32.mxu1 %vm457_vm1, %v14350_v9  ;;  %v8638_v6 = vpop.f32.mrf.mxu0  ;;  %v14353_v1 = vld [vmem:[%s18268_s26 + $0x42a] sm:$0xff] }
 0x35a   : > { %v7287_v31 = vpop.f32.mrf.mxu1  ;;  %v14611_v63 = vld [vmem:[%s18268_s26 + $0x450] sm:$0xff] }
 0x35b   : > { %v21044_v24 = vadd.f32 %v17617_v3, %v7919_v56  ;;  %v7918_v57 = vadd.f32 %v7287_v31, %v20147_v8  ;;  %v17620_v18 = vpop.f32.mrf.mxu0  ;;  %17763 = vmatmul.mubr.msk.f32.gmra.mxu0 %vm457_vm1, %v14609_v46  ;;  %v14354_v56 = vld [vmem:[%s18268_s26 + $0x43a] sm:$0xff] }
 0x35c   : > { %v17426_v62 = vpop.f32.mrf.mxu1  ;;  %17569 = vmatmul.mubr.msk.f32.gmra.mxu1 %vm457_vm1, %v14351_v10  ;;  %17765 = vmatprep.mubr.msk.f32.mxu0 %vm457_vm1, %v14610_v48  ;;  %v14612_v10 = vld [vmem:[%s18268_s26 + $0x460] sm:$0xff] }
 0x35d   : > { %v21049_v9 = vadd.f32 %v8638_v6, %v7918_v57  ;;  %v7921_v26 = vadd.f32 %v17426_v62, %v20156_v12  ;;  %17571 = vmatprep.mubr.msk.f32.mxu1 %vm457_vm1, %v14352_v51  ;;  %v8648_v8 = vpop.f32.mrf.mxu0  ;;  %v14355_v57 = vld [vmem:[%s18268_s26 + $0x442] sm:$0xff] }
 0x35e   : > { %v7297_v3 = vpop.f32.mrf.mxu1  ;;  %v14613_v62 = vld [vmem:[%s18268_s26 + $0x468] sm:$0xff] }
 0x35f   : > { %v21058_v31 = vadd.f32 %v17620_v18, %v7921_v26  ;;  %v7920_v46 = vadd.f32 %v7297_v3, %v20161_v7  ;;  %v17623_v12 = vpop.f32.mrf.mxu0  ;;  %17766 = vmatmul.mubr.msk.f32.gmra.mxu0 %vm457_vm1, %v14611_v63  ;;  %v14356_v26 = vld [vmem:[%s18268_s26 + $0x44a] sm:$0xff] }
 0x360   : > { %v17429_v6 = vpop.f32.mrf.mxu1  ;;  %17572 = vmatmul.mubr.msk.f32.gmra.mxu1 %vm457_vm1, %v14353_v1  ;;  %17768 = vmatprep.mubr.msk.f32.mxu0 %vm457_vm1, %v14612_v10  ;;  %v14614_v1 = vld [vmem:[%s18268_s26 + $0x470] sm:$0xff] }
 0x361   : > { %v21063_v51 = vadd.f32 %v8648_v8, %v7920_v46  ;;  %v7923_v48 = vadd.f32 %v17429_v6, %v20170_v19  ;;  %17574 = vmatprep.mubr.msk.f32.mxu1 %vm457_vm1, %v14354_v56  ;;  %v8658_v7 = vpop.f32.mrf.mxu0  ;;  %v14357_v46 = vld [vmem:[%s18268_s26 + $0x452] sm:$0xff] }
 0x362   : > { %v7307_v18 = vpop.f32.mrf.mxu1  ;;  %v14615_v6 = vld [vmem:[%s18268_s26 + $0x478] sm:$0xff] }
 0x363   : > { %v21072_v3 = vadd.f32 %v17623_v12, %v7923_v48  ;;  %v7922_v63 = vadd.f32 %v7307_v18, %v20175_v27  ;;  %v17626_v19 = vpop.f32.mrf.mxu0  ;;  %17769 = vmatmul.mubr.msk.f32.gmra.mxu0 %vm457_vm1, %v14613_v62  ;;  %v14358_v48 = vld [vmem:[%s18268_s26 + $0x462] sm:$0xff] }
 0x364   : > { %v17432_v8 = vpop.f32.mrf.mxu1  ;;  %17575 = vmatmul.mubr.msk.f32.gmra.mxu1 %vm457_vm1, %v14355_v57  ;;  %17771 = vmatprep.mubr.msk.f32.mxu0 %vm457_vm1, %v14614_v1  ;;  %v14616_v57 = vld [vmem:[%s18268_s26 + $0x488] sm:$0xff] }
 0x365   : > { %v21077_v56 = vadd.f32 %v8658_v7, %v7922_v63  ;;  %v7925_v10 = vadd.f32 %v17432_v8, %v20184_v2  ;;  %17577 = vmatprep.mubr.msk.f32.mxu1 %vm457_vm1, %v14356_v26  ;;  %v8668_v27 = vpop.f32.mrf.mxu0  ;;  %v14359_v63 = vld [vmem:[%s18268_s26 + $0x46a] sm:$0xff] }
 0x366   : > { %v7317_v12 = vpop.f32.mrf.mxu1  ;;  %v14617_v8 = vld [vmem:[%s18268_s26 + $0x490] sm:$0xff] }
 0x367   : > { %v21086_v18 = vadd.f32 %v17626_v19, %v7925_v10  ;;  %v7924_v62 = vadd.f32 %v7317_v12, %v20189_v22  ;;  %v17629_v2 = vpop.f32.mrf.mxu0  ;;  %17772 = vmatmul.mubr.msk.f32.gmra.mxu0 %vm457_vm1, %v14615_v6  ;;  %v14360_v10 = vld [vmem:[%s18268_s26 + $0x472] sm:$0xff] }
 0x368   : > { %v17435_v7 = vpop.f32.mrf.mxu1  ;;  %17578 = vmatmul.mubr.msk.f32.gmra.mxu1 %vm457_vm1, %v14357_v46  ;;  %17774 = vmatprep.mubr.msk.f32.mxu0 %vm457_vm1, %v14616_v57  ;;  %v14618_v46 = vld [vmem:[%s18268_s26 + $0x498] sm:$0xff] }
 0x369   : > { %v21091_v26 = vadd.f32 %v8668_v27, %v7924_v62  ;;  %v7927_v1 = vadd.f32 %v17435_v7, %v20198_v58  ;;  %17580 = vmatprep.mubr.msk.f32.mxu1 %vm457_vm1, %v14358_v48  ;;  %v8678_v22 = vpop.f32.mrf.mxu0  ;;  %v14361_v62 = vld [vmem:[%s18268_s26 + $0x47a] sm:$0xff] }
 0x36a   : > { %v7327_v19 = vpop.f32.mrf.mxu1  ;;  %v14619_v7 = vld [vmem:[%s18268_s26 + $0x4a0] sm:$0xff] }
 0x36b   : > { %v21100_v12 = vadd.f32 %v17629_v2, %v7927_v1  ;;  %v7926_v6 = vadd.f32 %v7327_v19, %v20203_v37  ;;  %v17632_v58 = vpop.f32.mrf.mxu0  ;;  %17775 = vmatmul.mubr.msk.f32.gmra.mxu0 %vm457_vm1, %v14617_v8  ;;  %v14362_v1 = vld [vmem:[%s18268_s26 + $0x48a] sm:$0xff] }
 0x36c   : > { %v17438_v27 = vpop.f32.mrf.mxu1  ;;  %17581 = vmatmul.mubr.msk.f32.gmra.mxu1 %vm457_vm1, %v14359_v63  ;;  %17777 = vmatprep.mubr.msk.f32.mxu0 %vm457_vm1, %v14618_v46  ;;  %v14620_v63 = vld [vmem:[%s18268_s26 + $0x4b0] sm:$0xff] }
 0x36d   : > { %v21105_v48 = vadd.f32 %v8678_v22, %v7926_v6  ;;  %v7929_v57 = vadd.f32 %v17438_v27, %v20212_v14  ;;  %17583 = vmatprep.mubr.msk.f32.mxu1 %vm457_vm1, %v14360_v10  ;;  %v8688_v37 = vpop.f32.mrf.mxu0  ;;  %v14363_v6 = vld [vmem:[%s18268_s26 + $0x492] sm:$0xff] }
 0x36e   : > { %v7337_v2 = vpop.f32.mrf.mxu1  ;;  %v14621_v27 = vld [vmem:[%s18268_s26 + $0x4b8] sm:$0xff] }
 0x36f   : > { %v21114_v19 = vadd.f32 %v17632_v58, %v7929_v57  ;;  %v7928_v8 = vadd.f32 %v7337_v2, %v20217_v53  ;;  %v17635_v14 = vpop.f32.mrf.mxu0  ;;  %17778 = vmatmul.mubr.msk.f32.gmra.mxu0 %vm457_vm1, %v14619_v7  ;;  %v14364_v57 = vld [vmem:[%s18268_s26 + $0x49a] sm:$0xff] }
 0x370   : > { %v17441_v22 = vpop.f32.mrf.mxu1  ;;  %17584 = vmatmul.mubr.msk.f32.gmra.mxu1 %vm457_vm1, %v14361_v62  ;;  %17780 = vmatprep.mubr.msk.f32.mxu0 %vm457_vm1, %v14620_v63  ;;  %v14622_v62 = vld [vmem:[%s18268_s26 + $0x4c0] sm:$0xff] }
 0x371   : > { %v21119_v10 = vadd.f32 %v8688_v37, %v7928_v8  ;;  %v7931_v46 = vadd.f32 %v17441_v22, %v20226_v20  ;;  %17586 = vmatprep.mubr.msk.f32.mxu1 %vm457_vm1, %v14362_v1  ;;  %v8698_v53 = vpop.f32.mrf.mxu0  ;;  %v14365_v8 = vld [vmem:[%s18268_s26 + $0x4a2] sm:$0xff] }
 0x372   : > { %v7347_v58 = vpop.f32.mrf.mxu1  ;;  %v14623_v22 = vld [vmem:[%s18268_s26 + $0x4c8] sm:$0xff] }
 0x373   : > { %v21128_v2 = vadd.f32 %v17635_v14, %v7931_v46  ;;  %v7930_v7 = vadd.f32 %v7347_v58, %v20231_v47  ;;  %v17638_v20 = vpop.f32.mrf.mxu0  ;;  %17781 = vmatmul.mubr.msk.f32.gmra.mxu0 %vm457_vm1, %v14621_v27  ;;  %v14366_v46 = vld [vmem:[%s18268_s26 + $0x4b2] sm:$0xff] }
 0x374   : > { %v17444_v37 = vpop.f32.mrf.mxu1  ;;  %17587 = vmatmul.mubr.msk.f32.gmra.mxu1 %vm457_vm1, %v14363_v6  ;;  %17783 = vmatprep.mubr.msk.f32.mxu0 %vm457_vm1, %v14622_v62  ;;  %v14624_v6 = vld [vmem:[%s18268_s26 + $0x4d8] sm:$0xff] }
 0x375   : > { %v21133_v1 = vadd.f32 %v8698_v53, %v7930_v7  ;;  %v7933_v63 = vadd.f32 %v17444_v37, %v20240_v28  ;;  %17589 = vmatprep.mubr.msk.f32.mxu1 %vm457_vm1, %v14364_v57  ;;  %v8708_v47 = vpop.f32.mrf.mxu0  ;;  %v14367_v7 = vld [vmem:[%s18268_s26 + $0x4ba] sm:$0xff] }
 0x376   : > { %v7357_v14 = vpop.f32.mrf.mxu1  ;;  %v14625_v37 = vld [vmem:[%s18268_s26 + $0x4e0] sm:$0xff] }
 0x377   : > { %v21142_v58 = vadd.f32 %v17638_v20, %v7933_v63  ;;  %v7932_v27 = vadd.f32 %v7357_v14, %v20245_v45  ;;  %v17641_v28 = vpop.f32.mrf.mxu0  ;;  %17784 = vmatmul.mubr.msk.f32.gmra.mxu0 %vm457_vm1, %v14623_v22  ;;  %v14368_v63 = vld [vmem:[%s18268_s26 + $0x4c2] sm:$0xff] }
 0x378   : > { %v17447_v53 = vpop.f32.mrf.mxu1  ;;  %17590 = vmatmul.mubr.msk.f32.gmra.mxu1 %vm457_vm1, %v14365_v8  ;;  %17786 = vmatprep.mubr.msk.f32.mxu0 %vm457_vm1, %v14624_v6  ;;  %v14626_v8 = vld [vmem:[%s18268_s26 + $0x4e8] sm:$0xff] }
 0x379   : > { %v21147_v57 = vadd.f32 %v8708_v47, %v7932_v27  ;;  %v7935_v62 = vadd.f32 %v17447_v53, %v20254_v36  ;;  %17592 = vmatprep.mubr.msk.f32.mxu1 %vm457_vm1, %v14366_v46  ;;  %v8718_v45 = vpop.f32.mrf.mxu0  ;;  %v14369_v27 = vld [vmem:[%s18268_s26 + $0x4ca] sm:$0xff] }
 0x37a   : > { %v7367_v20 = vpop.f32.mrf.mxu1  ;;  %v14627_v53 = vld [vmem:[%s18268_s26 + $0x4f0] sm:$0xff] }
 0x37b   : > { %v21156_v14 = vadd.f32 %v17641_v28, %v7935_v62  ;;  %v7934_v22 = vadd.f32 %v7367_v20, %v20259_v38  ;;  %v17644_v36 = vpop.f32.mrf.mxu0  ;;  %17787 = vmatmul.mubr.msk.f32.gmra.mxu0 %vm457_vm1, %v14625_v37  ;;  %v14370_v62 = vld [vmem:[%s18268_s26 + $0x4da] sm:$0xff] }
 0x37c   : > { %v17450_v47 = vpop.f32.mrf.mxu1  ;;  %17593 = vmatmul.mubr.msk.f32.gmra.mxu1 %vm457_vm1, %v14367_v7  ;;  %17789 = vmatprep.mubr.msk.f32.mxu0 %vm457_vm1, %v14626_v8  ;;  %v14628_v7 = vld [vmem:[%s18268_s26 + $0x500] sm:$0xff] }
 0x37d   : > { %v21161_v46 = vadd.f32 %v8718_v45, %v7934_v22  ;;  %v7937_v6 = vadd.f32 %v17450_v47, %v20268_v44  ;;  %17595 = vmatprep.mubr.msk.f32.mxu1 %vm457_vm1, %v14368_v63  ;;  %v8728_v38 = vpop.f32.mrf.mxu0  ;;  %v14371_v22 = vld [vmem:[%s18268_s26 + $0x4e2] sm:$0xff] }
 0x37e   : > { %v7377_v28 = vpop.f32.mrf.mxu1  ;;  %v14629_v47 = vld [vmem:[%s18268_s26 + $0x508] sm:$0xff] }
 0x37f   : > { %v21170_v20 = vadd.f32 %v17644_v36, %v7937_v6  ;;  %v7936_v37 = vadd.f32 %v7377_v28, %v20273_v35  ;;  %v17647_v44 = vpop.f32.mrf.mxu0  ;;  %17790 = vmatmul.mubr.msk.f32.gmra.mxu0 %vm457_vm1, %v14627_v53  ;;  %v14372_v6 = vld [vmem:[%s18268_s26 + $0x4ea] sm:$0xff] }
 0x380   : > { %v17453_v45 = vpop.f32.mrf.mxu1  ;;  %17596 = vmatmul.mubr.msk.f32.gmra.mxu1 %vm457_vm1, %v14369_v27  ;;  %17792 = vmatprep.mubr.msk.f32.mxu0 %vm457_vm1, %v14628_v7  ;;  %v14630_v27 = vld [vmem:[%s18268_s26 + $0x510] sm:$0xff] }
 0x381   : > { %v21175_v63 = vadd.f32 %v8728_v38, %v7936_v37  ;;  %v7939_v8 = vadd.f32 %v17453_v45, %v20282_v52  ;;  %17598 = vmatprep.mubr.msk.f32.mxu1 %vm457_vm1, %v14370_v62  ;;  %v8738_v35 = vpop.f32.mrf.mxu0  ;;  %v14373_v37 = vld [vmem:[%s18268_s26 + $0x4f2] sm:$0xff] }
 0x382   : > { %v7387_v36 = vpop.f32.mrf.mxu1  ;;  %v14631_v45 = vld [vmem:[%s18268_s26 + $0x518] sm:$0xff] }
 0x383   : > { %v21184_v28 = vadd.f32 %v17647_v44, %v7939_v8  ;;  %v7938_v53 = vadd.f32 %v7387_v36, %v20287_v59  ;;  %v17650_v52 = vpop.f32.mrf.mxu0  ;;  %17793 = vmatmul.mubr.msk.f32.gmra.mxu0 %vm457_vm1, %v14629_v47  ;;  %v14374_v8 = vld [vmem:[%s18268_s26 + $0x502] sm:$0xff] }
 0x384   : > { %v17456_v38 = vpop.f32.mrf.mxu1  ;;  %17599 = vmatmul.mubr.msk.f32.gmra.mxu1 %vm457_vm1, %v14371_v22  ;;  %17795 = vmatprep.mubr.msk.f32.mxu0 %vm457_vm1, %v14630_v27  ;;  %v14632_v22 = vld [vmem:[%s18268_s26 + $0x528] sm:$0xff] }
 0x385   : > { %v21189_v62 = vadd.f32 %v8738_v35, %v7938_v53  ;;  %v7941_v7 = vadd.f32 %v17456_v38, %v20296_v61  ;;  %17601 = vmatprep.mubr.msk.f32.mxu1 %vm457_vm1, %v14372_v6  ;;  %v8748_v59 = vpop.f32.mrf.mxu0  ;;  %v14375_v53 = vld [vmem:[%s18268_s26 + $0x50a] sm:$0xff] }
 0x386   : > { %v7397_v44 = vpop.f32.mrf.mxu1  ;;  %v14633_v38 = vld [vmem:[%s18268_s26 + $0x530] sm:$0xff] }
 0x387   : > { %v21198_v36 = vadd.f32 %v17650_v52, %v7941_v7  ;;  %v7940_v47 = vadd.f32 %v7397_v44, %v20301_v49  ;;  %v17653_v61 = vpop.f32.mrf.mxu0  ;;  %17796 = vmatmul.mubr.msk.f32.gmra.mxu0 %vm457_vm1, %v14631_v45  ;;  %v14376_v7 = vld [vmem:[%s18268_s26 + $0x512] sm:$0xff] }
 0x388   : > { %v17459_v35 = vpop.f32.mrf.mxu1  ;;  %17602 = vmatmul.mubr.msk.f32.gmra.mxu1 %vm457_vm1, %v14373_v37  ;;  %17798 = vmatprep.mubr.msk.f32.mxu0 %vm457_vm1, %v14632_v22  ;;  %v14634_v37 = vld [vmem:[%s18268_s26 + $0x538] sm:$0xff] }
 0x389   : > { %v21203_v6 = vadd.f32 %v8748_v59, %v7940_v47  ;;  %v7943_v27 = vadd.f32 %v17459_v35, %v20310_v5  ;;  %17604 = vmatprep.mubr.msk.f32.mxu1 %vm457_vm1, %v14374_v8  ;;  %v8758_v49 = vpop.f32.mrf.mxu0  ;;  %v14377_v47 = vld [vmem:[%s18268_s26 + $0x51a] sm:$0xff] }
 0x38a   : > { %v7407_v52 = vpop.f32.mrf.mxu1  ;;  %v14635_v35 = vld [vmem:[%s18268_s26 + $0x540] sm:$0xff] }
 0x38b   : > { %v21212_v44 = vadd.f32 %v17653_v61, %v7943_v27  ;;  %v7942_v45 = vadd.f32 %v7407_v52, %v20315_v21  ;;  %v17656_v5 = vpop.f32.mrf.mxu0  ;;  %17799 = vmatmul.mubr.msk.f32.gmra.mxu0 %vm457_vm1, %v14633_v38  ;;  %v14766_v27 = vld [vmem:[%s18268_s26 + $0x51] sm:$0xff] }
 0x38c   : > { %v17462_v59 = vpop.f32.mrf.mxu1  ;;  %17605 = vmatmul.mubr.msk.f32.gmra.mxu1 %vm457_vm1, %v14375_v53  ;;  %17801 = vmatprep.mubr.msk.f32.mxu0 %vm457_vm1, %v14634_v37  ;;  %v15024_v53 = vld [vmem:[%s18268_s26 + $0x52] sm:$0xff] }
 0x38d   : > { %v21217_v8 = vadd.f32 %v8758_v49, %v7942_v45  ;;  %v7945_v22 = vadd.f32 %v17462_v59, %v20324_v23  ;;  %17607 = vmatprep.mubr.msk.f32.mxu1 %vm457_vm1, %v14376_v7  ;;  %v8768_v21 = vpop.f32.mrf.mxu0  ;;  %v14767_v45 = vld [vmem:[%s18268_s26 + $0x59] sm:$0xff] }
 0x38e   : > { %v7417_v61 = vpop.f32.mrf.mxu1  ;;  %v15025_v59 = vld [vmem:[%s18268_s26 + $0x5a] sm:$0xff] }
 0x38f   : > { %v21226_v52 = vadd.f32 %v17656_v5, %v7945_v22  ;;  %v7944_v38 = vadd.f32 %v7417_v61, %v20329_v33  ;;  %v17659_v23 = vpop.f32.mrf.mxu0  ;;  %17802 = vmatmul.mubr.msk.f32.gmra.mxu0 %vm457_vm1, %v14635_v35  ;;  %v14768_v22 = vld [vmem:[%s18268_s26 + $0x61] sm:$0xff] }
 0x390   : > { %v17465_v49 = vpop.f32.mrf.mxu1  ;;  %17608 = vmatmul.mubr.msk.f32.gmra.mxu1 %vm457_vm1, %v14377_v47  ;;  %18000 = vmatprep.mubr.msk.f32.mxu0 %vm457_vm1, %v15024_v53  ;;  %v15026_v47 = vld [vmem:[%s18268_s26 + $0x62] sm:$0xff] }
 0x391   : > { %v21231_v7 = vadd.f32 %v8768_v21, %v7944_v38  ;;  %v7947_v37 = vadd.f32 %v17465_v49, %v20336_v29  ;;  %17806 = vmatprep.mubr.msk.f32.mxu1 %vm457_vm1, %v14766_v27  ;;  %v8778_v33 = vpop.f32.mrf.mxu0  ;;  %v14769_v38 = vld [vmem:[%s18268_s26 + $0x69] sm:$0xff] }
 0x392   : > { %v7427_v5 = vpop.f32.mrf.mxu1  ;;  %v15027_v49 = vld [vmem:[%s18268_s26 + $0x6a] sm:$0xff] }
 0x393   : > { %v21240_v61 = vadd.f32 %v17659_v23, %v7947_v37  ;;  %v7946_v35 = vadd.f32 %v7427_v5, %v20343_v41  ;;  %v17662_v29 = vpop.f32.mrf.mxu0  ;;  %18001 = vmatmul.mubr.msk.f32.vlgmr.msra.gmra.mxu0 %vm457_vm1, %v15025_v59  ;;  %v14770_v37 = vld [vmem:[%s18268_s26 + $0x79] sm:$0xff] }
 0x394   : > { %v17468_v21 = vpop.f32.mrf.mxu1  ;;  %17807 = vmatmul.mubr.msk.f32.vlgmr.msra.gmra.mxu1 %vm457_vm1, %v14767_v45  ;;  %18003 = vmatprep.mubr.msk.f32.mxu0 %vm457_vm1, %v15026_v47  ;;  %v15028_v5 = vld [vmem:[%s18268_s26 + $0x7a] sm:$0xff] }
 0x395   : > { %v21245_v27 = vadd.f32 %v8778_v33, %v7946_v35  ;;  %v7949_v53 = vadd.f32 %v17468_v21, %v20358_v25  ;;  %17809 = vmatprep.mubr.msk.f32.mxu1 %vm457_vm1, %v14768_v22  ;;  %v8788_v41 = vpop.f32.mrf.mxu0  ;;  %v14771_v35 = vld [vmem:[%s18268_s26 + $0x81] sm:$0xff] }
 0x396   : > { %v7437_v23 = vpop.f32.mrf.mxu1  ;;  %v15029_v21 = vld [vmem:[%s18268_s26 + $0x82] sm:$0xff] }
 0x397   : > { %v21254_v45 = vadd.f32 %v17662_v29, %v7949_v53  ;;  %v7948_v59 = vadd.f32 %v7437_v23, %v20363_v60  ;;  %v17665_v25 = vpop.f32.mrf.mxu0  ;;  %18004 = vmatmul.mubr.msk.f32.gmra.mxu0 %vm457_vm1, %v15027_v49  ;;  %v14772_v53 = vld [vmem:[%s18268_s26 + $0x89] sm:$0xff] }
 0x398   : > { %v17471_v33 = vpop.f32.mrf.mxu1  ;;  %17810 = vmatmul.mubr.msk.f32.gmra.mxu1 %vm457_vm1, %v14769_v38  ;;  %18006 = vmatprep.mubr.msk.f32.mxu0 %vm457_vm1, %v15028_v5  ;;  %v15030_v23 = vld [vmem:[%s18268_s26 + $0x8a] sm:$0xff] }
 0x399   : > { %v21259_v22 = vadd.f32 %v8788_v41, %v7948_v59  ;;  %v7951_v47 = vadd.f32 %v17471_v33, %v20372_v40  ;;  %17812 = vmatprep.mubr.msk.f32.mxu1 %vm457_vm1, %v14770_v37  ;;  %v8798_v60 = vpop.f32.mrf.mxu0  ;;  %v14773_v59 = vld [vmem:[%s18268_s26 + $0x91] sm:$0xff] }
 0x39a   : > { %v7447_v29 = vpop.f32.mrf.mxu1  ;;  %v15031_v33 = vld [vmem:[%s18268_s26 + $0x92] sm:$0xff] }
 0x39b   : > { %v21268_v38 = vadd.f32 %v17665_v25, %v7951_v47  ;;  %v7950_v49 = vadd.f32 %v7447_v29, %v20377_v15  ;;  %v17668_v40 = vpop.f32.mrf.mxu0  ;;  %18007 = vmatmul.mubr.msk.f32.gmra.mxu0 %vm457_vm1, %v15029_v21  ;;  %v14774_v47 = vld [vmem:[%s18268_s26 + $0xa1] sm:$0xff] }
 0x39c   : > { %v17474_v41 = vpop.f32.mrf.mxu1  ;;  %17813 = vmatmul.mubr.msk.f32.gmra.mxu1 %vm457_vm1, %v14771_v35  ;;  %18009 = vmatprep.mubr.msk.f32.mxu0 %vm457_vm1, %v15030_v23  ;;  %v15032_v29 = vld [vmem:[%s18268_s26 + $0xa2] sm:$0xff] }
 0x39d   : > { %v21273_v37 = vadd.f32 %v8798_v60, %v7950_v49  ;;  %v7953_v5 = vadd.f32 %v17474_v41, %v20386_v54  ;;  %17815 = vmatprep.mubr.msk.f32.mxu1 %vm457_vm1, %v14772_v53  ;;  %v8808_v15 = vpop.f32.mrf.mxu0  ;;  %v14775_v49 = vld [vmem:[%s18268_s26 + $0xa9] sm:$0xff] }
 0x39e   : > { %v7457_v25 = vpop.f32.mrf.mxu1  ;;  %v15033_v41 = vld [vmem:[%s18268_s26 + $0xaa] sm:$0xff] }
 0x39f   : > { %v21282_v35 = vadd.f32 %v17668_v40, %v7953_v5  ;;  %v7952_v21 = vadd.f32 %v7457_v25, %v20391_v43  ;;  %v17671_v54 = vpop.f32.mrf.mxu0  ;;  %18010 = vmatmul.mubr.msk.f32.gmra.mxu0 %vm457_vm1, %v15031_v33  ;;  %v14776_v5 = vld [vmem:[%s18268_s26 + $0xb1] sm:$0xff] }
 0x3a0   : > { %v17477_v60 = vpop.f32.mrf.mxu1  ;;  %17816 = vmatmul.mubr.msk.f32.gmra.mxu1 %vm457_vm1, %v14773_v59  ;;  %18012 = vmatprep.mubr.msk.f32.mxu0 %vm457_vm1, %v15032_v29  ;;  %v15034_v25 = vld [vmem:[%s18268_s26 + $0xb2] sm:$0xff] }
 0x3a1   : > { %v21287_v53 = vadd.f32 %v8808_v15, %v7952_v21  ;;  %v7955_v23 = vadd.f32 %v17477_v60, %v20400_v17  ;;  %17818 = vmatprep.mubr.msk.f32.mxu1 %vm457_vm1, %v14774_v47  ;;  %v8818_v43 = vpop.f32.mrf.mxu0  ;;  %v14777_v21 = vld [vmem:[%s18268_s26 + $0xb9] sm:$0xff] }
 0x3a2   : > { %v7467_v40 = vpop.f32.mrf.mxu1  ;;  %v15035_v60 = vld [vmem:[%s18268_s26 + $0xba] sm:$0xff] }
 0x3a3   : > { %v21296_v59 = vadd.f32 %v17671_v54, %v7955_v23  ;;  %v7954_v33 = vadd.f32 %v7467_v40, %v20405_v34  ;;  %v17674_v17 = vpop.f32.mrf.mxu0  ;;  %18013 = vmatmul.mubr.msk.f32.gmra.mxu0 %vm457_vm1, %v15033_v41  ;;  %v14778_v23 = vld [vmem:[%s18268_s26 + $0xc9] sm:$0xff] }
 0x3a4   : > { %v17480_v15 = vpop.f32.mrf.mxu1  ;;  %17819 = vmatmul.mubr.msk.f32.gmra.mxu1 %vm457_vm1, %v14775_v49  ;;  %18015 = vmatprep.mubr.msk.f32.mxu0 %vm457_vm1, %v15034_v25  ;;  %v15036_v40 = vld [vmem:[%s18268_s26 + $0xca] sm:$0xff] }
 0x3a5   : > { %v21301_v47 = vadd.f32 %v8818_v43, %v7954_v33  ;;  %v7957_v29 = vadd.f32 %v17480_v15, %v20414_v11  ;;  %17821 = vmatprep.mubr.msk.f32.mxu1 %vm457_vm1, %v14776_v5  ;;  %v8828_v34 = vpop.f32.mrf.mxu0  ;;  %v14779_v33 = vld [vmem:[%s18268_s26 + $0xd1] sm:$0xff] }
 0x3a6   : > { %v7477_v54 = vpop.f32.mrf.mxu1  ;;  %v15037_v15 = vld [vmem:[%s18268_s26 + $0xd2] sm:$0xff] }
 0x3a7   : > { %v21310_v49 = vadd.f32 %v17674_v17, %v7957_v29  ;;  %v7956_v41 = vadd.f32 %v7477_v54, %v20419_v55  ;;  %v17677_v11 = vpop.f32.mrf.mxu0  ;;  %18016 = vmatmul.mubr.msk.f32.gmra.mxu0 %vm457_vm1, %v15035_v60  ;;  %v14780_v29 = vld [vmem:[%s18268_s26 + $0xd9] sm:$0xff] }
 0x3a8   : > { %v17483_v43 = vpop.f32.mrf.mxu1  ;;  %17822 = vmatmul.mubr.msk.f32.gmra.mxu1 %vm457_vm1, %v14777_v21  ;;  %18018 = vmatprep.mubr.msk.f32.mxu0 %vm457_vm1, %v15036_v40  ;;  %v15038_v54 = vld [vmem:[%s18268_s26 + $0xda] sm:$0xff] }
 0x3a9   : > { %v21315_v5 = vadd.f32 %v8828_v34, %v7956_v41  ;;  %v7959_v25 = vadd.f32 %v17483_v43, %v20428_v30  ;;  %17824 = vmatprep.mubr.msk.f32.mxu1 %vm457_vm1, %v14778_v23  ;;  %v8838_v55 = vpop.f32.mrf.mxu0  ;;  %v14781_v41 = vld [vmem:[%s18268_s26 + $0xe1] sm:$0xff] }
 0x3aa   : > { %v7487_v17 = vpop.f32.mrf.mxu1  ;;  %v15039_v43 = vld [vmem:[%s18268_s26 + $0xe2] sm:$0xff] }
 0x3ab   : > { %v21324_v21 = vadd.f32 %v17677_v11, %v7959_v25  ;;  %v7958_v60 = vadd.f32 %v7487_v17, %v20433_v42  ;;  %v17680_v30 = vpop.f32.mrf.mxu0  ;;  %18019 = vmatmul.mubr.msk.f32.gmra.mxu0 %vm457_vm1, %v15037_v15  ;;  %v14782_v25 = vld [vmem:[%s18268_s26 + $0xf1] sm:$0xff] }
 0x3ac   : > { %v17486_v34 = vpop.f32.mrf.mxu1  ;;  %17825 = vmatmul.mubr.msk.f32.gmra.mxu1 %vm457_vm1, %v14779_v33  ;;  %18021 = vmatprep.mubr.msk.f32.mxu0 %vm457_vm1, %v15038_v54  ;;  %v15040_v17 = vld [vmem:[%s18268_s26 + $0xf2] sm:$0xff] }
 0x3ad   : > { %v21329_v23 = vadd.f32 %v8838_v55, %v7958_v60  ;;  %v7961_v40 = vadd.f32 %v17486_v34, %v20442_v0  ;;  %17827 = vmatprep.mubr.msk.f32.mxu1 %vm457_vm1, %v14780_v29  ;;  %v8848_v42 = vpop.f32.mrf.mxu0  ;;  %v25001_v54 = vld [vmem:[#allocation81_spill] sm:$0xff] }
 0x3ae   : > { %v7497_v11 = vpop.f32.mrf.mxu1  ;;  %v14783_v34 = vld [vmem:[%s18268_s26 + $0xf9] sm:$0xff] }
 0x3af   : > { %v21338_v33 = vadd.f32 %v17680_v30, %v7961_v40  ;;  %v7960_v15 = vadd.f32 %v7497_v11, %v20447_v13  ;;  %v17683_v0 = vpop.f32.mrf.mxu0  ;;  %18022 = vmatmul.mubr.msk.f32.gmra.mxu0 %vm457_vm1, %v15039_v43  ;;  %v15041_v30 = vld [vmem:[%s18268_s26 + $0xfa] sm:$0xff] }
 0x3b0   : > { %v17489_v55 = vpop.f32.mrf.mxu1  ;;  %17828 = vmatmul.mubr.msk.f32.gmra.mxu1 %vm457_vm1, %v14781_v41  ;;  %18024 = vmatprep.mubr.msk.f32.mxu0 %vm457_vm1, %v15040_v17  ;;  %v14784_v11 = vld [vmem:[%s18268_s26 + $0x101] sm:$0xff] }
 0x3b1   : > { %24999 = vst [vmem:[#allocation75_spill] sm:$0xff] %v21338_v33  ;;  %v21343_v29 = vadd.f32 %v8848_v42, %v7960_v15  ;;  %v7963_v60 = vadd.f32 %v17489_v55, %v25001_v54  ;;  %17830 = vmatprep.mubr.msk.f32.mxu1 %vm457_vm1, %v14782_v25  ;;  %v8858_v13 = vpop.f32.mrf.mxu0  ;;  %v15042_v33 = vld [vmem:[%s18268_s26 + $0x102] sm:$0xff] }
 0x3b2   : > { %v7507_v40 = vpop.f32.mrf.mxu1  ;;  %v25003_v43 = vld [vmem:[#allocation82_spill] sm:$0xff]  ;;  %v25005_v17 = vld [vmem:[#allocation83_spill] sm:$0xff] }
 0x3b3   : > { %25000 = vst [vmem:[#allocation77_spill] sm:$0xff] %v21343_v29  ;;  %v21352_v41 = vadd.f32 %v17683_v0, %v7963_v60  ;;  %v7962_v42 = vadd.f32 %v7507_v40, %v25003_v43  ;;  %v17686_v55 = vpop.f32.mrf.mxu0  ;;  %18025 = vmatmul.mubr.msk.f32.gmra.mxu0 %vm457_vm1, %v15041_v30  ;;  %v14785_v29 = vld [vmem:[%s18268_s26 + $0x109] sm:$0xff]  ;;  %v14786_v43 = vld [vmem:[%s18268_s26 + $0x119] sm:$0xff] }
 0x3b4   : > { %v17492_v15 = vpop.f32.mrf.mxu1  ;;  %17831 = vmatmul.mubr.msk.f32.gmra.mxu1 %vm457_vm1, %v14783_v34  ;;  %18027 = vmatprep.mubr.msk.f32.mxu0 %vm457_vm1, %v15042_v33  ;;  %v15043_v0 = vld [vmem:[%s18268_s26 + $0x10a] sm:$0xff]  ;;  %v25007_v30 = vld [vmem:[#allocation50_spill] sm:$0xff] }
 0x3b5   : > { %25002 = vst [vmem:[#allocation79_spill] sm:$0xff] %v21352_v41  ;;  %v21357_v25 = vadd.f32 %v8858_v13, %v7962_v42  ;;  %v7965_v54 = vadd.f32 %v17492_v15, %v25005_v17  ;;  %17833 = vmatprep.mubr.msk.f32.mxu1 %vm457_vm1, %v14784_v11  ;;  %v8868_v40 = vpop.f32.mrf.mxu0  ;;  %v15044_v41 = vld [vmem:[%s18268_s26 + $0x11a] sm:$0xff]  ;;  %v25009_v11 = vld [vmem:[#allocation52_spill] sm:$0xff] }
 0x3b6   : > { %v7517_v60 = vpop.f32.mrf.mxu1 }
 0x3b7   : > { %25004 = vst [vmem:[#allocation81_spill] sm:$0xff] %v21357_v25  ;;  %v21366_v34 = vadd.f32 %v17686_v55, %v7965_v54  ;;  %v7964_v13 = vadd.f32 %v7517_v60, %v25007_v30  ;;  %v17689_v15 = vpop.f32.mrf.mxu0  ;;  %18028 = vmatmul.mubr.msk.f32.gmra.mxu0 %vm457_vm1, %v15043_v0  ;;  %v14787_v25 = vld [vmem:[%s18268_s26 + $0x121] sm:$0xff]  ;;  %v14788_v30 = vld [vmem:[%s18268_s26 + $0x129] sm:$0xff] }
 0x3b8   : > { %v17495_v42 = vpop.f32.mrf.mxu1  ;;  %17834 = vmatmul.mubr.msk.f32.gmra.mxu1 %vm457_vm1, %v14785_v29  ;;  %18030 = vmatprep.mubr.msk.f32.mxu0 %vm457_vm1, %v15044_v41  ;;  %v15045_v55 = vld [vmem:[%s18268_s26 + $0x122] sm:$0xff] }
 0x3b9   : > { %25006 = vst [vmem:[#allocation82_spill] sm:$0xff] %v21366_v34  ;;  %v21371_v33 = vadd.f32 %v8868_v40, %v7964_v13  ;;  %v7967_v17 = vadd.f32 %v17495_v42, %v25009_v11  ;;  %17836 = vmatprep.mubr.msk.f32.mxu1 %vm457_vm1, %v14786_v43  ;;  %v8878_v60 = vpop.f32.mrf.mxu0  ;;  %v15046_v34 = vld [vmem:[%s18268_s26 + $0x12a] sm:$0xff]  ;;  %v25011_v0 = vld [vmem:[#allocation54_spill] sm:$0xff] }
 0x3ba   : > { %v7527_v54 = vpop.f32.mrf.mxu1  ;;  %v25013_v43 = vld [vmem:[#allocation56_spill] sm:$0xff] }
 0x3bb   : > { %25008 = vst [vmem:[#allocation83_spill] sm:$0xff] %v21371_v33  ;;  %v21380_v29 = vadd.f32 %v17689_v15, %v7967_v17  ;;  %v7966_v40 = vadd.f32 %v7527_v54, %v25011_v0  ;;  %v17692_v42 = vpop.f32.mrf.mxu0  ;;  %18031 = vmatmul.mubr.msk.f32.gmra.mxu0 %vm457_vm1, %v15045_v55  ;;  %v14789_v33 = vld [vmem:[%s18268_s26 + $0x131] sm:$0xff]  ;;  %v14790_v0 = vld [vmem:[%s18268_s26 + $0x141] sm:$0xff] }
 0x3bc   : > { %v17498_v13 = vpop.f32.mrf.mxu1  ;;  %17837 = vmatmul.mubr.msk.f32.gmra.mxu1 %vm457_vm1, %v14787_v25  ;;  %18033 = vmatprep.mubr.msk.f32.mxu0 %vm457_vm1, %v15046_v34  ;;  %v15047_v15 = vld [vmem:[%s18268_s26 + $0x132] sm:$0xff]  ;;  %v25015_v55 = vld [vmem:[#allocation58_spill] sm:$0xff] }
 0x3bd   : > { %25010 = vst [vmem:[#allocation50_spill] sm:$0xff] %v21380_v29  ;;  %v21385_v41 = vadd.f32 %v8878_v60, %v7966_v40  ;;  %v7969_v11 = vadd.f32 %v17498_v13, %v25013_v43  ;;  %17839 = vmatprep.mubr.msk.f32.mxu1 %vm457_vm1, %v14788_v30  ;;  %v8888_v54 = vpop.f32.mrf.mxu0  ;;  %v15048_v29 = vld [vmem:[%s18268_s26 + $0x142] sm:$0xff]  ;;  %v25017_v30 = vld [vmem:[#allocation60_spill] sm:$0xff] }
 0x3be   : > { %v7537_v17 = vpop.f32.mrf.mxu1 }
 0x3bf   : > { %25012 = vst [vmem:[#allocation52_spill] sm:$0xff] %v21385_v41  ;;  %v21394_v25 = vadd.f32 %v17692_v42, %v7969_v11  ;;  %v7968_v60 = vadd.f32 %v7537_v17, %v25015_v55  ;;  %v17695_v13 = vpop.f32.mrf.mxu0  ;;  %18034 = vmatmul.mubr.msk.f32.gmra.mxu0 %vm457_vm1, %v15047_v15  ;;  %v14791_v41 = vld [vmem:[%s18268_s26 + $0x149] sm:$0xff]  ;;  %v14792_v55 = vld [vmem:[%s18268_s26 + $0x151] sm:$0xff]  ;;  %v25019_v15 = vld [vmem:[#allocation62_spill] sm:$0xff] }
 0x3c0   : > { %v17501_v40 = vpop.f32.mrf.mxu1  ;;  %17840 = vmatmul.mubr.msk.f32.gmra.mxu1 %vm457_vm1, %v14789_v33  ;;  %18036 = vmatprep.mubr.msk.f32.mxu0 %vm457_vm1, %v15048_v29  ;;  %v15049_v42 = vld [vmem:[%s18268_s26 + $0x14a] sm:$0xff] }
 0x3c1   : > { %25014 = vst [vmem:[#allocation54_spill] sm:$0xff] %v21394_v25  ;;  %v21399_v34 = vadd.f32 %v8888_v54, %v7968_v60  ;;  %v7971_v43 = vadd.f32 %v17501_v40, %v25017_v30  ;;  %17842 = vmatprep.mubr.msk.f32.mxu1 %vm457_vm1, %v14790_v0  ;;  %v8898_v17 = vpop.f32.mrf.mxu0  ;;  %v15050_v25 = vld [vmem:[%s18268_s26 + $0x152] sm:$0xff] }
 0x3c2   : > { %v7547_v11 = vpop.f32.mrf.mxu1  ;;  %v25021_v0 = vld [vmem:[#allocation64_spill] sm:$0xff] }
 0x3c3   : > { %25016 = vst [vmem:[#allocation56_spill] sm:$0xff] %v21399_v34  ;;  %v21408_v33 = vadd.f32 %v17695_v13, %v7971_v43  ;;  %v7970_v54 = vadd.f32 %v7547_v11, %v25019_v15  ;;  %v17698_v40 = vpop.f32.mrf.mxu0  ;;  %18037 = vmatmul.mubr.msk.f32.gmra.mxu0 %vm457_vm1, %v15049_v42  ;;  %v14793_v34 = vld [vmem:[%s18268_s26 + $0x159] sm:$0xff]  ;;  %v14794_v15 = vld [vmem:[%s18268_s26 + $0x169] sm:$0xff] }
 0x3c4   : > { %v17504_v60 = vpop.f32.mrf.mxu1  ;;  %17843 = vmatmul.mubr.msk.f32.gmra.mxu1 %vm457_vm1, %v14791_v41  ;;  %18039 = vmatprep.mubr.msk.f32.mxu0 %vm457_vm1, %v15050_v25  ;;  %v15051_v13 = vld [vmem:[%s18268_s26 + $0x15a] sm:$0xff] }
 0x3c5   : > { %25018 = vst [vmem:[#allocation58_spill] sm:$0xff] %v21408_v33  ;;  %v21413_v29 = vadd.f32 %v8898_v17, %v7970_v54  ;;  %v7973_v30 = vadd.f32 %v17504_v60, %v25021_v0  ;;  %17845 = vmatprep.mubr.msk.f32.mxu1 %vm457_vm1, %v14792_v55  ;;  %v8908_v11 = vpop.f32.mrf.mxu0  ;;  %v15052_v33 = vld [vmem:[%s18268_s26 + $0x16a] sm:$0xff]  ;;  %v25023_v42 = vld [vmem:[#allocation66_spill] sm:$0xff] }
 0x3c6   : > { %v7557_v43 = vpop.f32.mrf.mxu1  ;;  %v25025_v55 = vld [vmem:[#allocation68_spill] sm:$0xff] }
 0x3c7   : > { %25020 = vst [vmem:[#allocation60_spill] sm:$0xff] %v21413_v29  ;;  %v21422_v41 = vadd.f32 %v17698_v40, %v7973_v30  ;;  %v7972_v17 = vadd.f32 %v7557_v43, %v25023_v42  ;;  %v17701_v60 = vpop.f32.mrf.mxu0  ;;  %18040 = vmatmul.mubr.msk.f32.gmra.mxu0 %vm457_vm1, %v15051_v13  ;;  %v14795_v29 = vld [vmem:[%s18268_s26 + $0x171] sm:$0xff]  ;;  %v14796_v42 = vld [vmem:[%s18268_s26 + $0x179] sm:$0xff] }
 0x3c8   : > { %v17507_v54 = vpop.f32.mrf.mxu1  ;;  %17846 = vmatmul.mubr.msk.f32.gmra.mxu1 %vm457_vm1, %v14793_v34  ;;  %18042 = vmatprep.mubr.msk.f32.mxu0 %vm457_vm1, %v15052_v33  ;;  %v15053_v40 = vld [vmem:[%s18268_s26 + $0x172] sm:$0xff]  ;;  %v25027_v13 = vld [vmem:[#allocation70_spill] sm:$0xff] }
 0x3c9   : > { %25022 = vst [vmem:[#allocation62_spill] sm:$0xff] %v21422_v41  ;;  %v21427_v25 = vadd.f32 %v8908_v11, %v7972_v17  ;;  %v7975_v0 = vadd.f32 %v17507_v54, %v25025_v55  ;;  %17848 = vmatprep.mubr.msk.f32.mxu1 %vm457_vm1, %v14794_v15  ;;  %v8918_v43 = vpop.f32.mrf.mxu0  ;;  %v15054_v41 = vld [vmem:[%s18268_s26 + $0x17a] sm:$0xff]  ;;  %v25029_v15 = vld [vmem:[#allocation72_spill] sm:$0xff] }
 0x3ca   : > { %v7567_v30 = vpop.f32.mrf.mxu1 }
 0x3cb   : > { %25024 = vst [vmem:[#allocation64_spill] sm:$0xff] %v21427_v25  ;;  %v21436_v34 = vadd.f32 %v17701_v60, %v7975_v0  ;;  %v7974_v11 = vadd.f32 %v7567_v30, %v25027_v13  ;;  %v17704_v54 = vpop.f32.mrf.mxu0  ;;  %18043 = vmatmul.mubr.msk.f32.gmra.mxu0 %vm457_vm1, %v15053_v40  ;;  %v14797_v25 = vld [vmem:[%s18268_s26 + $0x181] sm:$0xff]  ;;  %v14798_v13 = vld [vmem:[%s18268_s26 + $0x191] sm:$0xff] }
 0x3cc   : > { %v17510_v17 = vpop.f32.mrf.mxu1  ;;  %17849 = vmatmul.mubr.msk.f32.gmra.mxu1 %vm457_vm1, %v14795_v29  ;;  %18045 = vmatprep.mubr.msk.f32.mxu0 %vm457_vm1, %v15054_v41  ;;  %v15055_v60 = vld [vmem:[%s18268_s26 + $0x182] sm:$0xff] }
 0x3cd   : > { %25026 = vst [vmem:[#allocation66_spill] sm:$0xff] %v21436_v34  ;;  %v21441_v33 = vadd.f32 %v8918_v43, %v7974_v11  ;;  %v7977_v55 = vadd.f32 %v17510_v17, %v25029_v15  ;;  %17851 = vmatprep.mubr.msk.f32.mxu1 %vm457_vm1, %v14796_v42  ;;  %v8928_v30 = vpop.f32.mrf.mxu0  ;;  %v15056_v34 = vld [vmem:[%s18268_s26 + $0x192] sm:$0xff]  ;;  %v25031_v40 = vld [vmem:[#allocation74_spill] sm:$0xff] }
 0x3ce   : > { %v7577_v0 = vpop.f32.mrf.mxu1  ;;  %v25033_v42 = vld [vmem:[#allocation76_spill] sm:$0xff] }
 0x3cf   : > { %25028 = vst [vmem:[#allocation68_spill] sm:$0xff] %v21441_v33  ;;  %v21450_v29 = vadd.f32 %v17704_v54, %v7977_v55  ;;  %v7976_v43 = vadd.f32 %v7577_v0, %v25031_v40  ;;  %v17707_v17 = vpop.f32.mrf.mxu0  ;;  %18046 = vmatmul.mubr.msk.f32.gmra.mxu0 %vm457_vm1, %v15055_v60  ;;  %v14799_v33 = vld [vmem:[%s18268_s26 + $0x199] sm:$0xff]  ;;  %v14800_v40 = vld [vmem:[%s18268_s26 + $0x1a1] sm:$0xff] }
 0x3d0   : > { %v17513_v11 = vpop.f32.mrf.mxu1  ;;  %17852 = vmatmul.mubr.msk.f32.gmra.mxu1 %vm457_vm1, %v14797_v25  ;;  %18048 = vmatprep.mubr.msk.f32.mxu0 %vm457_vm1, %v15056_v34  ;;  %v15057_v54 = vld [vmem:[%s18268_s26 + $0x19a] sm:$0xff] }
 0x3d1   : > { %25030 = vst [vmem:[#allocation70_spill] sm:$0xff] %v21450_v29  ;;  %v21455_v41 = vadd.f32 %v8928_v30, %v7976_v43  ;;  %v7979_v15 = vadd.f32 %v17513_v11, %v25033_v42  ;;  %17854 = vmatprep.mubr.msk.f32.mxu1 %vm457_vm1, %v14798_v13  ;;  %v8938_v0 = vpop.f32.mrf.mxu0  ;;  %v15058_v29 = vld [vmem:[%s18268_s26 + $0x1a2] sm:$0xff]  ;;  %v25037_v13 = vld [vmem:[#allocation80_spill] sm:$0xff] }
 0x3d2   : > { %v7587_v55 = vpop.f32.mrf.mxu1  ;;  %v25035_v60 = vld [vmem:[#allocation78_spill] sm:$0xff] }
 0x3d3   : > { %25032 = vst [vmem:[#allocation72_spill] sm:$0xff] %v21455_v41  ;;  %v21464_v25 = vadd.f32 %v17707_v17, %v7979_v15  ;;  %v7978_v30 = vadd.f32 %v7587_v55, %v25035_v60  ;;  %v17710_v11 = vpop.f32.mrf.mxu0  ;;  %18049 = vmatmul.mubr.msk.f32.gmra.mxu0 %vm457_vm1, %v15057_v54  ;;  %v14801_v41 = vld [vmem:[%s18268_s26 + $0x1a9] sm:$0xff]  ;;  %v14802_v60 = vld [vmem:[%s18268_s26 + $0x1b9] sm:$0xff] }
 0x3d4   : > { %v17516_v43 = vpop.f32.mrf.mxu1  ;;  %17855 = vmatmul.mubr.msk.f32.gmra.mxu1 %vm457_vm1, %v14799_v33  ;;  %18051 = vmatprep.mubr.msk.f32.mxu0 %vm457_vm1, %v15058_v29  ;;  %v15059_v17 = vld [vmem:[%s18268_s26 + $0x1aa] sm:$0xff]  ;;  %v25039_v54 = vld [vmem:[#allocation2_spill] sm:$0xff] }
 0x3d5   : > { %25034 = vst [vmem:[#allocation74_spill] sm:$0xff] %v21464_v25  ;;  %v21469_v34 = vadd.f32 %v8938_v0, %v7978_v30  ;;  %v7981_v42 = vadd.f32 %v17516_v43, %v25037_v13  ;;  %17857 = vmatprep.mubr.msk.f32.mxu1 %vm457_vm1, %v14800_v40  ;;  %v8948_v55 = vpop.f32.mrf.mxu0  ;;  %v15060_v25 = vld [vmem:[%s18268_s26 + $0x1ba] sm:$0xff]  ;;  %v25041_v40 = vld [vmem:[#allocation3_spill] sm:$0xff] }
 0x3d6   : > { %v7597_v15 = vpop.f32.mrf.mxu1 }
 0x3d7   : > { %25036 = vst [vmem:[#allocation76_spill] sm:$0xff] %v21469_v34  ;;  %v21478_v33 = vadd.f32 %v17710_v11, %v7981_v42  ;;  %v7980_v0 = vadd.f32 %v7597_v15, %v25039_v54  ;;  %v17713_v43 = vpop.f32.mrf.mxu0  ;;  %18052 = vmatmul.mubr.msk.f32.gmra.mxu0 %vm457_vm1, %v15059_v17  ;;  %v14803_v34 = vld [vmem:[%s18268_s26 + $0x1c1] sm:$0xff]  ;;  %v14804_v54 = vld [vmem:[%s18268_s26 + $0x1c9] sm:$0xff] }
 0x3d8   : > { %v17519_v30 = vpop.f32.mrf.mxu1  ;;  %17858 = vmatmul.mubr.msk.f32.gmra.mxu1 %vm457_vm1, %v14801_v41  ;;  %18054 = vmatprep.mubr.msk.f32.mxu0 %vm457_vm1, %v15060_v25  ;;  %v15061_v11 = vld [vmem:[%s18268_s26 + $0x1c2] sm:$0xff]  ;;  %v25043_v17 = vld [vmem:[#allocation4_spill] sm:$0xff] }
 0x3d9   : > { %25038 = vst [vmem:[#allocation78_spill] sm:$0xff] %v21478_v33  ;;  %v21483_v29 = vadd.f32 %v8948_v55, %v7980_v0  ;;  %v7983_v13 = vadd.f32 %v17519_v30, %v25041_v40  ;;  %17860 = vmatprep.mubr.msk.f32.mxu1 %vm457_vm1, %v14802_v60  ;;  %v8958_v15 = vpop.f32.mrf.mxu0  ;;  %v15062_v33 = vld [vmem:[%s18268_s26 + $0x1ca] sm:$0xff]  ;;  %v25045_v60 = vld [vmem:[#allocation5_spill] sm:$0xff] }
 0x3da   : > { %v7607_v42 = vpop.f32.mrf.mxu1 }
 0x3db   : > { %25040 = vst [vmem:[#allocation80_spill] sm:$0xff] %v21483_v29  ;;  %v21492_v41 = vadd.f32 %v17713_v43, %v7983_v13  ;;  %v7982_v55 = vadd.f32 %v7607_v42, %v25043_v17  ;;  %v17716_v30 = vpop.f32.mrf.mxu0  ;;  %18055 = vmatmul.mubr.msk.f32.gmra.mxu0 %vm457_vm1, %v15061_v11  ;;  %v14805_v29 = vld [vmem:[%s18268_s26 + $0x1d1] sm:$0xff]  ;;  %v14806_v17 = vld [vmem:[%s18268_s26 + $0x1e1] sm:$0xff] }
 0x3dc   : > { %v17522_v0 = vpop.f32.mrf.mxu1  ;;  %17861 = vmatmul.mubr.msk.f32.gmra.mxu1 %vm457_vm1, %v14803_v34  ;;  %18057 = vmatprep.mubr.msk.f32.mxu0 %vm457_vm1, %v15062_v33  ;;  %v15063_v43 = vld [vmem:[%s18268_s26 + $0x1d2] sm:$0xff]  ;;  %v25047_v11 = vld [vmem:[#allocation6_spill] sm:$0xff] }
 0x3dd   : > { %25042 = vst [vmem:[#allocation2_spill] sm:$0xff] %v21492_v41  ;;  %v21497_v25 = vadd.f32 %v8958_v15, %v7982_v55  ;;  %v7985_v40 = vadd.f32 %v17522_v0, %v25045_v60  ;;  %17863 = vmatprep.mubr.msk.f32.mxu1 %vm457_vm1, %v14804_v54  ;;  %v8968_v42 = vpop.f32.mrf.mxu0  ;;  %v15064_v41 = vld [vmem:[%s18268_s26 + $0x1e2] sm:$0xff] }
 0x3de   : > { %v7617_v13 = vpop.f32.mrf.mxu1  ;;  %v25049_v54 = vld [vmem:[#allocation7_spill] sm:$0xff] }
 0x3df   : > { %25044 = vst [vmem:[#allocation3_spill] sm:$0xff] %v21497_v25  ;;  %v21506_v34 = vadd.f32 %v17716_v30, %v7985_v40  ;;  %v7984_v15 = vadd.f32 %v7617_v13, %v25047_v11  ;;  %v17719_v0 = vpop.f32.mrf.mxu0  ;;  %18058 = vmatmul.mubr.msk.f32.gmra.mxu0 %vm457_vm1, %v15063_v43  ;;  %v14807_v25 = vld [vmem:[%s18268_s26 + $0x1e9] sm:$0xff]  ;;  %v14808_v11 = vld [vmem:[%s18268_s26 + $0x1f1] sm:$0xff] }
 0x3e0   : > { %v17525_v55 = vpop.f32.mrf.mxu1  ;;  %17864 = vmatmul.mubr.msk.f32.gmra.mxu1 %vm457_vm1, %v14805_v29  ;;  %18060 = vmatprep.mubr.msk.f32.mxu0 %vm457_vm1, %v15064_v41  ;;  %v15065_v30 = vld [vmem:[%s18268_s26 + $0x1ea] sm:$0xff] }
 0x3e1   : > { %25046 = vst [vmem:[#allocation4_spill] sm:$0xff] %v21506_v34  ;;  %v21511_v33 = vadd.f32 %v8968_v42, %v7984_v15  ;;  %v7987_v60 = vadd.f32 %v17525_v55, %v25049_v54  ;;  %17866 = vmatprep.mubr.msk.f32.mxu1 %vm457_vm1, %v14806_v17  ;;  %v8978_v13 = vpop.f32.mrf.mxu0  ;;  %v15066_v34 = vld [vmem:[%s18268_s26 + $0x1f2] sm:$0xff] }
 0x3e2   : > { %v7627_v40 = vpop.f32.mrf.mxu1  ;;  %v25051_v43 = vld [vmem:[#allocation8_spill] sm:$0xff]  ;;  %v25053_v17 = vld [vmem:[#allocation9_spill] sm:$0xff] }
 0x3e3   : > { %25048 = vst [vmem:[#allocation5_spill] sm:$0xff] %v21511_v33  ;;  %v21520_v29 = vadd.f32 %v17719_v0, %v7987_v60  ;;  %v7986_v42 = vadd.f32 %v7627_v40, %v25051_v43  ;;  %v17722_v55 = vpop.f32.mrf.mxu0  ;;  %18061 = vmatmul.mubr.msk.f32.gmra.mxu0 %vm457_vm1, %v15065_v30  ;;  %v14809_v33 = vld [vmem:[%s18268_s26 + $0x1f9] sm:$0xff]  ;;  %v14810_v43 = vld [vmem:[%s18268_s26 + $0x209] sm:$0xff] }
 0x3e4   : > { %v17528_v15 = vpop.f32.mrf.mxu1  ;;  %17867 = vmatmul.mubr.msk.f32.gmra.mxu1 %vm457_vm1, %v14807_v25  ;;  %18063 = vmatprep.mubr.msk.f32.mxu0 %vm457_vm1, %v15066_v34  ;;  %v15067_v0 = vld [vmem:[%s18268_s26 + $0x1fa] sm:$0xff] }
 0x3e5   : > { %25050 = vst [vmem:[#allocation6_spill] sm:$0xff] %v21520_v29  ;;  %v21525_v41 = vadd.f32 %v8978_v13, %v7986_v42  ;;  %v7989_v54 = vadd.f32 %v17528_v15, %v25053_v17  ;;  %17869 = vmatprep.mubr.msk.f32.mxu1 %vm457_vm1, %v14808_v11  ;;  %v8988_v40 = vpop.f32.mrf.mxu0  ;;  %v15068_v29 = vld [vmem:[%s18268_s26 + $0x20a] sm:$0xff]  ;;  %v25055_v30 = vld [vmem:[#allocation10_spill] sm:$0xff] }
 0x3e6   : > { %v7637_v60 = vpop.f32.mrf.mxu1  ;;  %v25057_v11 = vld [vmem:[#allocation11_spill] sm:$0xff] }
 0x3e7   : > { %25052 = vst [vmem:[#allocation7_spill] sm:$0xff] %v21525_v41  ;;  %v21534_v25 = vadd.f32 %v17722_v55, %v7989_v54  ;;  %v7988_v13 = vadd.f32 %v7637_v60, %v25055_v30  ;;  %v17725_v15 = vpop.f32.mrf.mxu0  ;;  %18064 = vmatmul.mubr.msk.f32.gmra.mxu0 %vm457_vm1, %v15067_v0  ;;  %v14811_v41 = vld [vmem:[%s18268_s26 + $0x211] sm:$0xff]  ;;  %v14812_v30 = vld [vmem:[%s18268_s26 + $0x219] sm:$0xff] }
 0x3e8   : > { %v17531_v42 = vpop.f32.mrf.mxu1  ;;  %17870 = vmatmul.mubr.msk.f32.gmra.mxu1 %vm457_vm1, %v14809_v33  ;;  %18066 = vmatprep.mubr.msk.f32.mxu0 %vm457_vm1, %v15068_v29  ;;  %v15069_v55 = vld [vmem:[%s18268_s26 + $0x212] sm:$0xff] }
 0x3e9   : > { %25054 = vst [vmem:[#allocation8_spill] sm:$0xff] %v21534_v25  ;;  %v21539_v34 = vadd.f32 %v8988_v40, %v7988_v13  ;;  %v7991_v17 = vadd.f32 %v17531_v42, %v25057_v11  ;;  %17872 = vmatprep.mubr.msk.f32.mxu1 %vm457_vm1, %v14810_v43  ;;  %v8998_v60 = vpop.f32.mrf.mxu0  ;;  %v15070_v25 = vld [vmem:[%s18268_s26 + $0x21a] sm:$0xff]  ;;  %v25059_v0 = vld [vmem:[#allocation12_spill] sm:$0xff] }
 0x3ea   : > { %v7647_v54 = vpop.f32.mrf.mxu1  ;;  %v25061_v43 = vld [vmem:[#allocation13_spill] sm:$0xff] }
 0x3eb   : > { %25056 = vst [vmem:[#allocation9_spill] sm:$0xff] %v21539_v34  ;;  %v21548_v33 = vadd.f32 %v17725_v15, %v7991_v17  ;;  %v7990_v40 = vadd.f32 %v7647_v54, %v25059_v0  ;;  %v17728_v42 = vpop.f32.mrf.mxu0  ;;  %18067 = vmatmul.mubr.msk.f32.gmra.mxu0 %vm457_vm1, %v15069_v55  ;;  %v14813_v34 = vld [vmem:[%s18268_s26 + $0x221] sm:$0xff]  ;;  %v14814_v0 = vld [vmem:[%s18268_s26 + $0x231] sm:$0xff] }
 0x3ec   : > { %v17534_v13 = vpop.f32.mrf.mxu1  ;;  %17873 = vmatmul.mubr.msk.f32.gmra.mxu1 %vm457_vm1, %v14811_v41  ;;  %18069 = vmatprep.mubr.msk.f32.mxu0 %vm457_vm1, %v15070_v25  ;;  %v15071_v15 = vld [vmem:[%s18268_s26 + $0x222] sm:$0xff] }
 0x3ed   : > { %25058 = vst [vmem:[#allocation10_spill] sm:$0xff] %v21548_v33  ;;  %v21553_v29 = vadd.f32 %v8998_v60, %v7990_v40  ;;  %v7993_v11 = vadd.f32 %v17534_v13, %v25061_v43  ;;  %17875 = vmatprep.mubr.msk.f32.mxu1 %vm457_vm1, %v14812_v30  ;;  %v9008_v54 = vpop.f32.mrf.mxu0  ;;  %v15072_v33 = vld [vmem:[%s18268_s26 + $0x232] sm:$0xff]  ;;  %v25063_v55 = vld [vmem:[#allocation14_spill] sm:$0xff]  ;;  %v25065_v30 = vld [vmem:[#allocation15_spill] sm:$0xff] }
 0x3ee   : > { %v7657_v17 = vpop.f32.mrf.mxu1 }
 0x3ef   : > { %25060 = vst [vmem:[#allocation11_spill] sm:$0xff] %v21553_v29  ;;  %v21562_v41 = vadd.f32 %v17728_v42, %v7993_v11  ;;  %v7992_v60 = vadd.f32 %v7657_v17, %v25063_v55  ;;  %v17731_v13 = vpop.f32.mrf.mxu0  ;;  %18070 = vmatmul.mubr.msk.f32.gmra.mxu0 %vm457_vm1, %v15071_v15  ;;  %v14815_v29 = vld [vmem:[%s18268_s26 + $0x239] sm:$0xff]  ;;  %v14816_v55 = vld [vmem:[%s18268_s26 + $0x241] sm:$0xff]  ;;  %v25067_v15 = vld [vmem:[#allocation16_spill] sm:$0xff] }
 0x3f0   : > { %v17537_v40 = vpop.f32.mrf.mxu1  ;;  %17876 = vmatmul.mubr.msk.f32.gmra.mxu1 %vm457_vm1, %v14813_v34  ;;  %18072 = vmatprep.mubr.msk.f32.mxu0 %vm457_vm1, %v15072_v33  ;;  %v15073_v42 = vld [vmem:[%s18268_s26 + $0x23a] sm:$0xff] }
 0x3f1   : > { %25062 = vst [vmem:[#allocation12_spill] sm:$0xff] %v21562_v41  ;;  %v21567_v25 = vadd.f32 %v9008_v54, %v7992_v60  ;;  %v7995_v43 = vadd.f32 %v17537_v40, %v25065_v30  ;;  %17878 = vmatprep.mubr.msk.f32.mxu1 %vm457_vm1, %v14814_v0  ;;  %v9018_v17 = vpop.f32.mrf.mxu0  ;;  %v15074_v41 = vld [vmem:[%s18268_s26 + $0x242] sm:$0xff]  ;;  %v25069_v0 = vld [vmem:[#allocation17_spill] sm:$0xff] }
 0x3f2   : > { %v7667_v11 = vpop.f32.mrf.mxu1 }
 0x3f3   : > { %25064 = vst [vmem:[#allocation13_spill] sm:$0xff] %v21567_v25  ;;  %v21576_v34 = vadd.f32 %v17731_v13, %v7995_v43  ;;  %v7994_v54 = vadd.f32 %v7667_v11, %v25067_v15  ;;  %v17734_v40 = vpop.f32.mrf.mxu0  ;;  %18073 = vmatmul.mubr.msk.f32.gmra.mxu0 %vm457_vm1, %v15073_v42  ;;  %v14817_v25 = vld [vmem:[%s18268_s26 + $0x249] sm:$0xff]  ;;  %v14818_v15 = vld [vmem:[%s18268_s26 + $0x259] sm:$0xff] }
 0x3f4   : > { %v17540_v60 = vpop.f32.mrf.mxu1  ;;  %17879 = vmatmul.mubr.msk.f32.gmra.mxu1 %vm457_vm1, %v14815_v29  ;;  %18075 = vmatprep.mubr.msk.f32.mxu0 %vm457_vm1, %v15074_v41  ;;  %v15075_v13 = vld [vmem:[%s18268_s26 + $0x24a] sm:$0xff]  ;;  %v25071_v42 = vld [vmem:[#allocation18_spill] sm:$0xff] }
 0x3f5   : > { %25066 = vst [vmem:[#allocation14_spill] sm:$0xff] %v21576_v34  ;;  %v21581_v33 = vadd.f32 %v9018_v17, %v7994_v54  ;;  %v7997_v30 = vadd.f32 %v17540_v60, %v25069_v0  ;;  %17881 = vmatprep.mubr.msk.f32.mxu1 %vm457_vm1, %v14816_v55  ;;  %v9028_v11 = vpop.f32.mrf.mxu0  ;;  %v15076_v34 = vld [vmem:[%s18268_s26 + $0x25a] sm:$0xff]  ;;  %v25073_v55 = vld [vmem:[#allocation19_spill] sm:$0xff] }
 0x3f6   : > { %v7677_v43 = vpop.f32.mrf.mxu1 }
 0x3f7   : > { %25068 = vst [vmem:[#allocation15_spill] sm:$0xff] %v21581_v33  ;;  %v21590_v29 = vadd.f32 %v17734_v40, %v7997_v30  ;;  %v7996_v17 = vadd.f32 %v7677_v43, %v25071_v42  ;;  %v17737_v60 = vpop.f32.mrf.mxu0  ;;  %18076 = vmatmul.mubr.msk.f32.gmra.mxu0 %vm457_vm1, %v15075_v13  ;;  %v14819_v33 = vld [vmem:[%s18268_s26 + $0x261] sm:$0xff]  ;;  %v14820_v42 = vld [vmem:[%s18268_s26 + $0x269] sm:$0xff] }
 0x3f8   : > { %v17543_v54 = vpop.f32.mrf.mxu1  ;;  %17882 = vmatmul.mubr.msk.f32.gmra.mxu1 %vm457_vm1, %v14817_v25  ;;  %18078 = vmatprep.mubr.msk.f32.mxu0 %vm457_vm1, %v15076_v34  ;;  %v15077_v40 = vld [vmem:[%s18268_s26 + $0x262] sm:$0xff]  ;;  %v25075_v13 = vld [vmem:[#allocation20_spill] sm:$0xff] }
 0x3f9   : > { %25070 = vst [vmem:[#allocation16_spill] sm:$0xff] %v21590_v29  ;;  %v21595_v41 = vadd.f32 %v9028_v11, %v7996_v17  ;;  %v7999_v0 = vadd.f32 %v17543_v54, %v25073_v55  ;;  %17884 = vmatprep.mubr.msk.f32.mxu1 %vm457_vm1, %v14818_v15  ;;  %v9038_v43 = vpop.f32.mrf.mxu0  ;;  %v15078_v29 = vld [vmem:[%s18268_s26 + $0x26a] sm:$0xff]  ;;  %v25077_v15 = vld [vmem:[#allocation21_spill] sm:$0xff] }
 0x3fa   : > { %v7687_v30 = vpop.f32.mrf.mxu1 }
 0x3fb   : > { %25072 = vst [vmem:[#allocation17_spill] sm:$0xff] %v21595_v41  ;;  %v21604_v25 = vadd.f32 %v17737_v60, %v7999_v0  ;;  %v7998_v11 = vadd.f32 %v7687_v30, %v25075_v13  ;;  %v17740_v54 = vpop.f32.mrf.mxu0  ;;  %18079 = vmatmul.mubr.msk.f32.gmra.mxu0 %vm457_vm1, %v15077_v40  ;;  %v14821_v41 = vld [vmem:[%s18268_s26 + $0x271] sm:$0xff]  ;;  %v14822_v13 = vld [vmem:[%s18268_s26 + $0x281] sm:$0xff] }
 0x3fc   : > { %v17546_v17 = vpop.f32.mrf.mxu1  ;;  %17885 = vmatmul.mubr.msk.f32.gmra.mxu1 %vm457_vm1, %v14819_v33  ;;  %18081 = vmatprep.mubr.msk.f32.mxu0 %vm457_vm1, %v15078_v29  ;;  %v15079_v60 = vld [vmem:[%s18268_s26 + $0x272] sm:$0xff]  ;;  %v25079_v40 = vld [vmem:[#allocation22_spill] sm:$0xff] }
 0x3fd   : > { %25074 = vst [vmem:[#allocation18_spill] sm:$0xff] %v21604_v25  ;;  %v21609_v34 = vadd.f32 %v9038_v43, %v7998_v11  ;;  %v8001_v55 = vadd.f32 %v17546_v17, %v25077_v15  ;;  %17887 = vmatprep.mubr.msk.f32.mxu1 %vm457_vm1, %v14820_v42  ;;  %v9048_v30 = vpop.f32.mrf.mxu0  ;;  %v15080_v25 = vld [vmem:[%s18268_s26 + $0x282] sm:$0xff] }
 0x3fe   : > { %v7697_v0 = vpop.f32.mrf.mxu1  ;;  %v25081_v42 = vld [vmem:[#allocation23_spill] sm:$0xff] }
 0x3ff   : > { %25076 = vst [vmem:[#allocation19_spill] sm:$0xff] %v21609_v34  ;;  %v21618_v33 = vadd.f32 %v17740_v54, %v8001_v55  ;;  %v8000_v43 = vadd.f32 %v7697_v0, %v25079_v40  ;;  %v17743_v17 = vpop.f32.mrf.mxu0  ;;  %18082 = vmatmul.mubr.msk.f32.gmra.mxu0 %vm457_vm1, %v15079_v60  ;;  %v14823_v34 = vld [vmem:[%s18268_s26 + $0x289] sm:$0xff]  ;;  %v14824_v40 = vld [vmem:[%s18268_s26 + $0x291] sm:$0xff] }
 0x400   : > { %v17549_v11 = vpop.f32.mrf.mxu1  ;;  %17888 = vmatmul.mubr.msk.f32.gmra.mxu1 %vm457_vm1, %v14821_v41  ;;  %18084 = vmatprep.mubr.msk.f32.mxu0 %vm457_vm1, %v15080_v25  ;;  %v15081_v54 = vld [vmem:[%s18268_s26 + $0x28a] sm:$0xff] }
 0x401   : > { %25078 = vst [vmem:[#allocation20_spill] sm:$0xff] %v21618_v33  ;;  %v21623_v29 = vadd.f32 %v9048_v30, %v8000_v43  ;;  %v8003_v15 = vadd.f32 %v17549_v11, %v25081_v42  ;;  %17890 = vmatprep.mubr.msk.f32.mxu1 %vm457_vm1, %v14822_v13  ;;  %v9058_v0 = vpop.f32.mrf.mxu0  ;;  %v15082_v33 = vld [vmem:[%s18268_s26 + $0x292] sm:$0xff] }
 0x402   : > { %v7707_v55 = vpop.f32.mrf.mxu1  ;;  %v25083_v60 = vld [vmem:[#allocation24_spill] sm:$0xff]  ;;  %v25085_v13 = vld [vmem:[#allocation25_spill] sm:$0xff] }
 0x403   : > { %25080 = vst [vmem:[#allocation21_spill] sm:$0xff] %v21623_v29  ;;  %v21632_v41 = vadd.f32 %v17743_v17, %v8003_v15  ;;  %v8002_v30 = vadd.f32 %v7707_v55, %v25083_v60  ;;  %v17746_v11 = vpop.f32.mrf.mxu0  ;;  %18085 = vmatmul.mubr.msk.f32.gmra.mxu0 %vm457_vm1, %v15081_v54  ;;  %v14825_v29 = vld [vmem:[%s18268_s26 + $0x299] sm:$0xff]  ;;  %v14826_v60 = vld [vmem:[%s18268_s26 + $0x2a9] sm:$0xff] }
 0x404   : > { %v17552_v43 = vpop.f32.mrf.mxu1  ;;  %17891 = vmatmul.mubr.msk.f32.gmra.mxu1 %vm457_vm1, %v14823_v34  ;;  %18087 = vmatprep.mubr.msk.f32.mxu0 %vm457_vm1, %v15082_v33  ;;  %v15083_v17 = vld [vmem:[%s18268_s26 + $0x29a] sm:$0xff] }
 0x405   : > { %25082 = vst [vmem:[#allocation22_spill] sm:$0xff] %v21632_v41  ;;  %v21637_v25 = vadd.f32 %v9058_v0, %v8002_v30  ;;  %v8005_v42 = vadd.f32 %v17552_v43, %v25085_v13  ;;  %17893 = vmatprep.mubr.msk.f32.mxu1 %vm457_vm1, %v14824_v40  ;;  %v9068_v55 = vpop.f32.mrf.mxu0  ;;  %v15084_v41 = vld [vmem:[%s18268_s26 + $0x2aa] sm:$0xff]  ;;  %v25087_v54 = vld [vmem:[#allocation26_spill] sm:$0xff] }
 0x406   : > { %v7717_v15 = vpop.f32.mrf.mxu1  ;;  %v25089_v40 = vld [vmem:[#allocation27_spill] sm:$0xff] }
 0x407   : > { %25084 = vst [vmem:[#allocation23_spill] sm:$0xff] %v21637_v25  ;;  %v21646_v34 = vadd.f32 %v17746_v11, %v8005_v42  ;;  %v8004_v0 = vadd.f32 %v7717_v15, %v25087_v54  ;;  %v17749_v43 = vpop.f32.mrf.mxu0  ;;  %18088 = vmatmul.mubr.msk.f32.gmra.mxu0 %vm457_vm1, %v15083_v17  ;;  %v14827_v25 = vld [vmem:[%s18268_s26 + $0x2b1] sm:$0xff]  ;;  %v14828_v54 = vld [vmem:[%s18268_s26 + $0x2b9] sm:$0xff] }
 0x408   : > { %v17555_v30 = vpop.f32.mrf.mxu1  ;;  %17894 = vmatmul.mubr.msk.f32.gmra.mxu1 %vm457_vm1, %v14825_v29  ;;  %18090 = vmatprep.mubr.msk.f32.mxu0 %vm457_vm1, %v15084_v41  ;;  %v15085_v11 = vld [vmem:[%s18268_s26 + $0x2b2] sm:$0xff] }
 0x409   : > { %25086 = vst [vmem:[#allocation24_spill] sm:$0xff] %v21646_v34  ;;  %v21651_v33 = vadd.f32 %v9068_v55, %v8004_v0  ;;  %v8007_v13 = vadd.f32 %v17555_v30, %v25089_v40  ;;  %17896 = vmatprep.mubr.msk.f32.mxu1 %vm457_vm1, %v14826_v60  ;;  %v9078_v15 = vpop.f32.mrf.mxu0  ;;  %v15086_v34 = vld [vmem:[%s18268_s26 + $0x2ba] sm:$0xff]  ;;  %v25091_v17 = vld [vmem:[#allocation28_spill] sm:$0xff] }
 0x40a   : > { %v7727_v42 = vpop.f32.mrf.mxu1  ;;  %v25093_v60 = vld [vmem:[#allocation29_spill] sm:$0xff] }
 0x40b   : > { %25088 = vst [vmem:[#allocation25_spill] sm:$0xff] %v21651_v33  ;;  %v21660_v29 = vadd.f32 %v17749_v43, %v8007_v13  ;;  %v8006_v55 = vadd.f32 %v7727_v42, %v25091_v17  ;;  %v17752_v30 = vpop.f32.mrf.mxu0  ;;  %18091 = vmatmul.mubr.msk.f32.gmra.mxu0 %vm457_vm1, %v15085_v11  ;;  %v14829_v33 = vld [vmem:[%s18268_s26 + $0x2c1] sm:$0xff]  ;;  %v14830_v17 = vld [vmem:[%s18268_s26 + $0x2d1] sm:$0xff] }
 0x40c   : > { %v17558_v0 = vpop.f32.mrf.mxu1  ;;  %17897 = vmatmul.mubr.msk.f32.gmra.mxu1 %vm457_vm1, %v14827_v25  ;;  %18093 = vmatprep.mubr.msk.f32.mxu0 %vm457_vm1, %v15086_v34  ;;  %v15087_v43 = vld [vmem:[%s18268_s26 + $0x2c2] sm:$0xff] }
 0x40d   : > { %25090 = vst [vmem:[#allocation26_spill] sm:$0xff] %v21660_v29  ;;  %v21665_v41 = vadd.f32 %v9078_v15, %v8006_v55  ;;  %v8009_v40 = vadd.f32 %v17558_v0, %v25093_v60  ;;  %17899 = vmatprep.mubr.msk.f32.mxu1 %vm457_vm1, %v14828_v54  ;;  %v9088_v42 = vpop.f32.mrf.mxu0  ;;  %v15088_v29 = vld [vmem:[%s18268_s26 + $0x2d2] sm:$0xff]  ;;  %v25095_v11 = vld [vmem:[#allocation30_spill] sm:$0xff]  ;;  %v25097_v54 = vld [vmem:[#allocation31_spill] sm:$0xff] }
 0x40e   : > { %v7737_v13 = vpop.f32.mrf.mxu1 }
 0x40f   : > { %25092 = vst [vmem:[#allocation27_spill] sm:$0xff] %v21665_v41  ;;  %v21674_v25 = vadd.f32 %v17752_v30, %v8009_v40  ;;  %v8008_v15 = vadd.f32 %v7737_v13, %v25095_v11  ;;  %v17755_v0 = vpop.f32.mrf.mxu0  ;;  %18094 = vmatmul.mubr.msk.f32.gmra.mxu0 %vm457_vm1, %v15087_v43  ;;  %v14831_v41 = vld [vmem:[%s18268_s26 + $0x2d9] sm:$0xff]  ;;  %v14832_v11 = vld [vmem:[%s18268_s26 + $0x2e1] sm:$0xff]  ;;  %v25099_v43 = vld [vmem:[#allocation32_spill] sm:$0xff] }
 0x410   : > { %v17561_v55 = vpop.f32.mrf.mxu1  ;;  %17900 = vmatmul.mubr.msk.f32.gmra.mxu1 %vm457_vm1, %v14829_v33  ;;  %18096 = vmatprep.mubr.msk.f32.mxu0 %vm457_vm1, %v15088_v29  ;;  %v15089_v30 = vld [vmem:[%s18268_s26 + $0x2da] sm:$0xff] }
 0x411   : > { %25094 = vst [vmem:[#allocation28_spill] sm:$0xff] %v21674_v25  ;;  %v21679_v34 = vadd.f32 %v9088_v42, %v8008_v15  ;;  %v8011_v60 = vadd.f32 %v17561_v55, %v25097_v54  ;;  %17902 = vmatprep.mubr.msk.f32.mxu1 %vm457_vm1, %v14830_v17  ;;  %v9098_v13 = vpop.f32.mrf.mxu0  ;;  %v15090_v25 = vld [vmem:[%s18268_s26 + $0x2e2] sm:$0xff]  ;;  %v25101_v17 = vld [vmem:[#allocation33_spill] sm:$0xff] }
 0x412   : > { %v7747_v40 = vpop.f32.mrf.mxu1 }
 0x413   : > { %25096 = vst [vmem:[#allocation29_spill] sm:$0xff] %v21679_v34  ;;  %v21688_v33 = vadd.f32 %v17755_v0, %v8011_v60  ;;  %v8010_v42 = vadd.f32 %v7747_v40, %v25099_v43  ;;  %v17758_v55 = vpop.f32.mrf.mxu0  ;;  %18097 = vmatmul.mubr.msk.f32.gmra.mxu0 %vm457_vm1, %v15089_v30  ;;  %v14833_v34 = vld [vmem:[%s18268_s26 + $0x2e9] sm:$0xff]  ;;  %v14834_v43 = vld [vmem:[%s18268_s26 + $0x2f9] sm:$0xff] }
 0x414   : > { %v17564_v15 = vpop.f32.mrf.mxu1  ;;  %17903 = vmatmul.mubr.msk.f32.gmra.mxu1 %vm457_vm1, %v14831_v41  ;;  %18099 = vmatprep.mubr.msk.f32.mxu0 %vm457_vm1, %v15090_v25  ;;  %v15091_v0 = vld [vmem:[%s18268_s26 + $0x2ea] sm:$0xff]  ;;  %v25103_v30 = vld [vmem:[#allocation34_spill] sm:$0xff] }
 0x415   : > { %25098 = vst [vmem:[#allocation30_spill] sm:$0xff] %v21688_v33  ;;  %v21693_v29 = vadd.f32 %v9098_v13, %v8010_v42  ;;  %v8013_v54 = vadd.f32 %v17564_v15, %v25101_v17  ;;  %17905 = vmatprep.mubr.msk.f32.mxu1 %vm457_vm1, %v14832_v11  ;;  %v9108_v40 = vpop.f32.mrf.mxu0  ;;  %v15092_v33 = vld [vmem:[%s18268_s26 + $0x2fa] sm:$0xff]  ;;  %v25105_v11 = vld [vmem:[#allocation35_spill] sm:$0xff] }
 0x416   : > { %v7757_v60 = vpop.f32.mrf.mxu1 }
 0x417   : > { %25100 = vst [vmem:[#allocation31_spill] sm:$0xff] %v21693_v29  ;;  %v21702_v41 = vadd.f32 %v17758_v55, %v8013_v54  ;;  %v8012_v13 = vadd.f32 %v7757_v60, %v25103_v30  ;;  %v17761_v15 = vpop.f32.mrf.mxu0  ;;  %18100 = vmatmul.mubr.msk.f32.gmra.mxu0 %vm457_vm1, %v15091_v0  ;;  %v14835_v29 = vld [vmem:[%s18268_s26 + $0x301] sm:$0xff]  ;;  %v14836_v30 = vld [vmem:[%s18268_s26 + $0x309] sm:$0xff] }
 0x418   : > { %v17567_v42 = vpop.f32.mrf.mxu1  ;;  %17906 = vmatmul.mubr.msk.f32.gmra.mxu1 %vm457_vm1, %v14833_v34  ;;  %18102 = vmatprep.mubr.msk.f32.mxu0 %vm457_vm1, %v15092_v33  ;;  %v15093_v55 = vld [vmem:[%s18268_s26 + $0x302] sm:$0xff]  ;;  %v25107_v0 = vld [vmem:[#allocation36_spill] sm:$0xff] }
 0x419   : > { %25102 = vst [vmem:[#allocation32_spill] sm:$0xff] %v21702_v41  ;;  %v21707_v25 = vadd.f32 %v9108_v40, %v8012_v13  ;;  %v8015_v17 = vadd.f32 %v17567_v42, %v25105_v11  ;;  %17908 = vmatprep.mubr.msk.f32.mxu1 %vm457_vm1, %v14834_v43  ;;  %v9118_v60 = vpop.f32.mrf.mxu0  ;;  %v15094_v41 = vld [vmem:[%s18268_s26 + $0x30a] sm:$0xff]  ;;  %v25109_v43 = vld [vmem:[#allocation37_spill] sm:$0xff] }
 0x41a   : > { %v7767_v54 = vpop.f32.mrf.mxu1 }
 0x41b   : > { %25104 = vst [vmem:[#allocation33_spill] sm:$0xff] %v21707_v25  ;;  %v21716_v34 = vadd.f32 %v17761_v15, %v8015_v17  ;;  %v8014_v40 = vadd.f32 %v7767_v54, %v25107_v0  ;;  %v17764_v42 = vpop.f32.mrf.mxu0  ;;  %18103 = vmatmul.mubr.msk.f32.gmra.mxu0 %vm457_vm1, %v15093_v55  ;;  %v14837_v25 = vld [vmem:[%s18268_s26 + $0x311] sm:$0xff]  ;;  %v14838_v0 = vld [vmem:[%s18268_s26 + $0x321] sm:$0xff] }
 0x41c   : > { %v17570_v13 = vpop.f32.mrf.mxu1  ;;  %17909 = vmatmul.mubr.msk.f32.gmra.mxu1 %vm457_vm1, %v14835_v29  ;;  %18105 = vmatprep.mubr.msk.f32.mxu0 %vm457_vm1, %v15094_v41  ;;  %v15095_v15 = vld [vmem:[%s18268_s26 + $0x312] sm:$0xff]  ;;  %v25111_v55 = vld [vmem:[#allocation38_spill] sm:$0xff] }
 0x41d   : > { %25106 = vst [vmem:[#allocation34_spill] sm:$0xff] %v21716_v34  ;;  %v21721_v33 = vadd.f32 %v9118_v60, %v8014_v40  ;;  %v8017_v11 = vadd.f32 %v17570_v13, %v25109_v43  ;;  %17911 = vmatprep.mubr.msk.f32.mxu1 %vm457_vm1, %v14836_v30  ;;  %v9128_v54 = vpop.f32.mrf.mxu0  ;;  %v15096_v34 = vld [vmem:[%s18268_s26 + $0x322] sm:$0xff] }
 0x41e   : > { %v7777_v17 = vpop.f32.mrf.mxu1  ;;  %v25113_v30 = vld [vmem:[#allocation39_spill] sm:$0xff] }
 0x41f   : > { %25108 = vst [vmem:[#allocation35_spill] sm:$0xff] %v21721_v33  ;;  %v21730_v29 = vadd.f32 %v17764_v42, %v8017_v11  ;;  %v8016_v60 = vadd.f32 %v7777_v17, %v25111_v55  ;;  %v17767_v13 = vpop.f32.mrf.mxu0  ;;  %18106 = vmatmul.mubr.msk.f32.gmra.mxu0 %vm457_vm1, %v15095_v15  ;;  %v14839_v33 = vld [vmem:[%s18268_s26 + $0x329] sm:$0xff]  ;;  %v14840_v55 = vld [vmem:[%s18268_s26 + $0x331] sm:$0xff] }
 0x420   : > { %v17573_v40 = vpop.f32.mrf.mxu1  ;;  %17912 = vmatmul.mubr.msk.f32.gmra.mxu1 %vm457_vm1, %v14837_v25  ;;  %18108 = vmatprep.mubr.msk.f32.mxu0 %vm457_vm1, %v15096_v34  ;;  %v15097_v42 = vld [vmem:[%s18268_s26 + $0x32a] sm:$0xff] }
 0x421   : > { %25110 = vst [vmem:[#allocation36_spill] sm:$0xff] %v21730_v29  ;;  %v21735_v41 = vadd.f32 %v9128_v54, %v8016_v60  ;;  %v8019_v43 = vadd.f32 %v17573_v40, %v25113_v30  ;;  %17914 = vmatprep.mubr.msk.f32.mxu1 %vm457_vm1, %v14838_v0  ;;  %v9138_v17 = vpop.f32.mrf.mxu0  ;;  %v15098_v29 = vld [vmem:[%s18268_s26 + $0x332] sm:$0xff] }
 0x422   : > { %v7787_v11 = vpop.f32.mrf.mxu1  ;;  %v25115_v15 = vld [vmem:[#allocation40_spill] sm:$0xff]  ;;  %v25117_v0 = vld [vmem:[#allocation41_spill] sm:$0xff] }
 0x423   : > { %25112 = vst [vmem:[#allocation37_spill] sm:$0xff] %v21735_v41  ;;  %v21744_v25 = vadd.f32 %v17767_v13, %v8019_v43  ;;  %v8018_v54 = vadd.f32 %v7787_v11, %v25115_v15  ;;  %v17770_v40 = vpop.f32.mrf.mxu0  ;;  %18109 = vmatmul.mubr.msk.f32.gmra.mxu0 %vm457_vm1, %v15097_v42  ;;  %v14841_v41 = vld [vmem:[%s18268_s26 + $0x339] sm:$0xff]  ;;  %v14842_v15 = vld [vmem:[%s18268_s26 + $0x349] sm:$0xff] }
 0x424   : > { %v17576_v60 = vpop.f32.mrf.mxu1  ;;  %17915 = vmatmul.mubr.msk.f32.gmra.mxu1 %vm457_vm1, %v14839_v33  ;;  %18111 = vmatprep.mubr.msk.f32.mxu0 %vm457_vm1, %v15098_v29  ;;  %v15099_v13 = vld [vmem:[%s18268_s26 + $0x33a] sm:$0xff] }
 0x425   : > { %25114 = vst [vmem:[#allocation38_spill] sm:$0xff] %v21744_v25  ;;  %v21749_v34 = vadd.f32 %v9138_v17, %v8018_v54  ;;  %v8021_v30 = vadd.f32 %v17576_v60, %v25117_v0  ;;  %17917 = vmatprep.mubr.msk.f32.mxu1 %vm457_vm1, %v14840_v55  ;;  %v9148_v11 = vpop.f32.mrf.mxu0  ;;  %v15100_v25 = vld [vmem:[%s18268_s26 + $0x34a] sm:$0xff]  ;;  %v25119_v42 = vld [vmem:[#allocation42_spill] sm:$0xff] }
 0x426   : > { %v7797_v43 = vpop.f32.mrf.mxu1  ;;  %v25121_v55 = vld [vmem:[#allocation43_spill] sm:$0xff] }
 0x427   : > { %25116 = vst [vmem:[#allocation39_spill] sm:$0xff] %v21749_v34  ;;  %v21758_v33 = vadd.f32 %v17770_v40, %v8021_v30  ;;  %v8020_v17 = vadd.f32 %v7797_v43, %v25119_v42  ;;  %v17773_v60 = vpop.f32.mrf.mxu0  ;;  %18112 = vmatmul.mubr.msk.f32.gmra.mxu0 %vm457_vm1, %v15099_v13  ;;  %v14843_v34 = vld [vmem:[%s18268_s26 + $0x351] sm:$0xff]  ;;  %v14844_v42 = vld [vmem:[%s18268_s26 + $0x359] sm:$0xff] }
 0x428   : > { %v17579_v54 = vpop.f32.mrf.mxu1  ;;  %17918 = vmatmul.mubr.msk.f32.gmra.mxu1 %vm457_vm1, %v14841_v41  ;;  %18114 = vmatprep.mubr.msk.f32.mxu0 %vm457_vm1, %v15100_v25  ;;  %v15101_v40 = vld [vmem:[%s18268_s26 + $0x352] sm:$0xff] }
 0x429   : > { %25118 = vst [vmem:[#allocation40_spill] sm:$0xff] %v21758_v33  ;;  %v21763_v29 = vadd.f32 %v9148_v11, %v8020_v17  ;;  %v8023_v0 = vadd.f32 %v17579_v54, %v25121_v55  ;;  %17920 = vmatprep.mubr.msk.f32.mxu1 %vm457_vm1, %v14842_v15  ;;  %v9158_v43 = vpop.f32.mrf.mxu0  ;;  %v15102_v33 = vld [vmem:[%s18268_s26 + $0x35a] sm:$0xff]  ;;  %v25123_v13 = vld [vmem:[#allocation44_spill] sm:$0xff] }
 0x42a   : > { %v7807_v30 = vpop.f32.mrf.mxu1  ;;  %v25125_v15 = vld [vmem:[#allocation45_spill] sm:$0xff] }
 0x42b   : > { %25120 = vst [vmem:[#allocation41_spill] sm:$0xff] %v21763_v29  ;;  %v21772_v41 = vadd.f32 %v17773_v60, %v8023_v0  ;;  %v8022_v11 = vadd.f32 %v7807_v30, %v25123_v13  ;;  %v17776_v54 = vpop.f32.mrf.mxu0  ;;  %18115 = vmatmul.mubr.msk.f32.gmra.mxu0 %vm457_vm1, %v15101_v40  ;;  %v14845_v29 = vld [vmem:[%s18268_s26 + $0x361] sm:$0xff]  ;;  %v14846_v13 = vld [vmem:[%s18268_s26 + $0x371] sm:$0xff] }
 0x42c   : > { %v17582_v17 = vpop.f32.mrf.mxu1  ;;  %17921 = vmatmul.mubr.msk.f32.gmra.mxu1 %vm457_vm1, %v14843_v34  ;;  %18117 = vmatprep.mubr.msk.f32.mxu0 %vm457_vm1, %v15102_v33  ;;  %v15103_v60 = vld [vmem:[%s18268_s26 + $0x362] sm:$0xff] }
 0x42d   : > { %25122 = vst [vmem:[#allocation42_spill] sm:$0xff] %v21772_v41  ;;  %v21777_v25 = vadd.f32 %v9158_v43, %v8022_v11  ;;  %v8025_v55 = vadd.f32 %v17582_v17, %v25125_v15  ;;  %17923 = vmatprep.mubr.msk.f32.mxu1 %vm457_vm1, %v14844_v42  ;;  %v9168_v30 = vpop.f32.mrf.mxu0  ;;  %v15104_v41 = vld [vmem:[%s18268_s26 + $0x372] sm:$0xff]  ;;  %v25127_v40 = vld [vmem:[#allocation46_spill] sm:$0xff]  ;;  %v25129_v42 = vld [vmem:[#allocation47_spill] sm:$0xff] }
 0x42e   : > { %v7817_v0 = vpop.f32.mrf.mxu1 }
 0x42f   : > { %25124 = vst [vmem:[#allocation43_spill] sm:$0xff] %v21777_v25  ;;  %v21786_v34 = vadd.f32 %v17776_v54, %v8025_v55  ;;  %v8024_v43 = vadd.f32 %v7817_v0, %v25127_v40  ;;  %v17779_v17 = vpop.f32.mrf.mxu0  ;;  %18118 = vmatmul.mubr.msk.f32.gmra.mxu0 %vm457_vm1, %v15103_v60  ;;  %v14847_v25 = vld [vmem:[%s18268_s26 + $0x379] sm:$0xff]  ;;  %v14848_v40 = vld [vmem:[%s18268_s26 + $0x381] sm:$0xff]  ;;  %v25131_v60 = vld [vmem:[#allocation48_spill] sm:$0xff] }
 0x430   : > { %v17585_v11 = vpop.f32.mrf.mxu1  ;;  %17924 = vmatmul.mubr.msk.f32.gmra.mxu1 %vm457_vm1, %v14845_v29  ;;  %18120 = vmatprep.mubr.msk.f32.mxu0 %vm457_vm1, %v15104_v41  ;;  %v15105_v54 = vld [vmem:[%s18268_s26 + $0x37a] sm:$0xff] }
 0x431   : > { %25126 = vst [vmem:[#allocation44_spill] sm:$0xff] %v21786_v34  ;;  %v21791_v33 = vadd.f32 %v9168_v30, %v8024_v43  ;;  %v8027_v15 = vadd.f32 %v17585_v11, %v25129_v42  ;;  %17926 = vmatprep.mubr.msk.f32.mxu1 %vm457_vm1, %v14846_v13  ;;  %v9178_v0 = vpop.f32.mrf.mxu0  ;;  %v15106_v34 = vld [vmem:[%s18268_s26 + $0x382] sm:$0xff]  ;;  %v25133_v13 = vld [vmem:[#allocation49_spill] sm:$0xff] }
 0x432   : > { %v7827_v55 = vpop.f32.mrf.mxu1 }
 0x433   : > { %25128 = vst [vmem:[#allocation45_spill] sm:$0xff] %v21791_v33  ;;  %v21800_v29 = vadd.f32 %v17779_v17, %v8027_v15  ;;  %v8026_v30 = vadd.f32 %v7827_v55, %v25131_v60  ;;  %v17782_v11 = vpop.f32.mrf.mxu0  ;;  %18121 = vmatmul.mubr.msk.f32.gmra.mxu0 %vm457_vm1, %v15105_v54  ;;  %v14849_v33 = vld [vmem:[%s18268_s26 + $0x389] sm:$0xff]  ;;  %v14850_v60 = vld [vmem:[%s18268_s26 + $0x399] sm:$0xff] }
 0x434   : > { %v17588_v43 = vpop.f32.mrf.mxu1  ;;  %17927 = vmatmul.mubr.msk.f32.gmra.mxu1 %vm457_vm1, %v14847_v25  ;;  %18123 = vmatprep.mubr.msk.f32.mxu0 %vm457_vm1, %v15106_v34  ;;  %v15107_v17 = vld [vmem:[%s18268_s26 + $0x38a] sm:$0xff] }
 0x435   : > { %25130 = vst [vmem:[#allocation46_spill] sm:$0xff] %v21800_v29  ;;  %v21805_v41 = vadd.f32 %v9178_v0, %v8026_v30  ;;  %v8029_v42 = vadd.f32 %v17588_v43, %v25133_v13  ;;  %17929 = vmatprep.mubr.msk.f32.mxu1 %vm457_vm1, %v14848_v40  ;;  %v9188_v55 = vpop.f32.mrf.mxu0  ;;  %v15108_v29 = vld [vmem:[%s18268_s26 + $0x39a] sm:$0xff]  ;;  %v25135_v54 = vld [vmem:[#allocation51_spill] sm:$0xff] }
 0x436   : > { %v7837_v15 = vpop.f32.mrf.mxu1  ;;  %v25137_v40 = vld [vmem:[#allocation53_spill] sm:$0xff] }
 0x437   : > { %25132 = vst [vmem:[#allocation47_spill] sm:$0xff] %v21805_v41  ;;  %v21814_v25 = vadd.f32 %v17782_v11, %v8029_v42  ;;  %v8028_v0 = vadd.f32 %v7837_v15, %v25135_v54  ;;  %v17785_v43 = vpop.f32.mrf.mxu0  ;;  %18124 = vmatmul.mubr.msk.f32.gmra.mxu0 %vm457_vm1, %v15107_v17  ;;  %v14851_v41 = vld [vmem:[%s18268_s26 + $0x3a1] sm:$0xff]  ;;  %v14852_v54 = vld [vmem:[%s18268_s26 + $0x3a9] sm:$0xff] }
 0x438   : > { %v17591_v30 = vpop.f32.mrf.mxu1  ;;  %17930 = vmatmul.mubr.msk.f32.gmra.mxu1 %vm457_vm1, %v14849_v33  ;;  %18126 = vmatprep.mubr.msk.f32.mxu0 %vm457_vm1, %v15108_v29  ;;  %v15109_v11 = vld [vmem:[%s18268_s26 + $0x3a2] sm:$0xff] }
 0x439   : > { %25134 = vst [vmem:[#allocation48_spill] sm:$0xff] %v21814_v25  ;;  %v21819_v34 = vadd.f32 %v9188_v55, %v8028_v0  ;;  %v8031_v13 = vadd.f32 %v17591_v30, %v25137_v40  ;;  %17932 = vmatprep.mubr.msk.f32.mxu1 %vm457_vm1, %v14850_v60  ;;  %v9198_v15 = vpop.f32.mrf.mxu0  ;;  %v15110_v25 = vld [vmem:[%s18268_s26 + $0x3aa] sm:$0xff]  ;;  %v25141_v60 = vld [vmem:[#allocation57_spill] sm:$0xff] }
 0x43a   : > { %v7847_v42 = vpop.f32.mrf.mxu1  ;;  %v25139_v17 = vld [vmem:[#allocation55_spill] sm:$0xff] }
 0x43b   : > { %25136 = vst [vmem:[#allocation49_spill] sm:$0xff] %v21819_v34  ;;  %v21828_v33 = vadd.f32 %v17785_v43, %v8031_v13  ;;  %v8030_v55 = vadd.f32 %v7847_v42, %v25139_v17  ;;  %v17788_v30 = vpop.f32.mrf.mxu0  ;;  %18127 = vmatmul.mubr.msk.f32.gmra.mxu0 %vm457_vm1, %v15109_v11  ;;  %v14853_v34 = vld [vmem:[%s18268_s26 + $0x3b1] sm:$0xff]  ;;  %v14854_v17 = vld [vmem:[%s18268_s26 + $0x3c1] sm:$0xff] }
 0x43c   : > { %v17594_v0 = vpop.f32.mrf.mxu1  ;;  %17933 = vmatmul.mubr.msk.f32.gmra.mxu1 %vm457_vm1, %v14851_v41  ;;  %18129 = vmatprep.mubr.msk.f32.mxu0 %vm457_vm1, %v15110_v25  ;;  %v15111_v43 = vld [vmem:[%s18268_s26 + $0x3b2] sm:$0xff]  ;;  %v25143_v11 = vld [vmem:[#allocation59_spill] sm:$0xff] }
 0x43d   : > { %25138 = vst [vmem:[#allocation51_spill] sm:$0xff] %v21828_v33  ;;  %v21833_v29 = vadd.f32 %v9198_v15, %v8030_v55  ;;  %v8033_v40 = vadd.f32 %v17594_v0, %v25141_v60  ;;  %17935 = vmatprep.mubr.msk.f32.mxu1 %vm457_vm1, %v14852_v54  ;;  %v9208_v42 = vpop.f32.mrf.mxu0  ;;  %v15112_v33 = vld [vmem:[%s18268_s26 + $0x3c2] sm:$0xff]  ;;  %v25145_v54 = vld [vmem:[#allocation61_spill] sm:$0xff] }
 0x43e   : > { %v7857_v13 = vpop.f32.mrf.mxu1 }
 0x43f   : > { %25140 = vst [vmem:[#allocation53_spill] sm:$0xff] %v21833_v29  ;;  %v21842_v41 = vadd.f32 %v17788_v30, %v8033_v40  ;;  %v8032_v15 = vadd.f32 %v7857_v13, %v25143_v11  ;;  %v17791_v0 = vpop.f32.mrf.mxu0  ;;  %18130 = vmatmul.mubr.msk.f32.gmra.mxu0 %vm457_vm1, %v15111_v43  ;;  %v14855_v29 = vld [vmem:[%s18268_s26 + $0x3c9] sm:$0xff]  ;;  %v14856_v11 = vld [vmem:[%s18268_s26 + $0x3d1] sm:$0xff] }
 0x440   : > { %v17597_v55 = vpop.f32.mrf.mxu1  ;;  %17936 = vmatmul.mubr.msk.f32.gmra.mxu1 %vm457_vm1, %v14853_v34  ;;  %18132 = vmatprep.mubr.msk.f32.mxu0 %vm457_vm1, %v15112_v33  ;;  %v15113_v30 = vld [vmem:[%s18268_s26 + $0x3ca] sm:$0xff] }
 0x441   : > { %25142 = vst [vmem:[#allocation55_spill] sm:$0xff] %v21842_v41  ;;  %v21847_v25 = vadd.f32 %v9208_v42, %v8032_v15  ;;  %v8035_v60 = vadd.f32 %v17597_v55, %v25145_v54  ;;  %17938 = vmatprep.mubr.msk.f32.mxu1 %vm457_vm1, %v14854_v17  ;;  %v9218_v13 = vpop.f32.mrf.mxu0  ;;  %v15114_v41 = vld [vmem:[%s18268_s26 + $0x3d2] sm:$0xff]  ;;  %v25147_v43 = vld [vmem:[#allocation63_spill] sm:$0xff] }
 0x442   : > { %v7867_v40 = vpop.f32.mrf.mxu1  ;;  %v25149_v17 = vld [vmem:[#allocation65_spill] sm:$0xff] }
 0x443   : > { %25144 = vst [vmem:[#allocation57_spill] sm:$0xff] %v21847_v25  ;;  %v21856_v34 = vadd.f32 %v17791_v0, %v8035_v60  ;;  %v8034_v42 = vadd.f32 %v7867_v40, %v25147_v43  ;;  %v17794_v55 = vpop.f32.mrf.mxu0  ;;  %18133 = vmatmul.mubr.msk.f32.gmra.mxu0 %vm457_vm1, %v15113_v30  ;;  %v14857_v25 = vld [vmem:[%s18268_s26 + $0x3d9] sm:$0xff]  ;;  %v14858_v43 = vld [vmem:[%s18268_s26 + $0x3e9] sm:$0xff] }
 0x444   : > { %v17600_v15 = vpop.f32.mrf.mxu1  ;;  %17939 = vmatmul.mubr.msk.f32.gmra.mxu1 %vm457_vm1, %v14855_v29  ;;  %18135 = vmatprep.mubr.msk.f32.mxu0 %vm457_vm1, %v15114_v41  ;;  %v15115_v0 = vld [vmem:[%s18268_s26 + $0x3da] sm:$0xff]  ;;  %v25151_v30 = vld [vmem:[#allocation67_spill] sm:$0xff] }
 0x445   : > { %25146 = vst [vmem:[#allocation59_spill] sm:$0xff] %v21856_v34  ;;  %v21861_v33 = vadd.f32 %v9218_v13, %v8034_v42  ;;  %v8037_v54 = vadd.f32 %v17600_v15, %v25149_v17  ;;  %17941 = vmatprep.mubr.msk.f32.mxu1 %vm457_vm1, %v14856_v11  ;;  %v9228_v40 = vpop.f32.mrf.mxu0  ;;  %v15116_v34 = vld [vmem:[%s18268_s26 + $0x3ea] sm:$0xff]  ;;  %v25153_v11 = vld [vmem:[#allocation69_spill] sm:$0xff] }
 0x446   : > { %v7877_v60 = vpop.f32.mrf.mxu1 }
 0x447   : > { %25148 = vst [vmem:[#allocation61_spill] sm:$0xff] %v21861_v33  ;;  %v21870_v29 = vadd.f32 %v17794_v55, %v8037_v54  ;;  %v8036_v13 = vadd.f32 %v7877_v60, %v25151_v30  ;;  %v17797_v15 = vpop.f32.mrf.mxu0  ;;  %18136 = vmatmul.mubr.msk.f32.gmra.mxu0 %vm457_vm1, %v15115_v0  ;;  %v14859_v33 = vld [vmem:[%s18268_s26 + $0x3f1] sm:$0xff]  ;;  %v14860_v30 = vld [vmem:[%s18268_s26 + $0x3f9] sm:$0xff]  ;;  %v25155_v0 = vld [vmem:[#allocation71_spill] sm:$0xff] }
 0x448   : > { %v17603_v42 = vpop.f32.mrf.mxu1  ;;  %17942 = vmatmul.mubr.msk.f32.gmra.mxu1 %vm457_vm1, %v14857_v25  ;;  %18138 = vmatprep.mubr.msk.f32.mxu0 %vm457_vm1, %v15116_v34  ;;  %v15117_v55 = vld [vmem:[%s18268_s26 + $0x3f2] sm:$0xff] }
 0x449   : > { %25150 = vst [vmem:[#allocation63_spill] sm:$0xff] %v21870_v29  ;;  %v21875_v41 = vadd.f32 %v9228_v40, %v8036_v13  ;;  %v8039_v17 = vadd.f32 %v17603_v42, %v25153_v11  ;;  %17944 = vmatprep.mubr.msk.f32.mxu1 %vm457_vm1, %v14858_v43  ;;  %v9238_v60 = vpop.f32.mrf.mxu0  ;;  %v15118_v29 = vld [vmem:[%s18268_s26 + $0x3fa] sm:$0xff] }
 0x44a   : > { %v7887_v54 = vpop.f32.mrf.mxu1  ;;  %v25156_v43 = vld [vmem:[#allocation73_spill] sm:$0xff] }
 0x44b   : > { %25152 = vst [vmem:[#allocation65_spill] sm:$0xff] %v21875_v41  ;;  %v21884_v25 = vadd.f32 %v17797_v15, %v8039_v17  ;;  %v8038_v40 = vadd.f32 %v7887_v54, %v25155_v0  ;;  %v17800_v42 = vpop.f32.mrf.mxu0  ;;  %18139 = vmatmul.mubr.msk.f32.gmra.mxu0 %vm457_vm1, %v15117_v55  ;;  %v14861_v41 = vld [vmem:[%s18268_s26 + $0x401] sm:$0xff]  ;;  %v14862_v0 = vld [vmem:[%s18268_s26 + $0x411] sm:$0xff] }
 0x44c   : > { %v17606_v13 = vpop.f32.mrf.mxu1  ;;  %17945 = vmatmul.mubr.msk.f32.gmra.mxu1 %vm457_vm1, %v14859_v33  ;;  %18141 = vmatprep.mubr.msk.f32.mxu0 %vm457_vm1, %v15118_v29  ;;  %v15119_v15 = vld [vmem:[%s18268_s26 + $0x402] sm:$0xff] }
 0x44d   : > { %25154 = vst [vmem:[#allocation67_spill] sm:$0xff] %v21884_v25  ;;  %v21889_v34 = vadd.f32 %v9238_v60, %v8038_v40  ;;  %v8041_v11 = vadd.f32 %v17606_v13, %v25156_v43  ;;  %17947 = vmatprep.mubr.msk.f32.mxu1 %vm457_vm1, %v14860_v30  ;;  %v9248_v54 = vpop.f32.mrf.mxu0  ;;  %v15120_v25 = vld [vmem:[%s18268_s26 + $0x412] sm:$0xff] }
 0x44e   : > { %v7897_v17 = vpop.f32.mrf.mxu1  ;;  %v14863_v13 = vld [vmem:[%s18268_s26 + $0x419] sm:$0xff] }
 0x44f   : > { %v21898_v33 = vadd.f32 %v17800_v42, %v8041_v11  ;;  %v8040_v55 = vadd.f32 %v7897_v17, %v21007_v32  ;;  %v17803_v40 = vpop.f32.mrf.mxu0  ;;  %18142 = vmatmul.mubr.msk.f32.gmra.mxu0 %vm457_vm1, %v15119_v15  ;;  %v15121_v42 = vld [vmem:[%s18268_s26 + $0x41a] sm:$0xff]  ;;  %v15122_v17 = vld [vmem:[%s18268_s26 + $0x422] sm:$0xff] }
 0x450   : > { %v17609_v60 = vpop.f32.mrf.mxu1  ;;  %17948 = vmatmul.mubr.msk.f32.gmra.mxu1 %vm457_vm1, %v14861_v41  ;;  %18144 = vmatprep.mubr.msk.f32.mxu0 %vm457_vm1, %v15120_v25  ;;  %v14864_v11 = vld [vmem:[%s18268_s26 + $0x421] sm:$0xff] }
 0x451   : > { %25157 = vst [vmem:[#allocation69_spill] sm:$0xff] %v21898_v33  ;;  %v21903_v29 = vadd.f32 %v9248_v54, %v8040_v55  ;;  %v8043_v30 = vadd.f32 %v17609_v60, %v21016_v16  ;;  %17950 = vmatprep.mubr.msk.f32.mxu1 %vm457_vm1, %v14862_v0  ;;  %v9258_v32 = vpop.f32.mrf.mxu0  ;;  %v14865_v55 = vld [vmem:[%s18268_s26 + $0x429] sm:$0xff] }
 0x452   : > { %v7907_v43 = vpop.f32.mrf.mxu1  ;;  %v15123_v60 = vld [vmem:[%s18268_s26 + $0x42a] sm:$0xff] }
 0x453   : > { %25158 = vst [vmem:[#allocation71_spill] sm:$0xff] %v21903_v29  ;;  %v21912_v41 = vadd.f32 %v17803_v40, %v8043_v30  ;;  %v8042_v15 = vadd.f32 %v7907_v43, %v21021_v4  ;;  %v18002_v16 = vpop.f32.mrf.mxu0  ;;  %18145 = vmatmul.mubr.msk.f32.gmra.mxu0 %vm457_vm1, %v15121_v42  ;;  %v14866_v30 = vld [vmem:[%s18268_s26 + $0x439] sm:$0xff]  ;;  %v15128_v29 = vld [vmem:[%s18268_s26 + $0x462] sm:$0xff] }
 0x454   : > { %v17808_v54 = vpop.f32.mrf.mxu1  ;;  %17951 = vmatmul.mubr.msk.f32.gmra.mxu1 %vm457_vm1, %v14863_v13  ;;  %18147 = vmatprep.mubr.msk.f32.mxu0 %vm457_vm1, %v15122_v17  ;;  %v15124_v13 = vld [vmem:[%s18268_s26 + $0x43a] sm:$0xff] }
 0x455   : > { %25159 = vst [vmem:[#allocation73_spill] sm:$0xff] %v21912_v41  ;;  %v21917_v25 = vadd.f32 %v9258_v32, %v8042_v15  ;;  %v10618_v0 = vadd.f32 %v17808_v54, %v21030_v50  ;;  %17953 = vmatprep.mubr.msk.f32.mxu1 %vm457_vm1, %v14864_v11  ;;  %v11328_v4 = vpop.f32.mrf.mxu0  ;;  %v14867_v15 = vld [vmem:[%s18268_s26 + $0x441] sm:$0xff] }
 0x456   : > { %v9978_v40 = vpop.f32.mrf.mxu1  ;;  %v15125_v54 = vld [vmem:[%s18268_s26 + $0x442] sm:$0xff] }
 0x457   : > { %25160 = vst [vmem:[#allocation84_spill] sm:$0xff] %v21917_v25  ;;  %v10617_v42 = vadd.f32 %v9978_v40, %v21035_v39  ;;  %v21927_v43 = vadd.f32 %v18002_v16, %v10618_v0  ;;  %v18005_v50 = vpop.f32.mrf.mxu0  ;;  %18148 = vmatmul.mubr.msk.f32.gmra.mxu0 %vm457_vm1, %v15123_v60  ;;  %v14868_v16 = vld [vmem:[%s18268_s26 + $0x449] sm:$0xff]  ;;  %v14870_v41 = vld [vmem:[%s18268_s26 + $0x461] sm:$0xff] }
 0x458   : > { %v17811_v32 = vpop.f32.mrf.mxu1  ;;  %17954 = vmatmul.mubr.msk.f32.gmra.mxu1 %vm457_vm1, %v14865_v55  ;;  %18150 = vmatprep.mubr.msk.f32.mxu0 %vm457_vm1, %v15124_v13  ;;  %v15126_v0 = vld [vmem:[%s18268_s26 + $0x44a] sm:$0xff] }
 0x459   : > { %25161 = vst [vmem:[#allocation85_spill] sm:$0xff] %v21927_v43  ;;  %v21931_v11 = vadd.f32 %v11328_v4, %v10617_v42  ;;  %v10620_v17 = vadd.f32 %v17811_v32, %v21044_v24  ;;  %17956 = vmatprep.mubr.msk.f32.mxu1 %vm457_vm1, %v14866_v30  ;;  %v11338_v39 = vpop.f32.mrf.mxu0  ;;  %v12361_v60 = vmul.f32 %v21927_v43, %v21927_v43  ;;  %v14869_v32 = vld [vmem:[%s18268_s26 + $0x451] sm:$0xff] }
 0x45a   : > { %v9988_v25 = vpop.f32.mrf.mxu1 }
 0x45b   : > { %25162 = vst [vmem:[#allocation86_spill] sm:$0xff] %v21931_v11  ;;  %v12360_v55 = vmul.f32 %v21931_v11, %v21931_v11  ;;  %v12098_v24 = vsel %vm12097_vm2, %v21931_v11, 0.0  ;;  %v21946_v40 = vadd.f32 %v18005_v50, %v10620_v17  ;;  %v10619_v4 = vadd.f32 %v9988_v25, %v21049_v9  ;;  %v18008_v13 = vpop.f32.mrf.mxu0  ;;  %18151 = vmatmul.mubr.msk.f32.gmra.mxu0 %vm457_vm1, %v15125_v54  ;;  %v15127_v11 = vld [vmem:[%s18268_s26 + $0x452] sm:$0xff] }
 0x45c   : > { %v17814_v30 = vpop.f32.mrf.mxu1  ;;  %17957 = vmatmul.mubr.msk.f32.gmra.mxu1 %vm457_vm1, %v14867_v15  ;;  %18153 = vmatprep.mubr.msk.f32.mxu0 %vm457_vm1, %v15126_v0  ;;  %v12099_v50 = vsel %vm12097_vm2, %v21927_v43, 0.0  ;;  %v12489_v0 = vsel %vm12097_vm2, %v12361_v60, 0.0 }
 0x45d   : > { %v10622_v42 = vadd.f32 %v17814_v30, %v21058_v31  ;;  %17959 = vmatprep.mubr.msk.f32.mxu1 %vm457_vm1, %v14868_v16  ;;  %v12488_v9 = vsel %vm12097_vm2, %v12360_v55, 0.0  ;;  %v21959_v25 = vadd.f32 %v11338_v39, %v10619_v4  ;;  %v11348_v15 = vpop.f32.mrf.mxu0  ;;  %v12100_v54 = vadd.f32 %v12099_v50, %v12098_v24  ;;  %v15129_v50 = vld [vmem:[%s18268_s26 + $0x46a] sm:$0xff] }
 0x45e   : > { %v9998_v17 = vpop.f32.mrf.mxu1  ;;  %v12363_v30 = vmul.f32 %v21946_v40, %v21946_v40 }
 0x45f   : > { %25163 = vst [vmem:[#allocation87_spill] sm:$0xff] %v21959_v25  ;;  %v21963_v31 = vadd.f32 %v18008_v13, %v10622_v42  ;;  %v10621_v16 = vadd.f32 %v9998_v17, %v21063_v51  ;;  %v12101_v39 = vsel %vm12097_vm2, %v21959_v25, 0.0  ;;  %v12362_v55 = vmul.f32 %v21959_v25, %v21959_v25  ;;  %v18011_v24 = vpop.f32.mrf.mxu0  ;;  %18154 = vmatmul.mubr.msk.f32.gmra.mxu0 %vm457_vm1, %v15127_v11  ;;  %v14871_v42 = vld [vmem:[%s18268_s26 + $0x469] sm:$0xff]  ;;  %v14872_v11 = vld [vmem:[%s18268_s26 + $0x471] sm:$0xff] }
 0x460   : > { %v17817_v4 = vpop.f32.mrf.mxu1  ;;  %17960 = vmatmul.mubr.msk.f32.gmra.mxu1 %vm457_vm1, %v14869_v32  ;;  %v12490_v51 = vadd.f32 %v12489_v0, %v12488_v9  ;;  %v12102_v13 = vadd.f32 %v12101_v39, %v12100_v54  ;;  %18156 = vmatprep.mubr.msk.f32.mxu0 %vm457_vm1, %v15128_v29  ;;  %v12103_v17 = vsel %vm12097_vm2, %v21946_v40, 0.0  ;;  %v15130_v9 = vld [vmem:[%s18268_s26 + $0x472] sm:$0xff] }
 0x461   : > { %v21975_v60 = vadd.f32 %v11348_v15, %v10621_v16  ;;  %17962 = vmatprep.mubr.msk.f32.mxu1 %vm457_vm1, %v14870_v41  ;;  %v12491_v25 = vsel %vm12097_vm2, %v12362_v55, 0.0  ;;  %v10624_v32 = vadd.f32 %v17817_v4, %v21072_v3  ;;  %v11358_v33 = vpop.f32.mrf.mxu0  ;;  %v12365_v41 = vmul.f32 %v21963_v31, %v21963_v31 }
 0x462   : > { %v10008_v43 = vpop.f32.mrf.mxu1  ;;  %v12104_v54 = vadd.f32 %v12103_v17, %v12102_v13  ;;  %v12492_v15 = vadd.f32 %v12491_v25, %v12490_v51  ;;  %v12493_v16 = vsel %vm12097_vm2, %v12363_v30, 0.0  ;;  %v14873_v30 = vld [vmem:[%s18268_s26 + $0x479] sm:$0xff] }
 0x463   : > { %v12105_v29 = vsel %vm12097_vm2, %v21975_v60, 0.0  ;;  %v12364_v0 = vmul.f32 %v21975_v60, %v21975_v60  ;;  %v21994_v3 = vadd.f32 %v18011_v24, %v10624_v32  ;;  %v10623_v39 = vadd.f32 %v10008_v43, %v21077_v56  ;;  %v18014_v25 = vpop.f32.mrf.mxu0  ;;  %18157 = vmatmul.mubr.msk.f32.gmra.mxu0 %vm457_vm1, %v15129_v50  ;;  %v15131_v24 = vld [vmem:[%s18268_s26 + $0x47a] sm:$0xff]  ;;  %v14874_v50 = vld [vmem:[%s18268_s26 + $0x489] sm:$0xff] }
 0x464   : > { %v17820_v55 = vpop.f32.mrf.mxu1  ;;  %17963 = vmatmul.mubr.msk.f32.gmra.mxu1 %vm457_vm1, %v14871_v42  ;;  %v12494_v4 = vadd.f32 %v12493_v16, %v12492_v15  ;;  %v12106_v51 = vadd.f32 %v12105_v29, %v12104_v54  ;;  %18159 = vmatprep.mubr.msk.f32.mxu0 %vm457_vm1, %v15130_v9  ;;  %v12107_v56 = vsel %vm12097_vm2, %v21963_v31, 0.0  ;;  %v15132_v15 = vld [vmem:[%s18268_s26 + $0x48a] sm:$0xff]  ;;  %v12497_v29 = vsel %vm12097_vm2, %v12365_v41, 0.0  ;;  %v15133_v41 = vld [vmem:[%s18268_s26 + $0x492] sm:$0xff] }
 0x465   : > { %v10626_v13 = vadd.f32 %v17820_v55, %v21086_v18  ;;  %17965 = vmatprep.mubr.msk.f32.mxu1 %vm457_vm1, %v14872_v11  ;;  %v12495_v43 = vsel %vm12097_vm2, %v12364_v0, 0.0  ;;  %v22007_v42 = vadd.f32 %v11358_v33, %v10623_v39  ;;  %v11368_v32 = vpop.f32.mrf.mxu0  ;;  %v12367_v11 = vmul.f32 %v21994_v3, %v21994_v3 }
 0x466   : > { %v10018_v17 = vpop.f32.mrf.mxu1  ;;  %v12108_v54 = vadd.f32 %v12107_v56, %v12106_v51  ;;  %v12496_v18 = vadd.f32 %v12495_v43, %v12494_v4 }
 0x467   : > { %v10625_v9 = vadd.f32 %v10018_v17, %v21091_v26  ;;  %v12109_v16 = vsel %vm12097_vm2, %v22007_v42, 0.0  ;;  %v12366_v33 = vmul.f32 %v22007_v42, %v22007_v42  ;;  %v22019_v0 = vadd.f32 %v18014_v25, %v10626_v13  ;;  %v18017_v55 = vpop.f32.mrf.mxu0  ;;  %18160 = vmatmul.mubr.msk.f32.gmra.mxu0 %vm457_vm1, %v15131_v24  ;;  %v14875_v26 = vld [vmem:[%s18268_s26 + $0x491] sm:$0xff]  ;;  %v14876_v17 = vld [vmem:[%s18268_s26 + $0x499] sm:$0xff] }
 0x468   : > { %v17823_v39 = vpop.f32.mrf.mxu1  ;;  %17966 = vmatmul.mubr.msk.f32.gmra.mxu1 %vm457_vm1, %v14873_v30  ;;  %v12498_v4 = vadd.f32 %v12497_v29, %v12496_v18  ;;  %v12110_v51 = vadd.f32 %v12109_v16, %v12108_v54  ;;  %18162 = vmatprep.mubr.msk.f32.mxu0 %vm457_vm1, %v15132_v15  ;;  %v12111_v25 = vsel %vm12097_vm2, %v21994_v3, 0.0  ;;  %v12501_v54 = vsel %vm12097_vm2, %v12367_v11, 0.0  ;;  %v15134_v29 = vld [vmem:[%s18268_s26 + $0x49a] sm:$0xff] }
 0x469   : > { %17968 = vmatprep.mubr.msk.f32.mxu1 %vm457_vm1, %v14874_v50  ;;  %v12499_v13 = vsel %vm12097_vm2, %v12366_v33, 0.0  ;;  %v22030_v56 = vadd.f32 %v11368_v32, %v10625_v9  ;;  %v10628_v30 = vadd.f32 %v17823_v39, %v21100_v12  ;;  %v11378_v24 = vpop.f32.mrf.mxu0  ;;  %v12369_v16 = vmul.f32 %v22019_v0, %v22019_v0 }
 0x46a   : > { %v10028_v43 = vpop.f32.mrf.mxu1  ;;  %v12112_v18 = vadd.f32 %v12111_v25, %v12110_v51  ;;  %v12500_v50 = vadd.f32 %v12499_v13, %v12498_v4  ;;  %v14877_v25 = vld [vmem:[%s18268_s26 + $0x4a1] sm:$0xff] }
 0x46b   : > { %v10627_v15 = vadd.f32 %v10028_v43, %v21105_v48  ;;  %v12113_v32 = vsel %vm12097_vm2, %v22030_v56, 0.0  ;;  %v12368_v12 = vmul.f32 %v22030_v56, %v22030_v56  ;;  %v22043_v9 = vadd.f32 %v18017_v55, %v10628_v30  ;;  %v18020_v11 = vpop.f32.mrf.mxu0  ;;  %18163 = vmatmul.mubr.msk.f32.gmra.mxu0 %vm457_vm1, %v15133_v41  ;;  %v15135_v13 = vld [vmem:[%s18268_s26 + $0x4a2] sm:$0xff]  ;;  %v14878_v41 = vld [vmem:[%s18268_s26 + $0x4b1] sm:$0xff] }
 0x46c   : > { %v17826_v33 = vpop.f32.mrf.mxu1  ;;  %17969 = vmatmul.mubr.msk.f32.gmra.mxu1 %vm457_vm1, %v14875_v26  ;;  %v12502_v48 = vadd.f32 %v12501_v54, %v12500_v50  ;;  %v12114_v39 = vadd.f32 %v12113_v32, %v12112_v18  ;;  %v12115_v55 = vsel %vm12097_vm2, %v22019_v0, 0.0  ;;  %18165 = vmatprep.mubr.msk.f32.mxu0 %vm457_vm1, %v15134_v29  ;;  %v15136_v54 = vld [vmem:[%s18268_s26 + $0x4b2] sm:$0xff]  ;;  %v12505_v50 = vsel %vm12097_vm2, %v12369_v16, 0.0 }
 0x46d   : > { %v22047_v4 = vadd.f32 %v11378_v24, %v10627_v15  ;;  %v10630_v51 = vadd.f32 %v17826_v33, %v21114_v19  ;;  %17971 = vmatprep.mubr.msk.f32.mxu1 %vm457_vm1, %v14876_v17  ;;  %v12503_v30 = vsel %vm12097_vm2, %v12368_v12, 0.0  ;;  %v11388_v43 = vpop.f32.mrf.mxu0  ;;  %v12371_v15 = vmul.f32 %v22043_v9, %v22043_v9 }
 0x46e   : > { %v10038_v26 = vpop.f32.mrf.mxu1  ;;  %v12116_v18 = vadd.f32 %v12115_v55, %v12114_v39  ;;  %v12504_v24 = vadd.f32 %v12503_v30, %v12502_v48 }
 0x46f   : > { %v12117_v19 = vsel %vm12097_vm2, %v22047_v4, 0.0  ;;  %v12370_v17 = vmul.f32 %v22047_v4, %v22047_v4  ;;  %v22066_v32 = vadd.f32 %v18020_v11, %v10630_v51  ;;  %v10629_v29 = vadd.f32 %v10038_v26, %v21119_v10  ;;  %v18023_v33 = vpop.f32.mrf.mxu0  ;;  %18166 = vmatmul.mubr.msk.f32.gmra.mxu0 %vm457_vm1, %v15135_v13  ;;  %v14879_v11 = vld [vmem:[%s18268_s26 + $0x4b9] sm:$0xff]  ;;  %v14880_v13 = vld [vmem:[%s18268_s26 + $0x4c1] sm:$0xff] }
 0x470   : > { %v17829_v12 = vpop.f32.mrf.mxu1  ;;  %17972 = vmatmul.mubr.msk.f32.gmra.mxu1 %vm457_vm1, %v14877_v25  ;;  %v12506_v48 = vadd.f32 %v12505_v50, %v12504_v24  ;;  %v12118_v39 = vadd.f32 %v12117_v19, %v12116_v18  ;;  %18168 = vmatprep.mubr.msk.f32.mxu0 %vm457_vm1, %v15136_v54  ;;  %v15137_v10 = vld [vmem:[%s18268_s26 + $0x4ba] sm:$0xff]  ;;  %v12119_v51 = vsel %vm12097_vm2, %v22043_v9, 0.0  ;;  %v15138_v24 = vld [vmem:[%s18268_s26 + $0x4c2] sm:$0xff]  ;;  %v12509_v54 = vsel %vm12097_vm2, %v12371_v15, 0.0  ;;  %v15139_v15 = vld [vmem:[%s18268_s26 + $0x4ca] sm:$0xff] }
 0x471   : > { %v12507_v55 = vsel %vm12097_vm2, %v12370_v17, 0.0  ;;  %v10632_v16 = vadd.f32 %v17829_v12, %v21128_v2  ;;  %17974 = vmatprep.mubr.msk.f32.mxu1 %vm457_vm1, %v14878_v41  ;;  %v22079_v25 = vadd.f32 %v11388_v43, %v10629_v29  ;;  %v11398_v26 = vpop.f32.mrf.mxu0  ;;  %v12373_v2 = vmul.f32 %v22066_v32, %v22066_v32 }
 0x472   : > { %v10048_v30 = vpop.f32.mrf.mxu1  ;;  %v12120_v18 = vadd.f32 %v12119_v51, %v12118_v39  ;;  %v12508_v19 = vadd.f32 %v12507_v55, %v12506_v48 }
 0x473   : > { %v10631_v41 = vadd.f32 %v10048_v30, %v21133_v1  ;;  %v12121_v17 = vsel %vm12097_vm2, %v22079_v25, 0.0  ;;  %v12372_v43 = vmul.f32 %v22079_v25, %v22079_v25  ;;  %v22091_v50 = vadd.f32 %v18023_v33, %v10632_v16  ;;  %v18026_v12 = vpop.f32.mrf.mxu0  ;;  %18169 = vmatmul.mubr.msk.f32.gmra.mxu0 %vm457_vm1, %v15137_v10  ;;  %v14881_v1 = vld [vmem:[%s18268_s26 + $0x4c9] sm:$0xff]  ;;  %v14882_v30 = vld [vmem:[%s18268_s26 + $0x4d9] sm:$0xff] }
 0x474   : > { %v17832_v29 = vpop.f32.mrf.mxu1  ;;  %17975 = vmatmul.mubr.msk.f32.gmra.mxu1 %vm457_vm1, %v14879_v11  ;;  %v12510_v48 = vadd.f32 %v12509_v54, %v12508_v19  ;;  %v12122_v39 = vadd.f32 %v12121_v17, %v12120_v18  ;;  %18171 = vmatprep.mubr.msk.f32.mxu0 %vm457_vm1, %v15138_v24  ;;  %v12123_v33 = vsel %vm12097_vm2, %v22066_v32, 0.0  ;;  %v12513_v18 = vsel %vm12097_vm2, %v12373_v2, 0.0  ;;  %v15140_v54 = vld [vmem:[%s18268_s26 + $0x4da] sm:$0xff] }
 0x475   : > { %17977 = vmatprep.mubr.msk.f32.mxu1 %vm457_vm1, %v14880_v13  ;;  %v12511_v55 = vsel %vm12097_vm2, %v12372_v43, 0.0  ;;  %v22102_v16 = vadd.f32 %v11398_v26, %v10631_v41  ;;  %v10634_v11 = vadd.f32 %v17832_v29, %v21142_v58  ;;  %v11408_v10 = vpop.f32.mrf.mxu0  ;;  %v12375_v17 = vmul.f32 %v22091_v50, %v22091_v50 }
 0x476   : > { %v10058_v51 = vpop.f32.mrf.mxu1  ;;  %v12124_v19 = vadd.f32 %v12123_v33, %v12122_v39  ;;  %v12512_v13 = vadd.f32 %v12511_v55, %v12510_v48  ;;  %v14883_v33 = vld [vmem:[%s18268_s26 + $0x4e1] sm:$0xff] }
 0x477   : > { %v10633_v24 = vadd.f32 %v10058_v51, %v21147_v57  ;;  %v12125_v26 = vsel %vm12097_vm2, %v22102_v16, 0.0  ;;  %v12374_v58 = vmul.f32 %v22102_v16, %v22102_v16  ;;  %v22115_v41 = vadd.f32 %v18026_v12, %v10634_v11  ;;  %v18029_v2 = vpop.f32.mrf.mxu0  ;;  %18172 = vmatmul.mubr.msk.f32.gmra.mxu0 %vm457_vm1, %v15139_v15  ;;  %v15141_v55 = vld [vmem:[%s18268_s26 + $0x4e2] sm:$0xff] }
 0x478   : > { %v17835_v43 = vpop.f32.mrf.mxu1  ;;  %17978 = vmatmul.mubr.msk.f32.gmra.mxu1 %vm457_vm1, %v14881_v1  ;;  %v12514_v57 = vadd.f32 %v12513_v18, %v12512_v13  ;;  %v12126_v29 = vadd.f32 %v12125_v26, %v12124_v19  ;;  %v12127_v12 = vsel %vm12097_vm2, %v22091_v50, 0.0  ;;  %18174 = vmatprep.mubr.msk.f32.mxu0 %vm457_vm1, %v15140_v54  ;;  %v14884_v15 = vld [vmem:[%s18268_s26 + $0x4e9] sm:$0xff]  ;;  %v12517_v13 = vsel %vm12097_vm2, %v12375_v17, 0.0 }
 0x479   : > { %v22119_v48 = vadd.f32 %v11408_v10, %v10633_v24  ;;  %v10636_v39 = vadd.f32 %v17835_v43, %v21156_v14  ;;  %17980 = vmatprep.mubr.msk.f32.mxu1 %vm457_vm1, %v14882_v30  ;;  %v12515_v11 = vsel %vm12097_vm2, %v12374_v58, 0.0  ;;  %v11418_v51 = vpop.f32.mrf.mxu0  ;;  %v15142_v18 = vld [vmem:[%s18268_s26 + $0x4ea] sm:$0xff]  ;;  %v12377_v24 = vmul.f32 %v22115_v41, %v22115_v41 }
 0x47a   : > { %v10068_v1 = vpop.f32.mrf.mxu1  ;;  %v12128_v19 = vadd.f32 %v12127_v12, %v12126_v29  ;;  %v12516_v10 = vadd.f32 %v12515_v11, %v12514_v57 }
 0x47b   : > { %v12129_v14 = vsel %vm12097_vm2, %v22119_v48, 0.0  ;;  %v12376_v30 = vmul.f32 %v22119_v48, %v22119_v48  ;;  %v22138_v26 = vadd.f32 %v18029_v2, %v10636_v39  ;;  %v10635_v54 = vadd.f32 %v10068_v1, %v21161_v46  ;;  %v18032_v43 = vpop.f32.mrf.mxu0  ;;  %18175 = vmatmul.mubr.msk.f32.gmra.mxu0 %vm457_vm1, %v15141_v55  ;;  %v14885_v2 = vld [vmem:[%s18268_s26 + $0x4f1] sm:$0xff]  ;;  %v14886_v55 = vld [vmem:[%s18268_s26 + $0x501] sm:$0xff] }
 0x47c   : > { %v17838_v58 = vpop.f32.mrf.mxu1  ;;  %17981 = vmatmul.mubr.msk.f32.gmra.mxu1 %vm457_vm1, %v14883_v33  ;;  %v12518_v57 = vadd.f32 %v12517_v13, %v12516_v10  ;;  %v12130_v29 = vadd.f32 %v12129_v14, %v12128_v19  ;;  %18177 = vmatprep.mubr.msk.f32.mxu0 %vm457_vm1, %v15142_v18  ;;  %v15143_v46 = vld [vmem:[%s18268_s26 + $0x4f2] sm:$0xff]  ;;  %v12131_v39 = vsel %vm12097_vm2, %v22115_v41, 0.0  ;;  %v15144_v10 = vld [vmem:[%s18268_s26 + $0x502] sm:$0xff]  ;;  %v12521_v18 = vsel %vm12097_vm2, %v12377_v24, 0.0  ;;  %v15145_v24 = vld [vmem:[%s18268_s26 + $0x50a] sm:$0xff] }
 0x47d   : > { %v12519_v12 = vsel %vm12097_vm2, %v12376_v30, 0.0  ;;  %v10638_v17 = vadd.f32 %v17838_v58, %v21170_v20  ;;  %17983 = vmatprep.mubr.msk.f32.mxu1 %vm457_vm1, %v14884_v15  ;;  %v22151_v33 = vadd.f32 %v11418_v51, %v10635_v54  ;;  %v11428_v1 = vpop.f32.mrf.mxu0  ;;  %v12379_v20 = vmul.f32 %v22138_v26, %v22138_v26 }
 0x47e   : > { %v10078_v11 = vpop.f32.mrf.mxu1  ;;  %v12132_v19 = vadd.f32 %v12131_v39, %v12130_v29  ;;  %v12520_v14 = vadd.f32 %v12519_v12, %v12518_v57 }
 0x47f   : > { %v10637_v15 = vadd.f32 %v10078_v11, %v21175_v63  ;;  %v12133_v30 = vsel %vm12097_vm2, %v22151_v33, 0.0  ;;  %v12378_v51 = vmul.f32 %v22151_v33, %v22151_v33  ;;  %v22163_v13 = vadd.f32 %v18032_v43, %v10638_v17  ;;  %v18035_v58 = vpop.f32.mrf.mxu0  ;;  %18178 = vmatmul.mubr.msk.f32.gmra.mxu0 %vm457_vm1, %v15143_v46  ;;  %v14887_v63 = vld [vmem:[%s18268_s26 + $0x509] sm:$0xff]  ;;  %v14888_v11 = vld [vmem:[%s18268_s26 + $0x511] sm:$0xff] }
 0x480   : > { %v17841_v54 = vpop.f32.mrf.mxu1  ;;  %17984 = vmatmul.mubr.msk.f32.gmra.mxu1 %vm457_vm1, %v14885_v2  ;;  %v12522_v57 = vadd.f32 %v12521_v18, %v12520_v14  ;;  %v12134_v29 = vadd.f32 %v12133_v30, %v12132_v19  ;;  %18180 = vmatprep.mubr.msk.f32.mxu0 %vm457_vm1, %v15144_v10  ;;  %v12135_v43 = vsel %vm12097_vm2, %v22138_v26, 0.0  ;;  %v12525_v19 = vsel %vm12097_vm2, %v12379_v20, 0.0  ;;  %v15146_v18 = vld [vmem:[%s18268_s26 + $0x512] sm:$0xff] }
 0x481   : > { %17986 = vmatprep.mubr.msk.f32.mxu1 %vm457_vm1, %v14886_v55  ;;  %v12523_v12 = vsel %vm12097_vm2, %v12378_v51, 0.0  ;;  %v22174_v17 = vadd.f32 %v11428_v1, %v10637_v15  ;;  %v10640_v2 = vadd.f32 %v17841_v54, %v21184_v28  ;;  %v11438_v46 = vpop.f32.mrf.mxu0  ;;  %v12381_v30 = vmul.f32 %v22163_v13, %v22163_v13 }
 0x482   : > { %v10088_v39 = vpop.f32.mrf.mxu1  ;;  %v12136_v14 = vadd.f32 %v12135_v43, %v12134_v29  ;;  %v12524_v55 = vadd.f32 %v12523_v12, %v12522_v57  ;;  %v14889_v43 = vld [vmem:[%s18268_s26 + $0x519] sm:$0xff] }
 0x483   : > { %v10639_v10 = vadd.f32 %v10088_v39, %v21189_v62  ;;  %v12137_v1 = vsel %vm12097_vm2, %v22174_v17, 0.0  ;;  %v12380_v28 = vmul.f32 %v22174_v17, %v22174_v17  ;;  %v22187_v15 = vadd.f32 %v18035_v58, %v10640_v2  ;;  %v18038_v20 = vpop.f32.mrf.mxu0  ;;  %18181 = vmatmul.mubr.msk.f32.gmra.mxu0 %vm457_vm1, %v15145_v24  ;;  %v15147_v12 = vld [vmem:[%s18268_s26 + $0x51a] sm:$0xff]  ;;  %v14890_v24 = vld [vmem:[%s18268_s26 + $0x529] sm:$0xff] }
 0x484   : > { %v17844_v51 = vpop.f32.mrf.mxu1  ;;  %17987 = vmatmul.mubr.msk.f32.gmra.mxu1 %vm457_vm1, %v14887_v63  ;;  %v12526_v62 = vadd.f32 %v12525_v19, %v12524_v55  ;;  %v12138_v54 = vadd.f32 %v12137_v1, %v12136_v14  ;;  %v12139_v58 = vsel %vm12097_vm2, %v22163_v13, 0.0  ;;  %18183 = vmatprep.mubr.msk.f32.mxu0 %vm457_vm1, %v15146_v18  ;;  %v15148_v19 = vld [vmem:[%s18268_s26 + $0x52a] sm:$0xff]  ;;  %v12529_v55 = vsel %vm12097_vm2, %v12381_v30, 0.0 }
 0x485   : > { %v22191_v57 = vadd.f32 %v11438_v46, %v10639_v10  ;;  %v10642_v29 = vadd.f32 %v17844_v51, %v21198_v36  ;;  %17989 = vmatprep.mubr.msk.f32.mxu1 %vm457_vm1, %v14888_v11  ;;  %v12527_v2 = vsel %vm12097_vm2, %v12380_v28, 0.0  ;;  %v11448_v39 = vpop.f32.mrf.mxu0  ;;  %v12383_v10 = vmul.f32 %v22187_v15, %v22187_v15 }
 0x486   : > { %v10098_v63 = vpop.f32.mrf.mxu1  ;;  %v12140_v14 = vadd.f32 %v12139_v58, %v12138_v54  ;;  %v12528_v46 = vadd.f32 %v12527_v2, %v12526_v62 }
 0x487   : > { %v12141_v36 = vsel %vm12097_vm2, %v22191_v57, 0.0  ;;  %v12382_v11 = vmul.f32 %v22191_v57, %v22191_v57  ;;  %v22210_v1 = vadd.f32 %v18038_v20, %v10642_v29  ;;  %v10641_v18 = vadd.f32 %v10098_v63, %v21203_v6  ;;  %v18041_v51 = vpop.f32.mrf.mxu0  ;;  %18184 = vmatmul.mubr.msk.f32.gmra.mxu0 %vm457_vm1, %v15147_v12  ;;  %v14891_v20 = vld [vmem:[%s18268_s26 + $0x531] sm:$0xff]  ;;  %v14892_v12 = vld [vmem:[%s18268_s26 + $0x539] sm:$0xff] }
 0x488   : > { %v17847_v28 = vpop.f32.mrf.mxu1  ;;  %17990 = vmatmul.mubr.msk.f32.gmra.mxu1 %vm457_vm1, %v14889_v43  ;;  %v12530_v62 = vadd.f32 %v12529_v55, %v12528_v46  ;;  %v12142_v54 = vadd.f32 %v12141_v36, %v12140_v14  ;;  %18186 = vmatprep.mubr.msk.f32.mxu0 %vm457_vm1, %v15148_v19  ;;  %v15149_v6 = vld [vmem:[%s18268_s26 + $0x532] sm:$0xff]  ;;  %v12143_v29 = vsel %vm12097_vm2, %v22187_v15, 0.0  ;;  %v15150_v46 = vld [vmem:[%s18268_s26 + $0x53a] sm:$0xff]  ;;  %v12533_v19 = vsel %vm12097_vm2, %v12383_v10, 0.0  ;;  %v15151_v10 = vld [vmem:[%s18268_s26 + $0x542] sm:$0xff] }
 0x489   : > { %v12531_v58 = vsel %vm12097_vm2, %v12382_v11, 0.0  ;;  %v10644_v30 = vadd.f32 %v17847_v28, %v21212_v44  ;;  %17992 = vmatprep.mubr.msk.f32.mxu1 %vm457_vm1, %v14890_v24  ;;  %v22223_v43 = vadd.f32 %v11448_v39, %v10641_v18  ;;  %v11458_v63 = vpop.f32.mrf.mxu0  ;;  %v12385_v44 = vmul.f32 %v22210_v1, %v22210_v1 }
 0x48a   : > { %v10108_v2 = vpop.f32.mrf.mxu1  ;;  %v12144_v14 = vadd.f32 %v12143_v29, %v12142_v54  ;;  %v12532_v36 = vadd.f32 %v12531_v58, %v12530_v62  ;;  %v12147_v58 = vsel %vm12097_vm2, %v22210_v1, 0.0 }
 0x48b   : > { %v10643_v24 = vadd.f32 %v10108_v2, %v21217_v8  ;;  %v12145_v11 = vsel %vm12097_vm2, %v22223_v43, 0.0  ;;  %v12384_v39 = vmul.f32 %v22223_v43, %v22223_v43  ;;  %v22235_v55 = vadd.f32 %v18041_v51, %v10644_v30  ;;  %v18044_v28 = vpop.f32.mrf.mxu0  ;;  %18187 = vmatmul.mubr.msk.f32.gmra.mxu0 %vm457_vm1, %v15149_v6  ;;  %v14893_v8 = vld [vmem:[%s18268_s26 + $0x541] sm:$0xff] }
 0x48c   : > { %v17850_v18 = vpop.f32.mrf.mxu1  ;;  %17993 = vmatmul.mubr.msk.f32.gmra.mxu1 %vm457_vm1, %v14891_v20  ;;  %v12534_v62 = vadd.f32 %v12533_v19, %v12532_v36  ;;  %v12146_v54 = vadd.f32 %v12145_v11, %v12144_v14  ;;  %18189 = vmatprep.mubr.msk.f32.mxu0 %vm457_vm1, %v15150_v46  ;;  %v12537_v6 = vsel %vm12097_vm2, %v12385_v44, 0.0 }
 0x48d   : > { %17995 = vmatprep.mubr.msk.f32.mxu1 %vm457_vm1, %v14892_v12  ;;  %v12535_v51 = vsel %vm12097_vm2, %v12384_v39, 0.0  ;;  %v22246_v30 = vadd.f32 %v11458_v63, %v10643_v24  ;;  %v10646_v20 = vadd.f32 %v17850_v18, %v21226_v52  ;;  %v11468_v2 = vpop.f32.mrf.mxu0  ;;  %v12387_v46 = vmul.f32 %v22235_v55, %v22235_v55 }
 0x48e   : > { %v10118_v29 = vpop.f32.mrf.mxu1  ;;  %v12148_v14 = vadd.f32 %v12147_v58, %v12146_v54  ;;  %v12536_v36 = vadd.f32 %v12535_v51, %v12534_v62  ;;  %v12151_v62 = vsel %vm12097_vm2, %v22235_v55, 0.0 }
 0x48f   : > { %v10645_v12 = vadd.f32 %v10118_v29, %v21231_v7  ;;  %v12149_v19 = vsel %vm12097_vm2, %v22246_v30, 0.0  ;;  %v12386_v63 = vmul.f32 %v22246_v30, %v22246_v30  ;;  %v22257_v24 = vadd.f32 %v18044_v28, %v10646_v20  ;;  %v18047_v11 = vpop.f32.mrf.mxu0  ;;  %18190 = vmatmul.mubr.msk.f32.gmra.mxu0 %vm457_vm1, %v15151_v10 }
 0x490   : > { %v17853_v52 = vpop.f32.mrf.mxu1  ;;  %17996 = vmatmul.mubr.msk.f32.gmra.mxu1 %vm457_vm1, %v14893_v8  ;;  %v12538_v44 = vadd.f32 %v12537_v6, %v12536_v36  ;;  %v12150_v39 = vadd.f32 %v12149_v19, %v12148_v14  ;;  %v12541_v29 = vsel %vm12097_vm2, %v12387_v46, 0.0 }
 0x491   : > { %v22261_v7 = vadd.f32 %v11468_v2, %v10645_v12  ;;  %v10648_v18 = vadd.f32 %v17853_v52, %v21240_v61  ;;  %v12539_v54 = vsel %vm12097_vm2, %v12386_v63, 0.0  ;;  %v11478_v28 = vpop.f32.mrf.mxu0  ;;  %v12389_v61 = vmul.f32 %v22257_v24, %v22257_v24 }
 0x492   : > { %v10128_v58 = vpop.f32.mrf.mxu1  ;;  %v12152_v51 = vadd.f32 %v12151_v62, %v12150_v39  ;;  %v12540_v20 = vadd.f32 %v12539_v54, %v12538_v44  ;;  %v12155_v44 = vsel %vm12097_vm2, %v22257_v24, 0.0 }
 0x493   : > { %v12153_v8 = vsel %vm12097_vm2, %v22261_v7, 0.0  ;;  %v12388_v10 = vmul.f32 %v22261_v7, %v22261_v7  ;;  %v22274_v2 = vadd.f32 %v18047_v11, %v10648_v18  ;;  %v10647_v6 = vadd.f32 %v10128_v58, %v21245_v27  ;;  %v18050_v36 = vpop.f32.mrf.mxu0 }
 0x494   : > { %v17856_v14 = vpop.f32.mrf.mxu1  ;;  %v12542_v12 = vadd.f32 %v12541_v29, %v12540_v20  ;;  %v12154_v19 = vadd.f32 %v12153_v8, %v12152_v51  ;;  %v12545_v58 = vsel %vm12097_vm2, %v12389_v61, 0.0 }
 0x495   : > { %v12543_v63 = vsel %vm12097_vm2, %v12388_v10, 0.0  ;;  %v10650_v52 = vadd.f32 %v17856_v14, %v21254_v45  ;;  %v22281_v39 = vadd.f32 %v11478_v28, %v10647_v6  ;;  %v11488_v62 = vpop.f32.mrf.mxu0  ;;  %v12391_v27 = vmul.f32 %v22274_v2, %v22274_v2 }
 0x496   : > { %v10138_v46 = vpop.f32.mrf.mxu1  ;;  %v12156_v54 = vadd.f32 %v12155_v44, %v12154_v19  ;;  %v12544_v11 = vadd.f32 %v12543_v63, %v12542_v12  ;;  %v12159_v6 = vsel %vm12097_vm2, %v22274_v2, 0.0 }
 0x497   : > { %v10649_v18 = vadd.f32 %v10138_v46, %v21259_v22  ;;  %v12157_v51 = vsel %vm12097_vm2, %v22281_v39, 0.0  ;;  %v12390_v45 = vmul.f32 %v22281_v39, %v22281_v39  ;;  %v22291_v20 = vadd.f32 %v18050_v36, %v10650_v52  ;;  %v18053_v8 = vpop.f32.mrf.mxu0 }
 0x498   : > { %v17859_v28 = vpop.f32.mrf.mxu1  ;;  %v12546_v10 = vadd.f32 %v12545_v58, %v12544_v11  ;;  %v12158_v29 = vadd.f32 %v12157_v51, %v12156_v54  ;;  %v12549_v63 = vsel %vm12097_vm2, %v12391_v27, 0.0 }
 0x499   : > { %v12547_v14 = vsel %vm12097_vm2, %v12390_v45, 0.0  ;;  %v22296_v22 = vadd.f32 %v11488_v62, %v10649_v18  ;;  %v10652_v61 = vadd.f32 %v17859_v28, %v21268_v38  ;;  %v11498_v19 = vpop.f32.mrf.mxu0  ;;  %v12393_v46 = vmul.f32 %v22291_v20, %v22291_v20 }
 0x49a   : > { %v10148_v12 = vpop.f32.mrf.mxu1  ;;  %v12160_v44 = vadd.f32 %v12159_v6, %v12158_v29  ;;  %v12548_v36 = vadd.f32 %v12547_v14, %v12546_v10 }
 0x49b   : > { %v10651_v52 = vadd.f32 %v10148_v12, %v21273_v37  ;;  %v12161_v54 = vsel %vm12097_vm2, %v22296_v22, 0.0  ;;  %v12392_v62 = vmul.f32 %v22296_v22, %v22296_v22  ;;  %v22307_v11 = vadd.f32 %v18053_v8, %v10652_v61  ;;  %v18056_v18 = vpop.f32.mrf.mxu0 }
 0x49c   : > { %v17862_v38 = vpop.f32.mrf.mxu1  ;;  %v12550_v58 = vadd.f32 %v12549_v63, %v12548_v36  ;;  %v12162_v51 = vadd.f32 %v12161_v54, %v12160_v44  ;;  %v12163_v37 = vsel %vm12097_vm2, %v22291_v20, 0.0  ;;  %v12553_v12 = vsel %vm12097_vm2, %v12393_v46, 0.0 }
 0x49d   : > { %v22309_v27 = vadd.f32 %v11498_v19, %v10651_v52  ;;  %v10654_v45 = vadd.f32 %v17862_v38, %v21282_v35  ;;  %v12551_v28 = vsel %vm12097_vm2, %v12392_v62, 0.0  ;;  %v11508_v29 = vpop.f32.mrf.mxu0  ;;  %v12395_v35 = vmul.f32 %v22307_v11, %v22307_v11 }
 0x49e   : > { %v10158_v10 = vpop.f32.mrf.mxu1  ;;  %v12164_v6 = vadd.f32 %v12163_v37, %v12162_v51  ;;  %v12552_v14 = vadd.f32 %v12551_v28, %v12550_v58  ;;  %v12167_v58 = vsel %vm12097_vm2, %v22307_v11, 0.0 }
 0x49f   : > { %v12165_v8 = vsel %vm12097_vm2, %v22309_v27, 0.0  ;;  %v12394_v61 = vmul.f32 %v22309_v27, %v22309_v27  ;;  %v22322_v19 = vadd.f32 %v18056_v18, %v10654_v45  ;;  %v10653_v63 = vadd.f32 %v10158_v10, %v21287_v53  ;;  %v18059_v36 = vpop.f32.mrf.mxu0 }
 0x4a0   : > { %v17865_v44 = vpop.f32.mrf.mxu1  ;;  %v12554_v52 = vadd.f32 %v12553_v12, %v12552_v14  ;;  %v12166_v54 = vadd.f32 %v12165_v8, %v12164_v6  ;;  %v12557_v10 = vsel %vm12097_vm2, %v12395_v35, 0.0 }
 0x4a1   : > { %v12555_v62 = vsel %vm12097_vm2, %v12394_v61, 0.0  ;;  %v10656_v38 = vadd.f32 %v17865_v44, %v21296_v59  ;;  %v22329_v51 = vadd.f32 %v11508_v29, %v10653_v63  ;;  %v11518_v37 = vpop.f32.mrf.mxu0  ;;  %v12397_v53 = vmul.f32 %v22322_v19, %v22322_v19 }
 0x4a2   : > { %v10168_v46 = vpop.f32.mrf.mxu1  ;;  %v12168_v28 = vadd.f32 %v12167_v58, %v12166_v54  ;;  %v12556_v18 = vadd.f32 %v12555_v62, %v12554_v52  ;;  %v12171_v63 = vsel %vm12097_vm2, %v22322_v19, 0.0 }
 0x4a3   : > { %v10655_v45 = vadd.f32 %v10168_v46, %v21301_v47  ;;  %v12169_v6 = vsel %vm12097_vm2, %v22329_v51, 0.0  ;;  %v12396_v59 = vmul.f32 %v22329_v51, %v22329_v51  ;;  %v22339_v14 = vadd.f32 %v18059_v36, %v10656_v38  ;;  %v18062_v8 = vpop.f32.mrf.mxu0 }
 0x4a4   : > { %v17868_v29 = vpop.f32.mrf.mxu1  ;;  %v12558_v61 = vadd.f32 %v12557_v10, %v12556_v18  ;;  %v12170_v12 = vadd.f32 %v12169_v6, %v12168_v28  ;;  %v12561_v62 = vsel %vm12097_vm2, %v12397_v53, 0.0 }
 0x4a5   : > { %v12559_v44 = vsel %vm12097_vm2, %v12396_v59, 0.0  ;;  %v22344_v47 = vadd.f32 %v11518_v37, %v10655_v45  ;;  %v10658_v35 = vadd.f32 %v17868_v29, %v21310_v49  ;;  %v11528_v54 = vpop.f32.mrf.mxu0  ;;  %v12399_v46 = vmul.f32 %v22339_v14, %v22339_v14 }
 0x4a6   : > { %v10178_v52 = vpop.f32.mrf.mxu1  ;;  %v12172_v58 = vadd.f32 %v12171_v63, %v12170_v12  ;;  %v12560_v36 = vadd.f32 %v12559_v44, %v12558_v61 }
 0x4a7   : > { %v10657_v38 = vadd.f32 %v10178_v52, %v21315_v5  ;;  %v12173_v28 = vsel %vm12097_vm2, %v22344_v47, 0.0  ;;  %v12398_v37 = vmul.f32 %v22344_v47, %v22344_v47  ;;  %v22355_v18 = vadd.f32 %v18062_v8, %v10658_v35  ;;  %v18065_v45 = vpop.f32.mrf.mxu0 }
 0x4a8   : > { %v17871_v49 = vpop.f32.mrf.mxu1  ;;  %v12562_v10 = vadd.f32 %v12561_v62, %v12560_v36  ;;  %v12174_v6 = vadd.f32 %v12173_v28, %v12172_v58  ;;  %v12175_v5 = vsel %vm12097_vm2, %v22339_v14, 0.0  ;;  %v12565_v52 = vsel %vm12097_vm2, %v12399_v46, 0.0 }
 0x4a9   : > { %25164 = vst [vmem:[#allocation88_spill] sm:$0xff] %v22355_v18  ;;  %v22357_v53 = vadd.f32 %v11528_v54, %v10657_v38  ;;  %v10660_v59 = vadd.f32 %v17871_v49, %v21324_v21  ;;  %v12563_v29 = vsel %vm12097_vm2, %v12398_v37, 0.0  ;;  %v11538_v12 = vpop.f32.mrf.mxu0  ;;  %v12401_v21 = vmul.f32 %v22355_v18, %v22355_v18  ;;  %v25167_v49 = vld [vmem:[#allocation75_spill] sm:$0xff] }
 0x4aa   : > { %v10188_v61 = vpop.f32.mrf.mxu1  ;;  %v12176_v63 = vadd.f32 %v12175_v5, %v12174_v6  ;;  %v12564_v44 = vadd.f32 %v12563_v29, %v12562_v10  ;;  %v12179_v6 = vsel %vm12097_vm2, %v22355_v18, 0.0 }
 0x4ab   : > { %25165 = vst [vmem:[#allocation89_spill] sm:$0xff] %v22357_v53  ;;  %v12177_v8 = vsel %vm12097_vm2, %v22357_v53, 0.0  ;;  %v12400_v35 = vmul.f32 %v22357_v53, %v22357_v53  ;;  %v22370_v54 = vadd.f32 %v18065_v45, %v10660_v59  ;;  %v10659_v62 = vadd.f32 %v10188_v61, %v21329_v23  ;;  %v18068_v36 = vpop.f32.mrf.mxu0  ;;  %v25169_v59 = vld [vmem:[#allocation77_spill] sm:$0xff] }
 0x4ac   : > { %v17874_v58 = vpop.f32.mrf.mxu1  ;;  %v12566_v38 = vadd.f32 %v12565_v52, %v12564_v44  ;;  %v12178_v28 = vadd.f32 %v12177_v8, %v12176_v63  ;;  %v12569_v63 = vsel %vm12097_vm2, %v12401_v21, 0.0  ;;  %v25172_v21 = vld [vmem:[#allocation79_spill] sm:$0xff] }
 0x4ad   : > { %25166 = vst [vmem:[#allocation90_spill] sm:$0xff] %v22370_v54  ;;  %v12567_v37 = vsel %vm12097_vm2, %v12400_v35, 0.0  ;;  %v10662_v10 = vadd.f32 %v17874_v58, %v25167_v49  ;;  %v22377_v5 = vadd.f32 %v11538_v12, %v10659_v62  ;;  %v11548_v29 = vpop.f32.mrf.mxu0  ;;  %v12403_v23 = vmul.f32 %v22370_v54, %v22370_v54 }
 0x4ae   : > { %v10198_v46 = vpop.f32.mrf.mxu1  ;;  %v12180_v53 = vadd.f32 %v12179_v6, %v12178_v28  ;;  %v12568_v45 = vadd.f32 %v12567_v37, %v12566_v38  ;;  %v12183_v38 = vsel %vm12097_vm2, %v22370_v54, 0.0 }
 0x4af   : > { %25168 = vst [vmem:[#allocation75_spill] sm:$0xff] %v22377_v5  ;;  %v10661_v61 = vadd.f32 %v10198_v46, %v25169_v59  ;;  %v12181_v44 = vsel %vm12097_vm2, %v22377_v5, 0.0  ;;  %v12402_v8 = vmul.f32 %v22377_v5, %v22377_v5  ;;  %v22387_v35 = vadd.f32 %v18068_v36, %v10662_v10  ;;  %v18071_v52 = vpop.f32.mrf.mxu0  ;;  %v25173_v10 = vld [vmem:[#allocation81_spill] sm:$0xff] }
 0x4b0   : > { %v17877_v12 = vpop.f32.mrf.mxu1  ;;  %v12570_v62 = vadd.f32 %v12569_v63, %v12568_v45  ;;  %v12182_v58 = vadd.f32 %v12181_v44, %v12180_v53  ;;  %v12573_v59 = vsel %vm12097_vm2, %v12403_v23, 0.0 }
 0x4b1   : > { %25170 = vst [vmem:[#allocation77_spill] sm:$0xff] %v22387_v35  ;;  %v12571_v28 = vsel %vm12097_vm2, %v12402_v8, 0.0  ;;  %v22392_v37 = vadd.f32 %v11548_v29, %v10661_v61  ;;  %v10664_v49 = vadd.f32 %v17877_v12, %v25172_v21  ;;  %v11558_v46 = vpop.f32.mrf.mxu0  ;;  %v12405_v53 = vmul.f32 %v22387_v35, %v22387_v35 }
 0x4b2   : > { %v10208_v6 = vpop.f32.mrf.mxu1  ;;  %v12184_v5 = vadd.f32 %v12183_v38, %v12182_v58  ;;  %v12572_v36 = vadd.f32 %v12571_v28, %v12570_v62  ;;  %v25176_v62 = vld [vmem:[#allocation82_spill] sm:$0xff]  ;;  %v12187_v38 = vsel %vm12097_vm2, %v22387_v35, 0.0 }
 0x4b3   : > { %25171 = vst [vmem:[#allocation91_spill] sm:$0xff] %v22392_v37  ;;  %v10663_v18 = vadd.f32 %v10208_v6, %v25173_v10  ;;  %v12185_v45 = vsel %vm12097_vm2, %v22392_v37, 0.0  ;;  %v12404_v29 = vmul.f32 %v22392_v37, %v22392_v37  ;;  %v22403_v61 = vadd.f32 %v18071_v52, %v10664_v49  ;;  %v18074_v44 = vpop.f32.mrf.mxu0 }
 0x4b4   : > { %v17880_v63 = vpop.f32.mrf.mxu1  ;;  %v12574_v8 = vadd.f32 %v12573_v59, %v12572_v36  ;;  %v12186_v12 = vadd.f32 %v12185_v45, %v12184_v5  ;;  %v25178_v59 = vld [vmem:[#allocation83_spill] sm:$0xff] }
 0x4b5   : > { %25174 = vst [vmem:[#allocation79_spill] sm:$0xff] %v22403_v61  ;;  %v22405_v23 = vadd.f32 %v11558_v46, %v10663_v18  ;;  %v10666_v58 = vadd.f32 %v17880_v63, %v25176_v62  ;;  %v12575_v28 = vsel %vm12097_vm2, %v12404_v29, 0.0  ;;  %v11568_v6 = vpop.f32.mrf.mxu0  ;;  %v12577_v18 = vsel %vm12097_vm2, %v12405_v53, 0.0  ;;  %v25179_v62 = vld [vmem:[#allocation50_spill] sm:$0xff] }
 0x4b6   : > { %v10218_v21 = vpop.f32.mrf.mxu1  ;;  %v12188_v10 = vadd.f32 %v12187_v38, %v12186_v12  ;;  %v12576_v54 = vadd.f32 %v12575_v28, %v12574_v8  ;;  %v12407_v5 = vmul.f32 %v22403_v61, %v22403_v61  ;;  %v12191_v28 = vsel %vm12097_vm2, %v22403_v61, 0.0 }
 0x4b7   : > { %25175 = vst [vmem:[#allocation81_spill] sm:$0xff] %v22405_v23  ;;  %v12189_v52 = vsel %vm12097_vm2, %v22405_v23, 0.0  ;;  %v12406_v49 = vmul.f32 %v22405_v23, %v22405_v23  ;;  %v22418_v46 = vadd.f32 %v18074_v44, %v10666_v58  ;;  %v10665_v36 = vadd.f32 %v10218_v21, %v25178_v59  ;;  %v18077_v29 = vpop.f32.mrf.mxu0  ;;  %v25181_v21 = vld [vmem:[#allocation52_spill] sm:$0xff] }
 0x4b8   : > { %v17883_v45 = vpop.f32.mrf.mxu1  ;;  %v12578_v63 = vadd.f32 %v12577_v18, %v12576_v54  ;;  %v12190_v12 = vadd.f32 %v12189_v52, %v12188_v10  ;;  %v12581_v54 = vsel %vm12097_vm2, %v12407_v5, 0.0  ;;  %v25184_v5 = vld [vmem:[#allocation54_spill] sm:$0xff] }
 0x4b9   : > { %25177 = vst [vmem:[#allocation82_spill] sm:$0xff] %v22418_v46  ;;  %v12579_v8 = vsel %vm12097_vm2, %v12406_v49, 0.0  ;;  %v10668_v38 = vadd.f32 %v17883_v45, %v25179_v62  ;;  %v22425_v23 = vadd.f32 %v11568_v6, %v10665_v36  ;;  %v11578_v35 = vpop.f32.mrf.mxu0  ;;  %v12409_v58 = vmul.f32 %v22418_v46, %v22418_v46 }
 0x4ba   : > { %v10228_v53 = vpop.f32.mrf.mxu1  ;;  %v12192_v37 = vadd.f32 %v12191_v28, %v12190_v12  ;;  %v12580_v44 = vadd.f32 %v12579_v8, %v12578_v63  ;;  %v12195_v63 = vsel %vm12097_vm2, %v22418_v46, 0.0 }
 0x4bb   : > { %25180 = vst [vmem:[#allocation83_spill] sm:$0xff] %v22425_v23  ;;  %v10667_v59 = vadd.f32 %v10228_v53, %v25181_v21  ;;  %v12193_v10 = vsel %vm12097_vm2, %v22425_v23, 0.0  ;;  %v12408_v52 = vmul.f32 %v22425_v23, %v22425_v23  ;;  %v22435_v49 = vadd.f32 %v18077_v29, %v10668_v38  ;;  %v18080_v18 = vpop.f32.mrf.mxu0  ;;  %v25185_v38 = vld [vmem:[#allocation56_spill] sm:$0xff] }
 0x4bc   : > { %v17886_v6 = vpop.f32.mrf.mxu1  ;;  %v12582_v36 = vadd.f32 %v12581_v54, %v12580_v44  ;;  %v12194_v45 = vadd.f32 %v12193_v10, %v12192_v37  ;;  %v12585_v21 = vsel %vm12097_vm2, %v12409_v58, 0.0 }
 0x4bd   : > { %25182 = vst [vmem:[#allocation50_spill] sm:$0xff] %v22435_v49  ;;  %v12583_v12 = vsel %vm12097_vm2, %v12408_v52, 0.0  ;;  %v22440_v8 = vadd.f32 %v11578_v35, %v10667_v59  ;;  %v10670_v62 = vadd.f32 %v17886_v6, %v25184_v5  ;;  %v11588_v53 = vpop.f32.mrf.mxu0  ;;  %v12411_v37 = vmul.f32 %v22435_v49, %v22435_v49 }
 0x4be   : > { %v10238_v28 = vpop.f32.mrf.mxu1  ;;  %v12196_v23 = vadd.f32 %v12195_v63, %v12194_v45  ;;  %v12584_v29 = vadd.f32 %v12583_v12, %v12582_v36  ;;  %v25188_v36 = vld [vmem:[#allocation58_spill] sm:$0xff]  ;;  %v12199_v63 = vsel %vm12097_vm2, %v22435_v49, 0.0 }
 0x4bf   : > { %25183 = vst [vmem:[#allocation52_spill] sm:$0xff] %v22440_v8  ;;  %v10669_v61 = vadd.f32 %v10238_v28, %v25185_v38  ;;  %v12197_v44 = vsel %vm12097_vm2, %v22440_v8, 0.0  ;;  %v12410_v35 = vmul.f32 %v22440_v8, %v22440_v8  ;;  %v22451_v59 = vadd.f32 %v18080_v18, %v10670_v62  ;;  %v18083_v10 = vpop.f32.mrf.mxu0 }
 0x4c0   : > { %v17889_v54 = vpop.f32.mrf.mxu1  ;;  %v12586_v52 = vadd.f32 %v12585_v21, %v12584_v29  ;;  %v12198_v6 = vadd.f32 %v12197_v44, %v12196_v23  ;;  %v25190_v21 = vld [vmem:[#allocation60_spill] sm:$0xff] }
 0x4c1   : > { %25186 = vst [vmem:[#allocation54_spill] sm:$0xff] %v22451_v59  ;;  %v22453_v58 = vadd.f32 %v11588_v53, %v10669_v61  ;;  %v10672_v45 = vadd.f32 %v17889_v54, %v25188_v36  ;;  %v12587_v12 = vsel %vm12097_vm2, %v12410_v35, 0.0  ;;  %v11598_v28 = vpop.f32.mrf.mxu0  ;;  %v12589_v61 = vsel %vm12097_vm2, %v12411_v37, 0.0  ;;  %v25191_v36 = vld [vmem:[#allocation62_spill] sm:$0xff] }
 0x4c2   : > { %v10248_v5 = vpop.f32.mrf.mxu1  ;;  %v12200_v38 = vadd.f32 %v12199_v63, %v12198_v6  ;;  %v12588_v46 = vadd.f32 %v12587_v12, %v12586_v52  ;;  %v12413_v23 = vmul.f32 %v22451_v59, %v22451_v59  ;;  %v12203_v12 = vsel %vm12097_vm2, %v22451_v59, 0.0 }
 0x4c3   : > { %25187 = vst [vmem:[#allocation56_spill] sm:$0xff] %v22453_v58  ;;  %v12201_v18 = vsel %vm12097_vm2, %v22453_v58, 0.0  ;;  %v12412_v62 = vmul.f32 %v22453_v58, %v22453_v58  ;;  %v22466_v53 = vadd.f32 %v18083_v10, %v10672_v45  ;;  %v10671_v29 = vadd.f32 %v10248_v5, %v25190_v21  ;;  %v18086_v35 = vpop.f32.mrf.mxu0  ;;  %v25193_v5 = vld [vmem:[#allocation64_spill] sm:$0xff] }
 0x4c4   : > { %v17892_v44 = vpop.f32.mrf.mxu1  ;;  %v12590_v54 = vadd.f32 %v12589_v61, %v12588_v46  ;;  %v12202_v6 = vadd.f32 %v12201_v18, %v12200_v38  ;;  %v12593_v46 = vsel %vm12097_vm2, %v12413_v23, 0.0  ;;  %v25196_v23 = vld [vmem:[#allocation66_spill] sm:$0xff] }
 0x4c5   : > { %25189 = vst [vmem:[#allocation58_spill] sm:$0xff] %v22466_v53  ;;  %v12591_v52 = vsel %vm12097_vm2, %v12412_v62, 0.0  ;;  %v10674_v63 = vadd.f32 %v17892_v44, %v25191_v36  ;;  %v22473_v58 = vadd.f32 %v11598_v28, %v10671_v29  ;;  %v11608_v49 = vpop.f32.mrf.mxu0  ;;  %v12415_v45 = vmul.f32 %v22466_v53, %v22466_v53 }
 0x4c6   : > { %v10258_v37 = vpop.f32.mrf.mxu1  ;;  %v12204_v8 = vadd.f32 %v12203_v12, %v12202_v6  ;;  %v12592_v10 = vadd.f32 %v12591_v52, %v12590_v54  ;;  %v12207_v54 = vsel %vm12097_vm2, %v22466_v53, 0.0 }
 0x4c7   : > { %25192 = vst [vmem:[#allocation60_spill] sm:$0xff] %v22473_v58  ;;  %v10673_v21 = vadd.f32 %v10258_v37, %v25193_v5  ;;  %v12205_v38 = vsel %vm12097_vm2, %v22473_v58, 0.0  ;;  %v12414_v18 = vmul.f32 %v22473_v58, %v22473_v58  ;;  %v22483_v62 = vadd.f32 %v18086_v35, %v10674_v63  ;;  %v18089_v61 = vpop.f32.mrf.mxu0  ;;  %v25197_v63 = vld [vmem:[#allocation68_spill] sm:$0xff] }
 0x4c8   : > { %v17895_v28 = vpop.f32.mrf.mxu1  ;;  %v12594_v29 = vadd.f32 %v12593_v46, %v12592_v10  ;;  %v12206_v44 = vadd.f32 %v12205_v38, %v12204_v8  ;;  %v12597_v5 = vsel %vm12097_vm2, %v12415_v45, 0.0 }
 0x4c9   : > { %25194 = vst [vmem:[#allocation62_spill] sm:$0xff] %v22483_v62  ;;  %v12595_v6 = vsel %vm12097_vm2, %v12414_v18, 0.0  ;;  %v22488_v52 = vadd.f32 %v11608_v49, %v10673_v21  ;;  %v10676_v36 = vadd.f32 %v17895_v28, %v25196_v23  ;;  %v11618_v37 = vpop.f32.mrf.mxu0  ;;  %v12417_v8 = vmul.f32 %v22483_v62, %v22483_v62 }
 0x4ca   : > { %v10268_v12 = vpop.f32.mrf.mxu1  ;;  %v12208_v58 = vadd.f32 %v12207_v54, %v12206_v44  ;;  %v12596_v35 = vadd.f32 %v12595_v6, %v12594_v29  ;;  %v25200_v29 = vld [vmem:[#allocation70_spill] sm:$0xff]  ;;  %v12211_v54 = vsel %vm12097_vm2, %v22483_v62, 0.0 }
 0x4cb   : > { %25195 = vst [vmem:[#allocation64_spill] sm:$0xff] %v22488_v52  ;;  %v10675_v59 = vadd.f32 %v10268_v12, %v25197_v63  ;;  %v12209_v10 = vsel %vm12097_vm2, %v22488_v52, 0.0  ;;  %v12416_v49 = vmul.f32 %v22488_v52, %v22488_v52  ;;  %v22499_v21 = vadd.f32 %v18089_v61, %v10676_v36  ;;  %v18092_v38 = vpop.f32.mrf.mxu0 }
 0x4cc   : > { %v17898_v46 = vpop.f32.mrf.mxu1  ;;  %v12598_v18 = vadd.f32 %v12597_v5, %v12596_v35  ;;  %v12210_v28 = vadd.f32 %v12209_v10, %v12208_v58  ;;  %v25202_v5 = vld [vmem:[#allocation72_spill] sm:$0xff] }
 0x4cd   : > { %25198 = vst [vmem:[#allocation66_spill] sm:$0xff] %v22499_v21  ;;  %v22501_v45 = vadd.f32 %v11618_v37, %v10675_v59  ;;  %v10678_v44 = vadd.f32 %v17898_v46, %v25200_v29  ;;  %v12599_v6 = vsel %vm12097_vm2, %v12416_v49, 0.0  ;;  %v11628_v12 = vpop.f32.mrf.mxu0  ;;  %v12601_v59 = vsel %vm12097_vm2, %v12417_v8, 0.0  ;;  %v25203_v29 = vld [vmem:[#allocation74_spill] sm:$0xff] }
 0x4ce   : > { %v10278_v23 = vpop.f32.mrf.mxu1  ;;  %v12212_v63 = vadd.f32 %v12211_v54, %v12210_v28  ;;  %v12600_v53 = vadd.f32 %v12599_v6, %v12598_v18  ;;  %v12419_v58 = vmul.f32 %v22499_v21, %v22499_v21  ;;  %v12215_v6 = vsel %vm12097_vm2, %v22499_v21, 0.0 }
 0x4cf   : > { %25199 = vst [vmem:[#allocation68_spill] sm:$0xff] %v22501_v45  ;;  %v12213_v61 = vsel %vm12097_vm2, %v22501_v45, 0.0  ;;  %v12418_v36 = vmul.f32 %v22501_v45, %v22501_v45  ;;  %v22514_v37 = vadd.f32 %v18092_v38, %v10678_v44  ;;  %v10677_v35 = vadd.f32 %v10278_v23, %v25202_v5  ;;  %v18095_v49 = vpop.f32.mrf.mxu0  ;;  %v25205_v23 = vld [vmem:[#allocation76_spill] sm:$0xff] }
 0x4d0   : > { %v17901_v10 = vpop.f32.mrf.mxu1  ;;  %v12602_v46 = vadd.f32 %v12601_v59, %v12600_v53  ;;  %v12214_v28 = vadd.f32 %v12213_v61, %v12212_v63  ;;  %v12605_v53 = vsel %vm12097_vm2, %v12419_v58, 0.0  ;;  %v25208_v58 = vld [vmem:[#allocation78_spill] sm:$0xff] }
 0x4d1   : > { %25201 = vst [vmem:[#allocation70_spill] sm:$0xff] %v22514_v37  ;;  %v12603_v18 = vsel %vm12097_vm2, %v12418_v36, 0.0  ;;  %v10680_v54 = vadd.f32 %v17901_v10, %v25203_v29  ;;  %v22521_v45 = vadd.f32 %v11628_v12, %v10677_v35  ;;  %v11638_v62 = vpop.f32.mrf.mxu0  ;;  %v12421_v44 = vmul.f32 %v22514_v37, %v22514_v37 }
 0x4d2   : > { %v10288_v8 = vpop.f32.mrf.mxu1  ;;  %v12216_v52 = vadd.f32 %v12215_v6, %v12214_v28  ;;  %v12604_v38 = vadd.f32 %v12603_v18, %v12602_v46  ;;  %v12219_v46 = vsel %vm12097_vm2, %v22514_v37, 0.0 }
 0x4d3   : > { %25204 = vst [vmem:[#allocation72_spill] sm:$0xff] %v22521_v45  ;;  %v10679_v5 = vadd.f32 %v10288_v8, %v25205_v23  ;;  %v12217_v63 = vsel %vm12097_vm2, %v22521_v45, 0.0  ;;  %v12420_v61 = vmul.f32 %v22521_v45, %v22521_v45  ;;  %v22531_v36 = vadd.f32 %v18095_v49, %v10680_v54  ;;  %v18098_v59 = vpop.f32.mrf.mxu0  ;;  %v25209_v54 = vld [vmem:[#allocation80_spill] sm:$0xff] }
 0x4d4   : > { %v17904_v12 = vpop.f32.mrf.mxu1  ;;  %v12606_v35 = vadd.f32 %v12605_v53, %v12604_v38  ;;  %v12218_v10 = vadd.f32 %v12217_v63, %v12216_v52  ;;  %v12609_v23 = vsel %vm12097_vm2, %v12421_v44, 0.0 }
 0x4d5   : > { %25206 = vst [vmem:[#allocation74_spill] sm:$0xff] %v22531_v36  ;;  %v12607_v28 = vsel %vm12097_vm2, %v12420_v61, 0.0  ;;  %v22536_v18 = vadd.f32 %v11638_v62, %v10679_v5  ;;  %v10682_v29 = vadd.f32 %v17904_v12, %v25208_v58  ;;  %v11648_v8 = vpop.f32.mrf.mxu0  ;;  %v12423_v52 = vmul.f32 %v22531_v36, %v22531_v36 }
 0x4d6   : > { %v10298_v6 = vpop.f32.mrf.mxu1  ;;  %v12220_v45 = vadd.f32 %v12219_v46, %v12218_v10  ;;  %v12608_v49 = vadd.f32 %v12607_v28, %v12606_v35  ;;  %v25212_v35 = vld [vmem:[#allocation2_spill] sm:$0xff]  ;;  %v12223_v46 = vsel %vm12097_vm2, %v22531_v36, 0.0 }
 0x4d7   : > { %25207 = vst [vmem:[#allocation76_spill] sm:$0xff] %v22536_v18  ;;  %v10681_v21 = vadd.f32 %v10298_v6, %v25209_v54  ;;  %v12221_v38 = vsel %vm12097_vm2, %v22536_v18, 0.0  ;;  %v12422_v62 = vmul.f32 %v22536_v18, %v22536_v18  ;;  %v22547_v5 = vadd.f32 %v18098_v59, %v10682_v29  ;;  %v18101_v63 = vpop.f32.mrf.mxu0 }
 0x4d8   : > { %v17907_v53 = vpop.f32.mrf.mxu1  ;;  %v12610_v61 = vadd.f32 %v12609_v23, %v12608_v49  ;;  %v12222_v12 = vadd.f32 %v12221_v38, %v12220_v45  ;;  %v25214_v23 = vld [vmem:[#allocation3_spill] sm:$0xff] }
 0x4d9   : > { %25210 = vst [vmem:[#allocation78_spill] sm:$0xff] %v22547_v5  ;;  %v22549_v44 = vadd.f32 %v11648_v8, %v10681_v21  ;;  %v10684_v10 = vadd.f32 %v17907_v53, %v25212_v35  ;;  %v12611_v28 = vsel %vm12097_vm2, %v12422_v62, 0.0  ;;  %v11658_v6 = vpop.f32.mrf.mxu0  ;;  %v12613_v21 = vsel %vm12097_vm2, %v12423_v52, 0.0  ;;  %v25215_v35 = vld [vmem:[#allocation4_spill] sm:$0xff] }
 0x4da   : > { %v10308_v58 = vpop.f32.mrf.mxu1  ;;  %v12224_v54 = vadd.f32 %v12223_v46, %v12222_v12  ;;  %v12612_v37 = vadd.f32 %v12611_v28, %v12610_v61  ;;  %v12425_v45 = vmul.f32 %v22547_v5, %v22547_v5  ;;  %v12227_v28 = vsel %vm12097_vm2, %v22547_v5, 0.0 }
 0x4db   : > { %25211 = vst [vmem:[#allocation80_spill] sm:$0xff] %v22549_v44  ;;  %v12225_v59 = vsel %vm12097_vm2, %v22549_v44, 0.0  ;;  %v12424_v29 = vmul.f32 %v22549_v44, %v22549_v44  ;;  %v22562_v8 = vadd.f32 %v18101_v63, %v10684_v10  ;;  %v10683_v49 = vadd.f32 %v10308_v58, %v25214_v23  ;;  %v18104_v62 = vpop.f32.mrf.mxu0  ;;  %v25217_v58 = vld [vmem:[#allocation5_spill] sm:$0xff] }
 0x4dc   : > { %v17910_v38 = vpop.f32.mrf.mxu1  ;;  %v12614_v53 = vadd.f32 %v12613_v21, %v12612_v37  ;;  %v12226_v12 = vadd.f32 %v12225_v59, %v12224_v54  ;;  %v12617_v37 = vsel %vm12097_vm2, %v12425_v45, 0.0  ;;  %v25220_v45 = vld [vmem:[#allocation6_spill] sm:$0xff] }
 0x4dd   : > { %25213 = vst [vmem:[#allocation2_spill] sm:$0xff] %v22562_v8  ;;  %v12615_v61 = vsel %vm12097_vm2, %v12424_v29, 0.0  ;;  %v10686_v46 = vadd.f32 %v17910_v38, %v25215_v35  ;;  %v22569_v44 = vadd.f32 %v11658_v6, %v10683_v49  ;;  %v11668_v36 = vpop.f32.mrf.mxu0  ;;  %v12427_v10 = vmul.f32 %v22562_v8, %v22562_v8 }
 0x4de   : > { %v10318_v52 = vpop.f32.mrf.mxu1  ;;  %v12228_v18 = vadd.f32 %v12227_v28, %v12226_v12  ;;  %v12616_v63 = vadd.f32 %v12615_v61, %v12614_v53  ;;  %v12231_v53 = vsel %vm12097_vm2, %v22562_v8, 0.0 }
 0x4df   : > { %25216 = vst [vmem:[#allocation3_spill] sm:$0xff] %v22569_v44  ;;  %v10685_v23 = vadd.f32 %v10318_v52, %v25217_v58  ;;  %v12229_v54 = vsel %vm12097_vm2, %v22569_v44, 0.0  ;;  %v12426_v59 = vmul.f32 %v22569_v44, %v22569_v44  ;;  %v22579_v29 = vadd.f32 %v18104_v62, %v10686_v46  ;;  %v18107_v21 = vpop.f32.mrf.mxu0  ;;  %v25221_v46 = vld [vmem:[#allocation7_spill] sm:$0xff] }
 0x4e0   : > { %v17913_v6 = vpop.f32.mrf.mxu1  ;;  %v12618_v49 = vadd.f32 %v12617_v37, %v12616_v63  ;;  %v12230_v38 = vadd.f32 %v12229_v54, %v12228_v18  ;;  %v12621_v58 = vsel %vm12097_vm2, %v12427_v10, 0.0 }
 0x4e1   : > { %25218 = vst [vmem:[#allocation4_spill] sm:$0xff] %v22579_v29  ;;  %v12619_v12 = vsel %vm12097_vm2, %v12426_v59, 0.0  ;;  %v22584_v61 = vadd.f32 %v11668_v36, %v10685_v23  ;;  %v10688_v35 = vadd.f32 %v17913_v6, %v25220_v45  ;;  %v11678_v52 = vpop.f32.mrf.mxu0  ;;  %v12429_v18 = vmul.f32 %v22579_v29, %v22579_v29 }
 0x4e2   : > { %v10328_v28 = vpop.f32.mrf.mxu1  ;;  %v12232_v44 = vadd.f32 %v12231_v53, %v12230_v38  ;;  %v12620_v62 = vadd.f32 %v12619_v12, %v12618_v49  ;;  %v25224_v49 = vld [vmem:[#allocation8_spill] sm:$0xff]  ;;  %v12235_v53 = vsel %vm12097_vm2, %v22579_v29, 0.0 }
 0x4e3   : > { %25219 = vst [vmem:[#allocation5_spill] sm:$0xff] %v22584_v61  ;;  %v10687_v5 = vadd.f32 %v10328_v28, %v25221_v46  ;;  %v12233_v63 = vsel %vm12097_vm2, %v22584_v61, 0.0  ;;  %v12428_v36 = vmul.f32 %v22584_v61, %v22584_v61  ;;  %v22595_v23 = vadd.f32 %v18107_v21, %v10688_v35  ;;  %v18110_v54 = vpop.f32.mrf.mxu0 }
 0x4e4   : > { %v17916_v37 = vpop.f32.mrf.mxu1  ;;  %v12622_v59 = vadd.f32 %v12621_v58, %v12620_v62  ;;  %v12234_v6 = vadd.f32 %v12233_v63, %v12232_v44  ;;  %v25226_v58 = vld [vmem:[#allocation9_spill] sm:$0xff] }
 0x4e5   : > { %25222 = vst [vmem:[#allocation6_spill] sm:$0xff] %v22595_v23  ;;  %v22597_v10 = vadd.f32 %v11678_v52, %v10687_v5  ;;  %v10690_v38 = vadd.f32 %v17916_v37, %v25224_v49  ;;  %v12623_v12 = vsel %vm12097_vm2, %v12428_v36, 0.0  ;;  %v11688_v28 = vpop.f32.mrf.mxu0  ;;  %v12625_v5 = vsel %vm12097_vm2, %v12429_v18, 0.0  ;;  %v25227_v49 = vld [vmem:[#allocation10_spill] sm:$0xff] }
 0x4e6   : > { %v10338_v45 = vpop.f32.mrf.mxu1  ;;  %v12624_v46 = vadd.f32 %v12623_v12, %v12622_v59  ;;  %v12236_v8 = vadd.f32 %v12235_v53, %v12234_v6  ;;  %v12431_v44 = vmul.f32 %v22595_v23, %v22595_v23  ;;  %v12239_v12 = vsel %vm12097_vm2, %v22595_v23, 0.0 }
 0x4e7   : > { %25223 = vst [vmem:[#allocation7_spill] sm:$0xff] %v22597_v10  ;;  %v12237_v21 = vsel %vm12097_vm2, %v22597_v10, 0.0  ;;  %v12430_v35 = vmul.f32 %v22597_v10, %v22597_v10  ;;  %v22610_v52 = vadd.f32 %v18110_v54, %v10690_v38  ;;  %v10689_v62 = vadd.f32 %v10338_v45, %v25226_v58  ;;  %v18113_v36 = vpop.f32.mrf.mxu0  ;;  %v25229_v45 = vld [vmem:[#allocation11_spill] sm:$0xff] }
 0x4e8   : > { %v17919_v63 = vpop.f32.mrf.mxu1  ;;  %v12238_v37 = vadd.f32 %v12237_v21, %v12236_v8  ;;  %v12626_v59 = vadd.f32 %v12625_v5, %v12624_v46  ;;  %v12629_v8 = vsel %vm12097_vm2, %v12431_v44, 0.0  ;;  %v25232_v44 = vld [vmem:[#allocation12_spill] sm:$0xff] }
 0x4e9   : > { %25225 = vst [vmem:[#allocation8_spill] sm:$0xff] %v22610_v52  ;;  %v12627_v6 = vsel %vm12097_vm2, %v12430_v35, 0.0  ;;  %v10692_v53 = vadd.f32 %v17919_v63, %v25227_v49  ;;  %v22617_v10 = vadd.f32 %v11688_v28, %v10689_v62  ;;  %v11698_v29 = vpop.f32.mrf.mxu0  ;;  %v12433_v54 = vmul.f32 %v22610_v52, %v22610_v52 }
 0x4ea   : > { %v10348_v18 = vpop.f32.mrf.mxu1  ;;  %v12628_v61 = vadd.f32 %v12627_v6, %v12626_v59  ;;  %v12240_v38 = vadd.f32 %v12239_v12, %v12238_v37  ;;  %v12243_v59 = vsel %vm12097_vm2, %v22610_v52, 0.0 }
 0x4eb   : > { %25228 = vst [vmem:[#allocation9_spill] sm:$0xff] %v22617_v10  ;;  %v10691_v58 = vadd.f32 %v10348_v18, %v25229_v45  ;;  %v12241_v46 = vsel %vm12097_vm2, %v22617_v10, 0.0  ;;  %v12432_v21 = vmul.f32 %v22617_v10, %v22617_v10  ;;  %v22627_v35 = vadd.f32 %v18113_v36, %v10692_v53  ;;  %v18116_v5 = vpop.f32.mrf.mxu0  ;;  %v25233_v53 = vld [vmem:[#allocation13_spill] sm:$0xff] }
 0x4ec   : > { %v17922_v28 = vpop.f32.mrf.mxu1  ;;  %v12242_v62 = vadd.f32 %v12241_v46, %v12240_v38  ;;  %v12630_v63 = vadd.f32 %v12629_v8, %v12628_v61  ;;  %v12633_v45 = vsel %vm12097_vm2, %v12433_v54, 0.0 }
 0x4ed   : > { %25230 = vst [vmem:[#allocation10_spill] sm:$0xff] %v22627_v35  ;;  %v12631_v37 = vsel %vm12097_vm2, %v12432_v21, 0.0  ;;  %v22632_v6 = vadd.f32 %v11698_v29, %v10691_v58  ;;  %v10694_v49 = vadd.f32 %v17922_v28, %v25232_v44  ;;  %v11708_v18 = vpop.f32.mrf.mxu0  ;;  %v12435_v61 = vmul.f32 %v22627_v35, %v22627_v35 }
 0x4ee   : > { %v10358_v12 = vpop.f32.mrf.mxu1  ;;  %v12632_v10 = vadd.f32 %v12631_v37, %v12630_v63  ;;  %v12244_v36 = vadd.f32 %v12243_v59, %v12242_v62  ;;  %v25236_v62 = vld [vmem:[#allocation14_spill] sm:$0xff]  ;;  %v12247_v59 = vsel %vm12097_vm2, %v22627_v35, 0.0 }
 0x4ef   : > { %25231 = vst [vmem:[#allocation11_spill] sm:$0xff] %v22632_v6  ;;  %v10693_v23 = vadd.f32 %v10358_v12, %v25233_v53  ;;  %v12245_v38 = vsel %vm12097_vm2, %v22632_v6, 0.0  ;;  %v12434_v29 = vmul.f32 %v22632_v6, %v22632_v6  ;;  %v22643_v58 = vadd.f32 %v18116_v5, %v10694_v49  ;;  %v18119_v46 = vpop.f32.mrf.mxu0 }
 0x4f0   : > { %v17925_v8 = vpop.f32.mrf.mxu1  ;;  %v12246_v21 = vadd.f32 %v12245_v38, %v12244_v36  ;;  %v12634_v28 = vadd.f32 %v12633_v45, %v12632_v10  ;;  %v25238_v45 = vld [vmem:[#allocation15_spill] sm:$0xff] }
 0x4f1   : > { %25234 = vst [vmem:[#allocation12_spill] sm:$0xff] %v22643_v58  ;;  %v22645_v54 = vadd.f32 %v11708_v18, %v10693_v23  ;;  %v10696_v63 = vadd.f32 %v17925_v8, %v25236_v62  ;;  %v12635_v37 = vsel %vm12097_vm2, %v12434_v29, 0.0  ;;  %v11718_v12 = vpop.f32.mrf.mxu0  ;;  %v12637_v23 = vsel %vm12097_vm2, %v12435_v61, 0.0  ;;  %v25239_v62 = vld [vmem:[#allocation16_spill] sm:$0xff] }
 0x4f2   : > { %v10368_v44 = vpop.f32.mrf.mxu1  ;;  %v12636_v53 = vadd.f32 %v12635_v37, %v12634_v28  ;;  %v12248_v52 = vadd.f32 %v12247_v59, %v12246_v21  ;;  %v12437_v10 = vmul.f32 %v22643_v58, %v22643_v58  ;;  %v12251_v37 = vsel %vm12097_vm2, %v22643_v58, 0.0 }
 0x4f3   : > { %25235 = vst [vmem:[#allocation13_spill] sm:$0xff] %v22645_v54  ;;  %v12249_v5 = vsel %vm12097_vm2, %v22645_v54, 0.0  ;;  %v12436_v49 = vmul.f32 %v22645_v54, %v22645_v54  ;;  %v22658_v18 = vadd.f32 %v18119_v46, %v10696_v63  ;;  %v10695_v36 = vadd.f32 %v10368_v44, %v25238_v45  ;;  %v18122_v29 = vpop.f32.mrf.mxu0  ;;  %v25241_v44 = vld [vmem:[#allocation17_spill] sm:$0xff] }
 0x4f4   : > { %v17928_v38 = vpop.f32.mrf.mxu1  ;;  %v12250_v8 = vadd.f32 %v12249_v5, %v12248_v52  ;;  %v12638_v28 = vadd.f32 %v12637_v23, %v12636_v53  ;;  %v12641_v52 = vsel %vm12097_vm2, %v12437_v10, 0.0  ;;  %v25244_v10 = vld [vmem:[#allocation18_spill] sm:$0xff] }
 0x4f5   : > { %25237 = vst [vmem:[#allocation14_spill] sm:$0xff] %v22658_v18  ;;  %v12639_v21 = vsel %vm12097_vm2, %v12436_v49, 0.0  ;;  %v10698_v59 = vadd.f32 %v17928_v38, %v25239_v62  ;;  %v22665_v54 = vadd.f32 %v11718_v12, %v10695_v36  ;;  %v11728_v35 = vpop.f32.mrf.mxu0  ;;  %v12439_v46 = vmul.f32 %v22658_v18, %v22658_v18 }
 0x4f6   : > { %v10378_v61 = vpop.f32.mrf.mxu1  ;;  %v12640_v6 = vadd.f32 %v12639_v21, %v12638_v28  ;;  %v12252_v63 = vadd.f32 %v12251_v37, %v12250_v8  ;;  %v12255_v28 = vsel %vm12097_vm2, %v22658_v18, 0.0 }
 0x4f7   : > { %25240 = vst [vmem:[#allocation15_spill] sm:$0xff] %v22665_v54  ;;  %v10697_v45 = vadd.f32 %v10378_v61, %v25241_v44  ;;  %v12253_v53 = vsel %vm12097_vm2, %v22665_v54, 0.0  ;;  %v12438_v5 = vmul.f32 %v22665_v54, %v22665_v54  ;;  %v22675_v49 = vadd.f32 %v18122_v29, %v10698_v59  ;;  %v18125_v23 = vpop.f32.mrf.mxu0  ;;  %v25245_v59 = vld [vmem:[#allocation19_spill] sm:$0xff] }
 0x4f8   : > { %v17931_v12 = vpop.f32.mrf.mxu1  ;;  %v12254_v36 = vadd.f32 %v12253_v53, %v12252_v63  ;;  %v12642_v38 = vadd.f32 %v12641_v52, %v12640_v6  ;;  %v12645_v44 = vsel %vm12097_vm2, %v12439_v46, 0.0 }
 0x4f9   : > { %25242 = vst [vmem:[#allocation16_spill] sm:$0xff] %v22675_v49  ;;  %v12643_v8 = vsel %vm12097_vm2, %v12438_v5, 0.0  ;;  %v22680_v21 = vadd.f32 %v11728_v35, %v10697_v45  ;;  %v10700_v62 = vadd.f32 %v17931_v12, %v25244_v10  ;;  %v11738_v61 = vpop.f32.mrf.mxu0  ;;  %v12441_v6 = vmul.f32 %v22675_v49, %v22675_v49 }
 0x4fa   : > { %v10388_v37 = vpop.f32.mrf.mxu1  ;;  %v12644_v54 = vadd.f32 %v12643_v8, %v12642_v38  ;;  %v12256_v29 = vadd.f32 %v12255_v28, %v12254_v36  ;;  %v25248_v36 = vld [vmem:[#allocation20_spill] sm:$0xff]  ;;  %v12259_v28 = vsel %vm12097_vm2, %v22675_v49, 0.0 }
 0x4fb   : > { %25243 = vst [vmem:[#allocation17_spill] sm:$0xff] %v22680_v21  ;;  %v10699_v58 = vadd.f32 %v10388_v37, %v25245_v59  ;;  %v12257_v63 = vsel %vm12097_vm2, %v22680_v21, 0.0  ;;  %v12440_v35 = vmul.f32 %v22680_v21, %v22680_v21  ;;  %v22691_v45 = vadd.f32 %v18125_v23, %v10700_v62  ;;  %v18128_v53 = vpop.f32.mrf.mxu0 }
 0x4fc   : > { %v17934_v52 = vpop.f32.mrf.mxu1  ;;  %v12258_v5 = vadd.f32 %v12257_v63, %v12256_v29  ;;  %v12646_v12 = vadd.f32 %v12645_v44, %v12644_v54  ;;  %v25250_v44 = vld [vmem:[#allocation21_spill] sm:$0xff] }
 0x4fd   : > { %25246 = vst [vmem:[#allocation18_spill] sm:$0xff] %v22691_v45  ;;  %v22693_v46 = vadd.f32 %v11738_v61, %v10699_v58  ;;  %v10702_v38 = vadd.f32 %v17934_v52, %v25248_v36  ;;  %v12647_v8 = vsel %vm12097_vm2, %v12440_v35, 0.0  ;;  %v11748_v37 = vpop.f32.mrf.mxu0  ;;  %v12649_v58 = vsel %vm12097_vm2, %v12441_v6, 0.0  ;;  %v25251_v36 = vld [vmem:[#allocation22_spill] sm:$0xff] }
 0x4fe   : > { %v10398_v10 = vpop.f32.mrf.mxu1  ;;  %v12648_v59 = vadd.f32 %v12647_v8, %v12646_v12  ;;  %v12260_v18 = vadd.f32 %v12259_v28, %v12258_v5  ;;  %v12443_v54 = vmul.f32 %v22691_v45, %v22691_v45  ;;  %v12263_v8 = vsel %vm12097_vm2, %v22691_v45, 0.0 }
 0x4ff   : > { %25247 = vst [vmem:[#allocation19_spill] sm:$0xff] %v22693_v46  ;;  %v12261_v23 = vsel %vm12097_vm2, %v22693_v46, 0.0  ;;  %v12442_v62 = vmul.f32 %v22693_v46, %v22693_v46  ;;  %v22706_v61 = vadd.f32 %v18128_v53, %v10702_v38  ;;  %v10701_v29 = vadd.f32 %v10398_v10, %v25250_v44  ;;  %v18131_v35 = vpop.f32.mrf.mxu0  ;;  %v25253_v10 = vld [vmem:[#allocation23_spill] sm:$0xff] }
 0x500   : > { %v17937_v63 = vpop.f32.mrf.mxu1  ;;  %v12262_v52 = vadd.f32 %v12261_v23, %v12260_v18  ;;  %v12650_v12 = vadd.f32 %v12649_v58, %v12648_v59  ;;  %v12653_v18 = vsel %vm12097_vm2, %v12443_v54, 0.0  ;;  %v25256_v54 = vld [vmem:[#allocation24_spill] sm:$0xff] }
 0x501   : > { %25249 = vst [vmem:[#allocation20_spill] sm:$0xff] %v22706_v61  ;;  %v12651_v5 = vsel %vm12097_vm2, %v12442_v62, 0.0  ;;  %v10704_v28 = vadd.f32 %v17937_v63, %v25251_v36  ;;  %v22713_v46 = vadd.f32 %v11748_v37, %v10701_v29  ;;  %v11758_v49 = vpop.f32.mrf.mxu0  ;;  %v12445_v53 = vmul.f32 %v22706_v61, %v22706_v61 }
 0x502   : > { %v10408_v6 = vpop.f32.mrf.mxu1  ;;  %v12652_v21 = vadd.f32 %v12651_v5, %v12650_v12  ;;  %v12264_v38 = vadd.f32 %v12263_v8, %v12262_v52  ;;  %v12267_v12 = vsel %vm12097_vm2, %v22706_v61, 0.0 }
 0x503   : > { %25252 = vst [vmem:[#allocation21_spill] sm:$0xff] %v22713_v46  ;;  %v10703_v44 = vadd.f32 %v10408_v6, %v25253_v10  ;;  %v12265_v59 = vsel %vm12097_vm2, %v22713_v46, 0.0  ;;  %v12444_v23 = vmul.f32 %v22713_v46, %v22713_v46  ;;  %v22723_v62 = vadd.f32 %v18131_v35, %v10704_v28  ;;  %v18134_v58 = vpop.f32.mrf.mxu0  ;;  %v25257_v28 = vld [vmem:[#allocation25_spill] sm:$0xff] }
 0x504   : > { %v17940_v37 = vpop.f32.mrf.mxu1  ;;  %v12266_v29 = vadd.f32 %v12265_v59, %v12264_v38  ;;  %v12654_v63 = vadd.f32 %v12653_v18, %v12652_v21  ;;  %v12657_v10 = vsel %vm12097_vm2, %v12445_v53, 0.0 }
 0x505   : > { %25254 = vst [vmem:[#allocation22_spill] sm:$0xff] %v22723_v62  ;;  %v12655_v52 = vsel %vm12097_vm2, %v12444_v23, 0.0  ;;  %v22728_v5 = vadd.f32 %v11758_v49, %v10703_v44  ;;  %v10706_v36 = vadd.f32 %v17940_v37, %v25256_v54  ;;  %v11768_v6 = vpop.f32.mrf.mxu0  ;;  %v12447_v21 = vmul.f32 %v22723_v62, %v22723_v62 }
 0x506   : > { %v10418_v8 = vpop.f32.mrf.mxu1  ;;  %v12656_v46 = vadd.f32 %v12655_v52, %v12654_v63  ;;  %v12268_v35 = vadd.f32 %v12267_v12, %v12266_v29  ;;  %v25260_v29 = vld [vmem:[#allocation26_spill] sm:$0xff]  ;;  %v12271_v12 = vsel %vm12097_vm2, %v22723_v62, 0.0 }
 0x507   : > { %25255 = vst [vmem:[#allocation23_spill] sm:$0xff] %v22728_v5  ;;  %v10705_v45 = vadd.f32 %v10418_v8, %v25257_v28  ;;  %v12269_v38 = vsel %vm12097_vm2, %v22728_v5, 0.0  ;;  %v12446_v49 = vmul.f32 %v22728_v5, %v22728_v5  ;;  %v22739_v44 = vadd.f32 %v18134_v58, %v10706_v36  ;;  %v18137_v59 = vpop.f32.mrf.mxu0 }
 0x508   : > { %v17943_v18 = vpop.f32.mrf.mxu1  ;;  %v12270_v23 = vadd.f32 %v12269_v38, %v12268_v35  ;;  %v12658_v37 = vadd.f32 %v12657_v10, %v12656_v46  ;;  %v25262_v10 = vld [vmem:[#allocation27_spill] sm:$0xff] }
 0x509   : > { %25258 = vst [vmem:[#allocation24_spill] sm:$0xff] %v22739_v44  ;;  %v22741_v53 = vadd.f32 %v11768_v6, %v10705_v45  ;;  %v10708_v63 = vadd.f32 %v17943_v18, %v25260_v29  ;;  %v12659_v52 = vsel %vm12097_vm2, %v12446_v49, 0.0  ;;  %v11778_v8 = vpop.f32.mrf.mxu0  ;;  %v12661_v45 = vsel %vm12097_vm2, %v12447_v21, 0.0  ;;  %v25263_v29 = vld [vmem:[#allocation28_spill] sm:$0xff] }
 0x50a   : > { %v10428_v54 = vpop.f32.mrf.mxu1  ;;  %v12660_v28 = vadd.f32 %v12659_v52, %v12658_v37  ;;  %v12272_v61 = vadd.f32 %v12271_v12, %v12270_v23  ;;  %v12449_v46 = vmul.f32 %v22739_v44, %v22739_v44  ;;  %v12275_v52 = vsel %vm12097_vm2, %v22739_v44, 0.0 }
 0x50b   : > { %25259 = vst [vmem:[#allocation25_spill] sm:$0xff] %v22741_v53  ;;  %v12273_v58 = vsel %vm12097_vm2, %v22741_v53, 0.0  ;;  %v12448_v36 = vmul.f32 %v22741_v53, %v22741_v53  ;;  %v22754_v6 = vadd.f32 %v18137_v59, %v10708_v63  ;;  %v10707_v35 = vadd.f32 %v10428_v54, %v25262_v10  ;;  %v18140_v49 = vpop.f32.mrf.mxu0  ;;  %v25265_v54 = vld [vmem:[#allocation29_spill] sm:$0xff] }
 0x50c   : > { %v17946_v38 = vpop.f32.mrf.mxu1  ;;  %v12274_v18 = vadd.f32 %v12273_v58, %v12272_v61  ;;  %v12662_v37 = vadd.f32 %v12661_v45, %v12660_v28  ;;  %v12665_v61 = vsel %vm12097_vm2, %v12449_v46, 0.0  ;;  %v25268_v46 = vld [vmem:[#allocation30_spill] sm:$0xff] }
 0x50d   : > { %25261 = vst [vmem:[#allocation26_spill] sm:$0xff] %v22754_v6  ;;  %v12663_v23 = vsel %vm12097_vm2, %v12448_v36, 0.0  ;;  %v10710_v12 = vadd.f32 %v17946_v38, %v25263_v29  ;;  %v22761_v53 = vadd.f32 %v11778_v8, %v10707_v35  ;;  %v11788_v62 = vpop.f32.mrf.mxu0  ;;  %v12451_v59 = vmul.f32 %v22754_v6, %v22754_v6 }
 0x50e   : > { %v10438_v21 = vpop.f32.mrf.mxu1  ;;  %v12664_v5 = vadd.f32 %v12663_v23, %v12662_v37  ;;  %v12276_v63 = vadd.f32 %v12275_v52, %v12274_v18  ;;  %v12279_v37 = vsel %vm12097_vm2, %v22754_v6, 0.0 }
 0x50f   : > { %25264 = vst [vmem:[#allocation27_spill] sm:$0xff] %v22761_v53  ;;  %v10709_v10 = vadd.f32 %v10438_v21, %v25265_v54  ;;  %v12277_v28 = vsel %vm12097_vm2, %v22761_v53, 0.0  ;;  %v12450_v58 = vmul.f32 %v22761_v53, %v22761_v53  ;;  %v22771_v36 = vadd.f32 %v18140_v49, %v10710_v12  ;;  %v18143_v45 = vpop.f32.mrf.mxu0  ;;  %v25269_v12 = vld [vmem:[#allocation31_spill] sm:$0xff] }
 0x510   : > { %v17949_v8 = vpop.f32.mrf.mxu1  ;;  %v12278_v35 = vadd.f32 %v12277_v28, %v12276_v63  ;;  %v12666_v38 = vadd.f32 %v12665_v61, %v12664_v5  ;;  %v12669_v54 = vsel %vm12097_vm2, %v12451_v59, 0.0 }
 0x511   : > { %25266 = vst [vmem:[#allocation28_spill] sm:$0xff] %v22771_v36  ;;  %v12667_v18 = vsel %vm12097_vm2, %v12450_v58, 0.0  ;;  %v22776_v23 = vadd.f32 %v11788_v62, %v10709_v10  ;;  %v10712_v29 = vadd.f32 %v17949_v8, %v25268_v46  ;;  %v11798_v21 = vpop.f32.mrf.mxu0  ;;  %v12453_v5 = vmul.f32 %v22771_v36, %v22771_v36 }
 0x512   : > { %v10448_v52 = vpop.f32.mrf.mxu1  ;;  %v12668_v53 = vadd.f32 %v12667_v18, %v12666_v38  ;;  %v12280_v49 = vadd.f32 %v12279_v37, %v12278_v35  ;;  %v25272_v35 = vld [vmem:[#allocation32_spill] sm:$0xff]  ;;  %v12283_v37 = vsel %vm12097_vm2, %v22771_v36, 0.0 }
 0x513   : > { %25267 = vst [vmem:[#allocation29_spill] sm:$0xff] %v22776_v23  ;;  %v10711_v44 = vadd.f32 %v10448_v52, %v25269_v12  ;;  %v12281_v63 = vsel %vm12097_vm2, %v22776_v23, 0.0  ;;  %v12452_v62 = vmul.f32 %v22776_v23, %v22776_v23  ;;  %v22787_v10 = vadd.f32 %v18143_v45, %v10712_v29  ;;  %v18146_v28 = vpop.f32.mrf.mxu0 }
 0x514   : > { %v17952_v61 = vpop.f32.mrf.mxu1  ;;  %v12282_v58 = vadd.f32 %v12281_v63, %v12280_v49  ;;  %v12670_v8 = vadd.f32 %v12669_v54, %v12668_v53  ;;  %v25274_v54 = vld [vmem:[#allocation33_spill] sm:$0xff] }
 0x515   : > { %25270 = vst [vmem:[#allocation30_spill] sm:$0xff] %v22787_v10  ;;  %v22789_v59 = vadd.f32 %v11798_v21, %v10711_v44  ;;  %v10714_v38 = vadd.f32 %v17952_v61, %v25272_v35  ;;  %v12671_v18 = vsel %vm12097_vm2, %v12452_v62, 0.0  ;;  %v11808_v52 = vpop.f32.mrf.mxu0  ;;  %v12673_v44 = vsel %vm12097_vm2, %v12453_v5, 0.0  ;;  %v25275_v35 = vld [vmem:[#allocation34_spill] sm:$0xff] }
 0x516   : > { %v10458_v46 = vpop.f32.mrf.mxu1  ;;  %v12672_v12 = vadd.f32 %v12671_v18, %v12670_v8  ;;  %v12284_v6 = vadd.f32 %v12283_v37, %v12282_v58  ;;  %v12455_v53 = vmul.f32 %v22787_v10, %v22787_v10  ;;  %v12287_v18 = vsel %vm12097_vm2, %v22787_v10, 0.0 }
 0x517   : > { %25271 = vst [vmem:[#allocation31_spill] sm:$0xff] %v22789_v59  ;;  %v12285_v45 = vsel %vm12097_vm2, %v22789_v59, 0.0  ;;  %v12454_v29 = vmul.f32 %v22789_v59, %v22789_v59  ;;  %v22802_v21 = vadd.f32 %v18146_v28, %v10714_v38  ;;  %v10713_v49 = vadd.f32 %v10458_v46, %v25274_v54  ;;  %v18149_v62 = vpop.f32.mrf.mxu0  ;;  %v25277_v46 = vld [vmem:[#allocation35_spill] sm:$0xff] }
 0x518   : > { %v17955_v63 = vpop.f32.mrf.mxu1  ;;  %v12286_v61 = vadd.f32 %v12285_v45, %v12284_v6  ;;  %v12674_v8 = vadd.f32 %v12673_v44, %v12672_v12  ;;  %v12677_v6 = vsel %vm12097_vm2, %v12455_v53, 0.0  ;;  %v25280_v53 = vld [vmem:[#allocation36_spill] sm:$0xff] }
 0x519   : > { %25273 = vst [vmem:[#allocation32_spill] sm:$0xff] %v22802_v21  ;;  %v12675_v58 = vsel %vm12097_vm2, %v12454_v29, 0.0  ;;  %v10716_v37 = vadd.f32 %v17955_v63, %v25275_v35  ;;  %v22809_v59 = vadd.f32 %v11808_v52, %v10713_v49  ;;  %v11818_v36 = vpop.f32.mrf.mxu0  ;;  %v12457_v28 = vmul.f32 %v22802_v21, %v22802_v21 }
 0x51a   : > { %v10468_v5 = vpop.f32.mrf.mxu1  ;;  %v12676_v23 = vadd.f32 %v12675_v58, %v12674_v8  ;;  %v12288_v38 = vadd.f32 %v12287_v18, %v12286_v61  ;;  %v12291_v8 = vsel %vm12097_vm2, %v22802_v21, 0.0 }
 0x51b   : > { %25276 = vst [vmem:[#allocation33_spill] sm:$0xff] %v22809_v59  ;;  %v10715_v54 = vadd.f32 %v10468_v5, %v25277_v46  ;;  %v12289_v12 = vsel %vm12097_vm2, %v22809_v59, 0.0  ;;  %v12456_v45 = vmul.f32 %v22809_v59, %v22809_v59  ;;  %v22819_v29 = vadd.f32 %v18149_v62, %v10716_v37  ;;  %v18152_v44 = vpop.f32.mrf.mxu0  ;;  %v25281_v37 = vld [vmem:[#allocation37_spill] sm:$0xff] }
 0x51c   : > { %v17958_v52 = vpop.f32.mrf.mxu1  ;;  %v12290_v49 = vadd.f32 %v12289_v12, %v12288_v38  ;;  %v12678_v63 = vadd.f32 %v12677_v6, %v12676_v23  ;;  %v12681_v46 = vsel %vm12097_vm2, %v12457_v28, 0.0 }
 0x51d   : > { %25278 = vst [vmem:[#allocation34_spill] sm:$0xff] %v22819_v29  ;;  %v12679_v61 = vsel %vm12097_vm2, %v12456_v45, 0.0  ;;  %v22824_v58 = vadd.f32 %v11818_v36, %v10715_v54  ;;  %v10718_v35 = vadd.f32 %v17958_v52, %v25280_v53  ;;  %v11828_v5 = vpop.f32.mrf.mxu0  ;;  %v12459_v23 = vmul.f32 %v22819_v29, %v22819_v29 }
 0x51e   : > { %v10478_v18 = vpop.f32.mrf.mxu1  ;;  %v12680_v59 = vadd.f32 %v12679_v61, %v12678_v63  ;;  %v12292_v62 = vadd.f32 %v12291_v8, %v12290_v49  ;;  %v25284_v49 = vld [vmem:[#allocation38_spill] sm:$0xff]  ;;  %v12295_v8 = vsel %vm12097_vm2, %v22819_v29, 0.0 }
 0x51f   : > { %25279 = vst [vmem:[#allocation35_spill] sm:$0xff] %v22824_v58  ;;  %v10717_v10 = vadd.f32 %v10478_v18, %v25281_v37  ;;  %v12293_v38 = vsel %vm12097_vm2, %v22824_v58, 0.0  ;;  %v12458_v36 = vmul.f32 %v22824_v58, %v22824_v58  ;;  %v22835_v54 = vadd.f32 %v18152_v44, %v10718_v35  ;;  %v18155_v12 = vpop.f32.mrf.mxu0 }
 0x520   : > { %v17961_v6 = vpop.f32.mrf.mxu1  ;;  %v12294_v45 = vadd.f32 %v12293_v38, %v12292_v62  ;;  %v12682_v52 = vadd.f32 %v12681_v46, %v12680_v59  ;;  %v25286_v46 = vld [vmem:[#allocation39_spill] sm:$0xff] }
 0x521   : > { %25282 = vst [vmem:[#allocation36_spill] sm:$0xff] %v22835_v54  ;;  %v22837_v28 = vadd.f32 %v11828_v5, %v10717_v10  ;;  %v10720_v63 = vadd.f32 %v17961_v6, %v25284_v49  ;;  %v12683_v61 = vsel %vm12097_vm2, %v12458_v36, 0.0  ;;  %v11838_v18 = vpop.f32.mrf.mxu0  ;;  %v12685_v10 = vsel %vm12097_vm2, %v12459_v23, 0.0  ;;  %v25287_v49 = vld [vmem:[#allocation40_spill] sm:$0xff] }
 0x522   : > { %v10488_v53 = vpop.f32.mrf.mxu1  ;;  %v12684_v37 = vadd.f32 %v12683_v61, %v12682_v52  ;;  %v12296_v21 = vadd.f32 %v12295_v8, %v12294_v45  ;;  %v12461_v59 = vmul.f32 %v22835_v54, %v22835_v54  ;;  %v12299_v61 = vsel %vm12097_vm2, %v22835_v54, 0.0 }
 0x523   : > { %25283 = vst [vmem:[#allocation37_spill] sm:$0xff] %v22837_v28  ;;  %v12297_v44 = vsel %vm12097_vm2, %v22837_v28, 0.0  ;;  %v12460_v35 = vmul.f32 %v22837_v28, %v22837_v28  ;;  %v22850_v5 = vadd.f32 %v18155_v12, %v10720_v63  ;;  %v10719_v62 = vadd.f32 %v10488_v53, %v25286_v46  ;;  %v18158_v36 = vpop.f32.mrf.mxu0  ;;  %v25289_v53 = vld [vmem:[#allocation41_spill] sm:$0xff] }
 0x524   : > { %v17964_v38 = vpop.f32.mrf.mxu1  ;;  %v12298_v6 = vadd.f32 %v12297_v44, %v12296_v21  ;;  %v12686_v52 = vadd.f32 %v12685_v10, %v12684_v37  ;;  %v12689_v21 = vsel %vm12097_vm2, %v12461_v59, 0.0  ;;  %v25292_v59 = vld [vmem:[#allocation42_spill] sm:$0xff] }
 0x525   : > { %25285 = vst [vmem:[#allocation38_spill] sm:$0xff] %v22850_v5  ;;  %v12687_v45 = vsel %vm12097_vm2, %v12460_v35, 0.0  ;;  %v10722_v8 = vadd.f32 %v17964_v38, %v25287_v49  ;;  %v22857_v28 = vadd.f32 %v11838_v18, %v10719_v62  ;;  %v11848_v29 = vpop.f32.mrf.mxu0  ;;  %v12463_v12 = vmul.f32 %v22850_v5, %v22850_v5 }
 0x526   : > { %v10498_v23 = vpop.f32.mrf.mxu1  ;;  %v12688_v58 = vadd.f32 %v12687_v45, %v12686_v52  ;;  %v12300_v63 = vadd.f32 %v12299_v61, %v12298_v6  ;;  %v12303_v52 = vsel %vm12097_vm2, %v22850_v5, 0.0 }
 0x527   : > { %25288 = vst [vmem:[#allocation39_spill] sm:$0xff] %v22857_v28  ;;  %v10721_v46 = vadd.f32 %v10498_v23, %v25289_v53  ;;  %v12301_v37 = vsel %vm12097_vm2, %v22857_v28, 0.0  ;;  %v12462_v44 = vmul.f32 %v22857_v28, %v22857_v28  ;;  %v22867_v35 = vadd.f32 %v18158_v36, %v10722_v8  ;;  %v18161_v10 = vpop.f32.mrf.mxu0  ;;  %v25293_v8 = vld [vmem:[#allocation43_spill] sm:$0xff] }
 0x528   : > { %v17967_v18 = vpop.f32.mrf.mxu1  ;;  %v12302_v62 = vadd.f32 %v12301_v37, %v12300_v63  ;;  %v12690_v38 = vadd.f32 %v12689_v21, %v12688_v58  ;;  %v12693_v53 = vsel %vm12097_vm2, %v12463_v12, 0.0 }
 0x529   : > { %25290 = vst [vmem:[#allocation40_spill] sm:$0xff] %v22867_v35  ;;  %v12691_v6 = vsel %vm12097_vm2, %v12462_v44, 0.0  ;;  %v22872_v45 = vadd.f32 %v11848_v29, %v10721_v46  ;;  %v10724_v49 = vadd.f32 %v17967_v18, %v25292_v59  ;;  %v11858_v23 = vpop.f32.mrf.mxu0  ;;  %v12465_v58 = vmul.f32 %v22867_v35, %v22867_v35 }
 0x52a   : > { %v10508_v61 = vpop.f32.mrf.mxu1  ;;  %v12692_v28 = vadd.f32 %v12691_v6, %v12690_v38  ;;  %v12304_v36 = vadd.f32 %v12303_v52, %v12302_v62  ;;  %v25296_v62 = vld [vmem:[#allocation44_spill] sm:$0xff]  ;;  %v12307_v52 = vsel %vm12097_vm2, %v22867_v35, 0.0 }
 0x52b   : > { %25291 = vst [vmem:[#allocation41_spill] sm:$0xff] %v22872_v45  ;;  %v10723_v54 = vadd.f32 %v10508_v61, %v25293_v8  ;;  %v12305_v63 = vsel %vm12097_vm2, %v22872_v45, 0.0  ;;  %v12464_v29 = vmul.f32 %v22872_v45, %v22872_v45  ;;  %v22883_v46 = vadd.f32 %v18161_v10, %v10724_v49  ;;  %v18164_v37 = vpop.f32.mrf.mxu0 }
 0x52c   : > { %v17970_v21 = vpop.f32.mrf.mxu1  ;;  %v12306_v44 = vadd.f32 %v12305_v63, %v12304_v36  ;;  %v12694_v18 = vadd.f32 %v12693_v53, %v12692_v28  ;;  %v25298_v53 = vld [vmem:[#allocation45_spill] sm:$0xff] }
 0x52d   : > { %25294 = vst [vmem:[#allocation42_spill] sm:$0xff] %v22883_v46  ;;  %v22885_v12 = vadd.f32 %v11858_v23, %v10723_v54  ;;  %v10726_v38 = vadd.f32 %v17970_v21, %v25296_v62  ;;  %v12695_v6 = vsel %vm12097_vm2, %v12464_v29, 0.0  ;;  %v11868_v61 = vpop.f32.mrf.mxu0  ;;  %v12697_v54 = vsel %vm12097_vm2, %v12465_v58, 0.0  ;;  %v25299_v62 = vld [vmem:[#allocation46_spill] sm:$0xff] }
 0x52e   : > { %v10518_v59 = vpop.f32.mrf.mxu1  ;;  %v12696_v8 = vadd.f32 %v12695_v6, %v12694_v18  ;;  %v12308_v5 = vadd.f32 %v12307_v52, %v12306_v44  ;;  %v12467_v28 = vmul.f32 %v22883_v46, %v22883_v46  ;;  %v12311_v6 = vsel %vm12097_vm2, %v22883_v46, 0.0 }
 0x52f   : > { %25295 = vst [vmem:[#allocation43_spill] sm:$0xff] %v22885_v12  ;;  %v12309_v10 = vsel %vm12097_vm2, %v22885_v12, 0.0  ;;  %v12466_v49 = vmul.f32 %v22885_v12, %v22885_v12  ;;  %v22898_v23 = vadd.f32 %v18164_v37, %v10726_v38  ;;  %v10725_v36 = vadd.f32 %v10518_v59, %v25298_v53  ;;  %v18167_v29 = vpop.f32.mrf.mxu0  ;;  %v25301_v59 = vld [vmem:[#allocation47_spill] sm:$0xff] }
 0x530   : > { %v17973_v63 = vpop.f32.mrf.mxu1  ;;  %v12310_v21 = vadd.f32 %v12309_v10, %v12308_v5  ;;  %v12698_v18 = vadd.f32 %v12697_v54, %v12696_v8  ;;  %v12701_v5 = vsel %vm12097_vm2, %v12467_v28, 0.0  ;;  %v25304_v28 = vld [vmem:[#allocation48_spill] sm:$0xff] }
 0x531   : > { %25297 = vst [vmem:[#allocation44_spill] sm:$0xff] %v22898_v23  ;;  %v12699_v44 = vsel %vm12097_vm2, %v12466_v49, 0.0  ;;  %v10728_v52 = vadd.f32 %v17973_v63, %v25299_v62  ;;  %v22905_v12 = vadd.f32 %v11868_v61, %v10725_v36  ;;  %v11878_v35 = vpop.f32.mrf.mxu0  ;;  %v12469_v37 = vmul.f32 %v22898_v23, %v22898_v23 }
 0x532   : > { %v10528_v58 = vpop.f32.mrf.mxu1  ;;  %v12700_v45 = vadd.f32 %v12699_v44, %v12698_v18  ;;  %v12312_v38 = vadd.f32 %v12311_v6, %v12310_v21  ;;  %v12315_v18 = vsel %vm12097_vm2, %v22898_v23, 0.0 }
 0x533   : > { %25300 = vst [vmem:[#allocation45_spill] sm:$0xff] %v22905_v12  ;;  %v10727_v53 = vadd.f32 %v10528_v58, %v25301_v59  ;;  %v12313_v8 = vsel %vm12097_vm2, %v22905_v12, 0.0  ;;  %v12468_v10 = vmul.f32 %v22905_v12, %v22905_v12  ;;  %v22915_v49 = vadd.f32 %v18167_v29, %v10728_v52  ;;  %v18170_v54 = vpop.f32.mrf.mxu0  ;;  %v25305_v52 = vld [vmem:[#allocation49_spill] sm:$0xff] }
 0x534   : > { %v17976_v61 = vpop.f32.mrf.mxu1  ;;  %v12314_v36 = vadd.f32 %v12313_v8, %v12312_v38  ;;  %v12702_v63 = vadd.f32 %v12701_v5, %v12700_v45  ;;  %v12705_v59 = vsel %vm12097_vm2, %v12469_v37, 0.0 }
 0x535   : > { %25302 = vst [vmem:[#allocation46_spill] sm:$0xff] %v22915_v49  ;;  %v12703_v21 = vsel %vm12097_vm2, %v12468_v10, 0.0  ;;  %v22920_v44 = vadd.f32 %v11878_v35, %v10727_v53  ;;  %v10730_v62 = vadd.f32 %v17976_v61, %v25304_v28  ;;  %v11888_v58 = vpop.f32.mrf.mxu0  ;;  %v12471_v45 = vmul.f32 %v22915_v49, %v22915_v49 }
 0x536   : > { %v10538_v6 = vpop.f32.mrf.mxu1  ;;  %v12704_v12 = vadd.f32 %v12703_v21, %v12702_v63  ;;  %v12316_v29 = vadd.f32 %v12315_v18, %v12314_v36  ;;  %v25308_v36 = vld [vmem:[#allocation51_spill] sm:$0xff]  ;;  %v12319_v18 = vsel %vm12097_vm2, %v22915_v49, 0.0 }
 0x537   : > { %25303 = vst [vmem:[#allocation47_spill] sm:$0xff] %v22920_v44  ;;  %v10729_v46 = vadd.f32 %v10538_v6, %v25305_v52  ;;  %v12317_v38 = vsel %vm12097_vm2, %v22920_v44, 0.0  ;;  %v12470_v35 = vmul.f32 %v22920_v44, %v22920_v44  ;;  %v22931_v53 = vadd.f32 %v18170_v54, %v10730_v62  ;;  %v18173_v8 = vpop.f32.mrf.mxu0 }
 0x538   : > { %v17979_v5 = vpop.f32.mrf.mxu1  ;;  %v12318_v10 = vadd.f32 %v12317_v38, %v12316_v29  ;;  %v12706_v61 = vadd.f32 %v12705_v59, %v12704_v12  ;;  %v25310_v59 = vld [vmem:[#allocation53_spill] sm:$0xff] }
 0x539   : > { %25306 = vst [vmem:[#allocation48_spill] sm:$0xff] %v22931_v53  ;;  %v22933_v37 = vadd.f32 %v11888_v58, %v10729_v46  ;;  %v10732_v63 = vadd.f32 %v17979_v5, %v25308_v36  ;;  %v12707_v21 = vsel %vm12097_vm2, %v12470_v35, 0.0  ;;  %v11898_v6 = vpop.f32.mrf.mxu0  ;;  %v12709_v46 = vsel %vm12097_vm2, %v12471_v45, 0.0  ;;  %v25311_v36 = vld [vmem:[#allocation55_spill] sm:$0xff] }
 0x53a   : > { %v10548_v28 = vpop.f32.mrf.mxu1  ;;  %v12708_v52 = vadd.f32 %v12707_v21, %v12706_v61  ;;  %v12320_v23 = vadd.f32 %v12319_v18, %v12318_v10  ;;  %v12473_v12 = vmul.f32 %v22931_v53, %v22931_v53  ;;  %v12323_v21 = vsel %vm12097_vm2, %v22931_v53, 0.0 }
 0x53b   : > { %25307 = vst [vmem:[#allocation49_spill] sm:$0xff] %v22933_v37  ;;  %v12321_v54 = vsel %vm12097_vm2, %v22933_v37, 0.0  ;;  %v12472_v62 = vmul.f32 %v22933_v37, %v22933_v37  ;;  %v22946_v58 = vadd.f32 %v18173_v8, %v10732_v63  ;;  %v10731_v29 = vadd.f32 %v10548_v28, %v25310_v59  ;;  %v18176_v35 = vpop.f32.mrf.mxu0  ;;  %v25313_v28 = vld [vmem:[#allocation57_spill] sm:$0xff] }
 0x53c   : > { %v17982_v38 = vpop.f32.mrf.mxu1  ;;  %v12322_v5 = vadd.f32 %v12321_v54, %v12320_v23  ;;  %v12710_v61 = vadd.f32 %v12709_v46, %v12708_v52  ;;  %v12713_v23 = vsel %vm12097_vm2, %v12473_v12, 0.0  ;;  %v25316_v12 = vld [vmem:[#allocation59_spill] sm:$0xff] }
 0x53d   : > { %25309 = vst [vmem:[#allocation51_spill] sm:$0xff] %v22946_v58  ;;  %v12711_v10 = vsel %vm12097_vm2, %v12472_v62, 0.0  ;;  %v10734_v18 = vadd.f32 %v17982_v38, %v25311_v36  ;;  %v22953_v37 = vadd.f32 %v11898_v6, %v10731_v29  ;;  %v11908_v49 = vpop.f32.mrf.mxu0  ;;  %v12475_v8 = vmul.f32 %v22946_v58, %v22946_v58 }
 0x53e   : > { %v10558_v45 = vpop.f32.mrf.mxu1  ;;  %v12712_v44 = vadd.f32 %v12711_v10, %v12710_v61  ;;  %v12324_v63 = vadd.f32 %v12323_v21, %v12322_v5  ;;  %v12327_v61 = vsel %vm12097_vm2, %v22946_v58, 0.0 }
 0x53f   : > { %25312 = vst [vmem:[#allocation53_spill] sm:$0xff] %v22953_v37  ;;  %v10733_v59 = vadd.f32 %v10558_v45, %v25313_v28  ;;  %v12325_v52 = vsel %vm12097_vm2, %v22953_v37, 0.0  ;;  %v12474_v54 = vmul.f32 %v22953_v37, %v22953_v37  ;;  %v22963_v62 = vadd.f32 %v18176_v35, %v10734_v18  ;;  %v18179_v46 = vpop.f32.mrf.mxu0  ;;  %v25317_v18 = vld [vmem:[#allocation61_spill] sm:$0xff] }
 0x540   : > { %v17985_v6 = vpop.f32.mrf.mxu1  ;;  %v12326_v29 = vadd.f32 %v12325_v52, %v12324_v63  ;;  %v12714_v38 = vadd.f32 %v12713_v23, %v12712_v44  ;;  %v12717_v28 = vsel %vm12097_vm2, %v12475_v8, 0.0 }
 0x541   : > { %25314 = vst [vmem:[#allocation55_spill] sm:$0xff] %v22963_v62  ;;  %v12715_v5 = vsel %vm12097_vm2, %v12474_v54, 0.0  ;;  %v22968_v10 = vadd.f32 %v11908_v49, %v10733_v59  ;;  %v10736_v36 = vadd.f32 %v17985_v6, %v25316_v12  ;;  %v11918_v45 = vpop.f32.mrf.mxu0  ;;  %v12477_v44 = vmul.f32 %v22963_v62, %v22963_v62 }
 0x542   : > { %v10568_v21 = vpop.f32.mrf.mxu1  ;;  %v12716_v37 = vadd.f32 %v12715_v5, %v12714_v38  ;;  %v12328_v35 = vadd.f32 %v12327_v61, %v12326_v29  ;;  %v25319_v29 = vld [vmem:[#allocation63_spill] sm:$0xff]  ;;  %v12331_v61 = vsel %vm12097_vm2, %v22963_v62, 0.0 }
 0x543   : > { %25315 = vst [vmem:[#allocation57_spill] sm:$0xff] %v22968_v10  ;;  %v10735_v53 = vadd.f32 %v10568_v21, %v25317_v18  ;;  %v12329_v63 = vsel %vm12097_vm2, %v22968_v10, 0.0  ;;  %v12476_v49 = vmul.f32 %v22968_v10, %v22968_v10  ;;  %v22979_v59 = vadd.f32 %v18179_v46, %v10736_v36  ;;  %v18182_v52 = vpop.f32.mrf.mxu0 }
 0x544   : > { %v17988_v23 = vpop.f32.mrf.mxu1  ;;  %v12330_v54 = vadd.f32 %v12329_v63, %v12328_v35  ;;  %v12718_v6 = vadd.f32 %v12717_v28, %v12716_v37  ;;  %v25320_v28 = vld [vmem:[#allocation65_spill] sm:$0xff] }
 0x545   : > { %v22981_v8 = vadd.f32 %v11918_v45, %v10735_v53  ;;  %v10738_v38 = vadd.f32 %v17988_v23, %v25319_v29  ;;  %v12719_v5 = vsel %vm12097_vm2, %v12476_v49, 0.0  ;;  %v11928_v21 = vpop.f32.mrf.mxu0  ;;  %v12721_v53 = vsel %vm12097_vm2, %v12477_v44, 0.0  ;;  %v25321_v29 = vld [vmem:[#allocation67_spill] sm:$0xff] }
 0x546   : > { %v10578_v12 = vpop.f32.mrf.mxu1  ;;  %v12720_v18 = vadd.f32 %v12719_v5, %v12718_v6  ;;  %v12332_v58 = vadd.f32 %v12331_v61, %v12330_v54  ;;  %v12479_v37 = vmul.f32 %v22979_v59, %v22979_v59  ;;  %v12335_v5 = vsel %vm12097_vm2, %v22979_v59, 0.0 }
 0x547   : > { %25318 = vst [vmem:[#allocation59_spill] sm:$0xff] %v22981_v8  ;;  %v12333_v46 = vsel %vm12097_vm2, %v22981_v8, 0.0  ;;  %v12478_v36 = vmul.f32 %v22981_v8, %v22981_v8  ;;  %v22994_v45 = vadd.f32 %v18182_v52, %v10738_v38  ;;  %v10737_v35 = vadd.f32 %v10578_v12, %v25320_v28  ;;  %v18185_v49 = vpop.f32.mrf.mxu0 }
 0x548   : > { %v17991_v63 = vpop.f32.mrf.mxu1  ;;  %v12334_v23 = vadd.f32 %v12333_v46, %v12332_v58  ;;  %v12722_v6 = vadd.f32 %v12721_v53, %v12720_v18  ;;  %v12725_v58 = vsel %vm12097_vm2, %v12479_v37, 0.0  ;;  %v25324_v37 = vld [vmem:[#allocation69_spill] sm:$0xff] }
 0x549   : > { %v12723_v54 = vsel %vm12097_vm2, %v12478_v36, 0.0  ;;  %v10740_v61 = vadd.f32 %v17991_v63, %v25321_v29  ;;  %v23001_v8 = vadd.f32 %v11928_v21, %v10737_v35  ;;  %v11938_v62 = vpop.f32.mrf.mxu0  ;;  %v12481_v52 = vmul.f32 %v22994_v45, %v22994_v45 }
 0x54a   : > { %v10588_v44 = vpop.f32.mrf.mxu1  ;;  %v12724_v10 = vadd.f32 %v12723_v54, %v12722_v6  ;;  %v12336_v38 = vadd.f32 %v12335_v5, %v12334_v23  ;;  %v12339_v63 = vsel %vm12097_vm2, %v22994_v45, 0.0 }
 0x54b   : > { %25322 = vst [vmem:[#allocation61_spill] sm:$0xff] %v23001_v8  ;;  %v10739_v12 = vadd.f32 %v10588_v44, %v21889_v34  ;;  %v12337_v18 = vsel %vm12097_vm2, %v23001_v8, 0.0  ;;  %v12480_v46 = vmul.f32 %v23001_v8, %v23001_v8  ;;  %v23011_v36 = vadd.f32 %v18185_v49, %v10740_v61  ;;  %v18188_v53 = vpop.f32.mrf.mxu0  ;;  %v25325_v61 = vld [vmem:[#allocation71_spill] sm:$0xff] }
 0x54c   : > { %v17994_v21 = vpop.f32.mrf.mxu1  ;;  %v12338_v28 = vadd.f32 %v12337_v18, %v12336_v38  ;;  %v12726_v35 = vadd.f32 %v12725_v58, %v12724_v10  ;;  %v12729_v5 = vsel %vm12097_vm2, %v12481_v52, 0.0  ;;  %v25328_v52 = vld [vmem:[#allocation73_spill] sm:$0xff] }
 0x54d   : > { %25323 = vst [vmem:[#allocation63_spill] sm:$0xff] %v23011_v36  ;;  %v12727_v23 = vsel %vm12097_vm2, %v12480_v46, 0.0  ;;  %v23016_v34 = vadd.f32 %v11938_v62, %v10739_v12  ;;  %v10742_v6 = vadd.f32 %v17994_v21, %v25324_v37  ;;  %v11948_v29 = vpop.f32.mrf.mxu0  ;;  %v12483_v10 = vmul.f32 %v23011_v36, %v23011_v36 }
 0x54e   : > { %v10598_v54 = vpop.f32.mrf.mxu1  ;;  %v12728_v44 = vadd.f32 %v12727_v23, %v12726_v35  ;;  %v12340_v49 = vadd.f32 %v12339_v63, %v12338_v28  ;;  %v12343_v63 = vsel %vm12097_vm2, %v23011_v36, 0.0 }
 0x54f   : > { %v10741_v8 = vadd.f32 %v10598_v54, %v25325_v61  ;;  %v12341_v38 = vsel %vm12097_vm2, %v23016_v34, 0.0  ;;  %v12482_v62 = vmul.f32 %v23016_v34, %v23016_v34  ;;  %v23027_v12 = vadd.f32 %v18188_v53, %v10742_v6  ;;  %v18191_v35 = vpop.f32.mrf.mxu0 }
 0x550   : > { %v17997_v58 = vpop.f32.mrf.mxu1  ;;  %v12342_v18 = vadd.f32 %v12341_v38, %v12340_v49  ;;  %v12730_v46 = vadd.f32 %v12729_v5, %v12728_v44  ;;  %v25330_v44 = vld [vmem:[#allocation84_spill] sm:$0xff] }
 0x551   : > { %25326 = vst [vmem:[#allocation65_spill] sm:$0xff] %v23027_v12  ;;  %v23029_v21 = vadd.f32 %v11948_v29, %v10741_v8  ;;  %v10744_v28 = vadd.f32 %v17997_v58, %v25328_v52  ;;  %v12731_v23 = vsel %vm12097_vm2, %v12482_v62, 0.0  ;;  %v12733_v8 = vsel %vm12097_vm2, %v12483_v10, 0.0 }
 0x552   : > { %v10608_v37 = vpop.f32.mrf.mxu1  ;;  %v12732_v54 = vadd.f32 %v12731_v23, %v12730_v46  ;;  %v12344_v61 = vadd.f32 %v12343_v63, %v12342_v18  ;;  %v12485_v29 = vmul.f32 %v23027_v12, %v23027_v12  ;;  %v11958_v18 = vpop.f32.mrf.mxu0  ;;  %v12347_v46 = vsel %vm12097_vm2, %v23027_v12, 0.0 }
 0x553   : > { %25327 = vst [vmem:[#allocation67_spill] sm:$0xff] %v23029_v21  ;;  %v12345_v53 = vsel %vm12097_vm2, %v23029_v21, 0.0  ;;  %v12484_v6 = vmul.f32 %v23029_v21, %v23029_v21  ;;  %v23042_v5 = vadd.f32 %v18191_v35, %v10744_v28  ;;  %v10743_v49 = vadd.f32 %v10608_v37, %v25330_v44 }
 0x554   : > { %v12346_v38 = vadd.f32 %v12345_v53, %v12344_v61  ;;  %v12734_v62 = vadd.f32 %v12733_v8, %v12732_v54  ;;  %v12737_v10 = vsel %vm12097_vm2, %v12485_v29, 0.0 }
 0x555   : > { %25329 = vst [vmem:[#allocation69_spill] sm:$0xff] %v23042_v5  ;;  %v12735_v58 = vsel %vm12097_vm2, %v12484_v6, 0.0  ;;  %v23048_v52 = vadd.f32 %v11958_v18, %v10743_v49  ;;  %v12487_v28 = vmul.f32 %v23042_v5, %v23042_v5  ;;  %v12351_v53 = vsel %vm12097_vm2, %v23042_v5, 0.0 }
 0x556   : > { %v12736_v63 = vadd.f32 %v12735_v58, %v12734_v62  ;;  %v12348_v23 = vadd.f32 %v12347_v46, %v12346_v38 }
 0x557   : > { %25331 = vst [vmem:[#allocation71_spill] sm:$0xff] %v23048_v52  ;;  %v12349_v35 = vsel %vm12097_vm2, %v23048_v52, 0.0  ;;  %v12486_v37 = vmul.f32 %v23048_v52, %v23048_v52  ;;  %v12741_v29 = vsel %vm12097_vm2, %v12487_v28, 0.0  ;;  %v12759_v28 = vlaneseq }
 0x558   : > { %v12350_v54 = vadd.f32 %v12349_v35, %v12348_v23  ;;  %v12738_v61 = vadd.f32 %v12737_v10, %v12736_v63 }
 0x559   : > { %v12739_v6 = vsel %vm12097_vm2, %v12486_v37, 0.0 }
 0x55a   : > { %v12352_v8 = vadd.f32 %v12351_v53, %v12350_v54  ;;  %v12740_v44 = vadd.f32 %v12739_v6, %v12738_v61  ;;  %v23061_v6 = vshrl.u32 %v12759_v28, 7  ;;  %v25338_v28 = vld [vmem:[#allocation90_spill] sm:$0xff] }
 0x55c   : > { %v12353_v49 = vrot.slane %v12352_v8, 4  ;;  %v12742_v38 = vadd.f32 %v12741_v29, %v12740_v44  ;;  %v24597_v44 = vsub.s32 0, %v23061_v6  ;;  %v25349_v29 = vld [vmem:[#allocation52_spill] sm:$0xff] }
 0x55e   : > { %v12354_v62 = vadd.f32 %v12353_v49, %v12352_v8  ;;  %v12743_v58 = vrot.slane %v12742_v38, 4  ;;  %v12095_v8 = vld [vmem:[%s24506_s2] sm:$0x1] }
 0x55f   : > { %v25332_v49 = vld [vmem:[#allocation86_spill] sm:$0xff] }
 0x560   : > { %v12355_v18 = vrot.slane %v12354_v62, 2  ;;  %v12744_v46 = vadd.f32 %v12743_v58, %v12742_v38 }
 0x562   : > { %v12356_v12 = vadd.f32 %v12355_v18, %v12354_v62  ;;  %v12745_v21 = vrot.slane %v12744_v46, 2  ;;  %v25333_v62 = vld [vmem:[#allocation85_spill] sm:$0xff]  ;;  %v25334_v18 = vld [vmem:[#allocation87_spill] sm:$0xff] }
 0x564   : > { %v12357_v52 = vrot.slane %v12356_v12, 1  ;;  %v12746_v23 = vadd.f32 %v12745_v21, %v12744_v46 }
 0x566   : > { %v12358_v63 = vadd.f32 %v12357_v52, %v12356_v12  ;;  %v12747_v10 = vrot.slane %v12746_v23, 1 }
 0x568   : > { %v12359_v35 = vmul.f32 0.0009765625, %v12358_v63  ;;  %v12748_v5 = vadd.f32 %v12747_v10, %v12746_v23 }
 0x56a   : > { %v12749_v36 = vmul.f32 0.0009765625, %v12748_v5  ;;  %v12750_v37 = vmul.f32 %v12359_v35, %v12359_v35  ;;  %v23070_v5 = vld [vmem:[%s24507_s3] sm:$0x1] }
 0x56c   : > { %v12751_v54 = vsub.f32 %v12749_v36, %v12750_v37 }
 0x56e   : > { %v12752_v61 = vmax.f32 %v12751_v54, 0.0  ;;  %v25335_v54 = vld [vmem:[#allocation89_spill] sm:$0xff] }
 0x570   : > { %v12753_v53 = vadd.f32 1e-05, %v12752_v61  ;;  %v25336_v61 = vld [vmem:[#allocation88_spill] sm:$0xff] }
 0x572   : > { %18203 = vrsqrt.f32 %v12753_v53  ;;  %v25337_v53 = vld [vmem:[#allocation75_spill] sm:$0xff] }
 0x57f   : > { %v18204_v21 = vpop.eup %18203 }
 0x580   : > { %v12755_v12 = vmul.f32 %v18204_v21, %v12095_v8  ;;  %v25339_v8 = vld [vmem:[#allocation91_spill] sm:$0xff]  ;;  %v25340_v21 = vld [vmem:[#allocation77_spill] sm:$0xff] }
 0x582   : > { %v23072_v36 = vmul.f32 %v12755_v12, %v12359_v35  ;;  %v23076_v52 = vrot.slane %v12755_v12, %v24597_v44  ;;  %v25351_v44 = vld [vmem:[#allocation50_spill] sm:$0xff] }
 0x584   : > { %v23082_v38 = vmul.f32 %v23076_v52, %v25332_v49  ;;  %v23086_v58 = vmul.f32 %v23076_v52, %v25333_v62  ;;  %v23090_v46 = vmul.f32 %v23076_v52, %v25334_v18  ;;  %v23094_v23 = vmul.f32 %v23076_v52, %v21946_v40  ;;  %v25341_v49 = vld [vmem:[#allocation81_spill] sm:$0xff]  ;;  %v25343_v18 = vld [vmem:[#allocation79_spill] sm:$0xff] }
 0x585   : > { %v23098_v63 = vmul.f32 %v23076_v52, %v21975_v60  ;;  %v23102_v10 = vmul.f32 %v23076_v52, %v21963_v31  ;;  %v23106_v35 = vmul.f32 %v23076_v52, %v22007_v42  ;;  %v23110_v37 = vmul.f32 %v23076_v52, %v21994_v3 }
 0x586   : > { %v23114_v40 = vmul.f32 %v23076_v52, %v22030_v56  ;;  %v23118_v60 = vmul.f32 %v23076_v52, %v22019_v0  ;;  %v23122_v31 = vmul.f32 %v23076_v52, %v22047_v4  ;;  %v23126_v42 = vmul.f32 %v23076_v52, %v22043_v9 }
 0x587   : > { %v23130_v3 = vmul.f32 %v23076_v52, %v22079_v25  ;;  %v23134_v56 = vmul.f32 %v23076_v52, %v22066_v32  ;;  %v23138_v0 = vmul.f32 %v23076_v52, %v22102_v16  ;;  %v23142_v4 = vmul.f32 %v23076_v52, %v22091_v50 }
 0x588   : > { %v23146_v9 = vmul.f32 %v23076_v52, %v22119_v48  ;;  %v23150_v25 = vmul.f32 %v23076_v52, %v22115_v41  ;;  %v23154_v32 = vmul.f32 %v23076_v52, %v22151_v33  ;;  %v23158_v16 = vmul.f32 %v23076_v52, %v22138_v26 }
 0x589   : > { %v23162_v50 = vmul.f32 %v23076_v52, %v22174_v17  ;;  %v23166_v48 = vmul.f32 %v23076_v52, %v22163_v13  ;;  %v23170_v41 = vmul.f32 %v23076_v52, %v22191_v57  ;;  %v23174_v33 = vmul.f32 %v23076_v52, %v22187_v15 }
 0x58a   : > { %v23178_v26 = vmul.f32 %v23076_v52, %v22223_v43  ;;  %v23182_v17 = vmul.f32 %v23076_v52, %v22210_v1  ;;  %v23186_v13 = vmul.f32 %v23076_v52, %v22246_v30  ;;  %v23190_v57 = vmul.f32 %v23076_v52, %v22235_v55 }
 0x58b   : > { %v23194_v15 = vmul.f32 %v23076_v52, %v22261_v7  ;;  %v23198_v43 = vmul.f32 %v23076_v52, %v22257_v24  ;;  %v23202_v1 = vmul.f32 %v23076_v52, %v22281_v39  ;;  %v23206_v30 = vmul.f32 %v23076_v52, %v22274_v2 }
 0x58c   : > { %v23210_v55 = vmul.f32 %v23076_v52, %v22296_v22  ;;  %v23214_v7 = vmul.f32 %v23076_v52, %v22291_v20  ;;  %v23218_v24 = vmul.f32 %v23076_v52, %v22309_v27  ;;  %v23222_v39 = vmul.f32 %v23076_v52, %v22307_v11 }
 0x58d   : > { %v23226_v2 = vmul.f32 %v23076_v52, %v22329_v51  ;;  %v23230_v22 = vmul.f32 %v23076_v52, %v22322_v19  ;;  %v23234_v20 = vmul.f32 %v23076_v52, %v22344_v47  ;;  %v23238_v27 = vmul.f32 %v23076_v52, %v22339_v14 }
 0x58e   : > { %v23242_v11 = vmul.f32 %v23076_v52, %v25335_v54  ;;  %v23246_v51 = vmul.f32 %v23076_v52, %v25336_v61  ;;  %v23250_v19 = vmul.f32 %v23076_v52, %v25337_v53  ;;  %v23254_v47 = vmul.f32 %v23076_v52, %v25338_v28  ;;  %v25345_v61 = vld [vmem:[#allocation83_spill] sm:$0xff]  ;;  %v25347_v28 = vld [vmem:[#allocation82_spill] sm:$0xff] }
 0x58f   : > { %v23258_v14 = vmul.f32 %v23076_v52, %v25339_v8  ;;  %v23262_v12 = vmul.f32 %v23076_v52, %v25340_v21  ;;  %v23266_v62 = vmul.f32 %v23076_v52, %v25341_v49  ;;  %v23270_v54 = vmul.f32 %v23076_v52, %v25343_v18 }
 0x590   : > { %v23274_v53 = vmul.f32 %v23076_v52, %v25345_v61  ;;  %v23278_v8 = vmul.f32 %v23076_v52, %v25347_v28  ;;  %v23282_v21 = vmul.f32 %v23076_v52, %v25349_v29  ;;  %v23286_v49 = vmul.f32 %v23076_v52, %v25351_v44 }
 0x591   : > { %25342 = vst [vmem:[#allocation73_spill] sm:$0xff] %v23266_v62  ;;  %25344 = vst [vmem:[#allocation84_spill] sm:$0xff] %v23270_v54  ;;  %v25353_v62 = vld [vmem:[#allocation56_spill] sm:$0xff]  ;;  %v25355_v54 = vld [vmem:[#allocation54_spill] sm:$0xff] }
 0x592   : > { %25346 = vst [vmem:[#allocation86_spill] sm:$0xff] %v23274_v53  ;;  %25348 = vst [vmem:[#allocation85_spill] sm:$0xff] %v23278_v8  ;;  %v23290_v18 = vmul.f32 %v23076_v52, %v25353_v62  ;;  %v23294_v61 = vmul.f32 %v23076_v52, %v25355_v54  ;;  %v25357_v53 = vld [vmem:[#allocation60_spill] sm:$0xff]  ;;  %v25359_v8 = vld [vmem:[#allocation58_spill] sm:$0xff] }
 0x593   : > { %25350 = vst [vmem:[#allocation87_spill] sm:$0xff] %v23282_v21  ;;  %25352 = vst [vmem:[#allocation89_spill] sm:$0xff] %v23286_v49  ;;  %v23298_v28 = vmul.f32 %v23076_v52, %v25357_v53  ;;  %v23302_v29 = vmul.f32 %v23076_v52, %v25359_v8  ;;  %v25361_v21 = vld [vmem:[#allocation64_spill] sm:$0xff]  ;;  %v25363_v49 = vld [vmem:[#allocation62_spill] sm:$0xff] }
 0x594   : > { %25354 = vst [vmem:[#allocation88_spill] sm:$0xff] %v23290_v18  ;;  %25356 = vst [vmem:[#allocation75_spill] sm:$0xff] %v23294_v61  ;;  %v23306_v44 = vmul.f32 %v23076_v52, %v25361_v21  ;;  %v23310_v62 = vmul.f32 %v23076_v52, %v25363_v49  ;;  %v25365_v18 = vld [vmem:[#allocation68_spill] sm:$0xff]  ;;  %v25367_v61 = vld [vmem:[#allocation66_spill] sm:$0xff] }
 0x595   : > { %25358 = vst [vmem:[#allocation90_spill] sm:$0xff] %v23298_v28  ;;  %25360 = vst [vmem:[#allocation91_spill] sm:$0xff] %v23302_v29  ;;  %v23314_v54 = vmul.f32 %v23076_v52, %v25365_v18  ;;  %v23318_v53 = vmul.f32 %v23076_v52, %v25367_v61  ;;  %v25369_v28 = vld [vmem:[#allocation72_spill] sm:$0xff]  ;;  %v25371_v29 = vld [vmem:[#allocation70_spill] sm:$0xff] }
 0x596   : > { %25362 = vst [vmem:[#allocation77_spill] sm:$0xff] %v23306_v44  ;;  %25364 = vst [vmem:[#allocation81_spill] sm:$0xff] %v23310_v62  ;;  %v23322_v8 = vmul.f32 %v23076_v52, %v25369_v28  ;;  %v23326_v21 = vmul.f32 %v23076_v52, %v25371_v29  ;;  %v25373_v44 = vld [vmem:[#allocation76_spill] sm:$0xff]  ;;  %v25375_v62 = vld [vmem:[#allocation74_spill] sm:$0xff] }
 0x597   : > { %25366 = vst [vmem:[#allocation79_spill] sm:$0xff] %v23314_v54  ;;  %25368 = vst [vmem:[#allocation83_spill] sm:$0xff] %v23318_v53  ;;  %v23330_v49 = vmul.f32 %v23076_v52, %v25373_v44  ;;  %v23334_v18 = vmul.f32 %v23076_v52, %v25375_v62  ;;  %v25377_v54 = vld [vmem:[#allocation80_spill] sm:$0xff]  ;;  %v25379_v53 = vld [vmem:[#allocation78_spill] sm:$0xff] }
 0x598   : > { %25370 = vst [vmem:[#allocation82_spill] sm:$0xff] %v23322_v8  ;;  %25372 = vst [vmem:[#allocation52_spill] sm:$0xff] %v23326_v21  ;;  %v23338_v61 = vmul.f32 %v23076_v52, %v25377_v54  ;;  %v23342_v28 = vmul.f32 %v23076_v52, %v25379_v53  ;;  %v25381_v8 = vld [vmem:[#allocation3_spill] sm:$0xff]  ;;  %v25383_v21 = vld [vmem:[#allocation2_spill] sm:$0xff] }
 0x599   : > { %25374 = vst [vmem:[#allocation50_spill] sm:$0xff] %v23330_v49  ;;  %25376 = vst [vmem:[#allocation56_spill] sm:$0xff] %v23334_v18  ;;  %v23346_v29 = vmul.f32 %v23076_v52, %v25381_v8  ;;  %v23350_v44 = vmul.f32 %v23076_v52, %v25383_v21  ;;  %v25385_v49 = vld [vmem:[#allocation5_spill] sm:$0xff]  ;;  %v25387_v18 = vld [vmem:[#allocation4_spill] sm:$0xff] }
 0x59a   : > { %25378 = vst [vmem:[#allocation54_spill] sm:$0xff] %v23338_v61  ;;  %25380 = vst [vmem:[#allocation60_spill] sm:$0xff] %v23342_v28  ;;  %v23354_v62 = vmul.f32 %v23076_v52, %v25385_v49  ;;  %v23358_v54 = vmul.f32 %v23076_v52, %v25387_v18  ;;  %v25389_v61 = vld [vmem:[#allocation7_spill] sm:$0xff]  ;;  %v25391_v28 = vld [vmem:[#allocation6_spill] sm:$0xff] }
 0x59b   : > { %25382 = vst [vmem:[#allocation58_spill] sm:$0xff] %v23346_v29  ;;  %25384 = vst [vmem:[#allocation64_spill] sm:$0xff] %v23350_v44  ;;  %v23362_v53 = vmul.f32 %v23076_v52, %v25389_v61  ;;  %v23366_v8 = vmul.f32 %v23076_v52, %v25391_v28  ;;  %v25393_v29 = vld [vmem:[#allocation9_spill] sm:$0xff]  ;;  %v25395_v44 = vld [vmem:[#allocation8_spill] sm:$0xff] }
 0x59c   : > { %25386 = vst [vmem:[#allocation62_spill] sm:$0xff] %v23354_v62  ;;  %25388 = vst [vmem:[#allocation68_spill] sm:$0xff] %v23358_v54  ;;  %v23370_v21 = vmul.f32 %v23076_v52, %v25393_v29  ;;  %v23374_v49 = vmul.f32 %v23076_v52, %v25395_v44  ;;  %v25397_v62 = vld [vmem:[#allocation11_spill] sm:$0xff]  ;;  %v25399_v54 = vld [vmem:[#allocation10_spill] sm:$0xff] }
 0x59d   : > { %25390 = vst [vmem:[#allocation66_spill] sm:$0xff] %v23362_v53  ;;  %25392 = vst [vmem:[#allocation72_spill] sm:$0xff] %v23366_v8  ;;  %v23378_v18 = vmul.f32 %v23076_v52, %v25397_v62  ;;  %v23382_v61 = vmul.f32 %v23076_v52, %v25399_v54  ;;  %v25401_v53 = vld [vmem:[#allocation13_spill] sm:$0xff]  ;;  %v25403_v8 = vld [vmem:[#allocation12_spill] sm:$0xff] }
 0x59e   : > { %25394 = vst [vmem:[#allocation70_spill] sm:$0xff] %v23370_v21  ;;  %25396 = vst [vmem:[#allocation76_spill] sm:$0xff] %v23374_v49  ;;  %v23386_v28 = vmul.f32 %v23076_v52, %v25401_v53  ;;  %v23390_v29 = vmul.f32 %v23076_v52, %v25403_v8  ;;  %v25405_v21 = vld [vmem:[#allocation15_spill] sm:$0xff]  ;;  %v25407_v49 = vld [vmem:[#allocation14_spill] sm:$0xff] }
 0x59f   : > { %25398 = vst [vmem:[#allocation74_spill] sm:$0xff] %v23378_v18  ;;  %25400 = vst [vmem:[#allocation80_spill] sm:$0xff] %v23382_v61  ;;  %v23394_v44 = vmul.f32 %v23076_v52, %v25405_v21  ;;  %v23398_v62 = vmul.f32 %v23076_v52, %v25407_v49  ;;  %v25409_v18 = vld [vmem:[#allocation17_spill] sm:$0xff]  ;;  %v25411_v61 = vld [vmem:[#allocation16_spill] sm:$0xff] }
 0x5a0   : > { %25402 = vst [vmem:[#allocation78_spill] sm:$0xff] %v23386_v28  ;;  %25404 = vst [vmem:[#allocation3_spill] sm:$0xff] %v23390_v29  ;;  %v23402_v54 = vmul.f32 %v23076_v52, %v25409_v18  ;;  %v23406_v53 = vmul.f32 %v23076_v52, %v25411_v61  ;;  %v25413_v28 = vld [vmem:[#allocation19_spill] sm:$0xff]  ;;  %v25415_v29 = vld [vmem:[#allocation18_spill] sm:$0xff] }
 0x5a1   : > { %25406 = vst [vmem:[#allocation2_spill] sm:$0xff] %v23394_v44  ;;  %25408 = vst [vmem:[#allocation5_spill] sm:$0xff] %v23398_v62  ;;  %v23410_v8 = vmul.f32 %v23076_v52, %v25413_v28  ;;  %v23414_v21 = vmul.f32 %v23076_v52, %v25415_v29  ;;  %v25417_v44 = vld [vmem:[#allocation21_spill] sm:$0xff]  ;;  %v25419_v62 = vld [vmem:[#allocation20_spill] sm:$0xff] }
 0x5a2   : > { %25410 = vst [vmem:[#allocation4_spill] sm:$0xff] %v23402_v54  ;;  %25412 = vst [vmem:[#allocation7_spill] sm:$0xff] %v23406_v53  ;;  %v23418_v49 = vmul.f32 %v23076_v52, %v25417_v44  ;;  %v23422_v18 = vmul.f32 %v23076_v52, %v25419_v62  ;;  %v25421_v54 = vld [vmem:[#allocation23_spill] sm:$0xff]  ;;  %v25423_v53 = vld [vmem:[#allocation22_spill] sm:$0xff] }
 0x5a3   : > { %25414 = vst [vmem:[#allocation6_spill] sm:$0xff] %v23410_v8  ;;  %25416 = vst [vmem:[#allocation9_spill] sm:$0xff] %v23414_v21  ;;  %v23426_v61 = vmul.f32 %v23076_v52, %v25421_v54  ;;  %v23430_v28 = vmul.f32 %v23076_v52, %v25423_v53  ;;  %v25425_v8 = vld [vmem:[#allocation25_spill] sm:$0xff]  ;;  %v25427_v21 = vld [vmem:[#allocation24_spill] sm:$0xff] }
 0x5a4   : > { %25418 = vst [vmem:[#allocation8_spill] sm:$0xff] %v23418_v49  ;;  %25420 = vst [vmem:[#allocation11_spill] sm:$0xff] %v23422_v18  ;;  %v23434_v29 = vmul.f32 %v23076_v52, %v25425_v8  ;;  %v23438_v44 = vmul.f32 %v23076_v52, %v25427_v21  ;;  %v25429_v49 = vld [vmem:[#allocation27_spill] sm:$0xff]  ;;  %v25431_v18 = vld [vmem:[#allocation26_spill] sm:$0xff] }
 0x5a5   : > { %25422 = vst [vmem:[#allocation10_spill] sm:$0xff] %v23426_v61  ;;  %25424 = vst [vmem:[#allocation13_spill] sm:$0xff] %v23430_v28  ;;  %v23442_v62 = vmul.f32 %v23076_v52, %v25429_v49  ;;  %v23446_v54 = vmul.f32 %v23076_v52, %v25431_v18  ;;  %v25433_v61 = vld [vmem:[#allocation29_spill] sm:$0xff]  ;;  %v25435_v28 = vld [vmem:[#allocation28_spill] sm:$0xff] }
 0x5a6   : > { %25426 = vst [vmem:[#allocation12_spill] sm:$0xff] %v23434_v29  ;;  %25428 = vst [vmem:[#allocation15_spill] sm:$0xff] %v23438_v44  ;;  %v23450_v53 = vmul.f32 %v23076_v52, %v25433_v61  ;;  %v23454_v8 = vmul.f32 %v23076_v52, %v25435_v28  ;;  %v25437_v29 = vld [vmem:[#allocation31_spill] sm:$0xff]  ;;  %v25439_v44 = vld [vmem:[#allocation30_spill] sm:$0xff] }
 0x5a7   : > { %25430 = vst [vmem:[#allocation14_spill] sm:$0xff] %v23442_v62  ;;  %25432 = vst [vmem:[#allocation17_spill] sm:$0xff] %v23446_v54  ;;  %v23458_v21 = vmul.f32 %v23076_v52, %v25437_v29  ;;  %v23462_v49 = vmul.f32 %v23076_v52, %v25439_v44  ;;  %v25441_v62 = vld [vmem:[#allocation33_spill] sm:$0xff]  ;;  %v25443_v54 = vld [vmem:[#allocation32_spill] sm:$0xff] }
 0x5a8   : > { %25434 = vst [vmem:[#allocation16_spill] sm:$0xff] %v23450_v53  ;;  %25436 = vst [vmem:[#allocation19_spill] sm:$0xff] %v23454_v8  ;;  %v23466_v18 = vmul.f32 %v23076_v52, %v25441_v62  ;;  %v23470_v61 = vmul.f32 %v23076_v52, %v25443_v54  ;;  %v25445_v53 = vld [vmem:[#allocation35_spill] sm:$0xff]  ;;  %v25447_v8 = vld [vmem:[#allocation34_spill] sm:$0xff] }
 0x5a9   : > { %25438 = vst [vmem:[#allocation18_spill] sm:$0xff] %v23458_v21  ;;  %25440 = vst [vmem:[#allocation21_spill] sm:$0xff] %v23462_v49  ;;  %v23474_v28 = vmul.f32 %v23076_v52, %v25445_v53  ;;  %v23478_v29 = vmul.f32 %v23076_v52, %v25447_v8  ;;  %v25449_v21 = vld [vmem:[#allocation37_spill] sm:$0xff]  ;;  %v25451_v49 = vld [vmem:[#allocation36_spill] sm:$0xff] }
 0x5aa   : > { %25442 = vst [vmem:[#allocation20_spill] sm:$0xff] %v23466_v18  ;;  %25444 = vst [vmem:[#allocation23_spill] sm:$0xff] %v23470_v61  ;;  %v23482_v44 = vmul.f32 %v23076_v52, %v25449_v21  ;;  %v23486_v62 = vmul.f32 %v23076_v52, %v25451_v49  ;;  %v25453_v18 = vld [vmem:[#allocation39_spill] sm:$0xff]  ;;  %v25455_v61 = vld [vmem:[#allocation38_spill] sm:$0xff] }
 0x5ab   : > { %25446 = vst [vmem:[#allocation22_spill] sm:$0xff] %v23474_v28  ;;  %25448 = vst [vmem:[#allocation25_spill] sm:$0xff] %v23478_v29  ;;  %v23490_v54 = vmul.f32 %v23076_v52, %v25453_v18  ;;  %v23494_v53 = vmul.f32 %v23076_v52, %v25455_v61  ;;  %v25457_v28 = vld [vmem:[#allocation41_spill] sm:$0xff]  ;;  %v25459_v29 = vld [vmem:[#allocation40_spill] sm:$0xff] }
 0x5ac   : > { %25450 = vst [vmem:[#allocation24_spill] sm:$0xff] %v23482_v44  ;;  %25452 = vst [vmem:[#allocation27_spill] sm:$0xff] %v23486_v62  ;;  %v23498_v8 = vmul.f32 %v23076_v52, %v25457_v28  ;;  %v23502_v21 = vmul.f32 %v23076_v52, %v25459_v29  ;;  %v25461_v44 = vld [vmem:[#allocation43_spill] sm:$0xff]  ;;  %v25463_v62 = vld [vmem:[#allocation42_spill] sm:$0xff] }
 0x5ad   : > { %25454 = vst [vmem:[#allocation26_spill] sm:$0xff] %v23490_v54  ;;  %25456 = vst [vmem:[#allocation29_spill] sm:$0xff] %v23494_v53  ;;  %v23506_v49 = vmul.f32 %v23076_v52, %v25461_v44  ;;  %v23510_v18 = vmul.f32 %v23076_v52, %v25463_v62  ;;  %v25465_v54 = vld [vmem:[#allocation45_spill] sm:$0xff]  ;;  %v25467_v53 = vld [vmem:[#allocation44_spill] sm:$0xff] }
 0x5ae   : > { %25458 = vst [vmem:[#allocation28_spill] sm:$0xff] %v23498_v8  ;;  %25460 = vst [vmem:[#allocation31_spill] sm:$0xff] %v23502_v21  ;;  %v23514_v61 = vmul.f32 %v23076_v52, %v25465_v54  ;;  %v23518_v28 = vmul.f32 %v23076_v52, %v25467_v53  ;;  %v25469_v8 = vld [vmem:[#allocation47_spill] sm:$0xff]  ;;  %v25471_v21 = vld [vmem:[#allocation46_spill] sm:$0xff] }
 0x5af   : > { %25462 = vst [vmem:[#allocation30_spill] sm:$0xff] %v23506_v49  ;;  %25464 = vst [vmem:[#allocation33_spill] sm:$0xff] %v23510_v18  ;;  %v23522_v29 = vmul.f32 %v23076_v52, %v25469_v8  ;;  %v23526_v44 = vmul.f32 %v23076_v52, %v25471_v21  ;;  %v25473_v49 = vld [vmem:[#allocation49_spill] sm:$0xff]  ;;  %v25475_v18 = vld [vmem:[#allocation48_spill] sm:$0xff] }
 0x5b0   : > { %25466 = vst [vmem:[#allocation32_spill] sm:$0xff] %v23514_v61  ;;  %25468 = vst [vmem:[#allocation35_spill] sm:$0xff] %v23518_v28  ;;  %v23530_v62 = vmul.f32 %v23076_v52, %v25473_v49  ;;  %v23534_v54 = vmul.f32 %v23076_v52, %v25475_v18  ;;  %v25476_v61 = vld [vmem:[#allocation53_spill] sm:$0xff]  ;;  %v25478_v28 = vld [vmem:[#allocation51_spill] sm:$0xff] }
 0x5b1   : > { %25470 = vst [vmem:[#allocation34_spill] sm:$0xff] %v23522_v29  ;;  %25472 = vst [vmem:[#allocation37_spill] sm:$0xff] %v23526_v44  ;;  %v23538_v53 = vmul.f32 %v23076_v52, %v25476_v61  ;;  %v23542_v8 = vmul.f32 %v23076_v52, %v25478_v28  ;;  %v25479_v29 = vld [vmem:[#allocation57_spill] sm:$0xff]  ;;  %v25480_v44 = vld [vmem:[#allocation55_spill] sm:$0xff]  ;;  %v23558_v61 = vmul.f32 %v23076_v52, %v22979_v59 }
 0x5b2   : > { %25474 = vst [vmem:[#allocation36_spill] sm:$0xff] %v23530_v62  ;;  %v23546_v21 = vmul.f32 %v23076_v52, %v25479_v29  ;;  %v23550_v49 = vmul.f32 %v23076_v52, %v25480_v44  ;;  %v25482_v62 = vld [vmem:[#allocation59_spill] sm:$0xff]  ;;  %v23566_v29 = vmul.f32 %v23076_v52, %v22994_v45  ;;  %v23570_v44 = vmul.f32 %v23076_v52, %v23016_v34  ;;  %v25493_v45 = vld [vmem:[#allocation65_spill] sm:$0xff] }
 0x5b3   : > { %25477 = vst [vmem:[#allocation39_spill] sm:$0xff] %v23538_v53  ;;  %v23554_v18 = vmul.f32 %v23076_v52, %v25482_v62  ;;  %25484 = vst [vmem:[#allocation40_spill] sm:$0xff] %v23558_v61  ;;  %v25485_v53 = vld [vmem:[#allocation61_spill] sm:$0xff]  ;;  %v25491_v59 = vsub.f32 %v23070_v5, %v23072_v36  ;;  %v25494_v34 = vld [vmem:[#allocation71_spill] sm:$0xff] }
 0x5b4   : > { %25481 = vst [vmem:[#allocation38_spill] sm:$0xff] %v23550_v49  ;;  %v23562_v28 = vmul.f32 %v23076_v52, %v25485_v53  ;;  %25487 = vst [vmem:[#allocation42_spill] sm:$0xff] %v23566_v29  ;;  %v25489_v49 = vld [vmem:[#allocation63_spill] sm:$0xff]  ;;  %v23589_v29 = vmul.f32 %v23076_v52, %v25493_v45  ;;  %v25500_v45 = vld [vmem:[#allocation84_spill] sm:$0xff] }
 0x5b5   : > { %25483 = vst [vmem:[#allocation41_spill] sm:$0xff] %v23554_v18  ;;  %25488 = vst [vmem:[#allocation45_spill] sm:$0xff] %v23570_v44  ;;  %v23574_v62 = vmul.f32 %v23076_v52, %v25489_v49  ;;  %v25490_v18 = vsub.s32 0, %v23061_v6  ;;  %v25492_v53 = vld [vmem:[#allocation67_spill] sm:$0xff]  ;;  %v23593_v44 = vmul.f32 %v23076_v52, %v25494_v34  ;;  %v25495_v49 = vld [vmem:[#allocation69_spill] sm:$0xff] }
 0x5b6   : > { %25486 = vst [vmem:[#allocation43_spill] sm:$0xff] %v23562_v28  ;;  %v23585_v28 = vmul.f32 %v23076_v52, %v25492_v53  ;;  %v23597_v6 = vmul.f32 %v23076_v52, %v25495_v49  ;;  %v25498_v53 = vld [vmem:[#allocation73_spill] sm:$0xff]  ;;  %v25502_v34 = vld [vmem:[#allocation86_spill] sm:$0xff] }
 0x5b7   : > { %v23581_v61 = vrot.slane %v25491_v59, %v25490_v18  ;;  %v25504_v49 = vld [vmem:[#allocation85_spill] sm:$0xff] }
 0x5b9   : > { %v23601_v5 = vadd.f32 %v23581_v61, %v23082_v38  ;;  %v23605_v36 = vadd.f32 %v23581_v61, %v23086_v58  ;;  %v23609_v18 = vadd.f32 %v23581_v61, %v23090_v46  ;;  %v23613_v59 = vadd.f32 %v23581_v61, %v23094_v23 }
 0x5ba   : > { %v23617_v52 = vadd.f32 %v23581_v61, %v23098_v63  ;;  %v23621_v38 = vadd.f32 %v23581_v61, %v23102_v10  ;;  %v23625_v58 = vadd.f32 %v23581_v61, %v23106_v35  ;;  %v23629_v46 = vadd.f32 %v23581_v61, %v23110_v37 }
 0x5bb   : > { %v23633_v23 = vadd.f32 %v23581_v61, %v23114_v40  ;;  %v23637_v63 = vadd.f32 %v23581_v61, %v23118_v60  ;;  %v23641_v10 = vadd.f32 %v23581_v61, %v23122_v31  ;;  %v23645_v35 = vadd.f32 %v23581_v61, %v23126_v42 }
 0x5bc   : > { %v23649_v37 = vadd.f32 %v23581_v61, %v23130_v3  ;;  %v23653_v40 = vadd.f32 %v23581_v61, %v23134_v56  ;;  %v23657_v60 = vadd.f32 %v23581_v61, %v23138_v0  ;;  %v23661_v31 = vadd.f32 %v23581_v61, %v23142_v4 }
 0x5bd   : > { %v23665_v42 = vadd.f32 %v23581_v61, %v23146_v9  ;;  %v23669_v3 = vadd.f32 %v23581_v61, %v23150_v25  ;;  %v23673_v56 = vadd.f32 %v23581_v61, %v23154_v32  ;;  %v23677_v0 = vadd.f32 %v23581_v61, %v23158_v16 }
 0x5be   : > { %v23681_v4 = vadd.f32 %v23581_v61, %v23162_v50  ;;  %v23685_v9 = vadd.f32 %v23581_v61, %v23166_v48  ;;  %v23689_v25 = vadd.f32 %v23581_v61, %v23170_v41  ;;  %v23693_v32 = vadd.f32 %v23581_v61, %v23174_v33 }
 0x5bf   : > { %v23697_v16 = vadd.f32 %v23581_v61, %v23178_v26  ;;  %v23701_v50 = vadd.f32 %v23581_v61, %v23182_v17  ;;  %v23705_v48 = vadd.f32 %v23581_v61, %v23186_v13  ;;  %v23709_v41 = vadd.f32 %v23581_v61, %v23190_v57 }
 0x5c0   : > { %v23713_v33 = vadd.f32 %v23581_v61, %v23194_v15  ;;  %v23717_v26 = vadd.f32 %v23581_v61, %v23198_v43  ;;  %v23721_v17 = vadd.f32 %v23581_v61, %v23202_v1  ;;  %v23725_v13 = vadd.f32 %v23581_v61, %v23206_v30 }
 0x5c1   : > { %v23729_v57 = vadd.f32 %v23581_v61, %v23210_v55  ;;  %v23733_v15 = vadd.f32 %v23581_v61, %v23214_v7  ;;  %v23737_v43 = vadd.f32 %v23581_v61, %v23218_v24  ;;  %v23741_v1 = vadd.f32 %v23581_v61, %v23222_v39 }
 0x5c2   : > { %v23745_v30 = vadd.f32 %v23581_v61, %v23226_v2  ;;  %v23749_v55 = vadd.f32 %v23581_v61, %v23230_v22  ;;  %v23753_v7 = vadd.f32 %v23581_v61, %v23234_v20  ;;  %v23757_v24 = vadd.f32 %v23581_v61, %v23238_v27 }
 0x5c3   : > { %v23761_v39 = vadd.f32 %v23581_v61, %v23242_v11  ;;  %v23765_v2 = vadd.f32 %v23581_v61, %v23246_v51  ;;  %v23769_v22 = vadd.f32 %v23581_v61, %v23250_v19  ;;  %v23773_v20 = vadd.f32 %v23581_v61, %v23254_v47 }
 0x5c4   : > { %v23777_v27 = vadd.f32 %v23581_v61, %v23258_v14  ;;  %v23781_v11 = vadd.f32 %v23581_v61, %v23262_v12  ;;  %v23785_v51 = vadd.f32 %v23581_v61, %v25498_v53  ;;  %v23789_v19 = vadd.f32 %v23581_v61, %v25500_v45 }
 0x5c5   : > { %v23793_v47 = vadd.f32 %v23581_v61, %v25502_v34  ;;  %v23797_v14 = vadd.f32 %v23581_v61, %v25504_v49 }
 0x5c6   : > { %25496 = vst [vmem:[#allocation44_spill] sm:$0xff] %v23777_v27  ;;  %25497 = vst [vmem:[#allocation47_spill] sm:$0xff] %v23781_v11  ;;  %v25506_v27 = vld [vmem:[#allocation87_spill] sm:$0xff]  ;;  %v25508_v11 = vld [vmem:[#allocation89_spill] sm:$0xff] }
 0x5c7   : > { %25499 = vst [vmem:[#allocation46_spill] sm:$0xff] %v23785_v51  ;;  %25501 = vst [vmem:[#allocation49_spill] sm:$0xff] %v23789_v19  ;;  %v23801_v12 = vadd.f32 %v23581_v61, %v25506_v27  ;;  %v23805_v53 = vadd.f32 %v23581_v61, %v25508_v11  ;;  %v25510_v51 = vld [vmem:[#allocation88_spill] sm:$0xff]  ;;  %v25512_v19 = vld [vmem:[#allocation75_spill] sm:$0xff] }
 0x5c8   : > { %25503 = vst [vmem:[#allocation48_spill] sm:$0xff] %v23793_v47  ;;  %25505 = vst [vmem:[#allocation53_spill] sm:$0xff] %v23797_v14  ;;  %v23809_v45 = vadd.f32 %v23581_v61, %v25510_v51  ;;  %v23813_v34 = vadd.f32 %v23581_v61, %v25512_v19  ;;  %v25514_v47 = vld [vmem:[#allocation90_spill] sm:$0xff]  ;;  %v25516_v14 = vld [vmem:[#allocation91_spill] sm:$0xff] }
 0x5c9   : > { %25507 = vst [vmem:[#allocation51_spill] sm:$0xff] %v23801_v12  ;;  %25509 = vst [vmem:[#allocation57_spill] sm:$0xff] %v23805_v53  ;;  %v23817_v49 = vadd.f32 %v23581_v61, %v25514_v47  ;;  %v23821_v27 = vadd.f32 %v23581_v61, %v25516_v14  ;;  %v25518_v12 = vld [vmem:[#allocation77_spill] sm:$0xff] }
 0x5ca   : > { %25511 = vst [vmem:[#allocation55_spill] sm:$0xff] %v23809_v45  ;;  %25513 = vst [vmem:[#allocation59_spill] sm:$0xff] %v23813_v34  ;;  %v23825_v11 = vadd.f32 %v23581_v61, %v25518_v12  ;;  %v25520_v53 = vld [vmem:[#allocation81_spill] sm:$0xff]  ;;  %v25522_v45 = vld [vmem:[#allocation79_spill] sm:$0xff] }
 0x5cb   : > { %25515 = vst [vmem:[#allocation61_spill] sm:$0xff] %v23817_v49  ;;  %25517 = vst [vmem:[#allocation63_spill] sm:$0xff] %v23821_v27  ;;  %v23829_v51 = vadd.f32 %v23581_v61, %v25520_v53  ;;  %v23833_v19 = vadd.f32 %v23581_v61, %v25522_v45  ;;  %v25524_v34 = vld [vmem:[#allocation83_spill] sm:$0xff]  ;;  %v25526_v49 = vld [vmem:[#allocation82_spill] sm:$0xff] }
 0x5cc   : > { %25519 = vst [vmem:[#allocation67_spill] sm:$0xff] %v23825_v11  ;;  %v23837_v47 = vadd.f32 %v23581_v61, %v25524_v34  ;;  %v23841_v14 = vadd.f32 %v23581_v61, %v25526_v49  ;;  %v25528_v27 = vld [vmem:[#allocation52_spill] sm:$0xff]  ;;  %v25530_v11 = vld [vmem:[#allocation50_spill] sm:$0xff] }
 0x5cd   : > { %25521 = vst [vmem:[#allocation65_spill] sm:$0xff] %v23829_v51  ;;  %25523 = vst [vmem:[#allocation71_spill] sm:$0xff] %v23833_v19  ;;  %v23845_v12 = vadd.f32 %v23581_v61, %v25528_v27  ;;  %v23849_v53 = vadd.f32 %v23581_v61, %v25530_v11  ;;  %v25532_v51 = vld [vmem:[#allocation56_spill] sm:$0xff]  ;;  %v25534_v19 = vld [vmem:[#allocation54_spill] sm:$0xff] }
 0x5ce   : > { %25525 = vst [vmem:[#allocation69_spill] sm:$0xff] %v23837_v47  ;;  %25527 = vst [vmem:[#allocation73_spill] sm:$0xff] %v23841_v14  ;;  %v23853_v45 = vadd.f32 %v23581_v61, %v25532_v51  ;;  %v23857_v34 = vadd.f32 %v23581_v61, %v25534_v19  ;;  %v25536_v47 = vld [vmem:[#allocation60_spill] sm:$0xff]  ;;  %v25538_v14 = vld [vmem:[#allocation58_spill] sm:$0xff] }
 0x5cf   : > { %25529 = vst [vmem:[#allocation84_spill] sm:$0xff] %v23845_v12  ;;  %25531 = vst [vmem:[#allocation86_spill] sm:$0xff] %v23849_v53  ;;  %v23861_v49 = vadd.f32 %v23581_v61, %v25536_v47  ;;  %v23865_v27 = vadd.f32 %v23581_v61, %v25538_v14  ;;  %v25540_v12 = vld [vmem:[#allocation64_spill] sm:$0xff]  ;;  %v25542_v53 = vld [vmem:[#allocation62_spill] sm:$0xff] }
 0x5d0   : > { %25533 = vst [vmem:[#allocation85_spill] sm:$0xff] %v23853_v45  ;;  %25535 = vst [vmem:[#allocation87_spill] sm:$0xff] %v23857_v34  ;;  %v23869_v11 = vadd.f32 %v23581_v61, %v25540_v12  ;;  %v23873_v51 = vadd.f32 %v23581_v61, %v25542_v53  ;;  %v25544_v45 = vld [vmem:[#allocation68_spill] sm:$0xff]  ;;  %v25546_v34 = vld [vmem:[#allocation66_spill] sm:$0xff] }
 0x5d1   : > { %25537 = vst [vmem:[#allocation89_spill] sm:$0xff] %v23861_v49  ;;  %25539 = vst [vmem:[#allocation88_spill] sm:$0xff] %v23865_v27  ;;  %v23877_v19 = vadd.f32 %v23581_v61, %v25544_v45  ;;  %v23881_v47 = vadd.f32 %v23581_v61, %v25546_v34  ;;  %v25548_v49 = vld [vmem:[#allocation72_spill] sm:$0xff]  ;;  %v25550_v27 = vld [vmem:[#allocation70_spill] sm:$0xff] }
 0x5d2   : > { %25541 = vst [vmem:[#allocation75_spill] sm:$0xff] %v23869_v11  ;;  %25543 = vst [vmem:[#allocation90_spill] sm:$0xff] %v23873_v51  ;;  %v23885_v14 = vadd.f32 %v23581_v61, %v25548_v49  ;;  %v23889_v12 = vadd.f32 %v23581_v61, %v25550_v27  ;;  %v25552_v11 = vld [vmem:[#allocation76_spill] sm:$0xff]  ;;  %v25554_v51 = vld [vmem:[#allocation74_spill] sm:$0xff] }
 0x5d3   : > { %25545 = vst [vmem:[#allocation91_spill] sm:$0xff] %v23877_v19  ;;  %25547 = vst [vmem:[#allocation77_spill] sm:$0xff] %v23881_v47  ;;  %v23893_v53 = vadd.f32 %v23581_v61, %v25552_v11  ;;  %v23897_v45 = vadd.f32 %v23581_v61, %v25554_v51  ;;  %v25556_v19 = vld [vmem:[#allocation80_spill] sm:$0xff]  ;;  %v25558_v47 = vld [vmem:[#allocation78_spill] sm:$0xff] }
 0x5d4   : > { %25549 = vst [vmem:[#allocation81_spill] sm:$0xff] %v23885_v14  ;;  %25551 = vst [vmem:[#allocation79_spill] sm:$0xff] %v23889_v12  ;;  %v23901_v34 = vadd.f32 %v23581_v61, %v25556_v19  ;;  %v23905_v49 = vadd.f32 %v23581_v61, %v25558_v47  ;;  %v25560_v14 = vld [vmem:[#allocation3_spill] sm:$0xff]  ;;  %v25562_v12 = vld [vmem:[#allocation2_spill] sm:$0xff] }
 0x5d5   : > { %25553 = vst [vmem:[#allocation83_spill] sm:$0xff] %v23893_v53  ;;  %25555 = vst [vmem:[#allocation82_spill] sm:$0xff] %v23897_v45  ;;  %v23909_v27 = vadd.f32 %v23581_v61, %v25560_v14  ;;  %v23913_v11 = vadd.f32 %v23581_v61, %v25562_v12  ;;  %v25564_v53 = vld [vmem:[#allocation5_spill] sm:$0xff]  ;;  %v25566_v45 = vld [vmem:[#allocation4_spill] sm:$0xff] }
 0x5d6   : > { %25557 = vst [vmem:[#allocation52_spill] sm:$0xff] %v23901_v34  ;;  %25559 = vst [vmem:[#allocation50_spill] sm:$0xff] %v23905_v49  ;;  %v23917_v51 = vadd.f32 %v23581_v61, %v25564_v53  ;;  %v23921_v19 = vadd.f32 %v23581_v61, %v25566_v45  ;;  %v25568_v34 = vld [vmem:[#allocation7_spill] sm:$0xff]  ;;  %v25570_v49 = vld [vmem:[#allocation6_spill] sm:$0xff] }
 0x5d7   : > { %25561 = vst [vmem:[#allocation56_spill] sm:$0xff] %v23909_v27  ;;  %25563 = vst [vmem:[#allocation54_spill] sm:$0xff] %v23913_v11  ;;  %v23925_v47 = vadd.f32 %v23581_v61, %v25568_v34  ;;  %v23929_v14 = vadd.f32 %v23581_v61, %v25570_v49  ;;  %v25572_v27 = vld [vmem:[#allocation9_spill] sm:$0xff]  ;;  %v25574_v11 = vld [vmem:[#allocation8_spill] sm:$0xff] }
 0x5d8   : > { %25565 = vst [vmem:[#allocation60_spill] sm:$0xff] %v23917_v51  ;;  %25567 = vst [vmem:[#allocation58_spill] sm:$0xff] %v23921_v19  ;;  %v23933_v12 = vadd.f32 %v23581_v61, %v25572_v27  ;;  %v23937_v53 = vadd.f32 %v23581_v61, %v25574_v11  ;;  %v25576_v51 = vld [vmem:[#allocation11_spill] sm:$0xff]  ;;  %v25578_v19 = vld [vmem:[#allocation10_spill] sm:$0xff] }
 0x5d9   : > { %25569 = vst [vmem:[#allocation64_spill] sm:$0xff] %v23925_v47  ;;  %25571 = vst [vmem:[#allocation62_spill] sm:$0xff] %v23929_v14  ;;  %v23941_v45 = vadd.f32 %v23581_v61, %v25576_v51  ;;  %v23945_v34 = vadd.f32 %v23581_v61, %v25578_v19  ;;  %v25580_v47 = vld [vmem:[#allocation13_spill] sm:$0xff]  ;;  %v25582_v14 = vld [vmem:[#allocation12_spill] sm:$0xff] }
 0x5da   : > { %25573 = vst [vmem:[#allocation68_spill] sm:$0xff] %v23933_v12  ;;  %25575 = vst [vmem:[#allocation66_spill] sm:$0xff] %v23937_v53  ;;  %v23949_v49 = vadd.f32 %v23581_v61, %v25580_v47  ;;  %v23953_v27 = vadd.f32 %v23581_v61, %v25582_v14  ;;  %v25584_v12 = vld [vmem:[#allocation15_spill] sm:$0xff]  ;;  %v25586_v53 = vld [vmem:[#allocation14_spill] sm:$0xff] }
 0x5db   : > { %25577 = vst [vmem:[#allocation72_spill] sm:$0xff] %v23941_v45  ;;  %25579 = vst [vmem:[#allocation70_spill] sm:$0xff] %v23945_v34  ;;  %v23957_v11 = vadd.f32 %v23581_v61, %v25584_v12  ;;  %v23961_v51 = vadd.f32 %v23581_v61, %v25586_v53  ;;  %v25588_v45 = vld [vmem:[#allocation17_spill] sm:$0xff]  ;;  %v25590_v34 = vld [vmem:[#allocation16_spill] sm:$0xff] }
 0x5dc   : > { %25581 = vst [vmem:[#allocation76_spill] sm:$0xff] %v23949_v49  ;;  %25583 = vst [vmem:[#allocation74_spill] sm:$0xff] %v23953_v27  ;;  %v23965_v19 = vadd.f32 %v23581_v61, %v25588_v45  ;;  %v23969_v47 = vadd.f32 %v23581_v61, %v25590_v34  ;;  %v25592_v49 = vld [vmem:[#allocation19_spill] sm:$0xff]  ;;  %v25594_v27 = vld [vmem:[#allocation18_spill] sm:$0xff] }
 0x5dd   : > { %25585 = vst [vmem:[#allocation80_spill] sm:$0xff] %v23957_v11  ;;  %25587 = vst [vmem:[#allocation78_spill] sm:$0xff] %v23961_v51  ;;  %v23973_v14 = vadd.f32 %v23581_v61, %v25592_v49  ;;  %v23977_v12 = vadd.f32 %v23581_v61, %v25594_v27  ;;  %v25596_v11 = vld [vmem:[#allocation21_spill] sm:$0xff]  ;;  %v25598_v51 = vld [vmem:[#allocation20_spill] sm:$0xff] }
 0x5de   : > { %25589 = vst [vmem:[#allocation3_spill] sm:$0xff] %v23965_v19  ;;  %25591 = vst [vmem:[#allocation2_spill] sm:$0xff] %v23969_v47  ;;  %v23981_v53 = vadd.f32 %v23581_v61, %v25596_v11  ;;  %v23985_v45 = vadd.f32 %v23581_v61, %v25598_v51  ;;  %v25600_v19 = vld [vmem:[#allocation23_spill] sm:$0xff]  ;;  %v25602_v47 = vld [vmem:[#allocation22_spill] sm:$0xff] }
 0x5df   : > { %25593 = vst [vmem:[#allocation5_spill] sm:$0xff] %v23973_v14  ;;  %25595 = vst [vmem:[#allocation4_spill] sm:$0xff] %v23977_v12  ;;  %v23989_v34 = vadd.f32 %v23581_v61, %v25600_v19  ;;  %v23993_v49 = vadd.f32 %v23581_v61, %v25602_v47  ;;  %v25604_v14 = vld [vmem:[#allocation25_spill] sm:$0xff]  ;;  %v25606_v12 = vld [vmem:[#allocation24_spill] sm:$0xff] }
 0x5e0   : > { %25597 = vst [vmem:[#allocation7_spill] sm:$0xff] %v23981_v53  ;;  %25599 = vst [vmem:[#allocation6_spill] sm:$0xff] %v23985_v45  ;;  %v23997_v27 = vadd.f32 %v23581_v61, %v25604_v14  ;;  %v24001_v11 = vadd.f32 %v23581_v61, %v25606_v12  ;;  %v25608_v53 = vld [vmem:[#allocation27_spill] sm:$0xff]  ;;  %v25610_v45 = vld [vmem:[#allocation26_spill] sm:$0xff] }
 0x5e1   : > { %25601 = vst [vmem:[#allocation9_spill] sm:$0xff] %v23989_v34  ;;  %25603 = vst [vmem:[#allocation8_spill] sm:$0xff] %v23993_v49  ;;  %v24005_v51 = vadd.f32 %v23581_v61, %v25608_v53  ;;  %v24009_v19 = vadd.f32 %v23581_v61, %v25610_v45  ;;  %v25612_v34 = vld [vmem:[#allocation29_spill] sm:$0xff]  ;;  %v25614_v49 = vld [vmem:[#allocation28_spill] sm:$0xff] }
 0x5e2   : > { %25605 = vst [vmem:[#allocation11_spill] sm:$0xff] %v23997_v27  ;;  %25607 = vst [vmem:[#allocation10_spill] sm:$0xff] %v24001_v11  ;;  %v24013_v47 = vadd.f32 %v23581_v61, %v25612_v34  ;;  %v24017_v14 = vadd.f32 %v23581_v61, %v25614_v49  ;;  %v25616_v27 = vld [vmem:[#allocation31_spill] sm:$0xff]  ;;  %v25618_v11 = vld [vmem:[#allocation30_spill] sm:$0xff] }
 0x5e3   : > { %25609 = vst [vmem:[#allocation13_spill] sm:$0xff] %v24005_v51  ;;  %25611 = vst [vmem:[#allocation12_spill] sm:$0xff] %v24009_v19  ;;  %v24021_v12 = vadd.f32 %v23581_v61, %v25616_v27  ;;  %v24025_v53 = vadd.f32 %v23581_v61, %v25618_v11  ;;  %v25620_v51 = vld [vmem:[#allocation33_spill] sm:$0xff]  ;;  %v25621_v19 = vld [vmem:[#allocation32_spill] sm:$0xff] }
 0x5e4   : > { %25613 = vst [vmem:[#allocation15_spill] sm:$0xff] %v24013_v47  ;;  %25615 = vst [vmem:[#allocation14_spill] sm:$0xff] %v24017_v14  ;;  %v24029_v45 = vadd.f32 %v23581_v61, %v25620_v51  ;;  %v24033_v34 = vadd.f32 %v23581_v61, %v25621_v19  ;;  %v25623_v47 = vld [vmem:[#allocation35_spill] sm:$0xff]  ;;  %v25624_v14 = vld [vmem:[#allocation34_spill] sm:$0xff]  ;;  %v24054_v19 = vadd.f32 %v23581_v61, %v23534_v54 }
 0x5e5   : > { %25617 = vst [vmem:[#allocation17_spill] sm:$0xff] %v24021_v12  ;;  %25619 = vst [vmem:[#allocation16_spill] sm:$0xff] %v24025_v53  ;;  %v24037_v49 = vadd.f32 %v23581_v61, %v25623_v47  ;;  %v24041_v27 = vadd.f32 %v23581_v61, %v25624_v14  ;;  %v25625_v12 = vld [vmem:[#allocation37_spill] sm:$0xff]  ;;  %v25627_v53 = vld [vmem:[#allocation36_spill] sm:$0xff]  ;;  %v24062_v14 = vadd.f32 %v23581_v61, %v23542_v8 }
 0x5e6   : > { %25622 = vst [vmem:[#allocation19_spill] sm:$0xff] %v24033_v34  ;;  %v24045_v11 = vadd.f32 %v23581_v61, %v25625_v12  ;;  %v24050_v51 = vadd.f32 %v23581_v61, %v25627_v53  ;;  %25629 = vst [vmem:[#allocation20_spill] sm:$0xff] %v24054_v19  ;;  %v25630_v34 = vld [vmem:[#allocation39_spill] sm:$0xff]  ;;  %v24066_v12 = vadd.f32 %v23581_v61, %v23546_v21  ;;  %v25636_v19 = vld [vmem:[#allocation40_spill] sm:$0xff] }
 0x5e7   : > { %v24058_v47 = vadd.f32 %v23581_v61, %v25630_v34  ;;  %25632 = vst [vmem:[#allocation22_spill] sm:$0xff] %v24062_v14  ;;  %v24078_v34 = vadd.f32 %v23581_v61, %v25636_v19  ;;  %v25638_v14 = vld [vmem:[#allocation42_spill] sm:$0xff]  ;;  %v24103_v19 = vadd.f32 %v23581_v61, %v23585_v28  ;;  %v13027_v28 = vmax.f32 %v23605_v36, 0.0 }
 0x5e8   : > { %25626 = vst [vmem:[#allocation18_spill] sm:$0xff] %v24045_v11  ;;  %25628 = vst [vmem:[#allocation21_spill] sm:$0xff] %v24050_v51  ;;  %v25634_v11 = vld [vmem:[#allocation38_spill] sm:$0xff]  ;;  %v25635_v51 = vld [vmem:[#allocation41_spill] sm:$0xff]  ;;  %v24086_v21 = vadd.f32 %v23581_v61, %v25638_v14  ;;  %v24111_v14 = vadd.f32 %v23581_v61, %v23593_v44  ;;  %v13031_v44 = vmax.f32 %v23621_v38, 0.0  ;;  %v13036_v36 = vmax.f32 %v23641_v10, 0.0 }
 0x5e9   : > { %25631 = vst [vmem:[#allocation23_spill] sm:$0xff] %v24058_v47  ;;  %25633 = vst [vmem:[#allocation25_spill] sm:$0xff] %v24066_v12  ;;  %v24070_v53 = vadd.f32 %v23581_v61, %v25634_v11  ;;  %v24074_v54 = vadd.f32 %v23581_v61, %v25635_v51  ;;  %v25637_v47 = vld [vmem:[#allocation43_spill] sm:$0xff]  ;;  %v25639_v12 = vld [vmem:[#allocation45_spill] sm:$0xff]  ;;  %v24094_v51 = vadd.f32 %v23581_v61, %v23574_v62  ;;  %v13040_v38 = vmax.f32 %v23657_v60, 0.0 }
 0x5ea   : > { %v24082_v8 = vadd.f32 %v23581_v61, %v25637_v47  ;;  %v24090_v11 = vadd.f32 %v23581_v61, %v25639_v12  ;;  %25640 = vst [vmem:[#allocation24_spill] sm:$0xff] %v24103_v19  ;;  %v24107_v47 = vadd.f32 %v23581_v61, %v23589_v29  ;;  %25642 = vst [vmem:[#allocation26_spill] sm:$0xff] %v24111_v14  ;;  %v13026_v12 = vmax.f32 %v23601_v5, 0.0 }
 0x5eb   : > { %v24115_v62 = vadd.f32 %v23581_v61, %v23597_v6  ;;  %v13028_v19 = vmax.f32 %v23609_v18, 0.0  ;;  %v13029_v29 = vmax.f32 %v23613_v59, 0.0  ;;  %v13032_v14 = vmax.f32 %v23625_v58, 0.0  ;;  %13155 = vst.msk [vmem:[%s24099_s23 + $0x8] sm:$0xff] %vm12097_vm2, %v13027_v28  ;;  %13159 = vst.msk [vmem:[%s24099_s23 + $0x28] sm:$0xff] %vm12097_vm2, %v13031_v44 }
 0x5ec   : > { %25641 = vst [vmem:[#allocation27_spill] sm:$0xff] %v24107_v47  ;;  %v13030_v47 = vmax.f32 %v23617_v52, 0.0  ;;  %v13033_v61 = vmax.f32 %v23629_v46, 0.0  ;;  %v13034_v6 = vmax.f32 %v23633_v23, 0.0  ;;  %v13035_v5 = vmax.f32 %v23637_v63, 0.0  ;;  %13154 = vst.msk [vmem:[%s24099_s23] sm:$0xff] %vm12097_vm2, %v13026_v12 }
 0x5ed   : > { %v13037_v18 = vmax.f32 %v23645_v35, 0.0  ;;  %13156 = vst.msk [vmem:[%s24099_s23 + $0x10] sm:$0xff] %vm12097_vm2, %v13028_v19  ;;  %13157 = vst.msk [vmem:[%s24099_s23 + $0x18] sm:$0xff] %vm12097_vm2, %v13029_v29  ;;  %v13038_v59 = vmax.f32 %v23649_v37, 0.0  ;;  %v13039_v52 = vmax.f32 %v23653_v40, 0.0  ;;  %v13041_v58 = vmax.f32 %v23661_v31, 0.0 }
 0x5ee   : > { %13158 = vst.msk [vmem:[%s24099_s23 + $0x20] sm:$0xff] %vm12097_vm2, %v13030_v47  ;;  %13160 = vst.msk [vmem:[%s24099_s23 + $0x30] sm:$0xff] %vm12097_vm2, %v13032_v14  ;;  %v13042_v46 = vmax.f32 %v23665_v42, 0.0  ;;  %v13043_v23 = vmax.f32 %v23669_v3, 0.0  ;;  %v13044_v63 = vmax.f32 %v23673_v56, 0.0  ;;  %v13045_v10 = vmax.f32 %v23677_v0, 0.0 }
 0x5ef   : > { %13161 = vst.msk [vmem:[%s24099_s23 + $0x38] sm:$0xff] %vm12097_vm2, %v13033_v61  ;;  %13162 = vst.msk [vmem:[%s24099_s23 + $0x40] sm:$0xff] %vm12097_vm2, %v13034_v6  ;;  %v13046_v35 = vmax.f32 %v23681_v4, 0.0  ;;  %v13047_v37 = vmax.f32 %v23685_v9, 0.0  ;;  %v13048_v40 = vmax.f32 %v23689_v25, 0.0  ;;  %v13049_v60 = vmax.f32 %v23693_v32, 0.0 }
 0x5f0   : > { %13163 = vst.msk [vmem:[%s24099_s23 + $0x48] sm:$0xff] %vm12097_vm2, %v13035_v5  ;;  %13164 = vst.msk [vmem:[%s24099_s23 + $0x50] sm:$0xff] %vm12097_vm2, %v13036_v36  ;;  %v13050_v31 = vmax.f32 %v23697_v16, 0.0  ;;  %v13051_v42 = vmax.f32 %v23701_v50, 0.0  ;;  %v13052_v3 = vmax.f32 %v23705_v48, 0.0  ;;  %v13053_v56 = vmax.f32 %v23709_v41, 0.0 }
 0x5f1   : > { %13165 = vst.msk [vmem:[%s24099_s23 + $0x58] sm:$0xff] %vm12097_vm2, %v13037_v18  ;;  %13166 = vst.msk [vmem:[%s24099_s23 + $0x60] sm:$0xff] %vm12097_vm2, %v13038_v59  ;;  %v13054_v0 = vmax.f32 %v23713_v33, 0.0  ;;  %v13055_v4 = vmax.f32 %v23717_v26, 0.0  ;;  %v13056_v9 = vmax.f32 %v23721_v17, 0.0  ;;  %v13057_v25 = vmax.f32 %v23725_v13, 0.0 }
 0x5f2   : > { %13167 = vst.msk [vmem:[%s24099_s23 + $0x68] sm:$0xff] %vm12097_vm2, %v13039_v52  ;;  %13168 = vst.msk [vmem:[%s24099_s23 + $0x70] sm:$0xff] %vm12097_vm2, %v13040_v38  ;;  %v13058_v32 = vmax.f32 %v23729_v57, 0.0  ;;  %v13059_v16 = vmax.f32 %v23733_v15, 0.0  ;;  %v13060_v50 = vmax.f32 %v23737_v43, 0.0  ;;  %v13061_v48 = vmax.f32 %v23741_v1, 0.0 }
 0x5f3   : > { %13169 = vst.msk [vmem:[%s24099_s23 + $0x78] sm:$0xff] %vm12097_vm2, %v13041_v58  ;;  %13170 = vst.msk [vmem:[%s24099_s23 + $0x80] sm:$0xff] %vm12097_vm2, %v13042_v46  ;;  %v13062_v41 = vmax.f32 %v23745_v30, 0.0  ;;  %v13063_v33 = vmax.f32 %v23749_v55, 0.0  ;;  %v13064_v26 = vmax.f32 %v23753_v7, 0.0  ;;  %v13065_v17 = vmax.f32 %v23757_v24, 0.0 }
 0x5f4   : > { %13171 = vst.msk [vmem:[%s24099_s23 + $0x88] sm:$0xff] %vm12097_vm2, %v13043_v23  ;;  %13172 = vst.msk [vmem:[%s24099_s23 + $0x90] sm:$0xff] %vm12097_vm2, %v13044_v63  ;;  %v13066_v13 = vmax.f32 %v23761_v39, 0.0  ;;  %v13067_v57 = vmax.f32 %v23765_v2, 0.0  ;;  %v13068_v15 = vmax.f32 %v23769_v22, 0.0  ;;  %v13069_v43 = vmax.f32 %v23773_v20, 0.0 }
 0x5f5   : > { %13173 = vst.msk [vmem:[%s24099_s23 + $0x98] sm:$0xff] %vm12097_vm2, %v13045_v10  ;;  %13174 = vst.msk [vmem:[%s24099_s23 + $0xa0] sm:$0xff] %vm12097_vm2, %v13046_v35  ;;  %v25643_v1 = vld [vmem:[#allocation44_spill] sm:$0xff]  ;;  %v25644_v55 = vld [vmem:[#allocation47_spill] sm:$0xff] }
 0x5f6   : > { %13175 = vst.msk [vmem:[%s24099_s23 + $0xa8] sm:$0xff] %vm12097_vm2, %v13047_v37  ;;  %13176 = vst.msk [vmem:[%s24099_s23 + $0xb0] sm:$0xff] %vm12097_vm2, %v13048_v40  ;;  %v13070_v30 = vmax.f32 %v25643_v1, 0.0  ;;  %v13071_v7 = vmax.f32 %v25644_v55, 0.0  ;;  %v25645_v24 = vld [vmem:[#allocation46_spill] sm:$0xff]  ;;  %v25646_v2 = vld [vmem:[#allocation49_spill] sm:$0xff] }
 0x5f7   : > { %13177 = vst.msk [vmem:[%s24099_s23 + $0xb8] sm:$0xff] %vm12097_vm2, %v13049_v60  ;;  %13178 = vst.msk [vmem:[%s24099_s23 + $0xc0] sm:$0xff] %vm12097_vm2, %v13050_v31  ;;  %v13072_v39 = vmax.f32 %v25645_v24, 0.0  ;;  %v13073_v22 = vmax.f32 %v25646_v2, 0.0  ;;  %v25647_v20 = vld [vmem:[#allocation48_spill] sm:$0xff]  ;;  %v25648_v47 = vld [vmem:[#allocation53_spill] sm:$0xff] }
 0x5f8   : > { %13179 = vst.msk [vmem:[%s24099_s23 + $0xc8] sm:$0xff] %vm12097_vm2, %v13051_v42  ;;  %13180 = vst.msk [vmem:[%s24099_s23 + $0xd0] sm:$0xff] %vm12097_vm2, %v13052_v3  ;;  %v13074_v19 = vmax.f32 %v25647_v20, 0.0  ;;  %v13075_v14 = vmax.f32 %v25648_v47, 0.0  ;;  %v25649_v12 = vld [vmem:[#allocation51_spill] sm:$0xff]  ;;  %v25650_v29 = vld [vmem:[#allocation57_spill] sm:$0xff] }
 0x5f9   : > { %13181 = vst.msk [vmem:[%s24099_s23 + $0xd8] sm:$0xff] %vm12097_vm2, %v13053_v56  ;;  %13182 = vst.msk [vmem:[%s24099_s23 + $0xe0] sm:$0xff] %vm12097_vm2, %v13054_v0  ;;  %v13076_v28 = vmax.f32 %v25649_v12, 0.0  ;;  %v13077_v44 = vmax.f32 %v25650_v29, 0.0  ;;  %v25651_v61 = vld [vmem:[#allocation55_spill] sm:$0xff]  ;;  %v25653_v18 = vld [vmem:[#allocation61_spill] sm:$0xff] }
 0x5fa   : > { %13183 = vst.msk [vmem:[%s24099_s23 + $0xe8] sm:$0xff] %vm12097_vm2, %v13055_v4  ;;  %13184 = vst.msk [vmem:[%s24099_s23 + $0xf0] sm:$0xff] %vm12097_vm2, %v13056_v9  ;;  %v13078_v6 = vmax.f32 %v25651_v61, 0.0  ;;  %v25652_v5 = vld [vmem:[#allocation59_spill] sm:$0xff]  ;;  %v13080_v59 = vmax.f32 %v25653_v18, 0.0  ;;  %v25656_v23 = vld [vmem:[#allocation65_spill] sm:$0xff] }
 0x5fb   : > { %13185 = vst.msk [vmem:[%s24099_s23 + $0xf8] sm:$0xff] %vm12097_vm2, %v13057_v25  ;;  %13186 = vst.msk [vmem:[%s24099_s23 + $0x100] sm:$0xff] %vm12097_vm2, %v13058_v32  ;;  %v13079_v36 = vmax.f32 %v25652_v5, 0.0  ;;  %v25654_v52 = vld [vmem:[#allocation63_spill] sm:$0xff]  ;;  %v13083_v63 = vmax.f32 %v25656_v23, 0.0  ;;  %v25658_v37 = vld [vmem:[#allocation69_spill] sm:$0xff] }
 0x5fc   : > { %13187 = vst.msk [vmem:[%s24099_s23 + $0x108] sm:$0xff] %vm12097_vm2, %v13059_v16  ;;  %13188 = vst.msk [vmem:[%s24099_s23 + $0x110] sm:$0xff] %vm12097_vm2, %v13060_v50  ;;  %v13081_v38 = vmax.f32 %v25654_v52, 0.0  ;;  %v25655_v58 = vld [vmem:[#allocation67_spill] sm:$0xff]  ;;  %v13085_v40 = vmax.f32 %v25658_v37, 0.0  ;;  %v25659_v60 = vld [vmem:[#allocation73_spill] sm:$0xff] }
 0x5fd   : > { %13189 = vst.msk [vmem:[%s24099_s23 + $0x118] sm:$0xff] %vm12097_vm2, %v13061_v48  ;;  %13190 = vst.msk [vmem:[%s24099_s23 + $0x120] sm:$0xff] %vm12097_vm2, %v13062_v41  ;;  %v13082_v46 = vmax.f32 %v25655_v58, 0.0  ;;  %v25657_v10 = vld [vmem:[#allocation71_spill] sm:$0xff]  ;;  %v13086_v31 = vmax.f32 %v25659_v60, 0.0  ;;  %v25660_v42 = vld [vmem:[#allocation84_spill] sm:$0xff] }
 0x5fe   : > { %13191 = vst.msk [vmem:[%s24099_s23 + $0x128] sm:$0xff] %vm12097_vm2, %v13063_v33  ;;  %13192 = vst.msk [vmem:[%s24099_s23 + $0x130] sm:$0xff] %vm12097_vm2, %v13064_v26  ;;  %v13084_v35 = vmax.f32 %v25657_v10, 0.0  ;;  %v13087_v3 = vmax.f32 %v25660_v42, 0.0  ;;  %v25661_v56 = vld [vmem:[#allocation86_spill] sm:$0xff]  ;;  %v25662_v4 = vld [vmem:[#allocation85_spill] sm:$0xff] }
 0x5ff   : > { %13193 = vst.msk [vmem:[%s24099_s23 + $0x138] sm:$0xff] %vm12097_vm2, %v13065_v17  ;;  %13194 = vst.msk [vmem:[%s24099_s23 + $0x140] sm:$0xff] %vm12097_vm2, %v13066_v13  ;;  %v13088_v0 = vmax.f32 %v25661_v56, 0.0  ;;  %v13089_v9 = vmax.f32 %v25662_v4, 0.0  ;;  %v25663_v25 = vld [vmem:[#allocation87_spill] sm:$0xff]  ;;  %v25664_v16 = vld [vmem:[#allocation89_spill] sm:$0xff] }
 0x600   : > { %13195 = vst.msk [vmem:[%s24099_s23 + $0x148] sm:$0xff] %vm12097_vm2, %v13067_v57  ;;  %13196 = vst.msk [vmem:[%s24099_s23 + $0x150] sm:$0xff] %vm12097_vm2, %v13068_v15  ;;  %v13090_v32 = vmax.f32 %v25663_v25, 0.0  ;;  %v13091_v50 = vmax.f32 %v25664_v16, 0.0  ;;  %v25665_v48 = vld [vmem:[#allocation88_spill] sm:$0xff]  ;;  %v25666_v33 = vld [vmem:[#allocation75_spill] sm:$0xff] }
 0x601   : > { %13197 = vst.msk [vmem:[%s24099_s23 + $0x158] sm:$0xff] %vm12097_vm2, %v13069_v43  ;;  %13198 = vst.msk [vmem:[%s24099_s23 + $0x160] sm:$0xff] %vm12097_vm2, %v13070_v30  ;;  %v13092_v41 = vmax.f32 %v25665_v48, 0.0  ;;  %v13093_v26 = vmax.f32 %v25666_v33, 0.0  ;;  %v25667_v17 = vld [vmem:[#allocation90_spill] sm:$0xff]  ;;  %v25668_v57 = vld [vmem:[#allocation91_spill] sm:$0xff] }
 0x602   : > { %13199 = vst.msk [vmem:[%s24099_s23 + $0x168] sm:$0xff] %vm12097_vm2, %v13071_v7  ;;  %13200 = vst.msk [vmem:[%s24099_s23 + $0x170] sm:$0xff] %vm12097_vm2, %v13072_v39  ;;  %v13094_v13 = vmax.f32 %v25667_v17, 0.0  ;;  %v13095_v15 = vmax.f32 %v25668_v57, 0.0  ;;  %v25669_v43 = vld [vmem:[#allocation77_spill] sm:$0xff]  ;;  %v25671_v7 = vld [vmem:[#allocation79_spill] sm:$0xff] }
 0x603   : > { %13201 = vst.msk [vmem:[%s24099_s23 + $0x178] sm:$0xff] %vm12097_vm2, %v13073_v22  ;;  %13202 = vst.msk [vmem:[%s24099_s23 + $0x180] sm:$0xff] %vm12097_vm2, %v13074_v19  ;;  %v13096_v1 = vmax.f32 %v25669_v43, 0.0  ;;  %v25670_v30 = vld [vmem:[#allocation81_spill] sm:$0xff]  ;;  %v13098_v24 = vmax.f32 %v25671_v7, 0.0  ;;  %v25672_v39 = vld [vmem:[#allocation83_spill] sm:$0xff] }
 0x604   : > { %13203 = vst.msk [vmem:[%s24099_s23 + $0x188] sm:$0xff] %vm12097_vm2, %v13075_v14  ;;  %13204 = vst.msk [vmem:[%s24099_s23 + $0x190] sm:$0xff] %vm12097_vm2, %v13076_v28  ;;  %v13097_v55 = vmax.f32 %v25670_v30, 0.0  ;;  %v13099_v2 = vmax.f32 %v25672_v39, 0.0  ;;  %v25673_v22 = vld [vmem:[#allocation82_spill] sm:$0xff]  ;;  %v25674_v19 = vld [vmem:[#allocation52_spill] sm:$0xff] }
 0x605   : > { %13205 = vst.msk [vmem:[%s24099_s23 + $0x198] sm:$0xff] %vm12097_vm2, %v13077_v44  ;;  %13206 = vst.msk [vmem:[%s24099_s23 + $0x1a0] sm:$0xff] %vm12097_vm2, %v13078_v6  ;;  %v13100_v20 = vmax.f32 %v25673_v22, 0.0  ;;  %v13101_v47 = vmax.f32 %v25674_v19, 0.0  ;;  %v25675_v14 = vld [vmem:[#allocation50_spill] sm:$0xff]  ;;  %v25676_v28 = vld [vmem:[#allocation56_spill] sm:$0xff] }
 0x606   : > { %13207 = vst.msk [vmem:[%s24099_s23 + $0x1a8] sm:$0xff] %vm12097_vm2, %v13079_v36  ;;  %13208 = vst.msk [vmem:[%s24099_s23 + $0x1b0] sm:$0xff] %vm12097_vm2, %v13080_v59  ;;  %v13102_v12 = vmax.f32 %v25675_v14, 0.0  ;;  %v13103_v29 = vmax.f32 %v25676_v28, 0.0  ;;  %v25677_v44 = vld [vmem:[#allocation54_spill] sm:$0xff]  ;;  %v25678_v6 = vld [vmem:[#allocation60_spill] sm:$0xff] }
 0x607   : > { %13209 = vst.msk [vmem:[%s24099_s23 + $0x1b8] sm:$0xff] %vm12097_vm2, %v13081_v38  ;;  %13210 = vst.msk [vmem:[%s24099_s23 + $0x1c0] sm:$0xff] %vm12097_vm2, %v13082_v46  ;;  %v13104_v61 = vmax.f32 %v25677_v44, 0.0  ;;  %v13105_v5 = vmax.f32 %v25678_v6, 0.0  ;;  %v25679_v36 = vld [vmem:[#allocation58_spill] sm:$0xff]  ;;  %v25680_v59 = vld [vmem:[#allocation64_spill] sm:$0xff] }
 0x608   : > { %13211 = vst.msk [vmem:[%s24099_s23 + $0x1c8] sm:$0xff] %vm12097_vm2, %v13083_v63  ;;  %13212 = vst.msk [vmem:[%s24099_s23 + $0x1d0] sm:$0xff] %vm12097_vm2, %v13084_v35  ;;  %v13106_v18 = vmax.f32 %v25679_v36, 0.0  ;;  %v13107_v52 = vmax.f32 %v25680_v59, 0.0  ;;  %v25681_v38 = vld [vmem:[#allocation62_spill] sm:$0xff]  ;;  %v25682_v46 = vld [vmem:[#allocation68_spill] sm:$0xff] }
 0x609   : > { %13213 = vst.msk [vmem:[%s24099_s23 + $0x1d8] sm:$0xff] %vm12097_vm2, %v13085_v40  ;;  %13214 = vst.msk [vmem:[%s24099_s23 + $0x1e0] sm:$0xff] %vm12097_vm2, %v13086_v31  ;;  %v13108_v58 = vmax.f32 %v25681_v38, 0.0  ;;  %v13109_v23 = vmax.f32 %v25682_v46, 0.0  ;;  %v25683_v63 = vld [vmem:[#allocation66_spill] sm:$0xff]  ;;  %v25684_v35 = vld [vmem:[#allocation72_spill] sm:$0xff] }
 0x60a   : > { %13215 = vst.msk [vmem:[%s24099_s23 + $0x1e8] sm:$0xff] %vm12097_vm2, %v13087_v3  ;;  %13216 = vst.msk [vmem:[%s24099_s23 + $0x1f0] sm:$0xff] %vm12097_vm2, %v13088_v0  ;;  %v13110_v10 = vmax.f32 %v25683_v63, 0.0  ;;  %v13111_v37 = vmax.f32 %v25684_v35, 0.0  ;;  %v25685_v40 = vld [vmem:[#allocation70_spill] sm:$0xff]  ;;  %v25686_v31 = vld [vmem:[#allocation76_spill] sm:$0xff] }
 0x60b   : > { %13217 = vst.msk [vmem:[%s24099_s23 + $0x1f8] sm:$0xff] %vm12097_vm2, %v13089_v9  ;;  %13218 = vst.msk [vmem:[%s24099_s23 + $0x200] sm:$0xff] %vm12097_vm2, %v13090_v32  ;;  %v13112_v60 = vmax.f32 %v25685_v40, 0.0  ;;  %v13113_v42 = vmax.f32 %v25686_v31, 0.0  ;;  %v25687_v3 = vld [vmem:[#allocation74_spill] sm:$0xff]  ;;  %v25688_v0 = vld [vmem:[#allocation80_spill] sm:$0xff] }
 0x60c   : > { %13219 = vst.msk [vmem:[%s24099_s23 + $0x208] sm:$0xff] %vm12097_vm2, %v13091_v50  ;;  %13220 = vst.msk [vmem:[%s24099_s23 + $0x210] sm:$0xff] %vm12097_vm2, %v13092_v41  ;;  %v13114_v56 = vmax.f32 %v25687_v3, 0.0  ;;  %v13115_v4 = vmax.f32 %v25688_v0, 0.0  ;;  %v25689_v9 = vld [vmem:[#allocation78_spill] sm:$0xff]  ;;  %v25690_v32 = vld [vmem:[#allocation3_spill] sm:$0xff] }
 0x60d   : > { %13221 = vst.msk [vmem:[%s24099_s23 + $0x218] sm:$0xff] %vm12097_vm2, %v13093_v26  ;;  %13222 = vst.msk [vmem:[%s24099_s23 + $0x220] sm:$0xff] %vm12097_vm2, %v13094_v13  ;;  %v13116_v25 = vmax.f32 %v25689_v9, 0.0  ;;  %v13117_v16 = vmax.f32 %v25690_v32, 0.0  ;;  %v25691_v50 = vld [vmem:[#allocation2_spill] sm:$0xff]  ;;  %v25692_v41 = vld [vmem:[#allocation5_spill] sm:$0xff] }
 0x60e   : > { %13223 = vst.msk [vmem:[%s24099_s23 + $0x228] sm:$0xff] %vm12097_vm2, %v13095_v15  ;;  %13224 = vst.msk [vmem:[%s24099_s23 + $0x230] sm:$0xff] %vm12097_vm2, %v13096_v1  ;;  %v13118_v48 = vmax.f32 %v25691_v50, 0.0  ;;  %v13119_v33 = vmax.f32 %v25692_v41, 0.0  ;;  %v25693_v26 = vld [vmem:[#allocation4_spill] sm:$0xff]  ;;  %v25694_v13 = vld [vmem:[#allocation7_spill] sm:$0xff] }
 0x60f   : > { %13225 = vst.msk [vmem:[%s24099_s23 + $0x238] sm:$0xff] %vm12097_vm2, %v13097_v55  ;;  %13226 = vst.msk [vmem:[%s24099_s23 + $0x240] sm:$0xff] %vm12097_vm2, %v13098_v24  ;;  %v13120_v17 = vmax.f32 %v25693_v26, 0.0  ;;  %v13121_v57 = vmax.f32 %v25694_v13, 0.0  ;;  %v25695_v15 = vld [vmem:[#allocation6_spill] sm:$0xff]  ;;  %v25696_v1 = vld [vmem:[#allocation9_spill] sm:$0xff] }
 0x610   : > { %13227 = vst.msk [vmem:[%s24099_s23 + $0x248] sm:$0xff] %vm12097_vm2, %v13099_v2  ;;  %13228 = vst.msk [vmem:[%s24099_s23 + $0x250] sm:$0xff] %vm12097_vm2, %v13100_v20  ;;  %v13122_v43 = vmax.f32 %v25695_v15, 0.0  ;;  %v13123_v30 = vmax.f32 %v25696_v1, 0.0  ;;  %v25697_v55 = vld [vmem:[#allocation8_spill] sm:$0xff]  ;;  %v25698_v24 = vld [vmem:[#allocation11_spill] sm:$0xff] }
 0x611   : > { %13229 = vst.msk [vmem:[%s24099_s23 + $0x258] sm:$0xff] %vm12097_vm2, %v13101_v47  ;;  %13230 = vst.msk [vmem:[%s24099_s23 + $0x260] sm:$0xff] %vm12097_vm2, %v13102_v12  ;;  %v13124_v7 = vmax.f32 %v25697_v55, 0.0  ;;  %v13125_v39 = vmax.f32 %v25698_v24, 0.0  ;;  %v25699_v2 = vld [vmem:[#allocation10_spill] sm:$0xff]  ;;  %v25700_v20 = vld [vmem:[#allocation13_spill] sm:$0xff] }
 0x612   : > { %13231 = vst.msk [vmem:[%s24099_s23 + $0x268] sm:$0xff] %vm12097_vm2, %v13103_v29  ;;  %13232 = vst.msk [vmem:[%s24099_s23 + $0x270] sm:$0xff] %vm12097_vm2, %v13104_v61  ;;  %v13126_v22 = vmax.f32 %v25699_v2, 0.0  ;;  %v13127_v19 = vmax.f32 %v25700_v20, 0.0  ;;  %v25701_v47 = vld [vmem:[#allocation12_spill] sm:$0xff]  ;;  %v25702_v12 = vld [vmem:[#allocation15_spill] sm:$0xff] }
 0x613   : > { %13233 = vst.msk [vmem:[%s24099_s23 + $0x278] sm:$0xff] %vm12097_vm2, %v13105_v5  ;;  %13234 = vst.msk [vmem:[%s24099_s23 + $0x280] sm:$0xff] %vm12097_vm2, %v13106_v18  ;;  %v13128_v14 = vmax.f32 %v25701_v47, 0.0  ;;  %v13129_v28 = vmax.f32 %v25702_v12, 0.0  ;;  %v25703_v29 = vld [vmem:[#allocation14_spill] sm:$0xff]  ;;  %v25704_v61 = vld [vmem:[#allocation17_spill] sm:$0xff] }
 0x614   : > { %13235 = vst.msk [vmem:[%s24099_s23 + $0x288] sm:$0xff] %vm12097_vm2, %v13107_v52  ;;  %13236 = vst.msk [vmem:[%s24099_s23 + $0x290] sm:$0xff] %vm12097_vm2, %v13108_v58  ;;  %v13130_v44 = vmax.f32 %v25703_v29, 0.0  ;;  %v13131_v6 = vmax.f32 %v25704_v61, 0.0  ;;  %v25705_v5 = vld [vmem:[#allocation16_spill] sm:$0xff]  ;;  %v13133_v18 = vmax.f32 %v24029_v45, 0.0 }
 0x615   : > { %13237 = vst.msk [vmem:[%s24099_s23 + $0x298] sm:$0xff] %vm12097_vm2, %v13109_v23  ;;  %13238 = vst.msk [vmem:[%s24099_s23 + $0x2a0] sm:$0xff] %vm12097_vm2, %v13110_v10  ;;  %v13132_v36 = vmax.f32 %v25705_v5, 0.0  ;;  %v25706_v59 = vld [vmem:[#allocation19_spill] sm:$0xff]  ;;  %v13135_v38 = vmax.f32 %v24037_v49, 0.0  ;;  %v13136_v58 = vmax.f32 %v24041_v27, 0.0 }
 0x616   : > { %13239 = vst.msk [vmem:[%s24099_s23 + $0x2a8] sm:$0xff] %vm12097_vm2, %v13111_v37  ;;  %13240 = vst.msk [vmem:[%s24099_s23 + $0x2b0] sm:$0xff] %vm12097_vm2, %v13112_v60  ;;  %v13134_v52 = vmax.f32 %v25706_v59, 0.0  ;;  %v25707_v46 = vld [vmem:[#allocation18_spill] sm:$0xff]  ;;  %v25708_v23 = vld [vmem:[#allocation21_spill] sm:$0xff]  ;;  %v13144_v3 = vmax.f32 %v24074_v54, 0.0 }
 0x617   : > { %13241 = vst.msk [vmem:[%s24099_s23 + $0x2b8] sm:$0xff] %vm12097_vm2, %v13113_v42  ;;  %13242 = vst.msk [vmem:[%s24099_s23 + $0x2c0] sm:$0xff] %vm12097_vm2, %v13114_v56  ;;  %v13137_v45 = vmax.f32 %v25707_v46, 0.0  ;;  %v13138_v63 = vmax.f32 %v25708_v23, 0.0  ;;  %v25709_v10 = vld [vmem:[#allocation20_spill] sm:$0xff]  ;;  %v25710_v35 = vld [vmem:[#allocation23_spill] sm:$0xff] }
 0x618   : > { %13243 = vst.msk [vmem:[%s24099_s23 + $0x2c8] sm:$0xff] %vm12097_vm2, %v13115_v4  ;;  %13244 = vst.msk [vmem:[%s24099_s23 + $0x2d0] sm:$0xff] %vm12097_vm2, %v13116_v25  ;;  %v13139_v49 = vmax.f32 %v25709_v10, 0.0  ;;  %v13140_v27 = vmax.f32 %v25710_v35, 0.0  ;;  %v25711_v37 = vld [vmem:[#allocation22_spill] sm:$0xff]  ;;  %v25712_v60 = vld [vmem:[#allocation25_spill] sm:$0xff] }
 0x619   : > { %13245 = vst.msk [vmem:[%s24099_s23 + $0x2d8] sm:$0xff] %vm12097_vm2, %v13117_v16  ;;  %13246 = vst.msk [vmem:[%s24099_s23 + $0x2e0] sm:$0xff] %vm12097_vm2, %v13118_v48  ;;  %v13141_v40 = vmax.f32 %v25711_v37, 0.0  ;;  %v13142_v31 = vmax.f32 %v25712_v60, 0.0  ;;  %v13143_v42 = vmax.f32 %v24070_v53, 0.0  ;;  %v13145_v56 = vmax.f32 %v24078_v34, 0.0 }
 0x61a   : > { %13247 = vst.msk [vmem:[%s24099_s23 + $0x2e8] sm:$0xff] %vm12097_vm2, %v13119_v33  ;;  %13248 = vst.msk [vmem:[%s24099_s23 + $0x2f0] sm:$0xff] %vm12097_vm2, %v13120_v17  ;;  %v13146_v0 = vmax.f32 %v24082_v8, 0.0  ;;  %v13147_v53 = vmax.f32 %v24086_v21, 0.0  ;;  %v13148_v54 = vmax.f32 %v24090_v11, 0.0  ;;  %v13149_v34 = vmax.f32 %v24094_v51, 0.0 }
 0x61b   : > { %13249 = vst.msk [vmem:[%s24099_s23 + $0x2f8] sm:$0xff] %vm12097_vm2, %v13121_v57  ;;  %13250 = vst.msk [vmem:[%s24099_s23 + $0x300] sm:$0xff] %vm12097_vm2, %v13122_v43  ;;  %v25713_v8 = vld [vmem:[#allocation24_spill] sm:$0xff]  ;;  %v25714_v4 = vld [vmem:[#allocation27_spill] sm:$0xff]  ;;  %v13153_v51 = vmax.f32 %v24115_v62, 0.0 }
 0x61c   : > { %13251 = vst.msk [vmem:[%s24099_s23 + $0x308] sm:$0xff] %vm12097_vm2, %v13123_v30  ;;  %13252 = vst.msk [vmem:[%s24099_s23 + $0x310] sm:$0xff] %vm12097_vm2, %v13124_v7  ;;  %v13150_v21 = vmax.f32 %v25713_v8, 0.0  ;;  %v13151_v11 = vmax.f32 %v25714_v4, 0.0  ;;  %v25715_v9 = vld [vmem:[#allocation26_spill] sm:$0xff] }
 0x61d   : > { %13253 = vst.msk [vmem:[%s24099_s23 + $0x318] sm:$0xff] %vm12097_vm2, %v13125_v39  ;;  %13254 = vst.msk [vmem:[%s24099_s23 + $0x320] sm:$0xff] %vm12097_vm2, %v13126_v22  ;;  %v13152_v25 = vmax.f32 %v25715_v9, 0.0 }
 0x61e   : > { %13255 = vst.msk [vmem:[%s24099_s23 + $0x328] sm:$0xff] %vm12097_vm2, %v13127_v19  ;;  %13256 = vst.msk [vmem:[%s24099_s23 + $0x330] sm:$0xff] %vm12097_vm2, %v13128_v14 }
 0x61f   : > { %13257 = vst.msk [vmem:[%s24099_s23 + $0x338] sm:$0xff] %vm12097_vm2, %v13129_v28  ;;  %13258 = vst.msk [vmem:[%s24099_s23 + $0x340] sm:$0xff] %vm12097_vm2, %v13130_v44 }
 0x620   : > { %13259 = vst.msk [vmem:[%s24099_s23 + $0x348] sm:$0xff] %vm12097_vm2, %v13131_v6  ;;  %13260 = vst.msk [vmem:[%s24099_s23 + $0x350] sm:$0xff] %vm12097_vm2, %v13132_v36 }
 0x621   : > { %13261 = vst.msk [vmem:[%s24099_s23 + $0x358] sm:$0xff] %vm12097_vm2, %v13133_v18  ;;  %13262 = vst.msk [vmem:[%s24099_s23 + $0x360] sm:$0xff] %vm12097_vm2, %v13134_v52 }
 0x622   : > { %13263 = vst.msk [vmem:[%s24099_s23 + $0x368] sm:$0xff] %vm12097_vm2, %v13135_v38  ;;  %13264 = vst.msk [vmem:[%s24099_s23 + $0x370] sm:$0xff] %vm12097_vm2, %v13136_v58 }
 0x623   : > { %13265 = vst.msk [vmem:[%s24099_s23 + $0x378] sm:$0xff] %vm12097_vm2, %v13137_v45  ;;  %13266 = vst.msk [vmem:[%s24099_s23 + $0x380] sm:$0xff] %vm12097_vm2, %v13138_v63 }
 0x624   : > { %13267 = vst.msk [vmem:[%s24099_s23 + $0x388] sm:$0xff] %vm12097_vm2, %v13139_v49  ;;  %13268 = vst.msk [vmem:[%s24099_s23 + $0x390] sm:$0xff] %vm12097_vm2, %v13140_v27 }
 0x625   : > { %13269 = vst.msk [vmem:[%s24099_s23 + $0x398] sm:$0xff] %vm12097_vm2, %v13141_v40  ;;  %13270 = vst.msk [vmem:[%s24099_s23 + $0x3a0] sm:$0xff] %vm12097_vm2, %v13142_v31 }
 0x626   : > { %13271 = vst.msk [vmem:[%s24099_s23 + $0x3a8] sm:$0xff] %vm12097_vm2, %v13143_v42  ;;  %13272 = vst.msk [vmem:[%s24099_s23 + $0x3b0] sm:$0xff] %vm12097_vm2, %v13144_v3 }
 0x627   : > { %13273 = vst.msk [vmem:[%s24099_s23 + $0x3b8] sm:$0xff] %vm12097_vm2, %v13145_v56  ;;  %13274 = vst.msk [vmem:[%s24099_s23 + $0x3c0] sm:$0xff] %vm12097_vm2, %v13146_v0 }
 0x628   : > { %13275 = vst.msk [vmem:[%s24099_s23 + $0x3c8] sm:$0xff] %vm12097_vm2, %v13147_v53  ;;  %13276 = vst.msk [vmem:[%s24099_s23 + $0x3d0] sm:$0xff] %vm12097_vm2, %v13148_v54 }
 0x629   : > { %13277 = vst.msk [vmem:[%s24099_s23 + $0x3d8] sm:$0xff] %vm12097_vm2, %v13149_v34  ;;  %13278 = vst.msk [vmem:[%s24099_s23 + $0x3e0] sm:$0xff] %vm12097_vm2, %v13150_v21 }
 0x62a   : > { %13279 = vst.msk [vmem:[%s24099_s23 + $0x3e8] sm:$0xff] %vm12097_vm2, %v13151_v11  ;;  %13280 = vst.msk [vmem:[%s24099_s23 + $0x3f0] sm:$0xff] %vm12097_vm2, %v13152_v25 }
 0x62b   : > { %13281 = vst.msk [vmem:[%s24099_s23 + $0x3f8] sm:$0xff] %vm12097_vm2, %v13153_v51 }
 0x62c PF: > { %s14_s15 = sadd.s32 1, %s18212_s15  }
 0x62d   : > { %p11_p4 = scmp.ge.s32.totalorder %s14_s15, 4  }
 0x62f   :  { %13 = sbr.rel (!%p11_p4) target bundleno = 1 (0x1), region = 76 }

</bundles_post_ra>
